<compile_context>
chip_gen: v6e
topology: v6e:2x2x1
jax: 0.10.0
libtpu: 0.0.40
codegen_flags: <defaults>
</compile_context>

<pallas_src>
import functools
import math

import jax
import jax.numpy as jnp
from jax.experimental import pallas as pl
from jax.experimental.pallas import tpu as pltpu


# ------------------------------ small helpers -------------------------------

def _round_up(x, m):
    return ((x + m - 1) // m) * m


def _pick_tile(dim, target, align):
    """Pick (tile, padded_dim): tile % align == 0, padded_dim % tile == 0, minimal pad."""
    padded_min = _round_up(dim, align)
    if padded_min <= target:
        return padded_min, padded_min
    best_key, best = None, None
    t = (target // align) * align
    while t >= align:
        padded = _round_up(dim, t)
        key = (padded - dim, -t)          # least waste, then largest tile
        if best_key is None or key < best_key:
            best_key, best = key, (t, padded)
        t -= align
    return best


_MAX_SPATIAL_TILE = 2048  # rows of a (H*W, C) view per grid step (multiple of 8)


def _spatial_tiling(hw):
    if hw <= _MAX_SPATIAL_TILE:
        return hw, hw
    return _MAX_SPATIAL_TILE, _round_up(hw, _MAX_SPATIAL_TILE)


# --------------------------- tiled GEMM (conv core) ---------------------------

def _gemm_kernel(*refs, apply_relu, has_bias):
    if has_bias:
        a_ref, w_ref, b_ref, o_ref, acc_ref = refs
    else:
        a_ref, w_ref, o_ref, acc_ref = refs
        b_ref = None
    k = pl.program_id(2)

    @pl.when(k == 0)
    def _init():
        acc_ref[...] = jnp.zeros_like(acc_ref)

    acc_ref[...] += jnp.dot(a_ref[...], w_ref[...],
                            preferred_element_type=jnp.float32)

    @pl.when(k == pl.num_programs(2) - 1)
    def _finalize():
        out = acc_ref[...]
        if has_bias:
            out = out + b_ref[...]
        if apply_relu:
            out = jnp.maximum(out, 0.0)
        o_ref[...] = out.astype(o_ref.dtype)


def matmul_bias(a, w, bias=None, apply_relu=False):
    """(M, K) @ (K, N) [+ bias] [-> ReLU] as a tiled, K-pipelined bf16 Pallas GEMM."""
    M, K = a.shape
    K2, N = w.shape
    assert K == K2
    tm, Mp = _pick_tile(M, 256, 16)     # bf16 sublane packing -> multiples of 16
    tn, Np = _pick_tile(N, 256, 128)    # lane dim -> multiples of 128
    tk, Kp = _pick_tile(K, 512, 128)

    a_p = jnp.pad(a.astype(jnp.bfloat16), ((0, Mp - M), (0, Kp - K)))
    w_p = jnp.pad(w.astype(jnp.bfloat16), ((0, Kp - K), (0, Np - N)))

    has_bias = bias is not None
    inputs = [a_p, w_p]
    in_specs = [pl.BlockSpec((tm, tk), lambda i, j, k: (i, k)),
                pl.BlockSpec((tk, tn), lambda i, j, k: (k, j))]
    if has_bias:
        b_p = jnp.pad(bias.astype(jnp.float32).reshape(1, N), ((0, 0), (0, Np - N)))
        inputs.append(b_p)
        in_specs.append(pl.BlockSpec((1, tn), lambda i, j, k: (0, j)))

    flops = 2 * Mp * Np * Kp
    bytes_accessed = a_p.size * 2 + w_p.size * 2 + Mp * Np * 4 + (Np * 4 if has_bias else 0)

    out = pl.pallas_call(
        functools.partial(_gemm_kernel, apply_relu=apply_relu, has_bias=has_bias),
        grid=(Mp // tm, Np // tn, Kp // tk),
        in_specs=in_specs,
        out_specs=pl.BlockSpec((tm, tn), lambda i, j, k: (i, j)),
        out_shape=jax.ShapeDtypeStruct((Mp, Np), jnp.float32),
        scratch_shapes=[pltpu.VMEM((tm, tn), jnp.float32)],
        compiler_params=pltpu.CompilerParams(
            dimension_semantics=("parallel", "parallel", "arbitrary"),
            vmem_limit_bytes=32 * 1024 * 1024),
        cost_estimate=pl.CostEstimate(flops=int(flops), transcendentals=0,
                                      bytes_accessed=int(bytes_accessed)),
    )(*inputs)
    return out[:M, :N]


# ------------------------ InstanceNorm (two-pass, NHWC) ------------------------

def _in_stats_kernel(x_ref, sum_ref, ssq_ref, acc_s, acc_q):
    @pl.when(pl.program_id(1) == 0)
    def _init():
        acc_s[...] = jnp.zeros_like(acc_s)
        acc_q[...] = jnp.zeros_like(acc_q)

    x = x_ref[...]
    acc_s[...] += jnp.sum(x, axis=0, keepdims=True)
    acc_q[...] += jnp.sum(x * x, axis=0, keepdims=True)

    @pl.when(pl.program_id(1) == pl.num_programs(1) - 1)
    def _finalize():
        sum_ref[...] = acc_s[...]
        ssq_ref[...] = acc_q[...]


def _in_apply_kernel(*refs, inv_hw, apply_relu, has_residual):
    if has_residual:
        x_ref, sum_ref, ssq_ref, g_ref, b_ref, r_ref, o_ref = refs
    else:
        x_ref, sum_ref, ssq_ref, g_ref, b_ref, o_ref = refs
        r_ref = None
    x = x_ref[...]
    mean = sum_ref[...] * inv_hw
    var = ssq_ref[...] * inv_hw - mean * mean
    rstd = jax.lax.rsqrt(var + 1e-5)
    y = (x - mean) * (rstd * g_ref[...]) + b_ref[...]
    if has_residual:
        y = y + r_ref[...]
    if apply_relu:
        y = jnp.maximum(y, 0.0)
    o_ref[...] = y


def instance_norm(x, gamma, beta, apply_relu=False, residual=None):
    """nn.InstanceNorm2d(affine=True, eps=1e-5) on NHWC (+ optional residual add + ReLU)."""
    N, H, W, C = x.shape
    HW = H * W
    ts, HWp = _spatial_tiling(HW)
    n_s = HWp // ts

    x3 = x.reshape(N, HW, C).astype(jnp.float32)
    if HWp != HW:
        x3 = jnp.pad(x3, ((0, 0), (0, HWp - HW), (0, 0)))  # zero rows: sums unaffected

    x_spec = pl.BlockSpec((None, ts, C), lambda n, s: (n, s, 0))
    stat_spec = pl.BlockSpec((None, 1, C), lambda n, s: (n, 0, 0))
    param_spec = pl.BlockSpec((None, 1, C), lambda n, s: (0, 0, 0))

    # pass 1: per-(n, c) sum / sum-of-squares, spatially tiled reduction
    sums, ssqs = pl.pallas_call(
        _in_stats_kernel,
        grid=(N, n_s),
        in_specs=[x_spec],
        out_specs=(stat_spec, stat_spec),
        out_shape=(jax.ShapeDtypeStruct((N, 1, C), jnp.float32),
                   jax.ShapeDtypeStruct((N, 1, C), jnp.float32)),
        scratch_shapes=[pltpu.VMEM((1, C), jnp.float32),
                        pltpu.VMEM((1, C), jnp.float32)],
        compiler_params=pltpu.CompilerParams(
            dimension_semantics=("parallel", "arbitrary")),
    )(x3)

    # pass 2: normalize + affine (+ residual) (+ ReLU), fully parallel tiles
    g = gamma.reshape(1, 1, C).astype(jnp.float32)
    b = beta.reshape(1, 1, C).astype(jnp.float32)
    inputs = [x3, sums, ssqs, g, b]
    in_specs = [x_spec, stat_spec, stat_spec, param_spec, param_spec]
    has_residual = residual is not None
    if has_residual:
        r3 = residual.reshape(N, HW, C).astype(jnp.float32)
        if HWp != HW:
            r3 = jnp.pad(r3, ((0, 0), (0, HWp - HW), (0, 0)))
        inputs.append(r3)
        in_specs.append(x_spec)

    out = pl.pallas_call(
        functools.partial(_in_apply_kernel, inv_hw=1.0 / HW,
                          apply_relu=apply_relu, has_residual=has_residual),
        grid=(N, n_s),
        in_specs=in_specs,
        out_specs=x_spec,
        out_shape=jax.ShapeDtypeStruct((N, HWp, C), jnp.float32),
        compiler_params=pltpu.CompilerParams(
            dimension_semantics=("parallel", "parallel")),
    )(*inputs)
    return out[:, :HW, :].reshape(N, H, W, C)


# ------------------- VGG channel normalization (NHWC affine) -------------------

def _chan_affine_kernel(x_ref, s_ref, t_ref, o_ref):
    o_ref[...] = x_ref[...] * s_ref[...] + t_ref[...]


def vgg_normalize(x, mean, std):
    """Normalization module: (img - mean) / std per channel, NHWC."""
    N, H, W, C = x.shape
    HW = H * W
    ts, HWp = _spatial_tiling(HW)
    n_s = HWp // ts
    x3 = x.reshape(N, HW, C).astype(jnp.float32)
    if HWp != HW:
        x3 = jnp.pad(x3, ((0, 0), (0, HWp - HW), (0, 0)))
    scale = (1.0 / std.astype(jnp.float32)).reshape(1, 1, C)
    shift = (-mean.astype(jnp.float32) / std.astype(jnp.float32)).reshape(1, 1, C)
    x_spec = pl.BlockSpec((None, ts, C), lambda n, s: (n, s, 0))
    p_spec = pl.BlockSpec((None, 1, C), lambda n, s: (0, 0, 0))
    out = pl.pallas_call(
        _chan_affine_kernel,
        grid=(N, n_s),
        in_specs=[x_spec, p_spec, p_spec],
        out_specs=x_spec,
        out_shape=jax.ShapeDtypeStruct((N, HWp, C), jnp.float32),
        compiler_params=pltpu.CompilerParams(
            dimension_semantics=("parallel", "parallel")),
    )(x3, scale, shift)
    return out[:, :HW, :].reshape(N, H, W, C)


# ------------------------------ 2x2 max pooling -------------------------------

def _pool_kernel(xe_ref, xo_ref, o_ref):
    m = jnp.maximum(xe_ref[...], xo_ref[...])     # (Ho, 2, Wo, C)
    o_ref[...] = jnp.maximum(m[:, 0], m[:, 1])    # (Ho, Wo, C)


def max_pool_2x2(x):
    """nn.MaxPool2d(kernel_size=2, stride=2) on NHWC; the reduction runs in Pallas."""
    N, H, W, C = x.shape
    Ho, Wo = H // 2, W // 2
    # TODO(synk): the even/odd W split is XLA glue; folding the pool into the following
    # conv's patch gather would remove this materialization entirely.
    xe = x[:, :, 0::2, :].reshape(N * Ho, 2, Wo, C)
    xo = x[:, :, 1::2, :].reshape(N * Ho, 2, Wo, C)
    in_spec = pl.BlockSpec((Ho, 2, Wo, C), lambda n: (n, 0, 0, 0))
    out_spec = pl.BlockSpec((Ho, Wo, C), lambda n: (n, 0, 0))
    out = pl.pallas_call(
        _pool_kernel,
        grid=(N,),
        in_specs=[in_spec, in_spec],
        out_specs=out_spec,
        out_shape=jax.ShapeDtypeStruct((N * Ho, Wo, C), jnp.float32),
        compiler_params=pltpu.CompilerParams(dimension_semantics=("parallel",)),
    )(xe, xo)
    return out.reshape(N, Ho, Wo, C)


# -------------------------------- conv / glue ---------------------------------

def conv2d(x, w, bias=None, *, stride=1, pad=0, pad_mode="reflect", apply_relu=False):
    """torch Conv2d semantics on NHWC; the GEMM (fused bias/ReLU) is a tiled Pallas kernel."""
    cout, cin, kh, kw = w.shape
    if pad > 0:
        x = jnp.pad(x, ((0, 0), (pad, pad), (pad, pad), (0, 0)), mode=pad_mode)
    N, Hp, Wp, C = x.shape
    Ho = (Hp - kh) // stride + 1
    Wo = (Wp - kw) // stride + 1
    # TODO(synk): im2col below is XLA glue (kh*kw activation duplication); streaming the
    # taps through the GEMM index_map / manual DMA would make the conv bandwidth-optimal.
    patches = [x[:, i:i + stride * Ho:stride, j:j + stride * Wo:stride, :]
               for i in range(kh) for j in range(kw)]
    a = jnp.stack(patches, axis=3).reshape(N * Ho * Wo, kh * kw * C)
    wmat = jnp.transpose(w, (2, 3, 1, 0)).reshape(kh * kw * cin, cout)
    out = matmul_bias(a, wmat, bias, apply_relu=apply_relu)
    return out.reshape(N, Ho, Wo, cout)


def upsample_nearest_2x(x):
    # TODO(synk): fuse the nearest-neighbour upsample into the following conv's patch
    # gather instead of materializing the 4x feature map in HBM.
    return jnp.repeat(jnp.repeat(x, 2, axis=1), 2, axis=2)


# ------------------------------ parameter setup -------------------------------

def _conv_init(key, cin, cout, k):
    k1, k2 = jax.random.split(key)
    bound = 1.0 / math.sqrt(cin * k * k)
    w = jax.random.uniform(k1, (cout, cin, k, k), jnp.float32, -bound, bound)
    b = jax.random.uniform(k2, (cout,), jnp.float32, -bound, bound)
    return w, b


def build_vgg_blocks(num_relu):
    """vgg19.features pruned at the num_relu-th ReLU; each block ends with a (conv, ReLU)."""
    cfg = [64, 64, "M", 128, 128, "M", 256, 256, 256, 256, "M",
           512, 512, 512, 512, "M", 512, 512, 512, 512, "M"]
    blocks, current, cin = [], [], 3
    for v in cfg:
        if v == "M":
            current.append(("pool",))
        else:
            current.append(("conv", cin, v))
            cin = v
            blocks.append(current)
            current = []
            if len(blocks) >= num_relu:
                break
    return blocks


def init_params(key, num_hidden_relu):
    keys = iter(jax.random.split(key, 64))
    p = {}
    # encoder: ConvLayer(3,32,9,1) / (32,64,3,2) / (64,128,3,2), each + InstanceNorm + ReLU
    for name, cin, cout, k in [("enc1", 3, 32, 9), ("enc2", 32, 64, 3), ("enc3", 64, 128, 3)]:
        w, b = _conv_init(next(keys), cin, cout, k)
        p[f"{name}_w"], p[f"{name}_b"] = w, b
        p[f"{name}_g"] = jnp.ones((cout,), jnp.float32)
        p[f"{name}_beta"] = jnp.zeros((cout,), jnp.float32)
    # 5 residual blocks (128 channels, k=3)
    res = []
    for _ in range(5):
        blk = {}
        for j in (1, 2):
            w, b = _conv_init(next(keys), 128, 128, 3)
            blk[f"w{j}"], blk[f"b{j}"] = w, b
            blk[f"g{j}"] = jnp.ones((128,), jnp.float32)
            blk[f"beta{j}"] = jnp.zeros((128,), jnp.float32)
        res.append(blk)
    p["res"] = res
    # decoder: Upsample+Conv(128,64,3) / Upsample+Conv(64,32,3) / Conv(32,3,9)
    for name, cin, cout, k, norm in [("dec1", 128, 64, 3, True),
                                     ("dec2", 64, 32, 3, True),
                                     ("dec3", 32, 3, 9, False)]:
        w, b = _conv_init(next(keys), cin, cout, k)
        p[f"{name}_w"], p[f"{name}_b"] = w, b
        if norm:
            p[f"{name}_g"] = jnp.ones((cout,), jnp.float32)
            p[f"{name}_beta"] = jnp.zeros((cout,), jnp.float32)
    # pruned VGG
    vgg_blocks = build_vgg_blocks(num_hidden_relu)
    vgg_convs = []
    for block in vgg_blocks:
        conv_op = [op for op in block if op[0] == "conv"][0]
        vgg_convs.append(_conv_init(next(keys), conv_op[1], conv_op[2], 3))
    p["vgg_convs"] = vgg_convs
    p["vgg_mean"] = jnp.array([0.485, 0.456, 0.406], jnp.float32)
    p["vgg_std"] = jnp.array([0.329, 0.224, 0.225], jnp.float32)  # matches module spec
    return p, vgg_blocks


# ---------------------------------- forward -----------------------------------

def vgg_forward(x_nhwc, params, vgg_blocks):
    outputs = []
    h = vgg_normalize(x_nhwc, params["vgg_mean"], params["vgg_std"])
    outputs.append(h)  # the Normalization block's output is the first feature
    for bi, block in enumerate(vgg_blocks):
        for op in block:
            if op[0] == "pool":
                h = max_pool_2x2(h)
            else:
                w, b = params["vgg_convs"][bi]
                # VGG convs: zero padding=1, ReLU fused into the Pallas GEMM epilogue
                h = conv2d(h, w, b, stride=1, pad=1, pad_mode="constant", apply_relu=True)
        outputs.append(h)
    return outputs


def image_transformer_forward(params, vgg_blocks, input_nchw):
    # single NCHW -> NHWC transpose at the API boundary
    x = jnp.transpose(input_nchw, (0, 2, 3, 1)).astype(jnp.float32)

    # ----- encoder -----  (conv bias omitted: exactly cancelled by the InstanceNorm mean)
    h = conv2d(x, params["enc1_w"], None, stride=1, pad=4, pad_mode="reflect")
    h = instance_norm(h, params["enc1_g"], params["enc1_beta"], apply_relu=True)
    h = conv2d(h, params["enc2_w"], None, stride=2, pad=1, pad_mode="reflect")
    h = instance_norm(h, params["enc2_g"], params["enc2_beta"], apply_relu=True)
    h = conv2d(h, params["enc3_w"], None, stride=2, pad=1, pad_mode="reflect")
    h = instance_norm(h, params["enc3_g"], params["enc3_beta"], apply_relu=True)

    # ----- residual blocks -----
    for blk in params["res"]:
        r = h
        t = conv2d(h, blk["w1"], None, stride=1, pad=1, pad_mode="reflect")
        t = instance_norm(t, blk["g1"], blk["beta1"], apply_relu=True)
        t = conv2d(t, blk["w2"], None, stride=1, pad=1, pad_mode="reflect")
        h = instance_norm(t, blk["g2"], blk["beta2"], apply_relu=True, residual=r)

    # ----- decoder -----
    h = upsample_nearest_2x(h)
    h = conv2d(h, params["dec1_w"], None, stride=1, pad=1, pad_mode="reflect")
    h = instance_norm(h, params["dec1_g"], params["dec1_beta"], apply_relu=True)
    h = upsample_nearest_2x(h)
    h = conv2d(h, params["dec2_w"], None, stride=1, pad=1, pad_mode="reflect")
    h = instance_norm(h, params["dec2_g"], params["dec2_beta"], apply_relu=True)
    generated = conv2d(h, params["dec3_w"], params["dec3_b"],
                       stride=1, pad=4, pad_mode="reflect")

    # ----- pruned VGG features of generated image and original input -----
    vgg_gen = vgg_forward(generated, params, vgg_blocks)
    vgg_orig = vgg_forward(x, params, vgg_blocks)

    to_nchw = lambda t: jnp.transpose(t, (0, 3, 1, 2))
    return {
        "generated_image": to_nchw(generated),
        "vgg_generated_features": [to_nchw(f) for f in vgg_gen],
        "vgg_origin_features": [to_nchw(f) for f in vgg_orig],
    }


# ------------------------------------ main -------------------------------------

if __name__ == "__main__":
    NUM_HIDDEN_RELU = 3  # small synthetic config (module default is 15; structure identical)
    key = jax.random.PRNGKey(0)
    pkey, xkey = jax.random.split(key)
    params, vgg_blocks = init_params(pkey, NUM_HIDDEN_RELU)

    # NCHW input, 3 channels (matching the PyTorch module's API)
    x = jax.random.uniform(xkey, (2, 3, 16, 16), jnp.float32)

    fwd = jax.jit(lambda p, inp: image_transformer_forward(p, vgg_blocks, inp))
    out = jax.block_until_ready(fwd(params, x))

    assert out["generated_image"].shape == (2, 3, 16, 16)
    assert len(out["vgg_generated_features"]) == NUM_HIDDEN_RELU + 1
    assert len(out["vgg_origin_features"]) == NUM_HIDDEN_RELU + 1
    assert all(bool(jnp.all(jnp.isfinite(v))) for v in jax.tree_util.tree_leaves(out))
    print("KERNEL_OK")
</pallas_src>

<mosaic_0001>
module attributes {stable_mosaic.version = 11 : i64} {
  func.func @_gemm_kernel(%arg0: i32, %arg1: i32, %arg2: i32, %arg3: memref<256x256xbf16, #tpu.memory_space<vmem>>, %arg4: memref<256x128xbf16, #tpu.memory_space<vmem>>, %arg5: memref<256x128xf32, #tpu.memory_space<vmem>>, %arg6: memref<256x128xf32, #tpu.memory_space<vmem>>) attributes {dimension_semantics = [#tpu.dimension_semantics<parallel>, #tpu.dimension_semantics<parallel>, #tpu.dimension_semantics<arbitrary>], iteration_bounds = array<i64: 2, 1, 1>, scalar_prefetch = 0 : i64, scratch_operands = 1 : i64, tpu.core_type = #tpu.core_type<tc>, window_params = [{transform_indices = @transform_0, window_bounds = array<i64: 256, 256>}, {transform_indices = @transform_1, window_bounds = array<i64: 256, 128>}, {transform_indices = @transform_2, window_bounds = array<i64: 256, 128>}]} {
    %c0_i32 = arith.constant 0 : i32
    %0 = arith.cmpi eq, %arg2, %c0_i32 : i32
    %1 = arith.extui %0 : i1 to i32
    %c0_i32_0 = arith.constant 0 : i32
    %2 = arith.cmpi ne, %1, %c0_i32_0 : i32
    scf.if %2 {
      %cst_10 = arith.constant 0.000000e+00 : f32
      %12 = vector.broadcast %cst_10 : f32 to vector<256x128xf32>
      %c0_11 = arith.constant 0 : index
      %c0_12 = arith.constant 0 : index
      %13 = vector.load %arg6[%c0_11, %c0_12] : memref<256x128xf32, #tpu.memory_space<vmem>>, vector<256x128xf32>
      tpu.vector_store %arg6[%c0_11, %c0_12], %12 {strides = array<i32>} : memref<256x128xf32, #tpu.memory_space<vmem>>, vector<256x128xf32>,
    } else {
    }
    %c0 = arith.constant 0 : index
    %c0_1 = arith.constant 0 : index
    %3 = vector.load %arg6[%c0, %c0_1] : memref<256x128xf32, #tpu.memory_space<vmem>>, vector<256x128xf32>
    %c0_2 = arith.constant 0 : index
    %c0_3 = arith.constant 0 : index
    %4 = vector.load %arg3[%c0_2, %c0_3] : memref<256x256xbf16, #tpu.memory_space<vmem>>, vector<256x256xbf16>
    %c0_4 = arith.constant 0 : index
    %c0_5 = arith.constant 0 : index
    %5 = vector.load %arg4[%c0_4, %c0_5] : memref<256x128xbf16, #tpu.memory_space<vmem>>, vector<256x128xbf16>
    %cst = arith.constant dense<0.000000e+00> : vector<256x128xf32>
    %6 = tpu.matmul %4, %5, %cst {dimension_numbers = #tpu.dot_dimension_numbers<[1], [0], [0], [1], [0, 0, 1, 1], [], []>} : vector<256x256xbf16>, vector<256x128xbf16>, vector<256x128xf32> -> vector<256x128xf32>
    %7 = arith.addf %3, %6 : vector<256x128xf32>
    %c0_6 = arith.constant 0 : index
    %c0_7 = arith.constant 0 : index
    %8 = vector.load %arg6[%c0_6, %c0_7] : memref<256x128xf32, #tpu.memory_space<vmem>>, vector<256x128xf32>
    tpu.vector_store %arg6[%c0_6, %c0_7], %7 {strides = array<i32>} : memref<256x128xf32, #tpu.memory_space<vmem>>, vector<256x128xf32>,
    %c0_i32_8 = arith.constant 0 : i32
    %9 = arith.cmpi eq, %arg2, %c0_i32_8 : i32
    %10 = arith.extui %9 : i1 to i32
    %c0_i32_9 = arith.constant 0 : i32
    %11 = arith.cmpi ne, %10, %c0_i32_9 : i32
    scf.if %11 {
      %c0_10 = arith.constant 0 : index
      %c0_11 = arith.constant 0 : index
      %12 = vector.load %arg6[%c0_10, %c0_11] : memref<256x128xf32, #tpu.memory_space<vmem>>, vector<256x128xf32>
      %c0_12 = arith.constant 0 : index
      %c0_13 = arith.constant 0 : index
      %13 = vector.load %arg5[%c0_12, %c0_13] : memref<256x128xf32, #tpu.memory_space<vmem>>, vector<256x128xf32>
      tpu.vector_store %arg5[%c0_12, %c0_13], %12 {strides = array<i32>} : memref<256x128xf32, #tpu.memory_space<vmem>>, vector<256x128xf32>,
    } else {
    }
    return
  }
  func.func @transform_0(%arg0: i32, %arg1: i32, %arg2: i32) -> (i32, i32) {
    %c0_i32 = arith.constant 0 : i32
    return %arg0, %arg2 : i32, i32
  }
  func.func @transform_1(%arg0: i32, %arg1: i32, %arg2: i32) -> (i32, i32) {
    %c0_i32 = arith.constant 0 : i32
    return %arg2, %arg1 : i32, i32
  }
  func.func @transform_2(%arg0: i32, %arg1: i32, %arg2: i32) -> (i32, i32) {
    %c0_i32 = arith.constant 0 : i32
    return %arg0, %arg1 : i32, i32
  }
}

module attributes {stable_mosaic.version = 11 : i64} {
  func.func @_in_stats_kernel(%arg0: i32, %arg1: i32, %arg2: memref<1x256x32xf32, #tpu.memory_space<vmem>>, %arg3: memref<1x1x32xf32, #tpu.memory_space<vmem>>, %arg4: memref<1x1x32xf32, #tpu.memory_space<vmem>>, %arg5: memref<1x32xf32, #tpu.memory_space<vmem>>, %arg6: memref<1x32xf32, #tpu.memory_space<vmem>>) attributes {dimension_semantics = [#tpu.dimension_semantics<parallel>, #tpu.dimension_semantics<arbitrary>], iteration_bounds = array<i64: 2, 1>, scalar_prefetch = 0 : i64, scratch_operands = 2 : i64, tpu.core_type = #tpu.core_type<tc>, window_params = [{transform_indices = @transform_0, window_bounds = array<i64: 1, 256, 32>}, {transform_indices = @transform_1, window_bounds = array<i64: 1, 1, 32>}, {transform_indices = @transform_2, window_bounds = array<i64: 1, 1, 32>}]} {
    %c0_i32 = arith.constant 0 : i32
    %0 = arith.cmpi eq, %arg1, %c0_i32 : i32
    %1 = arith.extui %0 : i1 to i32
    %c0_i32_0 = arith.constant 0 : i32
    %2 = arith.cmpi ne, %1, %c0_i32_0 : i32
    scf.if %2 {
      %cst_14 = arith.constant 0.000000e+00 : f32
      %19 = vector.broadcast %cst_14 : f32 to vector<1x32xf32>
      %c0_15 = arith.constant 0 : index
      %c0_16 = arith.constant 0 : index
      %20 = vector.load %arg5[%c0_15, %c0_16] : memref<1x32xf32, #tpu.memory_space<vmem>>, vector<1x32xf32>
      tpu.vector_store %arg5[%c0_15, %c0_16], %19 {strides = array<i32>} : memref<1x32xf32, #tpu.memory_space<vmem>>, vector<1x32xf32>,
      %cst_17 = arith.constant 0.000000e+00 : f32
      %21 = vector.broadcast %cst_17 : f32 to vector<1x32xf32>
      %c0_18 = arith.constant 0 : index
      %c0_19 = arith.constant 0 : index
      %22 = vector.load %arg6[%c0_18, %c0_19] : memref<1x32xf32, #tpu.memory_space<vmem>>, vector<1x32xf32>
      tpu.vector_store %arg6[%c0_18, %c0_19], %21 {strides = array<i32>} : memref<1x32xf32, #tpu.memory_space<vmem>>, vector<1x32xf32>,
    } else {
    }
    %c0 = arith.constant 0 : index
    %c0_1 = arith.constant 0 : index
    %c0_2 = arith.constant 0 : index
    %3 = vector.load %arg2[%c0, %c0_1, %c0_2] : memref<1x256x32xf32, #tpu.memory_space<vmem>>, vector<1x256x32xf32>
    %4 = vector.shape_cast %3 : vector<1x256x32xf32> to vector<256x32xf32>
    %c0_3 = arith.constant 0 : index
    %c0_4 = arith.constant 0 : index
    %5 = vector.load %arg5[%c0_3, %c0_4] : memref<1x32xf32, #tpu.memory_space<vmem>>, vector<1x32xf32>
    %cst = arith.constant dense<0.000000e+00> : vector<32xf32>
    %6 = vector.multi_reduction <add>, %4, %cst [0] : vector<256x32xf32> to vector<32xf32>
    %7 = vector.shape_cast %6 : vector<32xf32> to vector<1x32xf32>
    %8 = arith.addf %5, %7 : vector<1x32xf32>
    %c0_5 = arith.constant 0 : index
    %c0_6 = arith.constant 0 : index
    %9 = vector.load %arg5[%c0_5, %c0_6] : memref<1x32xf32, #tpu.memory_space<vmem>>, vector<1x32xf32>
    tpu.vector_store %arg5[%c0_5, %c0_6], %8 {strides = array<i32>} : memref<1x32xf32, #tpu.memory_space<vmem>>, vector<1x32xf32>,
    %c0_7 = arith.constant 0 : index
    %c0_8 = arith.constant 0 : index
    %10 = vector.load %arg6[%c0_7, %c0_8] : memref<1x32xf32, #tpu.memory_space<vmem>>, vector<1x32xf32>
    %11 = arith.mulf %4, %4 : vector<256x32xf32>
    %cst_9 = arith.constant dense<0.000000e+00> : vector<32xf32>
    %12 = vector.multi_reduction <add>, %11, %cst_9 [0] : vector<256x32xf32> to vector<32xf32>
    %13 = vector.shape_cast %12 : vector<32xf32> to vector<1x32xf32>
    %14 = arith.addf %10, %13 : vector<1x32xf32>
    %c0_10 = arith.constant 0 : index
    %c0_11 = arith.constant 0 : index
    %15 = vector.load %arg6[%c0_10, %c0_11] : memref<1x32xf32, #tpu.memory_space<vmem>>, vector<1x32xf32>
    tpu.vector_store %arg6[%c0_10, %c0_11], %14 {strides = array<i32>} : memref<1x32xf32, #tpu.memory_space<vmem>>, vector<1x32xf32>,
    %c0_i32_12 = arith.constant 0 : i32
    %16 = arith.cmpi eq, %arg1, %c0_i32_12 : i32
    %17 = arith.extui %16 : i1 to i32
    %c0_i32_13 = arith.constant 0 : i32
    %18 = arith.cmpi ne, %17, %c0_i32_13 : i32
    scf.if %18 {
      %c0_14 = arith.constant 0 : index
      %c0_15 = arith.constant 0 : index
      %19 = vector.load %arg5[%c0_14, %c0_15] : memref<1x32xf32, #tpu.memory_space<vmem>>, vector<1x32xf32>
      %c0_16 = arith.constant 0 : index
      %c0_17 = arith.constant 0 : index
      %c0_18 = arith.constant 0 : index
      %20 = vector.load %arg3[%c0_16, %c0_17, %c0_18] : memref<1x1x32xf32, #tpu.memory_space<vmem>>, vector<1x1x32xf32>
      %21 = vector.shape_cast %20 : vector<1x1x32xf32> to vector<1x32xf32>
      %22 = vector.shape_cast %19 : vector<1x32xf32> to vector<1x1x32xf32>
      tpu.vector_store %arg3[%c0_16, %c0_17, %c0_18], %22 {strides = array<i32>} : memref<1x1x32xf32, #tpu.memory_space<vmem>>, vector<1x1x32xf32>,
      %c0_19 = arith.constant 0 : index
      %c0_20 = arith.constant 0 : index
      %23 = vector.load %arg6[%c0_19, %c0_20] : memref<1x32xf32, #tpu.memory_space<vmem>>, vector<1x32xf32>
      %c0_21 = arith.constant 0 : index
      %c0_22 = arith.constant 0 : index
      %c0_23 = arith.constant 0 : index
      %24 = vector.load %arg4[%c0_21, %c0_22, %c0_23] : memref<1x1x32xf32, #tpu.memory_space<vmem>>, vector<1x1x32xf32>
      %25 = vector.shape_cast %24 : vector<1x1x32xf32> to vector<1x32xf32>
      %26 = vector.shape_cast %23 : vector<1x32xf32> to vector<1x1x32xf32>
      tpu.vector_store %arg4[%c0_21, %c0_22, %c0_23], %26 {strides = array<i32>} : memref<1x1x32xf32, #tpu.memory_space<vmem>>, vector<1x1x32xf32>,
    } else {
    }
    return
  }
  func.func @transform_0(%arg0: i32, %arg1: i32) -> (i32, i32, i32) {
    %c0_i32 = arith.constant 0 : i32
    %c0_i32_0 = arith.constant 0 : i32
    return %arg0, %arg1, %c0_i32 : i32, i32, i32
  }
  func.func @transform_1(%arg0: i32, %arg1: i32) -> (i32, i32, i32) {
    %c0_i32 = arith.constant 0 : i32
    %c0_i32_0 = arith.constant 0 : i32
    %c0_i32_1 = arith.constant 0 : i32
    return %arg0, %c0_i32, %c0_i32_0 : i32, i32, i32
  }
  func.func @transform_2(%arg0: i32, %arg1: i32) -> (i32, i32, i32) {
    %c0_i32 = arith.constant 0 : i32
    %c0_i32_0 = arith.constant 0 : i32
    %c0_i32_1 = arith.constant 0 : i32
    return %arg0, %c0_i32, %c0_i32_0 : i32, i32, i32
  }
}

module attributes {stable_mosaic.version = 11 : i64} {
  func.func @_in_apply_kernel(%arg0: i32, %arg1: i32, %arg2: memref<1x256x32xf32, #tpu.memory_space<vmem>>, %arg3: memref<1x1x32xf32, #tpu.memory_space<vmem>>, %arg4: memref<1x1x32xf32, #tpu.memory_space<vmem>>, %arg5: memref<1x1x32xf32, #tpu.memory_space<vmem>>, %arg6: memref<1x1x32xf32, #tpu.memory_space<vmem>>, %arg7: memref<1x256x32xf32, #tpu.memory_space<vmem>>) attributes {dimension_semantics = [#tpu.dimension_semantics<parallel>, #tpu.dimension_semantics<parallel>], iteration_bounds = array<i64: 2, 1>, scalar_prefetch = 0 : i64, scratch_operands = 0 : i64, tpu.core_type = #tpu.core_type<tc>, window_params = [{transform_indices = @transform_0, window_bounds = array<i64: 1, 256, 32>}, {transform_indices = @transform_1, window_bounds = array<i64: 1, 1, 32>}, {transform_indices = @transform_2, window_bounds = array<i64: 1, 1, 32>}, {pipeline_mode = #tpu.pipeline_mode<synchronous>, transform_indices = @transform_3, window_bounds = array<i64: 1, 1, 32>}, {pipeline_mode = #tpu.pipeline_mode<synchronous>, transform_indices = @transform_4, window_bounds = array<i64: 1, 1, 32>}, {transform_indices = @transform_5, window_bounds = array<i64: 1, 256, 32>}]} {
    %c0 = arith.constant 0 : index
    %c0_0 = arith.constant 0 : index
    %c0_1 = arith.constant 0 : index
    %0 = vector.load %arg2[%c0, %c0_0, %c0_1] : memref<1x256x32xf32, #tpu.memory_space<vmem>>, vector<1x256x32xf32>
    %1 = vector.shape_cast %0 : vector<1x256x32xf32> to vector<256x32xf32>
    %c0_2 = arith.constant 0 : index
    %c0_3 = arith.constant 0 : index
    %c0_4 = arith.constant 0 : index
    %2 = vector.load %arg3[%c0_2, %c0_3, %c0_4] : memref<1x1x32xf32, #tpu.memory_space<vmem>>, vector<1x1x32xf32>
    %3 = vector.shape_cast %2 : vector<1x1x32xf32> to vector<1x32xf32>
    %cst = arith.constant 3.906250e-03 : f32
    %4 = vector.broadcast %cst : f32 to vector<1x32xf32>
    %5 = arith.mulf %3, %4 : vector<1x32xf32>
    %c0_5 = arith.constant 0 : index
    %c0_6 = arith.constant 0 : index
    %c0_7 = arith.constant 0 : index
    %6 = vector.load %arg4[%c0_5, %c0_6, %c0_7] : memref<1x1x32xf32, #tpu.memory_space<vmem>>, vector<1x1x32xf32>
    %7 = vector.shape_cast %6 : vector<1x1x32xf32> to vector<1x32xf32>
    %cst_8 = arith.constant 3.906250e-03 : f32
    %8 = vector.broadcast %cst_8 : f32 to vector<1x32xf32>
    %9 = arith.mulf %7, %8 : vector<1x32xf32>
    %10 = arith.mulf %5, %5 : vector<1x32xf32>
    %11 = arith.subf %9, %10 : vector<1x32xf32>
    %cst_9 = arith.constant 9.99999974E-6 : f32
    %12 = vector.broadcast %cst_9 : f32 to vector<1x32xf32>
    %13 = arith.addf %11, %12 : vector<1x32xf32>
    %14 = math.rsqrt %13 : vector<1x32xf32>
    %15 = vector.broadcast %5 : vector<1x32xf32> to vector<256x32xf32>
    %16 = arith.subf %1, %15 : vector<256x32xf32>
    %c0_10 = arith.constant 0 : index
    %c0_11 = arith.constant 0 : index
    %c0_12 = arith.constant 0 : index
    %17 = vector.load %arg5[%c0_10, %c0_11, %c0_12] : memref<1x1x32xf32, #tpu.memory_space<vmem>>, vector<1x1x32xf32>
    %18 = vector.shape_cast %17 : vector<1x1x32xf32> to vector<1x32xf32>
    %19 = arith.mulf %14, %18 : vector<1x32xf32>
    %20 = vector.broadcast %19 : vector<1x32xf32> to vector<256x32xf32>
    %21 = arith.mulf %16, %20 : vector<256x32xf32>
    %c0_13 = arith.constant 0 : index
    %c0_14 = arith.constant 0 : index
    %c0_15 = arith.constant 0 : index
    %22 = vector.load %arg6[%c0_13, %c0_14, %c0_15] : memref<1x1x32xf32, #tpu.memory_space<vmem>>, vector<1x1x32xf32>
    %23 = vector.shape_cast %22 : vector<1x1x32xf32> to vector<1x32xf32>
    %24 = vector.broadcast %23 : vector<1x32xf32> to vector<256x32xf32>
    %25 = arith.addf %21, %24 : vector<256x32xf32>
    %cst_16 = arith.constant 0.000000e+00 : f32
    %26 = vector.broadcast %cst_16 : f32 to vector<256x32xf32>
    %27 = arith.maximumf %25, %26 : vector<256x32xf32>
    %c0_17 = arith.constant 0 : index
    %c0_18 = arith.constant 0 : index
    %c0_19 = arith.constant 0 : index
    %28 = vector.load %arg7[%c0_17, %c0_18, %c0_19] : memref<1x256x32xf32, #tpu.memory_space<vmem>>, vector<1x256x32xf32>
    %29 = vector.shape_cast %28 : vector<1x256x32xf32> to vector<256x32xf32>
    %30 = vector.shape_cast %27 : vector<256x32xf32> to vector<1x256x32xf32>
    tpu.vector_store %arg7[%c0_17, %c0_18, %c0_19], %30 {strides = array<i32>} : memref<1x256x32xf32, #tpu.memory_space<vmem>>, vector<1x256x32xf32>,
    return
  }
  func.func @transform_0(%arg0: i32, %arg1: i32) -> (i32, i32, i32) {
    %c0_i32 = arith.constant 0 : i32
    %c0_i32_0 = arith.constant 0 : i32
    return %arg0, %arg1, %c0_i32 : i32, i32, i32
  }
  func.func @transform_1(%arg0: i32, %arg1: i32) -> (i32, i32, i32) {
    %c0_i32 = arith.constant 0 : i32
    %c0_i32_0 = arith.constant 0 : i32
    %c0_i32_1 = arith.constant 0 : i32
    return %arg0, %c0_i32, %c0_i32_0 : i32, i32, i32
  }
  func.func @transform_2(%arg0: i32, %arg1: i32) -> (i32, i32, i32) {
    %c0_i32 = arith.constant 0 : i32
    %c0_i32_0 = arith.constant 0 : i32
    %c0_i32_1 = arith.constant 0 : i32
    return %arg0, %c0_i32, %c0_i32_0 : i32, i32, i32
  }
  func.func @transform_3(%arg0: i32, %arg1: i32) -> (i32, i32, i32) {
    %c0_i32 = arith.constant 0 : i32
    %c0_i32_0 = arith.constant 0 : i32
    %c0_i32_1 = arith.constant 0 : i32
    %c0_i32_2 = arith.constant 0 : i32
    return %c0_i32, %c0_i32_0, %c0_i32_1 : i32, i32, i32
  }
  func.func @transform_4(%arg0: i32, %arg1: i32) -> (i32, i32, i32) {
    %c0_i32 = arith.constant 0 : i32
    %c0_i32_0 = arith.constant 0 : i32
    %c0_i32_1 = arith.constant 0 : i32
    %c0_i32_2 = arith.constant 0 : i32
    return %c0_i32, %c0_i32_0, %c0_i32_1 : i32, i32, i32
  }
  func.func @transform_5(%arg0: i32, %arg1: i32) -> (i32, i32, i32) {
    %c0_i32 = arith.constant 0 : i32
    %c0_i32_0 = arith.constant 0 : i32
    return %arg0, %arg1, %c0_i32 : i32, i32, i32
  }
}

module attributes {stable_mosaic.version = 11 : i64} {
  func.func @_gemm_kernel(%arg0: i32, %arg1: i32, %arg2: i32, %arg3: memref<128x384xbf16, #tpu.memory_space<vmem>>, %arg4: memref<384x128xbf16, #tpu.memory_space<vmem>>, %arg5: memref<128x128xf32, #tpu.memory_space<vmem>>, %arg6: memref<128x128xf32, #tpu.memory_space<vmem>>) attributes {dimension_semantics = [#tpu.dimension_semantics<parallel>, #tpu.dimension_semantics<parallel>, #tpu.dimension_semantics<arbitrary>], iteration_bounds = array<i64: 1, 1, 1>, scalar_prefetch = 0 : i64, scratch_operands = 1 : i64, tpu.core_type = #tpu.core_type<tc>, window_params = [{transform_indices = @transform_0, window_bounds = array<i64: 128, 384>}, {transform_indices = @transform_1, window_bounds = array<i64: 384, 128>}, {transform_indices = @transform_2, window_bounds = array<i64: 128, 128>}]} {
    %c0_i32 = arith.constant 0 : i32
    %0 = arith.cmpi eq, %arg2, %c0_i32 : i32
    %1 = arith.extui %0 : i1 to i32
    %c0_i32_0 = arith.constant 0 : i32
    %2 = arith.cmpi ne, %1, %c0_i32_0 : i32
    scf.if %2 {
      %cst_10 = arith.constant 0.000000e+00 : f32
      %12 = vector.broadcast %cst_10 : f32 to vector<128x128xf32>
      %c0_11 = arith.constant 0 : index
      %c0_12 = arith.constant 0 : index
      %13 = vector.load %arg6[%c0_11, %c0_12] : memref<128x128xf32, #tpu.memory_space<vmem>>, vector<128x128xf32>
      tpu.vector_store %arg6[%c0_11, %c0_12], %12 {strides = array<i32>} : memref<128x128xf32, #tpu.memory_space<vmem>>, vector<128x128xf32>,
    } else {
    }
    %c0 = arith.constant 0 : index
    %c0_1 = arith.constant 0 : index
    %3 = vector.load %arg6[%c0, %c0_1] : memref<128x128xf32, #tpu.memory_space<vmem>>, vector<128x128xf32>
    %c0_2 = arith.constant 0 : index
    %c0_3 = arith.constant 0 : index
    %4 = vector.load %arg3[%c0_2, %c0_3] : memref<128x384xbf16, #tpu.memory_space<vmem>>, vector<128x384xbf16>
    %c0_4 = arith.constant 0 : index
    %c0_5 = arith.constant 0 : index
    %5 = vector.load %arg4[%c0_4, %c0_5] : memref<384x128xbf16, #tpu.memory_space<vmem>>, vector<384x128xbf16>
    %cst = arith.constant dense<0.000000e+00> : vector<128x128xf32>
    %6 = tpu.matmul %4, %5, %cst {dimension_numbers = #tpu.dot_dimension_numbers<[1], [0], [0], [1], [0, 0, 1, 1], [], []>} : vector<128x384xbf16>, vector<384x128xbf16>, vector<128x128xf32> -> vector<128x128xf32>
    %7 = arith.addf %3, %6 : vector<128x128xf32>
    %c0_6 = arith.constant 0 : index
    %c0_7 = arith.constant 0 : index
    %8 = vector.load %arg6[%c0_6, %c0_7] : memref<128x128xf32, #tpu.memory_space<vmem>>, vector<128x128xf32>
    tpu.vector_store %arg6[%c0_6, %c0_7], %7 {strides = array<i32>} : memref<128x128xf32, #tpu.memory_space<vmem>>, vector<128x128xf32>,
    %c0_i32_8 = arith.constant 0 : i32
    %9 = arith.cmpi eq, %arg2, %c0_i32_8 : i32
    %10 = arith.extui %9 : i1 to i32
    %c0_i32_9 = arith.constant 0 : i32
    %11 = arith.cmpi ne, %10, %c0_i32_9 : i32
    scf.if %11 {
      %c0_10 = arith.constant 0 : index
      %c0_11 = arith.constant 0 : index
      %12 = vector.load %arg6[%c0_10, %c0_11] : memref<128x128xf32, #tpu.memory_space<vmem>>, vector<128x128xf32>
      %c0_12 = arith.constant 0 : index
      %c0_13 = arith.constant 0 : index
      %13 = vector.load %arg5[%c0_12, %c0_13] : memref<128x128xf32, #tpu.memory_space<vmem>>, vector<128x128xf32>
      tpu.vector_store %arg5[%c0_12, %c0_13], %12 {strides = array<i32>} : memref<128x128xf32, #tpu.memory_space<vmem>>, vector<128x128xf32>,
    } else {
    }
    return
  }
  func.func @transform_0(%arg0: i32, %arg1: i32, %arg2: i32) -> (i32, i32) {
    %c0_i32 = arith.constant 0 : i32
    return %arg0, %arg2 : i32, i32
  }
  func.func @transform_1(%arg0: i32, %arg1: i32, %arg2: i32) -> (i32, i32) {
    %c0_i32 = arith.constant 0 : i32
    return %arg2, %arg1 : i32, i32
  }
  func.func @transform_2(%arg0: i32, %arg1: i32, %arg2: i32) -> (i32, i32) {
    %c0_i32 = arith.constant 0 : i32
    return %arg0, %arg1 : i32, i32
  }
}

module attributes {stable_mosaic.version = 11 : i64} {
  func.func @_in_stats_kernel(%arg0: i32, %arg1: i32, %arg2: memref<1x64x64xf32, #tpu.memory_space<vmem>>, %arg3: memref<1x1x64xf32, #tpu.memory_space<vmem>>, %arg4: memref<1x1x64xf32, #tpu.memory_space<vmem>>, %arg5: memref<1x64xf32, #tpu.memory_space<vmem>>, %arg6: memref<1x64xf32, #tpu.memory_space<vmem>>) attributes {dimension_semantics = [#tpu.dimension_semantics<parallel>, #tpu.dimension_semantics<arbitrary>], iteration_bounds = array<i64: 2, 1>, scalar_prefetch = 0 : i64, scratch_operands = 2 : i64, tpu.core_type = #tpu.core_type<tc>, window_params = [{transform_indices = @transform_0, window_bounds = array<i64: 1, 64, 64>}, {transform_indices = @transform_1, window_bounds = array<i64: 1, 1, 64>}, {transform_indices = @transform_2, window_bounds = array<i64: 1, 1, 64>}]} {
    %c0_i32 = arith.constant 0 : i32
    %0 = arith.cmpi eq, %arg1, %c0_i32 : i32
    %1 = arith.extui %0 : i1 to i32
    %c0_i32_0 = arith.constant 0 : i32
    %2 = arith.cmpi ne, %1, %c0_i32_0 : i32
    scf.if %2 {
      %cst_14 = arith.constant 0.000000e+00 : f32
      %19 = vector.broadcast %cst_14 : f32 to vector<1x64xf32>
      %c0_15 = arith.constant 0 : index
      %c0_16 = arith.constant 0 : index
      %20 = vector.load %arg5[%c0_15, %c0_16] : memref<1x64xf32, #tpu.memory_space<vmem>>, vector<1x64xf32>
      tpu.vector_store %arg5[%c0_15, %c0_16], %19 {strides = array<i32>} : memref<1x64xf32, #tpu.memory_space<vmem>>, vector<1x64xf32>,
      %cst_17 = arith.constant 0.000000e+00 : f32
      %21 = vector.broadcast %cst_17 : f32 to vector<1x64xf32>
      %c0_18 = arith.constant 0 : index
      %c0_19 = arith.constant 0 : index
      %22 = vector.load %arg6[%c0_18, %c0_19] : memref<1x64xf32, #tpu.memory_space<vmem>>, vector<1x64xf32>
      tpu.vector_store %arg6[%c0_18, %c0_19], %21 {strides = array<i32>} : memref<1x64xf32, #tpu.memory_space<vmem>>, vector<1x64xf32>,
    } else {
    }
    %c0 = arith.constant 0 : index
    %c0_1 = arith.constant 0 : index
    %c0_2 = arith.constant 0 : index
    %3 = vector.load %arg2[%c0, %c0_1, %c0_2] : memref<1x64x64xf32, #tpu.memory_space<vmem>>, vector<1x64x64xf32>
    %4 = vector.shape_cast %3 : vector<1x64x64xf32> to vector<64x64xf32>
    %c0_3 = arith.constant 0 : index
    %c0_4 = arith.constant 0 : index
    %5 = vector.load %arg5[%c0_3, %c0_4] : memref<1x64xf32, #tpu.memory_space<vmem>>, vector<1x64xf32>
    %cst = arith.constant dense<0.000000e+00> : vector<64xf32>
    %6 = vector.multi_reduction <add>, %4, %cst [0] : vector<64x64xf32> to vector<64xf32>
    %7 = vector.shape_cast %6 : vector<64xf32> to vector<1x64xf32>
    %8 = arith.addf %5, %7 : vector<1x64xf32>
    %c0_5 = arith.constant 0 : index
    %c0_6 = arith.constant 0 : index
    %9 = vector.load %arg5[%c0_5, %c0_6] : memref<1x64xf32, #tpu.memory_space<vmem>>, vector<1x64xf32>
    tpu.vector_store %arg5[%c0_5, %c0_6], %8 {strides = array<i32>} : memref<1x64xf32, #tpu.memory_space<vmem>>, vector<1x64xf32>,
    %c0_7 = arith.constant 0 : index
    %c0_8 = arith.constant 0 : index
    %10 = vector.load %arg6[%c0_7, %c0_8] : memref<1x64xf32, #tpu.memory_space<vmem>>, vector<1x64xf32>
    %11 = arith.mulf %4, %4 : vector<64x64xf32>
    %cst_9 = arith.constant dense<0.000000e+00> : vector<64xf32>
    %12 = vector.multi_reduction <add>, %11, %cst_9 [0] : vector<64x64xf32> to vector<64xf32>
    %13 = vector.shape_cast %12 : vector<64xf32> to vector<1x64xf32>
    %14 = arith.addf %10, %13 : vector<1x64xf32>
    %c0_10 = arith.constant 0 : index
    %c0_11 = arith.constant 0 : index
    %15 = vector.load %arg6[%c0_10, %c0_11] : memref<1x64xf32, #tpu.memory_space<vmem>>, vector<1x64xf32>
    tpu.vector_store %arg6[%c0_10, %c0_11], %14 {strides = array<i32>} : memref<1x64xf32, #tpu.memory_space<vmem>>, vector<1x64xf32>,
    %c0_i32_12 = arith.constant 0 : i32
    %16 = arith.cmpi eq, %arg1, %c0_i32_12 : i32
    %17 = arith.extui %16 : i1 to i32
    %c0_i32_13 = arith.constant 0 : i32
    %18 = arith.cmpi ne, %17, %c0_i32_13 : i32
    scf.if %18 {
      %c0_14 = arith.constant 0 : index
      %c0_15 = arith.constant 0 : index
      %19 = vector.load %arg5[%c0_14, %c0_15] : memref<1x64xf32, #tpu.memory_space<vmem>>, vector<1x64xf32>
      %c0_16 = arith.constant 0 : index
      %c0_17 = arith.constant 0 : index
      %c0_18 = arith.constant 0 : index
      %20 = vector.load %arg3[%c0_16, %c0_17, %c0_18] : memref<1x1x64xf32, #tpu.memory_space<vmem>>, vector<1x1x64xf32>
      %21 = vector.shape_cast %20 : vector<1x1x64xf32> to vector<1x64xf32>
      %22 = vector.shape_cast %19 : vector<1x64xf32> to vector<1x1x64xf32>
      tpu.vector_store %arg3[%c0_16, %c0_17, %c0_18], %22 {strides = array<i32>} : memref<1x1x64xf32, #tpu.memory_space<vmem>>, vector<1x1x64xf32>,
      %c0_19 = arith.constant 0 : index
      %c0_20 = arith.constant 0 : index
      %23 = vector.load %arg6[%c0_19, %c0_20] : memref<1x64xf32, #tpu.memory_space<vmem>>, vector<1x64xf32>
      %c0_21 = arith.constant 0 : index
      %c0_22 = arith.constant 0 : index
      %c0_23 = arith.constant 0 : index
      %24 = vector.load %arg4[%c0_21, %c0_22, %c0_23] : memref<1x1x64xf32, #tpu.memory_space<vmem>>, vector<1x1x64xf32>
      %25 = vector.shape_cast %24 : vector<1x1x64xf32> to vector<1x64xf32>
      %26 = vector.shape_cast %23 : vector<1x64xf32> to vector<1x1x64xf32>
      tpu.vector_store %arg4[%c0_21, %c0_22, %c0_23], %26 {strides = array<i32>} : memref<1x1x64xf32, #tpu.memory_space<vmem>>, vector<1x1x64xf32>,
    } else {
    }
    return
  }
  func.func @transform_0(%arg0: i32, %arg1: i32) -> (i32, i32, i32) {
    %c0_i32 = arith.constant 0 : i32
    %c0_i32_0 = arith.constant 0 : i32
    return %arg0, %arg1, %c0_i32 : i32, i32, i32
  }
  func.func @transform_1(%arg0: i32, %arg1: i32) -> (i32, i32, i32) {
    %c0_i32 = arith.constant 0 : i32
    %c0_i32_0 = arith.constant 0 : i32
    %c0_i32_1 = arith.constant 0 : i32
    return %arg0, %c0_i32, %c0_i32_0 : i32, i32, i32
  }
  func.func @transform_2(%arg0: i32, %arg1: i32) -> (i32, i32, i32) {
    %c0_i32 = arith.constant 0 : i32
    %c0_i32_0 = arith.constant 0 : i32
    %c0_i32_1 = arith.constant 0 : i32
    return %arg0, %c0_i32, %c0_i32_0 : i32, i32, i32
  }
}

module attributes {stable_mosaic.version = 11 : i64} {
  func.func @_in_apply_kernel(%arg0: i32, %arg1: i32, %arg2: memref<1x64x64xf32, #tpu.memory_space<vmem>>, %arg3: memref<1x1x64xf32, #tpu.memory_space<vmem>>, %arg4: memref<1x1x64xf32, #tpu.memory_space<vmem>>, %arg5: memref<1x1x64xf32, #tpu.memory_space<vmem>>, %arg6: memref<1x1x64xf32, #tpu.memory_space<vmem>>, %arg7: memref<1x64x64xf32, #tpu.memory_space<vmem>>) attributes {dimension_semantics = [#tpu.dimension_semantics<parallel>, #tpu.dimension_semantics<parallel>], iteration_bounds = array<i64: 2, 1>, scalar_prefetch = 0 : i64, scratch_operands = 0 : i64, tpu.core_type = #tpu.core_type<tc>, window_params = [{transform_indices = @transform_0, window_bounds = array<i64: 1, 64, 64>}, {transform_indices = @transform_1, window_bounds = array<i64: 1, 1, 64>}, {transform_indices = @transform_2, window_bounds = array<i64: 1, 1, 64>}, {pipeline_mode = #tpu.pipeline_mode<synchronous>, transform_indices = @transform_3, window_bounds = array<i64: 1, 1, 64>}, {pipeline_mode = #tpu.pipeline_mode<synchronous>, transform_indices = @transform_4, window_bounds = array<i64: 1, 1, 64>}, {transform_indices = @transform_5, window_bounds = array<i64: 1, 64, 64>}]} {
    %c0 = arith.constant 0 : index
    %c0_0 = arith.constant 0 : index
    %c0_1 = arith.constant 0 : index
    %0 = vector.load %arg2[%c0, %c0_0, %c0_1] : memref<1x64x64xf32, #tpu.memory_space<vmem>>, vector<1x64x64xf32>
    %1 = vector.shape_cast %0 : vector<1x64x64xf32> to vector<64x64xf32>
    %c0_2 = arith.constant 0 : index
    %c0_3 = arith.constant 0 : index
    %c0_4 = arith.constant 0 : index
    %2 = vector.load %arg3[%c0_2, %c0_3, %c0_4] : memref<1x1x64xf32, #tpu.memory_space<vmem>>, vector<1x1x64xf32>
    %3 = vector.shape_cast %2 : vector<1x1x64xf32> to vector<1x64xf32>
    %cst = arith.constant 1.562500e-02 : f32
    %4 = vector.broadcast %cst : f32 to vector<1x64xf32>
    %5 = arith.mulf %3, %4 : vector<1x64xf32>
    %c0_5 = arith.constant 0 : index
    %c0_6 = arith.constant 0 : index
    %c0_7 = arith.constant 0 : index
    %6 = vector.load %arg4[%c0_5, %c0_6, %c0_7] : memref<1x1x64xf32, #tpu.memory_space<vmem>>, vector<1x1x64xf32>
    %7 = vector.shape_cast %6 : vector<1x1x64xf32> to vector<1x64xf32>
    %cst_8 = arith.constant 1.562500e-02 : f32
    %8 = vector.broadcast %cst_8 : f32 to vector<1x64xf32>
    %9 = arith.mulf %7, %8 : vector<1x64xf32>
    %10 = arith.mulf %5, %5 : vector<1x64xf32>
    %11 = arith.subf %9, %10 : vector<1x64xf32>
    %cst_9 = arith.constant 9.99999974E-6 : f32
    %12 = vector.broadcast %cst_9 : f32 to vector<1x64xf32>
    %13 = arith.addf %11, %12 : vector<1x64xf32>
    %14 = math.rsqrt %13 : vector<1x64xf32>
    %15 = vector.broadcast %5 : vector<1x64xf32> to vector<64x64xf32>
    %16 = arith.subf %1, %15 : vector<64x64xf32>
    %c0_10 = arith.constant 0 : index
    %c0_11 = arith.constant 0 : index
    %c0_12 = arith.constant 0 : index
    %17 = vector.load %arg5[%c0_10, %c0_11, %c0_12] : memref<1x1x64xf32, #tpu.memory_space<vmem>>, vector<1x1x64xf32>
    %18 = vector.shape_cast %17 : vector<1x1x64xf32> to vector<1x64xf32>
    %19 = arith.mulf %14, %18 : vector<1x64xf32>
    %20 = vector.broadcast %19 : vector<1x64xf32> to vector<64x64xf32>
    %21 = arith.mulf %16, %20 : vector<64x64xf32>
    %c0_13 = arith.constant 0 : index
    %c0_14 = arith.constant 0 : index
    %c0_15 = arith.constant 0 : index
    %22 = vector.load %arg6[%c0_13, %c0_14, %c0_15] : memref<1x1x64xf32, #tpu.memory_space<vmem>>, vector<1x1x64xf32>
    %23 = vector.shape_cast %22 : vector<1x1x64xf32> to vector<1x64xf32>
    %24 = vector.broadcast %23 : vector<1x64xf32> to vector<64x64xf32>
    %25 = arith.addf %21, %24 : vector<64x64xf32>
    %cst_16 = arith.constant 0.000000e+00 : f32
    %26 = vector.broadcast %cst_16 : f32 to vector<64x64xf32>
    %27 = arith.maximumf %25, %26 : vector<64x64xf32>
    %c0_17 = arith.constant 0 : index
    %c0_18 = arith.constant 0 : index
    %c0_19 = arith.constant 0 : index
    %28 = vector.load %arg7[%c0_17, %c0_18, %c0_19] : memref<1x64x64xf32, #tpu.memory_space<vmem>>, vector<1x64x64xf32>
    %29 = vector.shape_cast %28 : vector<1x64x64xf32> to vector<64x64xf32>
    %30 = vector.shape_cast %27 : vector<64x64xf32> to vector<1x64x64xf32>
    tpu.vector_store %arg7[%c0_17, %c0_18, %c0_19], %30 {strides = array<i32>} : memref<1x64x64xf32, #tpu.memory_space<vmem>>, vector<1x64x64xf32>,
    return
  }
  func.func @transform_0(%arg0: i32, %arg1: i32) -> (i32, i32, i32) {
    %c0_i32 = arith.constant 0 : i32
    %c0_i32_0 = arith.constant 0 : i32
    return %arg0, %arg1, %c0_i32 : i32, i32, i32
  }
  func.func @transform_1(%arg0: i32, %arg1: i32) -> (i32, i32, i32) {
    %c0_i32 = arith.constant 0 : i32
    %c0_i32_0 = arith.constant 0 : i32
    %c0_i32_1 = arith.constant 0 : i32
    return %arg0, %c0_i32, %c0_i32_0 : i32, i32, i32
  }
  func.func @transform_2(%arg0: i32, %arg1: i32) -> (i32, i32, i32) {
    %c0_i32 = arith.constant 0 : i32
    %c0_i32_0 = arith.constant 0 : i32
    %c0_i32_1 = arith.constant 0 : i32
    return %arg0, %c0_i32, %c0_i32_0 : i32, i32, i32
  }
  func.func @transform_3(%arg0: i32, %arg1: i32) -> (i32, i32, i32) {
    %c0_i32 = arith.constant 0 : i32
    %c0_i32_0 = arith.constant 0 : i32
    %c0_i32_1 = arith.constant 0 : i32
    %c0_i32_2 = arith.constant 0 : i32
    return %c0_i32, %c0_i32_0, %c0_i32_1 : i32, i32, i32
  }
  func.func @transform_4(%arg0: i32, %arg1: i32) -> (i32, i32, i32) {
    %c0_i32 = arith.constant 0 : i32
    %c0_i32_0 = arith.constant 0 : i32
    %c0_i32_1 = arith.constant 0 : i32
    %c0_i32_2 = arith.constant 0 : i32
    return %c0_i32, %c0_i32_0, %c0_i32_1 : i32, i32, i32
  }
  func.func @transform_5(%arg0: i32, %arg1: i32) -> (i32, i32, i32) {
    %c0_i32 = arith.constant 0 : i32
    %c0_i32_0 = arith.constant 0 : i32
    return %arg0, %arg1, %c0_i32 : i32, i32, i32
  }
}

module attributes {stable_mosaic.version = 11 : i64} {
  func.func @_in_apply_kernel(%arg0: i32, %arg1: i32, %arg2: memref<1x16x128xf32, #tpu.memory_space<vmem>>, %arg3: memref<1x1x128xf32, #tpu.memory_space<vmem>>, %arg4: memref<1x1x128xf32, #tpu.memory_space<vmem>>, %arg5: memref<1x1x128xf32, #tpu.memory_space<vmem>>, %arg6: memref<1x1x128xf32, #tpu.memory_space<vmem>>, %arg7: memref<1x16x128xf32, #tpu.memory_space<vmem>>) attributes {dimension_semantics = [#tpu.dimension_semantics<parallel>, #tpu.dimension_semantics<parallel>], iteration_bounds = array<i64: 2, 1>, scalar_prefetch = 0 : i64, scratch_operands = 0 : i64, tpu.core_type = #tpu.core_type<tc>, window_params = [{transform_indices = @transform_0, window_bounds = array<i64: 1, 16, 128>}, {transform_indices = @transform_1, window_bounds = array<i64: 1, 1, 128>}, {transform_indices = @transform_2, window_bounds = array<i64: 1, 1, 128>}, {pipeline_mode = #tpu.pipeline_mode<synchronous>, transform_indices = @transform_3, window_bounds = array<i64: 1, 1, 128>}, {pipeline_mode = #tpu.pipeline_mode<synchronous>, transform_indices = @transform_4, window_bounds = array<i64: 1, 1, 128>}, {transform_indices = @transform_5, window_bounds = array<i64: 1, 16, 128>}]} {
    %c0 = arith.constant 0 : index
    %c0_0 = arith.constant 0 : index
    %c0_1 = arith.constant 0 : index
    %0 = vector.load %arg2[%c0, %c0_0, %c0_1] : memref<1x16x128xf32, #tpu.memory_space<vmem>>, vector<1x16x128xf32>
    %1 = vector.shape_cast %0 : vector<1x16x128xf32> to vector<16x128xf32>
    %c0_2 = arith.constant 0 : index
    %c0_3 = arith.constant 0 : index
    %c0_4 = arith.constant 0 : index
    %2 = vector.load %arg3[%c0_2, %c0_3, %c0_4] : memref<1x1x128xf32, #tpu.memory_space<vmem>>, vector<1x1x128xf32>
    %3 = vector.shape_cast %2 : vector<1x1x128xf32> to vector<1x128xf32>
    %cst = arith.constant 6.250000e-02 : f32
    %4 = vector.broadcast %cst : f32 to vector<1x128xf32>
    %5 = arith.mulf %3, %4 : vector<1x128xf32>
    %c0_5 = arith.constant 0 : index
    %c0_6 = arith.constant 0 : index
    %c0_7 = arith.constant 0 : index
    %6 = vector.load %arg4[%c0_5, %c0_6, %c0_7] : memref<1x1x128xf32, #tpu.memory_space<vmem>>, vector<1x1x128xf32>
    %7 = vector.shape_cast %6 : vector<1x1x128xf32> to vector<1x128xf32>
    %cst_8 = arith.constant 6.250000e-02 : f32
    %8 = vector.broadcast %cst_8 : f32 to vector<1x128xf32>
    %9 = arith.mulf %7, %8 : vector<1x128xf32>
    %10 = arith.mulf %5, %5 : vector<1x128xf32>
    %11 = arith.subf %9, %10 : vector<1x128xf32>
    %cst_9 = arith.constant 9.99999974E-6 : f32
    %12 = vector.broadcast %cst_9 : f32 to vector<1x128xf32>
    %13 = arith.addf %11, %12 : vector<1x128xf32>
    %14 = math.rsqrt %13 : vector<1x128xf32>
    %15 = vector.broadcast %5 : vector<1x128xf32> to vector<16x128xf32>
    %16 = arith.subf %1, %15 : vector<16x128xf32>
    %c0_10 = arith.constant 0 : index
    %c0_11 = arith.constant 0 : index
    %c0_12 = arith.constant 0 : index
    %17 = vector.load %arg5[%c0_10, %c0_11, %c0_12] : memref<1x1x128xf32, #tpu.memory_space<vmem>>, vector<1x1x128xf32>
    %18 = vector.shape_cast %17 : vector<1x1x128xf32> to vector<1x128xf32>
    %19 = arith.mulf %14, %18 : vector<1x128xf32>
    %20 = vector.broadcast %19 : vector<1x128xf32> to vector<16x128xf32>
    %21 = arith.mulf %16, %20 : vector<16x128xf32>
    %c0_13 = arith.constant 0 : index
    %c0_14 = arith.constant 0 : index
    %c0_15 = arith.constant 0 : index
    %22 = vector.load %arg6[%c0_13, %c0_14, %c0_15] : memref<1x1x128xf32, #tpu.memory_space<vmem>>, vector<1x1x128xf32>
    %23 = vector.shape_cast %22 : vector<1x1x128xf32> to vector<1x128xf32>
    %24 = vector.broadcast %23 : vector<1x128xf32> to vector<16x128xf32>
    %25 = arith.addf %21, %24 : vector<16x128xf32>
    %cst_16 = arith.constant 0.000000e+00 : f32
    %26 = vector.broadcast %cst_16 : f32 to vector<16x128xf32>
    %27 = arith.maximumf %25, %26 : vector<16x128xf32>
    %c0_17 = arith.constant 0 : index
    %c0_18 = arith.constant 0 : index
    %c0_19 = arith.constant 0 : index
    %28 = vector.load %arg7[%c0_17, %c0_18, %c0_19] : memref<1x16x128xf32, #tpu.memory_space<vmem>>, vector<1x16x128xf32>
    %29 = vector.shape_cast %28 : vector<1x16x128xf32> to vector<16x128xf32>
    %30 = vector.shape_cast %27 : vector<16x128xf32> to vector<1x16x128xf32>
    tpu.vector_store %arg7[%c0_17, %c0_18, %c0_19], %30 {strides = array<i32>} : memref<1x16x128xf32, #tpu.memory_space<vmem>>, vector<1x16x128xf32>,
    return
  }
  func.func @transform_0(%arg0: i32, %arg1: i32) -> (i32, i32, i32) {
    %c0_i32 = arith.constant 0 : i32
    %c0_i32_0 = arith.constant 0 : i32
    return %arg0, %arg1, %c0_i32 : i32, i32, i32
  }
  func.func @transform_1(%arg0: i32, %arg1: i32) -> (i32, i32, i32) {
    %c0_i32 = arith.constant 0 : i32
    %c0_i32_0 = arith.constant 0 : i32
    %c0_i32_1 = arith.constant 0 : i32
    return %arg0, %c0_i32, %c0_i32_0 : i32, i32, i32
  }
  func.func @transform_2(%arg0: i32, %arg1: i32) -> (i32, i32, i32) {
    %c0_i32 = arith.constant 0 : i32
    %c0_i32_0 = arith.constant 0 : i32
    %c0_i32_1 = arith.constant 0 : i32
    return %arg0, %c0_i32, %c0_i32_0 : i32, i32, i32
  }
  func.func @transform_3(%arg0: i32, %arg1: i32) -> (i32, i32, i32) {
    %c0_i32 = arith.constant 0 : i32
    %c0_i32_0 = arith.constant 0 : i32
    %c0_i32_1 = arith.constant 0 : i32
    %c0_i32_2 = arith.constant 0 : i32
    return %c0_i32, %c0_i32_0, %c0_i32_1 : i32, i32, i32
  }
  func.func @transform_4(%arg0: i32, %arg1: i32) -> (i32, i32, i32) {
    %c0_i32 = arith.constant 0 : i32
    %c0_i32_0 = arith.constant 0 : i32
    %c0_i32_1 = arith.constant 0 : i32
    %c0_i32_2 = arith.constant 0 : i32
    return %c0_i32, %c0_i32_0, %c0_i32_1 : i32, i32, i32
  }
  func.func @transform_5(%arg0: i32, %arg1: i32) -> (i32, i32, i32) {
    %c0_i32 = arith.constant 0 : i32
    %c0_i32_0 = arith.constant 0 : i32
    return %arg0, %arg1, %c0_i32 : i32, i32, i32
  }
}

module attributes {stable_mosaic.version = 11 : i64} {
  func.func @_gemm_kernel(%arg0: i32, %arg1: i32, %arg2: i32, %arg3: memref<32x128xbf16, #tpu.memory_space<vmem>>, %arg4: memref<128x128xbf16, #tpu.memory_space<vmem>>, %arg5: memref<32x128xf32, #tpu.memory_space<vmem>>, %arg6: memref<32x128xf32, #tpu.memory_space<vmem>>) attributes {dimension_semantics = [#tpu.dimension_semantics<parallel>, #tpu.dimension_semantics<parallel>, #tpu.dimension_semantics<arbitrary>], iteration_bounds = array<i64: 1, 1, 5>, scalar_prefetch = 0 : i64, scratch_operands = 1 : i64, tpu.core_type = #tpu.core_type<tc>, window_params = [{transform_indices = @transform_0, window_bounds = array<i64: 32, 128>}, {transform_indices = @transform_1, window_bounds = array<i64: 128, 128>}, {transform_indices = @transform_2, window_bounds = array<i64: 32, 128>}]} {
    %c0_i32 = arith.constant 0 : i32
    %0 = arith.cmpi eq, %arg2, %c0_i32 : i32
    %1 = arith.extui %0 : i1 to i32
    %c0_i32_0 = arith.constant 0 : i32
    %2 = arith.cmpi ne, %1, %c0_i32_0 : i32
    scf.if %2 {
      %cst_9 = arith.constant 0.000000e+00 : f32
      %12 = vector.broadcast %cst_9 : f32 to vector<32x128xf32>
      %c0_10 = arith.constant 0 : index
      %c0_11 = arith.constant 0 : index
      %13 = vector.load %arg6[%c0_10, %c0_11] : memref<32x128xf32, #tpu.memory_space<vmem>>, vector<32x128xf32>
      tpu.vector_store %arg6[%c0_10, %c0_11], %12 {strides = array<i32>} : memref<32x128xf32, #tpu.memory_space<vmem>>, vector<32x128xf32>,
    } else {
    }
    %c0 = arith.constant 0 : index
    %c0_1 = arith.constant 0 : index
    %3 = vector.load %arg6[%c0, %c0_1] : memref<32x128xf32, #tpu.memory_space<vmem>>, vector<32x128xf32>
    %c0_2 = arith.constant 0 : index
    %c0_3 = arith.constant 0 : index
    %4 = vector.load %arg3[%c0_2, %c0_3] : memref<32x128xbf16, #tpu.memory_space<vmem>>, vector<32x128xbf16>
    %c0_4 = arith.constant 0 : index
    %c0_5 = arith.constant 0 : index
    %5 = vector.load %arg4[%c0_4, %c0_5] : memref<128x128xbf16, #tpu.memory_space<vmem>>, vector<128x128xbf16>
    %cst = arith.constant dense<0.000000e+00> : vector<32x128xf32>
    %6 = tpu.matmul %4, %5, %cst {dimension_numbers = #tpu.dot_dimension_numbers<[1], [0], [0], [1], [0, 0, 1, 1], [], []>} : vector<32x128xbf16>, vector<128x128xbf16>, vector<32x128xf32> -> vector<32x128xf32>
    %7 = arith.addf %3, %6 : vector<32x128xf32>
    %c0_6 = arith.constant 0 : index
    %c0_7 = arith.constant 0 : index
    %8 = vector.load %arg6[%c0_6, %c0_7] : memref<32x128xf32, #tpu.memory_space<vmem>>, vector<32x128xf32>
    tpu.vector_store %arg6[%c0_6, %c0_7], %7 {strides = array<i32>} : memref<32x128xf32, #tpu.memory_space<vmem>>, vector<32x128xf32>,
    %c4_i32 = arith.constant 4 : i32
    %9 = arith.cmpi eq, %arg2, %c4_i32 : i32
    %10 = arith.extui %9 : i1 to i32
    %c0_i32_8 = arith.constant 0 : i32
    %11 = arith.cmpi ne, %10, %c0_i32_8 : i32
    scf.if %11 {
      %c0_9 = arith.constant 0 : index
      %c0_10 = arith.constant 0 : index
      %12 = vector.load %arg6[%c0_9, %c0_10] : memref<32x128xf32, #tpu.memory_space<vmem>>, vector<32x128xf32>
      %c0_11 = arith.constant 0 : index
      %c0_12 = arith.constant 0 : index
      %13 = vector.load %arg5[%c0_11, %c0_12] : memref<32x128xf32, #tpu.memory_space<vmem>>, vector<32x128xf32>
      tpu.vector_store %arg5[%c0_11, %c0_12], %12 {strides = array<i32>} : memref<32x128xf32, #tpu.memory_space<vmem>>, vector<32x128xf32>,
    } else {
    }
    return
  }
  func.func @transform_0(%arg0: i32, %arg1: i32, %arg2: i32) -> (i32, i32) {
    %c0_i32 = arith.constant 0 : i32
    return %arg0, %arg2 : i32, i32
  }
  func.func @transform_1(%arg0: i32, %arg1: i32, %arg2: i32) -> (i32, i32) {
    %c0_i32 = arith.constant 0 : i32
    return %arg2, %arg1 : i32, i32
  }
  func.func @transform_2(%arg0: i32, %arg1: i32, %arg2: i32) -> (i32, i32) {
    %c0_i32 = arith.constant 0 : i32
    return %arg0, %arg1 : i32, i32
  }
}

module attributes {stable_mosaic.version = 11 : i64} {
  func.func @_in_stats_kernel(%arg0: i32, %arg1: i32, %arg2: memref<1x16x128xf32, #tpu.memory_space<vmem>>, %arg3: memref<1x1x128xf32, #tpu.memory_space<vmem>>, %arg4: memref<1x1x128xf32, #tpu.memory_space<vmem>>, %arg5: memref<1x128xf32, #tpu.memory_space<vmem>>, %arg6: memref<1x128xf32, #tpu.memory_space<vmem>>) attributes {dimension_semantics = [#tpu.dimension_semantics<parallel>, #tpu.dimension_semantics<arbitrary>], iteration_bounds = array<i64: 2, 1>, scalar_prefetch = 0 : i64, scratch_operands = 2 : i64, tpu.core_type = #tpu.core_type<tc>, window_params = [{transform_indices = @transform_0, window_bounds = array<i64: 1, 16, 128>}, {transform_indices = @transform_1, window_bounds = array<i64: 1, 1, 128>}, {transform_indices = @transform_2, window_bounds = array<i64: 1, 1, 128>}]} {
    %c0_i32 = arith.constant 0 : i32
    %0 = arith.cmpi eq, %arg1, %c0_i32 : i32
    %1 = arith.extui %0 : i1 to i32
    %c0_i32_0 = arith.constant 0 : i32
    %2 = arith.cmpi ne, %1, %c0_i32_0 : i32
    scf.if %2 {
      %cst_14 = arith.constant 0.000000e+00 : f32
      %19 = vector.broadcast %cst_14 : f32 to vector<1x128xf32>
      %c0_15 = arith.constant 0 : index
      %c0_16 = arith.constant 0 : index
      %20 = vector.load %arg5[%c0_15, %c0_16] : memref<1x128xf32, #tpu.memory_space<vmem>>, vector<1x128xf32>
      tpu.vector_store %arg5[%c0_15, %c0_16], %19 {strides = array<i32>} : memref<1x128xf32, #tpu.memory_space<vmem>>, vector<1x128xf32>,
      %cst_17 = arith.constant 0.000000e+00 : f32
      %21 = vector.broadcast %cst_17 : f32 to vector<1x128xf32>
      %c0_18 = arith.constant 0 : index
      %c0_19 = arith.constant 0 : index
      %22 = vector.load %arg6[%c0_18, %c0_19] : memref<1x128xf32, #tpu.memory_space<vmem>>, vector<1x128xf32>
      tpu.vector_store %arg6[%c0_18, %c0_19], %21 {strides = array<i32>} : memref<1x128xf32, #tpu.memory_space<vmem>>, vector<1x128xf32>,
    } else {
    }
    %c0 = arith.constant 0 : index
    %c0_1 = arith.constant 0 : index
    %c0_2 = arith.constant 0 : index
    %3 = vector.load %arg2[%c0, %c0_1, %c0_2] : memref<1x16x128xf32, #tpu.memory_space<vmem>>, vector<1x16x128xf32>
    %4 = vector.shape_cast %3 : vector<1x16x128xf32> to vector<16x128xf32>
    %c0_3 = arith.constant 0 : index
    %c0_4 = arith.constant 0 : index
    %5 = vector.load %arg5[%c0_3, %c0_4] : memref<1x128xf32, #tpu.memory_space<vmem>>, vector<1x128xf32>
    %cst = arith.constant dense<0.000000e+00> : vector<128xf32>
    %6 = vector.multi_reduction <add>, %4, %cst [0] : vector<16x128xf32> to vector<128xf32>
    %7 = vector.shape_cast %6 : vector<128xf32> to vector<1x128xf32>
    %8 = arith.addf %5, %7 : vector<1x128xf32>
    %c0_5 = arith.constant 0 : index
    %c0_6 = arith.constant 0 : index
    %9 = vector.load %arg5[%c0_5, %c0_6] : memref<1x128xf32, #tpu.memory_space<vmem>>, vector<1x128xf32>
    tpu.vector_store %arg5[%c0_5, %c0_6], %8 {strides = array<i32>} : memref<1x128xf32, #tpu.memory_space<vmem>>, vector<1x128xf32>,
    %c0_7 = arith.constant 0 : index
    %c0_8 = arith.constant 0 : index
    %10 = vector.load %arg6[%c0_7, %c0_8] : memref<1x128xf32, #tpu.memory_space<vmem>>, vector<1x128xf32>
    %11 = arith.mulf %4, %4 : vector<16x128xf32>
    %cst_9 = arith.constant dense<0.000000e+00> : vector<128xf32>
    %12 = vector.multi_reduction <add>, %11, %cst_9 [0] : vector<16x128xf32> to vector<128xf32>
    %13 = vector.shape_cast %12 : vector<128xf32> to vector<1x128xf32>
    %14 = arith.addf %10, %13 : vector<1x128xf32>
    %c0_10 = arith.constant 0 : index
    %c0_11 = arith.constant 0 : index
    %15 = vector.load %arg6[%c0_10, %c0_11] : memref<1x128xf32, #tpu.memory_space<vmem>>, vector<1x128xf32>
    tpu.vector_store %arg6[%c0_10, %c0_11], %14 {strides = array<i32>} : memref<1x128xf32, #tpu.memory_space<vmem>>, vector<1x128xf32>,
    %c0_i32_12 = arith.constant 0 : i32
    %16 = arith.cmpi eq, %arg1, %c0_i32_12 : i32
    %17 = arith.extui %16 : i1 to i32
    %c0_i32_13 = arith.constant 0 : i32
    %18 = arith.cmpi ne, %17, %c0_i32_13 : i32
    scf.if %18 {
      %c0_14 = arith.constant 0 : index
      %c0_15 = arith.constant 0 : index
      %19 = vector.load %arg5[%c0_14, %c0_15] : memref<1x128xf32, #tpu.memory_space<vmem>>, vector<1x128xf32>
      %c0_16 = arith.constant 0 : index
      %c0_17 = arith.constant 0 : index
      %c0_18 = arith.constant 0 : index
      %20 = vector.load %arg3[%c0_16, %c0_17, %c0_18] : memref<1x1x128xf32, #tpu.memory_space<vmem>>, vector<1x1x128xf32>
      %21 = vector.shape_cast %20 : vector<1x1x128xf32> to vector<1x128xf32>
      %22 = vector.shape_cast %19 : vector<1x128xf32> to vector<1x1x128xf32>
      tpu.vector_store %arg3[%c0_16, %c0_17, %c0_18], %22 {strides = array<i32>} : memref<1x1x128xf32, #tpu.memory_space<vmem>>, vector<1x1x128xf32>,
      %c0_19 = arith.constant 0 : index
      %c0_20 = arith.constant 0 : index
      %23 = vector.load %arg6[%c0_19, %c0_20] : memref<1x128xf32, #tpu.memory_space<vmem>>, vector<1x128xf32>
      %c0_21 = arith.constant 0 : index
      %c0_22 = arith.constant 0 : index
      %c0_23 = arith.constant 0 : index
      %24 = vector.load %arg4[%c0_21, %c0_22, %c0_23] : memref<1x1x128xf32, #tpu.memory_space<vmem>>, vector<1x1x128xf32>
      %25 = vector.shape_cast %24 : vector<1x1x128xf32> to vector<1x128xf32>
      %26 = vector.shape_cast %23 : vector<1x128xf32> to vector<1x1x128xf32>
      tpu.vector_store %arg4[%c0_21, %c0_22, %c0_23], %26 {strides = array<i32>} : memref<1x1x128xf32, #tpu.memory_space<vmem>>, vector<1x1x128xf32>,
    } else {
    }
    return
  }
  func.func @transform_0(%arg0: i32, %arg1: i32) -> (i32, i32, i32) {
    %c0_i32 = arith.constant 0 : i32
    %c0_i32_0 = arith.constant 0 : i32
    return %arg0, %arg1, %c0_i32 : i32, i32, i32
  }
  func.func @transform_1(%arg0: i32, %arg1: i32) -> (i32, i32, i32) {
    %c0_i32 = arith.constant 0 : i32
    %c0_i32_0 = arith.constant 0 : i32
    %c0_i32_1 = arith.constant 0 : i32
    return %arg0, %c0_i32, %c0_i32_0 : i32, i32, i32
  }
  func.func @transform_2(%arg0: i32, %arg1: i32) -> (i32, i32, i32) {
    %c0_i32 = arith.constant 0 : i32
    %c0_i32_0 = arith.constant 0 : i32
    %c0_i32_1 = arith.constant 0 : i32
    return %arg0, %c0_i32, %c0_i32_0 : i32, i32, i32
  }
}

module attributes {stable_mosaic.version = 11 : i64} {
  func.func @_gemm_kernel(%arg0: i32, %arg1: i32, %arg2: i32, %arg3: memref<32x384xbf16, #tpu.memory_space<vmem>>, %arg4: memref<384x128xbf16, #tpu.memory_space<vmem>>, %arg5: memref<32x128xf32, #tpu.memory_space<vmem>>, %arg6: memref<32x128xf32, #tpu.memory_space<vmem>>) attributes {dimension_semantics = [#tpu.dimension_semantics<parallel>, #tpu.dimension_semantics<parallel>, #tpu.dimension_semantics<arbitrary>], iteration_bounds = array<i64: 1, 1, 3>, scalar_prefetch = 0 : i64, scratch_operands = 1 : i64, tpu.core_type = #tpu.core_type<tc>, window_params = [{transform_indices = @transform_0, window_bounds = array<i64: 32, 384>}, {transform_indices = @transform_1, window_bounds = array<i64: 384, 128>}, {transform_indices = @transform_2, window_bounds = array<i64: 32, 128>}]} {
    %c0_i32 = arith.constant 0 : i32
    %0 = arith.cmpi eq, %arg2, %c0_i32 : i32
    %1 = arith.extui %0 : i1 to i32
    %c0_i32_0 = arith.constant 0 : i32
    %2 = arith.cmpi ne, %1, %c0_i32_0 : i32
    scf.if %2 {
      %cst_9 = arith.constant 0.000000e+00 : f32
      %12 = vector.broadcast %cst_9 : f32 to vector<32x128xf32>
      %c0_10 = arith.constant 0 : index
      %c0_11 = arith.constant 0 : index
      %13 = vector.load %arg6[%c0_10, %c0_11] : memref<32x128xf32, #tpu.memory_space<vmem>>, vector<32x128xf32>
      tpu.vector_store %arg6[%c0_10, %c0_11], %12 {strides = array<i32>} : memref<32x128xf32, #tpu.memory_space<vmem>>, vector<32x128xf32>,
    } else {
    }
    %c0 = arith.constant 0 : index
    %c0_1 = arith.constant 0 : index
    %3 = vector.load %arg6[%c0, %c0_1] : memref<32x128xf32, #tpu.memory_space<vmem>>, vector<32x128xf32>
    %c0_2 = arith.constant 0 : index
    %c0_3 = arith.constant 0 : index
    %4 = vector.load %arg3[%c0_2, %c0_3] : memref<32x384xbf16, #tpu.memory_space<vmem>>, vector<32x384xbf16>
    %c0_4 = arith.constant 0 : index
    %c0_5 = arith.constant 0 : index
    %5 = vector.load %arg4[%c0_4, %c0_5] : memref<384x128xbf16, #tpu.memory_space<vmem>>, vector<384x128xbf16>
    %cst = arith.constant dense<0.000000e+00> : vector<32x128xf32>
    %6 = tpu.matmul %4, %5, %cst {dimension_numbers = #tpu.dot_dimension_numbers<[1], [0], [0], [1], [0, 0, 1, 1], [], []>} : vector<32x384xbf16>, vector<384x128xbf16>, vector<32x128xf32> -> vector<32x128xf32>
    %7 = arith.addf %3, %6 : vector<32x128xf32>
    %c0_6 = arith.constant 0 : index
    %c0_7 = arith.constant 0 : index
    %8 = vector.load %arg6[%c0_6, %c0_7] : memref<32x128xf32, #tpu.memory_space<vmem>>, vector<32x128xf32>
    tpu.vector_store %arg6[%c0_6, %c0_7], %7 {strides = array<i32>} : memref<32x128xf32, #tpu.memory_space<vmem>>, vector<32x128xf32>,
    %c2_i32 = arith.constant 2 : i32
    %9 = arith.cmpi eq, %arg2, %c2_i32 : i32
    %10 = arith.extui %9 : i1 to i32
    %c0_i32_8 = arith.constant 0 : i32
    %11 = arith.cmpi ne, %10, %c0_i32_8 : i32
    scf.if %11 {
      %c0_9 = arith.constant 0 : index
      %c0_10 = arith.constant 0 : index
      %12 = vector.load %arg6[%c0_9, %c0_10] : memref<32x128xf32, #tpu.memory_space<vmem>>, vector<32x128xf32>
      %c0_11 = arith.constant 0 : index
      %c0_12 = arith.constant 0 : index
      %13 = vector.load %arg5[%c0_11, %c0_12] : memref<32x128xf32, #tpu.memory_space<vmem>>, vector<32x128xf32>
      tpu.vector_store %arg5[%c0_11, %c0_12], %12 {strides = array<i32>} : memref<32x128xf32, #tpu.memory_space<vmem>>, vector<32x128xf32>,
    } else {
    }
    return
  }
  func.func @transform_0(%arg0: i32, %arg1: i32, %arg2: i32) -> (i32, i32) {
    %c0_i32 = arith.constant 0 : i32
    return %arg0, %arg2 : i32, i32
  }
  func.func @transform_1(%arg0: i32, %arg1: i32, %arg2: i32) -> (i32, i32) {
    %c0_i32 = arith.constant 0 : i32
    return %arg2, %arg1 : i32, i32
  }
  func.func @transform_2(%arg0: i32, %arg1: i32, %arg2: i32) -> (i32, i32) {
    %c0_i32 = arith.constant 0 : i32
    return %arg0, %arg1 : i32, i32
  }
}

module attributes {stable_mosaic.version = 11 : i64} {
  func.func @_in_apply_kernel(%arg0: i32, %arg1: i32, %arg2: memref<1x16x128xf32, #tpu.memory_space<vmem>>, %arg3: memref<1x1x128xf32, #tpu.memory_space<vmem>>, %arg4: memref<1x1x128xf32, #tpu.memory_space<vmem>>, %arg5: memref<1x1x128xf32, #tpu.memory_space<vmem>>, %arg6: memref<1x1x128xf32, #tpu.memory_space<vmem>>, %arg7: memref<1x16x128xf32, #tpu.memory_space<vmem>>, %arg8: memref<1x16x128xf32, #tpu.memory_space<vmem>>) attributes {dimension_semantics = [#tpu.dimension_semantics<parallel>, #tpu.dimension_semantics<parallel>], iteration_bounds = array<i64: 2, 1>, scalar_prefetch = 0 : i64, scratch_operands = 0 : i64, tpu.core_type = #tpu.core_type<tc>, window_params = [{transform_indices = @transform_0, window_bounds = array<i64: 1, 16, 128>}, {transform_indices = @transform_1, window_bounds = array<i64: 1, 1, 128>}, {transform_indices = @transform_2, window_bounds = array<i64: 1, 1, 128>}, {pipeline_mode = #tpu.pipeline_mode<synchronous>, transform_indices = @transform_3, window_bounds = array<i64: 1, 1, 128>}, {pipeline_mode = #tpu.pipeline_mode<synchronous>, transform_indices = @transform_4, window_bounds = array<i64: 1, 1, 128>}, {transform_indices = @transform_5, window_bounds = array<i64: 1, 16, 128>}, {transform_indices = @transform_6, window_bounds = array<i64: 1, 16, 128>}]} {
    %c0 = arith.constant 0 : index
    %c0_0 = arith.constant 0 : index
    %c0_1 = arith.constant 0 : index
    %0 = vector.load %arg2[%c0, %c0_0, %c0_1] : memref<1x16x128xf32, #tpu.memory_space<vmem>>, vector<1x16x128xf32>
    %1 = vector.shape_cast %0 : vector<1x16x128xf32> to vector<16x128xf32>
    %c0_2 = arith.constant 0 : index
    %c0_3 = arith.constant 0 : index
    %c0_4 = arith.constant 0 : index
    %2 = vector.load %arg3[%c0_2, %c0_3, %c0_4] : memref<1x1x128xf32, #tpu.memory_space<vmem>>, vector<1x1x128xf32>
    %3 = vector.shape_cast %2 : vector<1x1x128xf32> to vector<1x128xf32>
    %cst = arith.constant 6.250000e-02 : f32
    %4 = vector.broadcast %cst : f32 to vector<1x128xf32>
    %5 = arith.mulf %3, %4 : vector<1x128xf32>
    %c0_5 = arith.constant 0 : index
    %c0_6 = arith.constant 0 : index
    %c0_7 = arith.constant 0 : index
    %6 = vector.load %arg4[%c0_5, %c0_6, %c0_7] : memref<1x1x128xf32, #tpu.memory_space<vmem>>, vector<1x1x128xf32>
    %7 = vector.shape_cast %6 : vector<1x1x128xf32> to vector<1x128xf32>
    %cst_8 = arith.constant 6.250000e-02 : f32
    %8 = vector.broadcast %cst_8 : f32 to vector<1x128xf32>
    %9 = arith.mulf %7, %8 : vector<1x128xf32>
    %10 = arith.mulf %5, %5 : vector<1x128xf32>
    %11 = arith.subf %9, %10 : vector<1x128xf32>
    %cst_9 = arith.constant 9.99999974E-6 : f32
    %12 = vector.broadcast %cst_9 : f32 to vector<1x128xf32>
    %13 = arith.addf %11, %12 : vector<1x128xf32>
    %14 = math.rsqrt %13 : vector<1x128xf32>
    %15 = vector.broadcast %5 : vector<1x128xf32> to vector<16x128xf32>
    %16 = arith.subf %1, %15 : vector<16x128xf32>
    %c0_10 = arith.constant 0 : index
    %c0_11 = arith.constant 0 : index
    %c0_12 = arith.constant 0 : index
    %17 = vector.load %arg5[%c0_10, %c0_11, %c0_12] : memref<1x1x128xf32, #tpu.memory_space<vmem>>, vector<1x1x128xf32>
    %18 = vector.shape_cast %17 : vector<1x1x128xf32> to vector<1x128xf32>
    %19 = arith.mulf %14, %18 : vector<1x128xf32>
    %20 = vector.broadcast %19 : vector<1x128xf32> to vector<16x128xf32>
    %21 = arith.mulf %16, %20 : vector<16x128xf32>
    %c0_13 = arith.constant 0 : index
    %c0_14 = arith.constant 0 : index
    %c0_15 = arith.constant 0 : index
    %22 = vector.load %arg6[%c0_13, %c0_14, %c0_15] : memref<1x1x128xf32, #tpu.memory_space<vmem>>, vector<1x1x128xf32>
    %23 = vector.shape_cast %22 : vector<1x1x128xf32> to vector<1x128xf32>
    %24 = vector.broadcast %23 : vector<1x128xf32> to vector<16x128xf32>
    %25 = arith.addf %21, %24 : vector<16x128xf32>
    %c0_16 = arith.constant 0 : index
    %c0_17 = arith.constant 0 : index
    %c0_18 = arith.constant 0 : index
    %26 = vector.load %arg7[%c0_16, %c0_17, %c0_18] : memref<1x16x128xf32, #tpu.memory_space<vmem>>, vector<1x16x128xf32>
    %27 = vector.shape_cast %26 : vector<1x16x128xf32> to vector<16x128xf32>
    %28 = arith.addf %25, %27 : vector<16x128xf32>
    %cst_19 = arith.constant 0.000000e+00 : f32
    %29 = vector.broadcast %cst_19 : f32 to vector<16x128xf32>
    %30 = arith.maximumf %28, %29 : vector<16x128xf32>
    %c0_20 = arith.constant 0 : index
    %c0_21 = arith.constant 0 : index
    %c0_22 = arith.constant 0 : index
    %31 = vector.load %arg8[%c0_20, %c0_21, %c0_22] : memref<1x16x128xf32, #tpu.memory_space<vmem>>, vector<1x16x128xf32>
    %32 = vector.shape_cast %31 : vector<1x16x128xf32> to vector<16x128xf32>
    %33 = vector.shape_cast %30 : vector<16x128xf32> to vector<1x16x128xf32>
    tpu.vector_store %arg8[%c0_20, %c0_21, %c0_22], %33 {strides = array<i32>} : memref<1x16x128xf32, #tpu.memory_space<vmem>>, vector<1x16x128xf32>,
    return
  }
  func.func @transform_0(%arg0: i32, %arg1: i32) -> (i32, i32, i32) {
    %c0_i32 = arith.constant 0 : i32
    %c0_i32_0 = arith.constant 0 : i32
    return %arg0, %arg1, %c0_i32 : i32, i32, i32
  }
  func.func @transform_1(%arg0: i32, %arg1: i32) -> (i32, i32, i32) {
    %c0_i32 = arith.constant 0 : i32
    %c0_i32_0 = arith.constant 0 : i32
    %c0_i32_1 = arith.constant 0 : i32
    return %arg0, %c0_i32, %c0_i32_0 : i32, i32, i32
  }
  func.func @transform_2(%arg0: i32, %arg1: i32) -> (i32, i32, i32) {
    %c0_i32 = arith.constant 0 : i32
    %c0_i32_0 = arith.constant 0 : i32
    %c0_i32_1 = arith.constant 0 : i32
    return %arg0, %c0_i32, %c0_i32_0 : i32, i32, i32
  }
  func.func @transform_3(%arg0: i32, %arg1: i32) -> (i32, i32, i32) {
    %c0_i32 = arith.constant 0 : i32
    %c0_i32_0 = arith.constant 0 : i32
    %c0_i32_1 = arith.constant 0 : i32
    %c0_i32_2 = arith.constant 0 : i32
    return %c0_i32, %c0_i32_0, %c0_i32_1 : i32, i32, i32
  }
  func.func @transform_4(%arg0: i32, %arg1: i32) -> (i32, i32, i32) {
    %c0_i32 = arith.constant 0 : i32
    %c0_i32_0 = arith.constant 0 : i32
    %c0_i32_1 = arith.constant 0 : i32
    %c0_i32_2 = arith.constant 0 : i32
    return %c0_i32, %c0_i32_0, %c0_i32_1 : i32, i32, i32
  }
  func.func @transform_5(%arg0: i32, %arg1: i32) -> (i32, i32, i32) {
    %c0_i32 = arith.constant 0 : i32
    %c0_i32_0 = arith.constant 0 : i32
    return %arg0, %arg1, %c0_i32 : i32, i32, i32
  }
  func.func @transform_6(%arg0: i32, %arg1: i32) -> (i32, i32, i32) {
    %c0_i32 = arith.constant 0 : i32
    %c0_i32_0 = arith.constant 0 : i32
    return %arg0, %arg1, %c0_i32 : i32, i32, i32
  }
}

module attributes {stable_mosaic.version = 11 : i64} {
  func.func @_gemm_kernel(%arg0: i32, %arg1: i32, %arg2: i32, %arg3: memref<128x384xbf16, #tpu.memory_space<vmem>>, %arg4: memref<384x128xbf16, #tpu.memory_space<vmem>>, %arg5: memref<128x128xf32, #tpu.memory_space<vmem>>, %arg6: memref<128x128xf32, #tpu.memory_space<vmem>>) attributes {dimension_semantics = [#tpu.dimension_semantics<parallel>, #tpu.dimension_semantics<parallel>, #tpu.dimension_semantics<arbitrary>], iteration_bounds = array<i64: 1, 1, 3>, scalar_prefetch = 0 : i64, scratch_operands = 1 : i64, tpu.core_type = #tpu.core_type<tc>, window_params = [{transform_indices = @transform_0, window_bounds = array<i64: 128, 384>}, {transform_indices = @transform_1, window_bounds = array<i64: 384, 128>}, {transform_indices = @transform_2, window_bounds = array<i64: 128, 128>}]} {
    %c0_i32 = arith.constant 0 : i32
    %0 = arith.cmpi eq, %arg2, %c0_i32 : i32
    %1 = arith.extui %0 : i1 to i32
    %c0_i32_0 = arith.constant 0 : i32
    %2 = arith.cmpi ne, %1, %c0_i32_0 : i32
    scf.if %2 {
      %cst_9 = arith.constant 0.000000e+00 : f32
      %12 = vector.broadcast %cst_9 : f32 to vector<128x128xf32>
      %c0_10 = arith.constant 0 : index
      %c0_11 = arith.constant 0 : index
      %13 = vector.load %arg6[%c0_10, %c0_11] : memref<128x128xf32, #tpu.memory_space<vmem>>, vector<128x128xf32>
      tpu.vector_store %arg6[%c0_10, %c0_11], %12 {strides = array<i32>} : memref<128x128xf32, #tpu.memory_space<vmem>>, vector<128x128xf32>,
    } else {
    }
    %c0 = arith.constant 0 : index
    %c0_1 = arith.constant 0 : index
    %3 = vector.load %arg6[%c0, %c0_1] : memref<128x128xf32, #tpu.memory_space<vmem>>, vector<128x128xf32>
    %c0_2 = arith.constant 0 : index
    %c0_3 = arith.constant 0 : index
    %4 = vector.load %arg3[%c0_2, %c0_3] : memref<128x384xbf16, #tpu.memory_space<vmem>>, vector<128x384xbf16>
    %c0_4 = arith.constant 0 : index
    %c0_5 = arith.constant 0 : index
    %5 = vector.load %arg4[%c0_4, %c0_5] : memref<384x128xbf16, #tpu.memory_space<vmem>>, vector<384x128xbf16>
    %cst = arith.constant dense<0.000000e+00> : vector<128x128xf32>
    %6 = tpu.matmul %4, %5, %cst {dimension_numbers = #tpu.dot_dimension_numbers<[1], [0], [0], [1], [0, 0, 1, 1], [], []>} : vector<128x384xbf16>, vector<384x128xbf16>, vector<128x128xf32> -> vector<128x128xf32>
    %7 = arith.addf %3, %6 : vector<128x128xf32>
    %c0_6 = arith.constant 0 : index
    %c0_7 = arith.constant 0 : index
    %8 = vector.load %arg6[%c0_6, %c0_7] : memref<128x128xf32, #tpu.memory_space<vmem>>, vector<128x128xf32>
    tpu.vector_store %arg6[%c0_6, %c0_7], %7 {strides = array<i32>} : memref<128x128xf32, #tpu.memory_space<vmem>>, vector<128x128xf32>,
    %c2_i32 = arith.constant 2 : i32
    %9 = arith.cmpi eq, %arg2, %c2_i32 : i32
    %10 = arith.extui %9 : i1 to i32
    %c0_i32_8 = arith.constant 0 : i32
    %11 = arith.cmpi ne, %10, %c0_i32_8 : i32
    scf.if %11 {
      %c0_9 = arith.constant 0 : index
      %c0_10 = arith.constant 0 : index
      %12 = vector.load %arg6[%c0_9, %c0_10] : memref<128x128xf32, #tpu.memory_space<vmem>>, vector<128x128xf32>
      %c0_11 = arith.constant 0 : index
      %c0_12 = arith.constant 0 : index
      %13 = vector.load %arg5[%c0_11, %c0_12] : memref<128x128xf32, #tpu.memory_space<vmem>>, vector<128x128xf32>
      tpu.vector_store %arg5[%c0_11, %c0_12], %12 {strides = array<i32>} : memref<128x128xf32, #tpu.memory_space<vmem>>, vector<128x128xf32>,
    } else {
    }
    return
  }
  func.func @transform_0(%arg0: i32, %arg1: i32, %arg2: i32) -> (i32, i32) {
    %c0_i32 = arith.constant 0 : i32
    return %arg0, %arg2 : i32, i32
  }
  func.func @transform_1(%arg0: i32, %arg1: i32, %arg2: i32) -> (i32, i32) {
    %c0_i32 = arith.constant 0 : i32
    return %arg2, %arg1 : i32, i32
  }
  func.func @transform_2(%arg0: i32, %arg1: i32, %arg2: i32) -> (i32, i32) {
    %c0_i32 = arith.constant 0 : i32
    return %arg0, %arg1 : i32, i32
  }
}

module attributes {stable_mosaic.version = 11 : i64} {
  func.func @_gemm_kernel(%arg0: i32, %arg1: i32, %arg2: i32, %arg3: memref<256x128xbf16, #tpu.memory_space<vmem>>, %arg4: memref<128x128xbf16, #tpu.memory_space<vmem>>, %arg5: memref<256x128xf32, #tpu.memory_space<vmem>>, %arg6: memref<256x128xf32, #tpu.memory_space<vmem>>) attributes {dimension_semantics = [#tpu.dimension_semantics<parallel>, #tpu.dimension_semantics<parallel>, #tpu.dimension_semantics<arbitrary>], iteration_bounds = array<i64: 2, 1, 5>, scalar_prefetch = 0 : i64, scratch_operands = 1 : i64, tpu.core_type = #tpu.core_type<tc>, window_params = [{transform_indices = @transform_0, window_bounds = array<i64: 256, 128>}, {transform_indices = @transform_1, window_bounds = array<i64: 128, 128>}, {transform_indices = @transform_2, window_bounds = array<i64: 256, 128>}]} {
    %c0_i32 = arith.constant 0 : i32
    %0 = arith.cmpi eq, %arg2, %c0_i32 : i32
    %1 = arith.extui %0 : i1 to i32
    %c0_i32_0 = arith.constant 0 : i32
    %2 = arith.cmpi ne, %1, %c0_i32_0 : i32
    scf.if %2 {
      %cst_9 = arith.constant 0.000000e+00 : f32
      %12 = vector.broadcast %cst_9 : f32 to vector<256x128xf32>
      %c0_10 = arith.constant 0 : index
      %c0_11 = arith.constant 0 : index
      %13 = vector.load %arg6[%c0_10, %c0_11] : memref<256x128xf32, #tpu.memory_space<vmem>>, vector<256x128xf32>
      tpu.vector_store %arg6[%c0_10, %c0_11], %12 {strides = array<i32>} : memref<256x128xf32, #tpu.memory_space<vmem>>, vector<256x128xf32>,
    } else {
    }
    %c0 = arith.constant 0 : index
    %c0_1 = arith.constant 0 : index
    %3 = vector.load %arg6[%c0, %c0_1] : memref<256x128xf32, #tpu.memory_space<vmem>>, vector<256x128xf32>
    %c0_2 = arith.constant 0 : index
    %c0_3 = arith.constant 0 : index
    %4 = vector.load %arg3[%c0_2, %c0_3] : memref<256x128xbf16, #tpu.memory_space<vmem>>, vector<256x128xbf16>
    %c0_4 = arith.constant 0 : index
    %c0_5 = arith.constant 0 : index
    %5 = vector.load %arg4[%c0_4, %c0_5] : memref<128x128xbf16, #tpu.memory_space<vmem>>, vector<128x128xbf16>
    %cst = arith.constant dense<0.000000e+00> : vector<256x128xf32>
    %6 = tpu.matmul %4, %5, %cst {dimension_numbers = #tpu.dot_dimension_numbers<[1], [0], [0], [1], [0, 0, 1, 1], [], []>} : vector<256x128xbf16>, vector<128x128xbf16>, vector<256x128xf32> -> vector<256x128xf32>
    %7 = arith.addf %3, %6 : vector<256x128xf32>
    %c0_6 = arith.constant 0 : index
    %c0_7 = arith.constant 0 : index
    %8 = vector.load %arg6[%c0_6, %c0_7] : memref<256x128xf32, #tpu.memory_space<vmem>>, vector<256x128xf32>
    tpu.vector_store %arg6[%c0_6, %c0_7], %7 {strides = array<i32>} : memref<256x128xf32, #tpu.memory_space<vmem>>, vector<256x128xf32>,
    %c4_i32 = arith.constant 4 : i32
    %9 = arith.cmpi eq, %arg2, %c4_i32 : i32
    %10 = arith.extui %9 : i1 to i32
    %c0_i32_8 = arith.constant 0 : i32
    %11 = arith.cmpi ne, %10, %c0_i32_8 : i32
    scf.if %11 {
      %c0_9 = arith.constant 0 : index
      %c0_10 = arith.constant 0 : index
      %12 = vector.load %arg6[%c0_9, %c0_10] : memref<256x128xf32, #tpu.memory_space<vmem>>, vector<256x128xf32>
      %c0_11 = arith.constant 0 : index
      %c0_12 = arith.constant 0 : index
      %13 = vector.load %arg5[%c0_11, %c0_12] : memref<256x128xf32, #tpu.memory_space<vmem>>, vector<256x128xf32>
      tpu.vector_store %arg5[%c0_11, %c0_12], %12 {strides = array<i32>} : memref<256x128xf32, #tpu.memory_space<vmem>>, vector<256x128xf32>,
    } else {
    }
    return
  }
  func.func @transform_0(%arg0: i32, %arg1: i32, %arg2: i32) -> (i32, i32) {
    %c0_i32 = arith.constant 0 : i32
    return %arg0, %arg2 : i32, i32
  }
  func.func @transform_1(%arg0: i32, %arg1: i32, %arg2: i32) -> (i32, i32) {
    %c0_i32 = arith.constant 0 : i32
    return %arg2, %arg1 : i32, i32
  }
  func.func @transform_2(%arg0: i32, %arg1: i32, %arg2: i32) -> (i32, i32) {
    %c0_i32 = arith.constant 0 : i32
    return %arg0, %arg1 : i32, i32
  }
}

module attributes {stable_mosaic.version = 11 : i64} {
  func.func @_gemm_kernel(%arg0: i32, %arg1: i32, %arg2: i32, %arg3: memref<256x384xbf16, #tpu.memory_space<vmem>>, %arg4: memref<384x128xbf16, #tpu.memory_space<vmem>>, %arg5: memref<1x128xf32, #tpu.memory_space<vmem>>, %arg6: memref<256x128xf32, #tpu.memory_space<vmem>>, %arg7: memref<256x128xf32, #tpu.memory_space<vmem>>) attributes {dimension_semantics = [#tpu.dimension_semantics<parallel>, #tpu.dimension_semantics<parallel>, #tpu.dimension_semantics<arbitrary>], iteration_bounds = array<i64: 2, 1, 7>, scalar_prefetch = 0 : i64, scratch_operands = 1 : i64, tpu.core_type = #tpu.core_type<tc>, window_params = [{transform_indices = @transform_0, window_bounds = array<i64: 256, 384>}, {transform_indices = @transform_1, window_bounds = array<i64: 384, 128>}, {transform_indices = @transform_2, window_bounds = array<i64: 1, 128>}, {transform_indices = @transform_3, window_bounds = array<i64: 256, 128>}]} {
    %c0_i32 = arith.constant 0 : i32
    %0 = arith.cmpi eq, %arg2, %c0_i32 : i32
    %1 = arith.extui %0 : i1 to i32
    %c0_i32_0 = arith.constant 0 : i32
    %2 = arith.cmpi ne, %1, %c0_i32_0 : i32
    scf.if %2 {
      %cst_9 = arith.constant 0.000000e+00 : f32
      %12 = vector.broadcast %cst_9 : f32 to vector<256x128xf32>
      %c0_10 = arith.constant 0 : index
      %c0_11 = arith.constant 0 : index
      %13 = vector.load %arg7[%c0_10, %c0_11] : memref<256x128xf32, #tpu.memory_space<vmem>>, vector<256x128xf32>
      tpu.vector_store %arg7[%c0_10, %c0_11], %12 {strides = array<i32>} : memref<256x128xf32, #tpu.memory_space<vmem>>, vector<256x128xf32>,
    } else {
    }
    %c0 = arith.constant 0 : index
    %c0_1 = arith.constant 0 : index
    %3 = vector.load %arg7[%c0, %c0_1] : memref<256x128xf32, #tpu.memory_space<vmem>>, vector<256x128xf32>
    %c0_2 = arith.constant 0 : index
    %c0_3 = arith.constant 0 : index
    %4 = vector.load %arg3[%c0_2, %c0_3] : memref<256x384xbf16, #tpu.memory_space<vmem>>, vector<256x384xbf16>
    %c0_4 = arith.constant 0 : index
    %c0_5 = arith.constant 0 : index
    %5 = vector.load %arg4[%c0_4, %c0_5] : memref<384x128xbf16, #tpu.memory_space<vmem>>, vector<384x128xbf16>
    %cst = arith.constant dense<0.000000e+00> : vector<256x128xf32>
    %6 = tpu.matmul %4, %5, %cst {dimension_numbers = #tpu.dot_dimension_numbers<[1], [0], [0], [1], [0, 0, 1, 1], [], []>} : vector<256x384xbf16>, vector<384x128xbf16>, vector<256x128xf32> -> vector<256x128xf32>
    %7 = arith.addf %3, %6 : vector<256x128xf32>
    %c0_6 = arith.constant 0 : index
    %c0_7 = arith.constant 0 : index
    %8 = vector.load %arg7[%c0_6, %c0_7] : memref<256x128xf32, #tpu.memory_space<vmem>>, vector<256x128xf32>
    tpu.vector_store %arg7[%c0_6, %c0_7], %7 {strides = array<i32>} : memref<256x128xf32, #tpu.memory_space<vmem>>, vector<256x128xf32>,
    %c6_i32 = arith.constant 6 : i32
    %9 = arith.cmpi eq, %arg2, %c6_i32 : i32
    %10 = arith.extui %9 : i1 to i32
    %c0_i32_8 = arith.constant 0 : i32
    %11 = arith.cmpi ne, %10, %c0_i32_8 : i32
    scf.if %11 {
      %c0_9 = arith.constant 0 : index
      %c0_10 = arith.constant 0 : index
      %12 = vector.load %arg7[%c0_9, %c0_10] : memref<256x128xf32, #tpu.memory_space<vmem>>, vector<256x128xf32>
      %c0_11 = arith.constant 0 : index
      %c0_12 = arith.constant 0 : index
      %13 = vector.load %arg5[%c0_11, %c0_12] : memref<1x128xf32, #tpu.memory_space<vmem>>, vector<1x128xf32>
      %14 = vector.broadcast %13 : vector<1x128xf32> to vector<256x128xf32>
      %15 = arith.addf %12, %14 : vector<256x128xf32>
      %c0_13 = arith.constant 0 : index
      %c0_14 = arith.constant 0 : index
      %16 = vector.load %arg6[%c0_13, %c0_14] : memref<256x128xf32, #tpu.memory_space<vmem>>, vector<256x128xf32>
      tpu.vector_store %arg6[%c0_13, %c0_14], %15 {strides = array<i32>} : memref<256x128xf32, #tpu.memory_space<vmem>>, vector<256x128xf32>,
    } else {
    }
    return
  }
  func.func @transform_0(%arg0: i32, %arg1: i32, %arg2: i32) -> (i32, i32) {
    %c0_i32 = arith.constant 0 : i32
    return %arg0, %arg2 : i32, i32
  }
  func.func @transform_1(%arg0: i32, %arg1: i32, %arg2: i32) -> (i32, i32) {
    %c0_i32 = arith.constant 0 : i32
    return %arg2, %arg1 : i32, i32
  }
  func.func @transform_2(%arg0: i32, %arg1: i32, %arg2: i32) -> (i32, i32) {
    %c0_i32 = arith.constant 0 : i32
    %c0_i32_0 = arith.constant 0 : i32
    return %c0_i32, %arg1 : i32, i32
  }
  func.func @transform_3(%arg0: i32, %arg1: i32, %arg2: i32) -> (i32, i32) {
    %c0_i32 = arith.constant 0 : i32
    return %arg0, %arg1 : i32, i32
  }
}

module attributes {stable_mosaic.version = 11 : i64} {
  func.func @_chan_affine_kernel(%arg0: i32, %arg1: i32, %arg2: memref<1x256x3xf32, #tpu.memory_space<vmem>>, %arg3: memref<1x1x3xf32, #tpu.memory_space<vmem>>, %arg4: memref<1x1x3xf32, #tpu.memory_space<vmem>>, %arg5: memref<1x256x3xf32, #tpu.memory_space<vmem>>) attributes {dimension_semantics = [#tpu.dimension_semantics<parallel>, #tpu.dimension_semantics<parallel>], iteration_bounds = array<i64: 2, 1>, scalar_prefetch = 0 : i64, scratch_operands = 0 : i64, tpu.core_type = #tpu.core_type<tc>, window_params = [{transform_indices = @transform_0, window_bounds = array<i64: 1, 256, 3>}, {pipeline_mode = #tpu.pipeline_mode<synchronous>, transform_indices = @transform_1, window_bounds = array<i64: 1, 1, 3>}, {pipeline_mode = #tpu.pipeline_mode<synchronous>, transform_indices = @transform_2, window_bounds = array<i64: 1, 1, 3>}, {transform_indices = @transform_3, window_bounds = array<i64: 1, 256, 3>}]} {
    %c0 = arith.constant 0 : index
    %c0_0 = arith.constant 0 : index
    %c0_1 = arith.constant 0 : index
    %0 = vector.load %arg2[%c0, %c0_0, %c0_1] : memref<1x256x3xf32, #tpu.memory_space<vmem>>, vector<1x256x3xf32>
    %1 = vector.shape_cast %0 : vector<1x256x3xf32> to vector<256x3xf32>
    %c0_2 = arith.constant 0 : index
    %c0_3 = arith.constant 0 : index
    %c0_4 = arith.constant 0 : index
    %2 = vector.load %arg3[%c0_2, %c0_3, %c0_4] : memref<1x1x3xf32, #tpu.memory_space<vmem>>, vector<1x1x3xf32>
    %3 = vector.shape_cast %2 : vector<1x1x3xf32> to vector<1x3xf32>
    %4 = vector.broadcast %3 : vector<1x3xf32> to vector<256x3xf32>
    %5 = arith.mulf %1, %4 : vector<256x3xf32>
    %c0_5 = arith.constant 0 : index
    %c0_6 = arith.constant 0 : index
    %c0_7 = arith.constant 0 : index
    %6 = vector.load %arg4[%c0_5, %c0_6, %c0_7] : memref<1x1x3xf32, #tpu.memory_space<vmem>>, vector<1x1x3xf32>
    %7 = vector.shape_cast %6 : vector<1x1x3xf32> to vector<1x3xf32>
    %8 = vector.broadcast %7 : vector<1x3xf32> to vector<256x3xf32>
    %9 = arith.addf %5, %8 : vector<256x3xf32>
    %c0_8 = arith.constant 0 : index
    %c0_9 = arith.constant 0 : index
    %c0_10 = arith.constant 0 : index
    %10 = vector.load %arg5[%c0_8, %c0_9, %c0_10] : memref<1x256x3xf32, #tpu.memory_space<vmem>>, vector<1x256x3xf32>
    %11 = vector.shape_cast %10 : vector<1x256x3xf32> to vector<256x3xf32>
    %12 = vector.shape_cast %9 : vector<256x3xf32> to vector<1x256x3xf32>
    tpu.vector_store %arg5[%c0_8, %c0_9, %c0_10], %12 {strides = array<i32>} : memref<1x256x3xf32, #tpu.memory_space<vmem>>, vector<1x256x3xf32>,
    return
  }
  func.func @transform_0(%arg0: i32, %arg1: i32) -> (i32, i32, i32) {
    %c0_i32 = arith.constant 0 : i32
    %c0_i32_0 = arith.constant 0 : i32
    return %arg0, %arg1, %c0_i32 : i32, i32, i32
  }
  func.func @transform_1(%arg0: i32, %arg1: i32) -> (i32, i32, i32) {
    %c0_i32 = arith.constant 0 : i32
    %c0_i32_0 = arith.constant 0 : i32
    %c0_i32_1 = arith.constant 0 : i32
    %c0_i32_2 = arith.constant 0 : i32
    return %c0_i32, %c0_i32_0, %c0_i32_1 : i32, i32, i32
  }
  func.func @transform_2(%arg0: i32, %arg1: i32) -> (i32, i32, i32) {
    %c0_i32 = arith.constant 0 : i32
    %c0_i32_0 = arith.constant 0 : i32
    %c0_i32_1 = arith.constant 0 : i32
    %c0_i32_2 = arith.constant 0 : i32
    return %c0_i32, %c0_i32_0, %c0_i32_1 : i32, i32, i32
  }
  func.func @transform_3(%arg0: i32, %arg1: i32) -> (i32, i32, i32) {
    %c0_i32 = arith.constant 0 : i32
    %c0_i32_0 = arith.constant 0 : i32
    return %arg0, %arg1, %c0_i32 : i32, i32, i32
  }
}

module attributes {stable_mosaic.version = 11 : i64} {
  func.func @_gemm_kernel(%arg0: i32, %arg1: i32, %arg2: i32, %arg3: memref<256x128xbf16, #tpu.memory_space<vmem>>, %arg4: memref<128x128xbf16, #tpu.memory_space<vmem>>, %arg5: memref<1x128xf32, #tpu.memory_space<vmem>>, %arg6: memref<256x128xf32, #tpu.memory_space<vmem>>, %arg7: memref<256x128xf32, #tpu.memory_space<vmem>>) attributes {dimension_semantics = [#tpu.dimension_semantics<parallel>, #tpu.dimension_semantics<parallel>, #tpu.dimension_semantics<arbitrary>], iteration_bounds = array<i64: 2, 1, 1>, scalar_prefetch = 0 : i64, scratch_operands = 1 : i64, tpu.core_type = #tpu.core_type<tc>, window_params = [{transform_indices = @transform_0, window_bounds = array<i64: 256, 128>}, {transform_indices = @transform_1, window_bounds = array<i64: 128, 128>}, {transform_indices = @transform_2, window_bounds = array<i64: 1, 128>}, {transform_indices = @transform_3, window_bounds = array<i64: 256, 128>}]} {
    %c0_i32 = arith.constant 0 : i32
    %0 = arith.cmpi eq, %arg2, %c0_i32 : i32
    %1 = arith.extui %0 : i1 to i32
    %c0_i32_0 = arith.constant 0 : i32
    %2 = arith.cmpi ne, %1, %c0_i32_0 : i32
    scf.if %2 {
      %cst_10 = arith.constant 0.000000e+00 : f32
      %12 = vector.broadcast %cst_10 : f32 to vector<256x128xf32>
      %c0_11 = arith.constant 0 : index
      %c0_12 = arith.constant 0 : index
      %13 = vector.load %arg7[%c0_11, %c0_12] : memref<256x128xf32, #tpu.memory_space<vmem>>, vector<256x128xf32>
      tpu.vector_store %arg7[%c0_11, %c0_12], %12 {strides = array<i32>} : memref<256x128xf32, #tpu.memory_space<vmem>>, vector<256x128xf32>,
    } else {
    }
    %c0 = arith.constant 0 : index
    %c0_1 = arith.constant 0 : index
    %3 = vector.load %arg7[%c0, %c0_1] : memref<256x128xf32, #tpu.memory_space<vmem>>, vector<256x128xf32>
    %c0_2 = arith.constant 0 : index
    %c0_3 = arith.constant 0 : index
    %4 = vector.load %arg3[%c0_2, %c0_3] : memref<256x128xbf16, #tpu.memory_space<vmem>>, vector<256x128xbf16>
    %c0_4 = arith.constant 0 : index
    %c0_5 = arith.constant 0 : index
    %5 = vector.load %arg4[%c0_4, %c0_5] : memref<128x128xbf16, #tpu.memory_space<vmem>>, vector<128x128xbf16>
    %cst = arith.constant dense<0.000000e+00> : vector<256x128xf32>
    %6 = tpu.matmul %4, %5, %cst {dimension_numbers = #tpu.dot_dimension_numbers<[1], [0], [0], [1], [0, 0, 1, 1], [], []>} : vector<256x128xbf16>, vector<128x128xbf16>, vector<256x128xf32> -> vector<256x128xf32>
    %7 = arith.addf %3, %6 : vector<256x128xf32>
    %c0_6 = arith.constant 0 : index
    %c0_7 = arith.constant 0 : index
    %8 = vector.load %arg7[%c0_6, %c0_7] : memref<256x128xf32, #tpu.memory_space<vmem>>, vector<256x128xf32>
    tpu.vector_store %arg7[%c0_6, %c0_7], %7 {strides = array<i32>} : memref<256x128xf32, #tpu.memory_space<vmem>>, vector<256x128xf32>,
    %c0_i32_8 = arith.constant 0 : i32
    %9 = arith.cmpi eq, %arg2, %c0_i32_8 : i32
    %10 = arith.extui %9 : i1 to i32
    %c0_i32_9 = arith.constant 0 : i32
    %11 = arith.cmpi ne, %10, %c0_i32_9 : i32
    scf.if %11 {
      %c0_10 = arith.constant 0 : index
      %c0_11 = arith.constant 0 : index
      %12 = vector.load %arg7[%c0_10, %c0_11] : memref<256x128xf32, #tpu.memory_space<vmem>>, vector<256x128xf32>
      %c0_12 = arith.constant 0 : index
      %c0_13 = arith.constant 0 : index
      %13 = vector.load %arg5[%c0_12, %c0_13] : memref<1x128xf32, #tpu.memory_space<vmem>>, vector<1x128xf32>
      %14 = vector.broadcast %13 : vector<1x128xf32> to vector<256x128xf32>
      %15 = arith.addf %12, %14 : vector<256x128xf32>
      %cst_14 = arith.constant 0.000000e+00 : f32
      %16 = vector.broadcast %cst_14 : f32 to vector<256x128xf32>
      %17 = arith.maximumf %15, %16 : vector<256x128xf32>
      %c0_15 = arith.constant 0 : index
      %c0_16 = arith.constant 0 : index
      %18 = vector.load %arg6[%c0_15, %c0_16] : memref<256x128xf32, #tpu.memory_space<vmem>>, vector<256x128xf32>
      tpu.vector_store %arg6[%c0_15, %c0_16], %17 {strides = array<i32>} : memref<256x128xf32, #tpu.memory_space<vmem>>, vector<256x128xf32>,
    } else {
    }
    return
  }
  func.func @transform_0(%arg0: i32, %arg1: i32, %arg2: i32) -> (i32, i32) {
    %c0_i32 = arith.constant 0 : i32
    return %arg0, %arg2 : i32, i32
  }
  func.func @transform_1(%arg0: i32, %arg1: i32, %arg2: i32) -> (i32, i32) {
    %c0_i32 = arith.constant 0 : i32
    return %arg2, %arg1 : i32, i32
  }
  func.func @transform_2(%arg0: i32, %arg1: i32, %arg2: i32) -> (i32, i32) {
    %c0_i32 = arith.constant 0 : i32
    %c0_i32_0 = arith.constant 0 : i32
    return %c0_i32, %arg1 : i32, i32
  }
  func.func @transform_3(%arg0: i32, %arg1: i32, %arg2: i32) -> (i32, i32) {
    %c0_i32 = arith.constant 0 : i32
    return %arg0, %arg1 : i32, i32
  }
}

module attributes {stable_mosaic.version = 11 : i64} {
  func.func @_gemm_kernel(%arg0: i32, %arg1: i32, %arg2: i32, %arg3: memref<256x128xbf16, #tpu.memory_space<vmem>>, %arg4: memref<128x128xbf16, #tpu.memory_space<vmem>>, %arg5: memref<1x128xf32, #tpu.memory_space<vmem>>, %arg6: memref<256x128xf32, #tpu.memory_space<vmem>>, %arg7: memref<256x128xf32, #tpu.memory_space<vmem>>) attributes {dimension_semantics = [#tpu.dimension_semantics<parallel>, #tpu.dimension_semantics<parallel>, #tpu.dimension_semantics<arbitrary>], iteration_bounds = array<i64: 2, 1, 5>, scalar_prefetch = 0 : i64, scratch_operands = 1 : i64, tpu.core_type = #tpu.core_type<tc>, window_params = [{transform_indices = @transform_0, window_bounds = array<i64: 256, 128>}, {transform_indices = @transform_1, window_bounds = array<i64: 128, 128>}, {transform_indices = @transform_2, window_bounds = array<i64: 1, 128>}, {transform_indices = @transform_3, window_bounds = array<i64: 256, 128>}]} {
    %c0_i32 = arith.constant 0 : i32
    %0 = arith.cmpi eq, %arg2, %c0_i32 : i32
    %1 = arith.extui %0 : i1 to i32
    %c0_i32_0 = arith.constant 0 : i32
    %2 = arith.cmpi ne, %1, %c0_i32_0 : i32
    scf.if %2 {
      %cst_9 = arith.constant 0.000000e+00 : f32
      %12 = vector.broadcast %cst_9 : f32 to vector<256x128xf32>
      %c0_10 = arith.constant 0 : index
      %c0_11 = arith.constant 0 : index
      %13 = vector.load %arg7[%c0_10, %c0_11] : memref<256x128xf32, #tpu.memory_space<vmem>>, vector<256x128xf32>
      tpu.vector_store %arg7[%c0_10, %c0_11], %12 {strides = array<i32>} : memref<256x128xf32, #tpu.memory_space<vmem>>, vector<256x128xf32>,
    } else {
    }
    %c0 = arith.constant 0 : index
    %c0_1 = arith.constant 0 : index
    %3 = vector.load %arg7[%c0, %c0_1] : memref<256x128xf32, #tpu.memory_space<vmem>>, vector<256x128xf32>
    %c0_2 = arith.constant 0 : index
    %c0_3 = arith.constant 0 : index
    %4 = vector.load %arg3[%c0_2, %c0_3] : memref<256x128xbf16, #tpu.memory_space<vmem>>, vector<256x128xbf16>
    %c0_4 = arith.constant 0 : index
    %c0_5 = arith.constant 0 : index
    %5 = vector.load %arg4[%c0_4, %c0_5] : memref<128x128xbf16, #tpu.memory_space<vmem>>, vector<128x128xbf16>
    %cst = arith.constant dense<0.000000e+00> : vector<256x128xf32>
    %6 = tpu.matmul %4, %5, %cst {dimension_numbers = #tpu.dot_dimension_numbers<[1], [0], [0], [1], [0, 0, 1, 1], [], []>} : vector<256x128xbf16>, vector<128x128xbf16>, vector<256x128xf32> -> vector<256x128xf32>
    %7 = arith.addf %3, %6 : vector<256x128xf32>
    %c0_6 = arith.constant 0 : index
    %c0_7 = arith.constant 0 : index
    %8 = vector.load %arg7[%c0_6, %c0_7] : memref<256x128xf32, #tpu.memory_space<vmem>>, vector<256x128xf32>
    tpu.vector_store %arg7[%c0_6, %c0_7], %7 {strides = array<i32>} : memref<256x128xf32, #tpu.memory_space<vmem>>, vector<256x128xf32>,
    %c4_i32 = arith.constant 4 : i32
    %9 = arith.cmpi eq, %arg2, %c4_i32 : i32
    %10 = arith.extui %9 : i1 to i32
    %c0_i32_8 = arith.constant 0 : i32
    %11 = arith.cmpi ne, %10, %c0_i32_8 : i32
    scf.if %11 {
      %c0_9 = arith.constant 0 : index
      %c0_10 = arith.constant 0 : index
      %12 = vector.load %arg7[%c0_9, %c0_10] : memref<256x128xf32, #tpu.memory_space<vmem>>, vector<256x128xf32>
      %c0_11 = arith.constant 0 : index
      %c0_12 = arith.constant 0 : index
      %13 = vector.load %arg5[%c0_11, %c0_12] : memref<1x128xf32, #tpu.memory_space<vmem>>, vector<1x128xf32>
      %14 = vector.broadcast %13 : vector<1x128xf32> to vector<256x128xf32>
      %15 = arith.addf %12, %14 : vector<256x128xf32>
      %cst_13 = arith.constant 0.000000e+00 : f32
      %16 = vector.broadcast %cst_13 : f32 to vector<256x128xf32>
      %17 = arith.maximumf %15, %16 : vector<256x128xf32>
      %c0_14 = arith.constant 0 : index
      %c0_15 = arith.constant 0 : index
      %18 = vector.load %arg6[%c0_14, %c0_15] : memref<256x128xf32, #tpu.memory_space<vmem>>, vector<256x128xf32>
      tpu.vector_store %arg6[%c0_14, %c0_15], %17 {strides = array<i32>} : memref<256x128xf32, #tpu.memory_space<vmem>>, vector<256x128xf32>,
    } else {
    }
    return
  }
  func.func @transform_0(%arg0: i32, %arg1: i32, %arg2: i32) -> (i32, i32) {
    %c0_i32 = arith.constant 0 : i32
    return %arg0, %arg2 : i32, i32
  }
  func.func @transform_1(%arg0: i32, %arg1: i32, %arg2: i32) -> (i32, i32) {
    %c0_i32 = arith.constant 0 : i32
    return %arg2, %arg1 : i32, i32
  }
  func.func @transform_2(%arg0: i32, %arg1: i32, %arg2: i32) -> (i32, i32) {
    %c0_i32 = arith.constant 0 : i32
    %c0_i32_0 = arith.constant 0 : i32
    return %c0_i32, %arg1 : i32, i32
  }
  func.func @transform_3(%arg0: i32, %arg1: i32, %arg2: i32) -> (i32, i32) {
    %c0_i32 = arith.constant 0 : i32
    return %arg0, %arg1 : i32, i32
  }
}

module attributes {stable_mosaic.version = 11 : i64} {
  func.func @_pool_kernel(%arg0: i32, %arg1: memref<8x2x8x64xf32, #tpu.memory_space<vmem>>, %arg2: memref<8x2x8x64xf32, #tpu.memory_space<vmem>>, %arg3: memref<8x8x64xf32, #tpu.memory_space<vmem>>) attributes {dimension_semantics = [#tpu.dimension_semantics<parallel>], iteration_bounds = array<i64: 2>, scalar_prefetch = 0 : i64, scratch_operands = 0 : i64, tpu.core_type = #tpu.core_type<tc>, window_params = [{transform_indices = @transform_0, window_bounds = array<i64: 8, 2, 8, 64>}, {transform_indices = @transform_1, window_bounds = array<i64: 8, 2, 8, 64>}, {transform_indices = @transform_2, window_bounds = array<i64: 8, 8, 64>}]} {
    %c0 = arith.constant 0 : index
    %c0_0 = arith.constant 0 : index
    %c0_1 = arith.constant 0 : index
    %c0_2 = arith.constant 0 : index
    %0 = vector.load %arg1[%c0, %c0_0, %c0_1, %c0_2] : memref<8x2x8x64xf32, #tpu.memory_space<vmem>>, vector<8x2x8x64xf32>
    %c0_3 = arith.constant 0 : index
    %c0_4 = arith.constant 0 : index
    %c0_5 = arith.constant 0 : index
    %c0_6 = arith.constant 0 : index
    %1 = vector.load %arg2[%c0_3, %c0_4, %c0_5, %c0_6] : memref<8x2x8x64xf32, #tpu.memory_space<vmem>>, vector<8x2x8x64xf32>
    %2 = arith.maximumf %0, %1 : vector<8x2x8x64xf32>
    %3 = vector.extract_strided_slice %2 {offsets = [0, 0, 0, 0], sizes = [8, 1, 8, 64], strides = [1, 1, 1, 1]} : vector<8x2x8x64xf32> to vector<8x1x8x64xf32>
    %4 = vector.shape_cast %3 : vector<8x1x8x64xf32> to vector<8x8x64xf32>
    %5 = vector.extract_strided_slice %2 {offsets = [0, 1, 0, 0], sizes = [8, 1, 8, 64], strides = [1, 1, 1, 1]} : vector<8x2x8x64xf32> to vector<8x1x8x64xf32>
    %6 = vector.shape_cast %5 : vector<8x1x8x64xf32> to vector<8x8x64xf32>
    %7 = arith.maximumf %4, %6 : vector<8x8x64xf32>
    %c0_7 = arith.constant 0 : index
    %c0_8 = arith.constant 0 : index
    %c0_9 = arith.constant 0 : index
    %8 = vector.load %arg3[%c0_7, %c0_8, %c0_9] : memref<8x8x64xf32, #tpu.memory_space<vmem>>, vector<8x8x64xf32>
    tpu.vector_store %arg3[%c0_7, %c0_8, %c0_9], %7 {strides = array<i32>} : memref<8x8x64xf32, #tpu.memory_space<vmem>>, vector<8x8x64xf32>,
    return
  }
  func.func @transform_0(%arg0: i32) -> (i32, i32, i32, i32) {
    %c0_i32 = arith.constant 0 : i32
    %c0_i32_0 = arith.constant 0 : i32
    %c0_i32_1 = arith.constant 0 : i32
    %c0_i32_2 = arith.constant 0 : i32
    return %arg0, %c0_i32, %c0_i32_0, %c0_i32_1 : i32, i32, i32, i32
  }
  func.func @transform_1(%arg0: i32) -> (i32, i32, i32, i32) {
    %c0_i32 = arith.constant 0 : i32
    %c0_i32_0 = arith.constant 0 : i32
    %c0_i32_1 = arith.constant 0 : i32
    %c0_i32_2 = arith.constant 0 : i32
    return %arg0, %c0_i32, %c0_i32_0, %c0_i32_1 : i32, i32, i32, i32
  }
  func.func @transform_2(%arg0: i32) -> (i32, i32, i32) {
    %c0_i32 = arith.constant 0 : i32
    %c0_i32_0 = arith.constant 0 : i32
    %c0_i32_1 = arith.constant 0 : i32
    return %arg0, %c0_i32, %c0_i32_0 : i32, i32, i32
  }
}

module attributes {stable_mosaic.version = 11 : i64} {
  func.func @_gemm_kernel(%arg0: i32, %arg1: i32, %arg2: i32, %arg3: memref<128x128xbf16, #tpu.memory_space<vmem>>, %arg4: memref<128x128xbf16, #tpu.memory_space<vmem>>, %arg5: memref<1x128xf32, #tpu.memory_space<vmem>>, %arg6: memref<128x128xf32, #tpu.memory_space<vmem>>, %arg7: memref<128x128xf32, #tpu.memory_space<vmem>>) attributes {dimension_semantics = [#tpu.dimension_semantics<parallel>, #tpu.dimension_semantics<parallel>, #tpu.dimension_semantics<arbitrary>], iteration_bounds = array<i64: 1, 1, 5>, scalar_prefetch = 0 : i64, scratch_operands = 1 : i64, tpu.core_type = #tpu.core_type<tc>, window_params = [{transform_indices = @transform_0, window_bounds = array<i64: 128, 128>}, {transform_indices = @transform_1, window_bounds = array<i64: 128, 128>}, {transform_indices = @transform_2, window_bounds = array<i64: 1, 128>}, {transform_indices = @transform_3, window_bounds = array<i64: 128, 128>}]} {
    %c0_i32 = arith.constant 0 : i32
    %0 = arith.cmpi eq, %arg2, %c0_i32 : i32
    %1 = arith.extui %0 : i1 to i32
    %c0_i32_0 = arith.constant 0 : i32
    %2 = arith.cmpi ne, %1, %c0_i32_0 : i32
    scf.if %2 {
      %cst_9 = arith.constant 0.000000e+00 : f32
      %12 = vector.broadcast %cst_9 : f32 to vector<128x128xf32>
      %c0_10 = arith.constant 0 : index
      %c0_11 = arith.constant 0 : index
      %13 = vector.load %arg7[%c0_10, %c0_11] : memref<128x128xf32, #tpu.memory_space<vmem>>, vector<128x128xf32>
      tpu.vector_store %arg7[%c0_10, %c0_11], %12 {strides = array<i32>} : memref<128x128xf32, #tpu.memory_space<vmem>>, vector<128x128xf32>,
    } else {
    }
    %c0 = arith.constant 0 : index
    %c0_1 = arith.constant 0 : index
    %3 = vector.load %arg7[%c0, %c0_1] : memref<128x128xf32, #tpu.memory_space<vmem>>, vector<128x128xf32>
    %c0_2 = arith.constant 0 : index
    %c0_3 = arith.constant 0 : index
    %4 = vector.load %arg3[%c0_2, %c0_3] : memref<128x128xbf16, #tpu.memory_space<vmem>>, vector<128x128xbf16>
    %c0_4 = arith.constant 0 : index
    %c0_5 = arith.constant 0 : index
    %5 = vector.load %arg4[%c0_4, %c0_5] : memref<128x128xbf16, #tpu.memory_space<vmem>>, vector<128x128xbf16>
    %cst = arith.constant dense<0.000000e+00> : vector<128x128xf32>
    %6 = tpu.matmul %4, %5, %cst {dimension_numbers = #tpu.dot_dimension_numbers<[1], [0], [0], [1], [0, 0, 1, 1], [], []>} : vector<128x128xbf16>, vector<128x128xbf16>, vector<128x128xf32> -> vector<128x128xf32>
    %7 = arith.addf %3, %6 : vector<128x128xf32>
    %c0_6 = arith.constant 0 : index
    %c0_7 = arith.constant 0 : index
    %8 = vector.load %arg7[%c0_6, %c0_7] : memref<128x128xf32, #tpu.memory_space<vmem>>, vector<128x128xf32>
    tpu.vector_store %arg7[%c0_6, %c0_7], %7 {strides = array<i32>} : memref<128x128xf32, #tpu.memory_space<vmem>>, vector<128x128xf32>,
    %c4_i32 = arith.constant 4 : i32
    %9 = arith.cmpi eq, %arg2, %c4_i32 : i32
    %10 = arith.extui %9 : i1 to i32
    %c0_i32_8 = arith.constant 0 : i32
    %11 = arith.cmpi ne, %10, %c0_i32_8 : i32
    scf.if %11 {
      %c0_9 = arith.constant 0 : index
      %c0_10 = arith.constant 0 : index
      %12 = vector.load %arg7[%c0_9, %c0_10] : memref<128x128xf32, #tpu.memory_space<vmem>>, vector<128x128xf32>
      %c0_11 = arith.constant 0 : index
      %c0_12 = arith.constant 0 : index
      %13 = vector.load %arg5[%c0_11, %c0_12] : memref<1x128xf32, #tpu.memory_space<vmem>>, vector<1x128xf32>
      %14 = vector.broadcast %13 : vector<1x128xf32> to vector<128x128xf32>
      %15 = arith.addf %12, %14 : vector<128x128xf32>
      %cst_13 = arith.constant 0.000000e+00 : f32
      %16 = vector.broadcast %cst_13 : f32 to vector<128x128xf32>
      %17 = arith.maximumf %15, %16 : vector<128x128xf32>
      %c0_14 = arith.constant 0 : index
      %c0_15 = arith.constant 0 : index
      %18 = vector.load %arg6[%c0_14, %c0_15] : memref<128x128xf32, #tpu.memory_space<vmem>>, vector<128x128xf32>
      tpu.vector_store %arg6[%c0_14, %c0_15], %17 {strides = array<i32>} : memref<128x128xf32, #tpu.memory_space<vmem>>, vector<128x128xf32>,
    } else {
    }
    return
  }
  func.func @transform_0(%arg0: i32, %arg1: i32, %arg2: i32) -> (i32, i32) {
    %c0_i32 = arith.constant 0 : i32
    return %arg0, %arg2 : i32, i32
  }
  func.func @transform_1(%arg0: i32, %arg1: i32, %arg2: i32) -> (i32, i32) {
    %c0_i32 = arith.constant 0 : i32
    return %arg2, %arg1 : i32, i32
  }
  func.func @transform_2(%arg0: i32, %arg1: i32, %arg2: i32) -> (i32, i32) {
    %c0_i32 = arith.constant 0 : i32
    %c0_i32_0 = arith.constant 0 : i32
    return %c0_i32, %arg1 : i32, i32
  }
  func.func @transform_3(%arg0: i32, %arg1: i32, %arg2: i32) -> (i32, i32) {
    %c0_i32 = arith.constant 0 : i32
    return %arg0, %arg1 : i32, i32
  }
}

</mosaic_0001>

<bundles_post_ra>
// kernel: _lambda_.57
= control target key start
LH: loop header
LB: loop body
LE: loop exit
PB: predicated region body
PF: predicated region fallthrough
CT: control target
= control target key end

     0   :  { %s562_s9 = smov 0   ;;  %s564_s10 = smov 0   ;;  %s707_s0 = inlined_call_operand.vmem [shape: f32[2,256,32], index: 0, kind: input, shape index: {}]   ;;  %s708_s1 = inlined_call_operand.vmem [shape: f32[2,1,32], index: 1, kind: output, shape index: {0}]   ;;  %s709_s2 = inlined_call_operand.vmem [shape: f32[2,1,32], index: 2, kind: output, shape index: {1}]  }
   0x1   :  { %s566_s11 = smov 0  }
   0x2 LB: > { %s25_s12 = sadd.s32 1, %s540_s10  ;;  %p491_p0 = scmp.ge.s32.totalorder %s544_s11, 1  ;;  %s544_s11 = sphi %s566_s11, %s13_s11   ;;  %s540_s10 = sphi %s564_s10, %s711_s10   ;;  %s536_s9 = sphi %s562_s9, %s710_s9  }
   0x3   : > { %p27_p1 = scmp.ge.s32.totalorder %s25_s12, 2  ;;  %p134_p2 = scmp.lt.s32.totalorder %s544_s11, 3 }
   0x5   : > { %s713_s12 = smov (%p27_p1, %s25_s12), 0  ;;  %p135_p3 = pnand %p491_p0, %p134_p2 }
   0x6   : > { %p162_p4 = scmp.lt.s32.totalorder (!%p135_p3), %s536_s9, 1 }
   0x7   : > { %138 = sbr.rel (%p135_p3) target bundleno = 107 (0x6b), region = 24 }
   0xc   : > { %vm181_vm0 = vcmask 253952   ;;  %v546_v0 = vmov 0.0   ;;  %s715_s9 = smov (!%p162_p4, %s536_s9), 1  ;;  %vm217_vm1 = vcmask 261120  }
   0xd   : > { %182 = vst.msk [vmem:[#allocation2] sm:$0x1] %vm181_vm0, %v546_v0  ;;  %183 = vst.msk [vmem:[#allocation3] sm:$0x1] %vm181_vm0, %v546_v0  ;;  %s496_s13 = sshll.u32 %s715_s9, 8  ;;  %s173_s19 = scalar_lea.vmem %s708_s1, %s715_s9 }
   0xe   : > { %s588_s16 = scalar_lea.vmem %s707_s0, %s496_s13  ;;  %s176_s22 = scalar_lea.vmem %s709_s2, %s715_s9 }
   0xf   : > { %v184_v1 = vld [vmem:[%s588_s16] sm:$0xff]  ;;  %v185_v2 = vld [vmem:[%s588_s16 + $0x8] sm:$0xff]  ;;  %v186_v3 = vld [vmem:[%s588_s16 + $0x10] sm:$0xff] }
  0x10   : > { %v218_v4 = vsel %vm217_vm1, %v184_v1, 0.0  ;;  %v219_v5 = vsel %vm217_vm1, %v185_v2, 0.0  ;;  %v221_v6 = vsel %vm217_vm1, %v186_v3, 0.0  ;;  %v187_v7 = vld [vmem:[%s588_s16 + $0x18] sm:$0xff]  ;;  %v188_v10 = vld [vmem:[%s588_s16 + $0x20] sm:$0xff]  ;;  %v189_v13 = vld [vmem:[%s588_s16 + $0x28] sm:$0xff]  ;;  %v291_v28 = vmul.f32 %v184_v1, %v184_v1 }
  0x11   : > { %v220_v8 = vadd.f32 %v219_v5, %v218_v4  ;;  %v223_v9 = vsel %vm217_vm1, %v187_v7, 0.0  ;;  %v225_v12 = vsel %vm217_vm1, %v188_v10, 0.0  ;;  %v227_v15 = vsel %vm217_vm1, %v189_v13, 0.0  ;;  %v190_v16 = vld [vmem:[%s588_s16 + $0x30] sm:$0xff]  ;;  %v191_v19 = vld [vmem:[%s588_s16 + $0x38] sm:$0xff]  ;;  %v192_v22 = vld [vmem:[%s588_s16 + $0x40] sm:$0xff] }
  0x12   : > { %v229_v18 = vsel %vm217_vm1, %v190_v16, 0.0  ;;  %v231_v21 = vsel %vm217_vm1, %v191_v19, 0.0  ;;  %v233_v24 = vsel %vm217_vm1, %v192_v22, 0.0  ;;  %v193_v25 = vld [vmem:[%s588_s16 + $0x48] sm:$0xff]  ;;  %v292_v29 = vmul.f32 %v185_v2, %v185_v2  ;;  %v194_v31 = vld [vmem:[%s588_s16 + $0x50] sm:$0xff]  ;;  %v195_v33 = vld [vmem:[%s588_s16 + $0x58] sm:$0xff] }
  0x13   : > { %v222_v11 = vadd.f32 %v221_v6, %v220_v8  ;;  %v235_v27 = vsel %vm217_vm1, %v193_v25, 0.0  ;;  %v293_v30 = vmul.f32 %v186_v3, %v186_v3  ;;  %v237_v34 = vsel %vm217_vm1, %v194_v31, 0.0  ;;  %v196_v42 = vld [vmem:[%s588_s16 + $0x60] sm:$0xff]  ;;  %v197_v48 = vld [vmem:[%s588_s16 + $0x68] sm:$0xff]  ;;  %v198_v54 = vld [vmem:[%s588_s16 + $0x70] sm:$0xff] }
  0x14   : > { %v294_v35 = vmul.f32 %v187_v7, %v187_v7  ;;  %v239_v37 = vsel %vm217_vm1, %v195_v33, 0.0  ;;  %v295_v38 = vmul.f32 %v188_v10, %v188_v10  ;;  %v323_v39 = vsel %vm217_vm1, %v291_v28, 0.0  ;;  %v199_v60 = vld [vmem:[%s588_s16 + $0x78] sm:$0xff]  ;;  %v200_v2 = vld [vmem:[%s588_s16 + $0x80] sm:$0xff]  ;;  %v201_v8 = vld [vmem:[%s588_s16 + $0x88] sm:$0xff] }
  0x15   : > { %v224_v14 = vadd.f32 %v223_v9, %v222_v11  ;;  %v324_v40 = vsel %vm217_vm1, %v292_v29, 0.0  ;;  %v326_v41 = vsel %vm217_vm1, %v293_v30, 0.0  ;;  %v241_v45 = vsel %vm217_vm1, %v196_v42, 0.0 }
  0x16   : > { %v325_v44 = vadd.f32 %v324_v40, %v323_v39  ;;  %v296_v46 = vmul.f32 %v189_v13, %v189_v13  ;;  %v328_v47 = vsel %vm217_vm1, %v294_v35, 0.0  ;;  %v243_v51 = vsel %vm217_vm1, %v197_v48, 0.0 }
  0x17   : > { %v226_v17 = vadd.f32 %v225_v12, %v224_v14  ;;  %v297_v52 = vmul.f32 %v190_v16, %v190_v16  ;;  %v330_v53 = vsel %vm217_vm1, %v295_v38, 0.0  ;;  %v245_v57 = vsel %vm217_vm1, %v198_v54, 0.0  ;;  %v202_v14 = vld [vmem:[%s588_s16 + $0x90] sm:$0xff] }
  0x18   : > { %v327_v50 = vadd.f32 %v326_v41, %v325_v44  ;;  %v298_v58 = vmul.f32 %v191_v19, %v191_v19  ;;  %v332_v59 = vsel %vm217_vm1, %v296_v46, 0.0  ;;  %v247_v63 = vsel %vm217_vm1, %v199_v60, 0.0  ;;  %v206_v38 = vld [vmem:[%s588_s16 + $0xb0] sm:$0xff]  ;;  %v207_v44 = vld [vmem:[%s588_s16 + $0xb8] sm:$0xff] }
  0x19   : > { %v228_v20 = vadd.f32 %v227_v15, %v226_v17  ;;  %v299_v0 = vmul.f32 %v192_v22, %v192_v22  ;;  %v334_v1 = vsel %vm217_vm1, %v297_v52, 0.0  ;;  %v249_v5 = vsel %vm217_vm1, %v200_v2, 0.0 }
  0x1a   : > { %v329_v56 = vadd.f32 %v328_v47, %v327_v50  ;;  %v300_v6 = vmul.f32 %v193_v25, %v193_v25  ;;  %v336_v7 = vsel %vm217_vm1, %v298_v58, 0.0  ;;  %v251_v11 = vsel %vm217_vm1, %v201_v8, 0.0  ;;  %v208_v50 = vld [vmem:[%s588_s16 + $0xc0] sm:$0xff] }
  0x1b   : > { %v230_v23 = vadd.f32 %v229_v18, %v228_v20  ;;  %v301_v12 = vmul.f32 %v194_v31, %v194_v31  ;;  %v338_v13 = vsel %vm217_vm1, %v299_v0, 0.0  ;;  %v253_v17 = vsel %vm217_vm1, %v202_v14, 0.0  ;;  %v203_v20 = vld [vmem:[%s588_s16 + $0x98] sm:$0xff] }
  0x1c   : > { %v331_v62 = vadd.f32 %v330_v53, %v329_v56  ;;  %v302_v18 = vmul.f32 %v195_v33, %v195_v33  ;;  %v340_v19 = vsel %vm217_vm1, %v300_v6, 0.0  ;;  %v304_v30 = vmul.f32 %v197_v48, %v197_v48  ;;  %v209_v56 = vld [vmem:[%s588_s16 + $0xc8] sm:$0xff] }
  0x1d   : > { %v232_v26 = vadd.f32 %v231_v21, %v230_v23  ;;  %v255_v23 = vsel %vm217_vm1, %v203_v20, 0.0  ;;  %v342_v25 = vsel %vm217_vm1, %v301_v12, 0.0  ;;  %v261_v41 = vsel %vm217_vm1, %v206_v38, 0.0 }
  0x1e   : > { %v333_v4 = vadd.f32 %v332_v59, %v331_v62  ;;  %v344_v31 = vsel %vm217_vm1, %v302_v18, 0.0  ;;  %v263_v47 = vsel %vm217_vm1, %v207_v44, 0.0  ;;  %v307_v48 = vmul.f32 %v200_v2, %v200_v2  ;;  %v210_v62 = vld [vmem:[%s588_s16 + $0xd0] sm:$0xff] }
  0x1f   : > { %v234_v32 = vadd.f32 %v233_v24, %v232_v26  ;;  %v303_v24 = vmul.f32 %v196_v42, %v196_v42  ;;  %v204_v26 = vld [vmem:[%s588_s16 + $0xa0] sm:$0xff]  ;;  %v306_v42 = vmul.f32 %v199_v60, %v199_v60  ;;  %v265_v53 = vsel %vm217_vm1, %v208_v50, 0.0 }
  0x20   : > { %v335_v10 = vadd.f32 %v334_v1, %v333_v4  ;;  %v257_v29 = vsel %vm217_vm1, %v204_v26, 0.0  ;;  %v267_v59 = vsel %vm217_vm1, %v209_v56, 0.0  ;;  %v309_v60 = vmul.f32 %v202_v14, %v202_v14  ;;  %v211_v4 = vld [vmem:[%s588_s16 + $0xd8] sm:$0xff] }
  0x21   : > { %v236_v36 = vadd.f32 %v235_v27, %v234_v32  ;;  %v205_v32 = vld [vmem:[%s588_s16 + $0xa8] sm:$0xff]  ;;  %v269_v1 = vsel %vm217_vm1, %v210_v62, 0.0  ;;  %v310_v2 = vmul.f32 %v203_v20, %v203_v20  ;;  %v313_v20 = vmul.f32 %v206_v38, %v206_v38 }
  0x22   : > { %v337_v16 = vadd.f32 %v336_v7, %v335_v10  ;;  %v259_v35 = vsel %vm217_vm1, %v205_v32, 0.0  ;;  %v271_v7 = vsel %vm217_vm1, %v211_v4, 0.0  ;;  %v212_v10 = vld [vmem:[%s588_s16 + $0xe0] sm:$0xff]  ;;  %v312_v14 = vmul.f32 %v205_v32, %v205_v32 }
  0x23   : > { %v238_v43 = vadd.f32 %v237_v34, %v236_v36  ;;  %v305_v36 = vmul.f32 %v198_v54, %v198_v54  ;;  %v308_v54 = vmul.f32 %v201_v8, %v201_v8  ;;  %v311_v8 = vmul.f32 %v204_v26, %v204_v26 }
  0x24   : > { %v339_v22 = vadd.f32 %v338_v13, %v337_v16  ;;  %v273_v13 = vsel %vm217_vm1, %v212_v10, 0.0  ;;  %v213_v16 = vld [vmem:[%s588_s16 + $0xe8] sm:$0xff]  ;;  %v314_v26 = vmul.f32 %v207_v44, %v207_v44  ;;  %v315_v32 = vmul.f32 %v208_v50, %v208_v50 }
  0x25   : > { %v240_v49 = vadd.f32 %v239_v37, %v238_v43  ;;  %v346_v37 = vsel %vm217_vm1, %v303_v24, 0.0  ;;  %v348_v43 = vsel %vm217_vm1, %v304_v30, 0.0  ;;  %v318_v44 = vmul.f32 %v211_v4, %v211_v4 }
  0x26   : > { %v341_v28 = vadd.f32 %v340_v19, %v339_v22  ;;  %v275_v19 = vsel %vm217_vm1, %v213_v16, 0.0  ;;  %v214_v22 = vld [vmem:[%s588_s16 + $0xf0] sm:$0xff] }
  0x27   : > { %v242_v55 = vadd.f32 %v241_v45, %v240_v49  ;;  %v350_v49 = vsel %vm217_vm1, %v305_v36, 0.0  ;;  %v316_v36 = vmul.f32 %v209_v56, %v209_v56  ;;  %v321_v56 = vmul.f32 %v214_v22, %v214_v22 }
  0x28   : > { %v343_v34 = vadd.f32 %v342_v25, %v341_v28  ;;  %v277_v25 = vsel %vm217_vm1, %v214_v22, 0.0  ;;  %v215_v28 = vld [vmem:[%s588_s16 + $0xf8] sm:$0xff] }
  0x29   : > { %v244_v61 = vadd.f32 %v243_v51, %v242_v55  ;;  %v352_v55 = vsel %vm217_vm1, %v306_v42, 0.0 }
  0x2a   : > { %v345_v40 = vadd.f32 %v344_v31, %v343_v34  ;;  %v279_v31 = vsel %vm217_vm1, %v215_v28, 0.0 }
  0x2b   : > { %v246_v3 = vadd.f32 %v245_v57, %v244_v61  ;;  %v354_v61 = vsel %vm217_vm1, %v307_v48, 0.0  ;;  %v319_v48 = vmul.f32 %v212_v10, %v212_v10 }
  0x2c   : > { %v347_v46 = vadd.f32 %v346_v37, %v345_v40  ;;  %v368_v37 = vsel %vm217_vm1, %v314_v26, 0.0  ;;  %v317_v40 = vmul.f32 %v210_v62, %v210_v62 }
  0x2d   : > { %v248_v9 = vadd.f32 %v247_v63, %v246_v3  ;;  %v356_v3 = vsel %vm217_vm1, %v308_v54, 0.0 }
  0x2e   : > { %v349_v52 = vadd.f32 %v348_v43, %v347_v46 }
  0x2f   : > { %v250_v15 = vadd.f32 %v249_v5, %v248_v9  ;;  %v358_v9 = vsel %vm217_vm1, %v309_v60, 0.0  ;;  %v216_v60 = vld [vmem:[#allocation2] sm:$0x1] }
  0x30   : > { %v351_v58 = vadd.f32 %v350_v49, %v349_v52  ;;  %v374_v49 = vsel %vm217_vm1, %v317_v40, 0.0  ;;  %v320_v52 = vmul.f32 %v213_v16, %v213_v16 }
  0x31   : > { %v252_v21 = vadd.f32 %v251_v11, %v250_v15  ;;  %v360_v15 = vsel %vm217_vm1, %v310_v2, 0.0 }
  0x32   : > { %v353_v0 = vadd.f32 %v352_v55, %v351_v58  ;;  %v380_v62 = vsel %vm217_vm1, %v320_v52, 0.0 }
  0x33   : > { %v254_v27 = vadd.f32 %v253_v17, %v252_v21  ;;  %v362_v21 = vsel %vm217_vm1, %v311_v8, 0.0 }
  0x34   : > { %v355_v6 = vadd.f32 %v354_v61, %v353_v0  ;;  %v322_v61 = vmul.f32 %v215_v28, %v215_v28 }
  0x35   : > { %v256_v33 = vadd.f32 %v255_v23, %v254_v27  ;;  %v364_v27 = vsel %vm217_vm1, %v312_v14, 0.0 }
  0x36   : > { %v357_v12 = vadd.f32 %v356_v3, %v355_v6  ;;  %v384_v4 = vsel %vm217_vm1, %v322_v61, 0.0 }
  0x37   : > { %v258_v39 = vadd.f32 %v257_v29, %v256_v33  ;;  %v366_v33 = vsel %vm217_vm1, %v313_v20, 0.0 }
  0x38   : > { %v359_v18 = vadd.f32 %v358_v9, %v357_v12 }
  0x39   : > { %v260_v45 = vadd.f32 %v259_v35, %v258_v39 }
  0x3a   : > { %v361_v24 = vadd.f32 %v360_v15, %v359_v18 }
  0x3b   : > { %v262_v51 = vadd.f32 %v261_v41, %v260_v45  ;;  %v370_v41 = vsel %vm217_vm1, %v315_v32, 0.0  ;;  %v372_v45 = vsel %vm217_vm1, %v316_v36, 0.0 }
  0x3c   : > { %v363_v30 = vadd.f32 %v362_v21, %v361_v24 }
  0x3d   : > { %v264_v57 = vadd.f32 %v263_v47, %v262_v51 }
  0x3e   : > { %v365_v35 = vadd.f32 %v364_v27, %v363_v30 }
  0x3f   : > { %v266_v63 = vadd.f32 %v265_v53, %v264_v57  ;;  %v376_v53 = vsel %vm217_vm1, %v318_v44, 0.0  ;;  %v378_v57 = vsel %vm217_vm1, %v319_v48, 0.0 }
  0x40   : > { %v367_v39 = vadd.f32 %v366_v33, %v365_v35 }
  0x41   : > { %v268_v5 = vadd.f32 %v267_v59, %v266_v63 }
  0x42   : > { %v369_v43 = vadd.f32 %v368_v37, %v367_v39 }
  0x43   : > { %v270_v11 = vadd.f32 %v269_v1, %v268_v5  ;;  %v382_v1 = vsel %vm217_vm1, %v321_v56, 0.0 }
  0x44   : > { %v371_v47 = vadd.f32 %v370_v41, %v369_v43 }
  0x45   : > { %v272_v17 = vadd.f32 %v271_v7, %v270_v11 }
  0x46   : > { %v373_v51 = vadd.f32 %v372_v45, %v371_v47 }
  0x47   : > { %v274_v23 = vadd.f32 %v273_v13, %v272_v17  ;;  %v290_v13 = vld [vmem:[#allocation3] sm:$0x1] }
  0x48   : > { %v375_v55 = vadd.f32 %v374_v49, %v373_v51 }
  0x49   : > { %v276_v29 = vadd.f32 %v275_v19, %v274_v23 }
  0x4a   : > { %v377_v59 = vadd.f32 %v376_v53, %v375_v55 }
  0x4b   : > { %v278_v34 = vadd.f32 %v277_v25, %v276_v29 }
  0x4c   : > { %v379_v0 = vadd.f32 %v378_v57, %v377_v59 }
  0x4d   : > { %v280_v38 = vadd.f32 %v279_v31, %v278_v34 }
  0x4e   : > { %v381_v3 = vadd.f32 %v380_v62, %v379_v0 }
  0x4f   : > { %v281_v42 = vrot.slane %v280_v38, 4 }
  0x50   : > { %v383_v5 = vadd.f32 %v382_v1, %v381_v3 }
  0x51   : > { %v282_v46 = vadd.f32 %v281_v42, %v280_v38 }
  0x52   : > { %v385_v6 = vadd.f32 %v384_v4, %v383_v5 }
  0x53   : > { %v283_v50 = vrot.slane %v282_v46, 2 }
  0x54   : > { %v386_v7 = vrot.slane %v385_v6, 4 }
  0x55   : > { %v284_v54 = vadd.f32 %v283_v50, %v282_v46 }
  0x56   : > { %v387_v8 = vadd.f32 %v386_v7, %v385_v6 }
  0x57   : > { %v285_v58 = vrot.slane %v284_v54, 1 }
  0x58   : > { %v388_v10 = vrot.slane %v387_v8, 2 }
  0x59   : > { %v286_v63 = vadd.f32 %v285_v58, %v284_v54 }
  0x5a   : > { %v389_v11 = vadd.f32 %v388_v10, %v387_v8 }
  0x5b   : > { %v287_v2 = vadd.f32 %v286_v63, %v216_v60 }
  0x5c   : > { %v390_v12 = vrot.slane %v389_v11, 1 }
  0x5d   : > { %289 = vst.msk [vmem:[#allocation2] sm:$0x1] %vm181_vm0, %v287_v2 }
  0x5e   : > { %v391_v14 = vadd.f32 %v390_v12, %v389_v11 }
  0x60   : > { %v392_v15 = vadd.f32 %v391_v14, %v290_v13 }
  0x62   : > { %393 = vst.msk [vmem:[#allocation3] sm:$0x1] %vm181_vm0, %v392_v15 }
  0x64   : > { %v397_v9 = vld [vmem:[#allocation2] sm:$0x1] }
  0x65   : > { %398 = vst.msk [vmem:[%s173_s19] sm:$0x1] %vm181_vm0, %v397_v9 }
  0x69   : > { %v399_v16 = vld [vmem:[#allocation3] sm:$0x1] }
  0x6a   : > { %400 = vst.msk [vmem:[%s176_s22] sm:$0x1] %vm181_vm0, %v399_v16 }
  0x6b PF: > { %s13_s11 = sadd.s32 1, %s544_s11   ;;  %s710_s9 = smov %s540_s10 }
  0x6c   : > { %p10_p5 = scmp.ge.s32.totalorder %s13_s11, 4   ;;  %s711_s10 = smov %s713_s12 }
  0x6e   :  { %12 = sbr.rel (!%p10_p5) target bundleno = 2 (0x2), region = 74 }

// kernel: _lambda_.56
= control target key start
LH: loop header
LB: loop body
LE: loop exit
PB: predicated region body
PF: predicated region fallthrough
CT: control target
= control target key end

     0   :  { %s1326_s9 = smov 0   ;;  %s1328_s10 = smov 0   ;;  %s1482_s0 = inlined_call_operand.vmem [shape: bf16[512,256], index: 0, kind: input, shape index: {}]   ;;  %s1483_s1 = inlined_call_operand.vmem [shape: bf16[256,128], index: 1, kind: input, shape index: {}]   ;;  %s1484_s2 = inlined_call_operand.vmem [shape: f32[512,128], index: 2, kind: output, shape index: {}]  }
   0x1   :  { %s1330_s11 = smov 0  }
   0x2 LB: > { %s31_s12 = sadd.s32 1, %s1305_s10  ;;  %p1014_p0 = scmp.ge.s32.totalorder %s1309_s11, 1  ;;  %s1309_s11 = sphi %s1330_s11, %s12_s11   ;;  %s1305_s10 = sphi %s1328_s10, %s1486_s10   ;;  %s1301_s9 = sphi %s1326_s9, %s1485_s9  }
   0x3   : > { %p33_p1 = scmp.ge.s32.totalorder %s31_s12, 2  ;;  %p158_p2 = scmp.lt.s32.totalorder %s1309_s11, 3 }
   0x5   : > { %s1488_s12 = smov (%p33_p1, %s31_s12), 0  ;;  %p159_p3 = pnand %p1014_p0, %p158_p2 }
   0x6   : > { %s1015_s15 = sshll.u32 (!%p159_p3), %s1301_s9, 5 }
   0x7   : > { %162 = sbr.rel (%p159_p3) target bundleno = 303 (0x12f), region = 28  ;;  %p198_p4 = scmp.lt.s32.totalorder (!%p159_p3), %s1015_s15, 63 }
   0xc   : > { %v1223_v0 = vld [vmem:[%s1483_s1 + $0x78] sm:$0xff]   ;;  %v1225_v2 = vld [vmem:[%s1483_s1 + $0x70] sm:$0xff]   ;;  %v1227_v4 = vld [vmem:[%s1483_s1 + $0x68] sm:$0xff]   ;;  %s1490_s15 = smov (!%p198_p4, %s1015_s15), 63 }
   0xd   : > { %v1224_v1 = vld [vmem:[%s1483_s1 + $0x38] sm:$0xff]   ;;  %1071 = vmatprep.subr.bf16.mxu0 %v1223_v0  ;;  %1183 = vmatprep.subr.bf16.mxu1 %v1223_v0  ;;  %v1226_v3 = vld [vmem:[%s1483_s1 + $0x30] sm:$0xff]   ;;  %v1228_v5 = vld [vmem:[%s1483_s1 + $0x28] sm:$0xff]   ;;  %s1070_s30 = sshll.u32 %s1490_s15, 3 }
   0xe   : > { %1072 = vmatpush3.bf16.msra.mxu0 %v1224_v1  ;;  %1191 = vmatpush3.bf16.msra.mxu1 %v1224_v1  ;;  %v1229_v6 = vld [vmem:[%s1483_s1 + $0x60] sm:$0xff]   ;;  %v1231_v8 = vld [vmem:[%s1483_s1 + $0x58] sm:$0xff]   ;;  %s1379_s7 = scalar_lea.vmem %s1482_s0, %s1070_s30  ;;  %v1233_v10 = vld [vmem:[%s1483_s1 + $0x50] sm:$0xff]   ;;  %s1439_s28 = scalar_lea.vmem %s1484_s2, %s1070_s30 }
   0xf   : > { %1073 = vmatprep.subr.bf16.mxu0 %v1225_v2  ;;  %1184 = vmatprep.subr.bf16.mxu1 %v1225_v2  ;;  %v1230_v7 = vld [vmem:[%s1483_s1 + $0x20] sm:$0xff]   ;;  %v1232_v9 = vld [vmem:[%s1483_s1 + $0x18] sm:$0xff]   ;;  %v1234_v13 = vld [vmem:[%s1483_s1 + $0x10] sm:$0xff]  }
  0x10   : > { %v1241_v11 = vld [vmem:[%s1379_s7 + $0x4] ss:$8 sps:$4 sm:$0xff]   ;;  %v1239_v18 = vld [vmem:[%s1379_s7] ss:$8 sps:$4 sm:$0xff]   ;;  %v1245_v20 = vld [vmem:[%s1379_s7 + $0x14] ss:$8 sps:$4 sm:$0xff]  }
  0x11   : > { %v1244_v12 = vld [vmem:[%s1379_s7 + $0x84] ss:$8 sps:$4 sm:$0xff]   ;;  %647 = vmatprep.mubr.bf16.mxu0 %v1241_v11  ;;  %v1242_v19 = vld [vmem:[%s1379_s7 + $0x80] ss:$8 sps:$4 sm:$0xff]   ;;  %v1247_v21 = vld [vmem:[%s1379_s7 + $0x94] ss:$8 sps:$4 sm:$0xff]  }
  0x12   : > { %1074 = vmatpush3.bf16.msra.mxu0 %v1226_v3  ;;  %1192 = vmatpush3.bf16.msra.mxu1 %v1226_v3  ;;  %v1235_v14 = vld [vmem:[%s1483_s1 + $0x48] sm:$0xff]   ;;  %v1237_v16 = vld [vmem:[%s1483_s1 + $0x40] sm:$0xff]   ;;  %v1249_v22 = vld [vmem:[%s1379_s7 + $0x10] ss:$8 sps:$4 sm:$0xff]  }
  0x13   : > { %1075 = vmatprep.subr.bf16.mxu0 %v1227_v4  ;;  %1185 = vmatprep.subr.bf16.mxu1 %v1227_v4  ;;  %v1236_v15 = vld [vmem:[%s1483_s1 + $0x8] sm:$0xff]   ;;  %v1238_v17 = vld [vmem:[%s1483_s1] sm:$0xff]   ;;  %v1250_v23 = vld [vmem:[%s1379_s7 + $0x90] ss:$8 sps:$4 sm:$0xff]  }
  0x14   : > { %711 = vmatprep.mubr.bf16.mxu1 %v1244_v12  ;;  %v1251_v24 = vld [vmem:[%s1379_s7 + $0x24] ss:$8 sps:$4 sm:$0xff]   ;;  %v1255_v26 = vld [vmem:[%s1379_s7 + $0x20] ss:$8 sps:$4 sm:$0xff]   ;;  %v1257_v28 = vld [vmem:[%s1379_s7 + $0x34] ss:$8 sps:$4 sm:$0xff]  }
  0x15   : > { %v1253_v25 = vld [vmem:[%s1379_s7 + $0xa4] ss:$8 sps:$4 sm:$0xff]   ;;  %v1256_v27 = vld [vmem:[%s1379_s7 + $0xa0] ss:$8 sps:$4 sm:$0xff]   ;;  %v1259_v29 = vld [vmem:[%s1379_s7 + $0xb4] ss:$8 sps:$4 sm:$0xff]  }
  0x16   : > { %1076 = vmatpush3.bf16.msra.mxu0 %v1228_v5  ;;  %1193 = vmatpush3.bf16.msra.mxu1 %v1228_v5  ;;  %v1261_v30 = vld [vmem:[%s1379_s7 + $0x30] ss:$8 sps:$4 sm:$0xff]   ;;  %v1263_v32 = vld [vmem:[%s1379_s7 + $0x44] ss:$8 sps:$4 sm:$0xff]   ;;  %v1267_v34 = vld [vmem:[%s1379_s7 + $0x40] ss:$8 sps:$4 sm:$0xff]  }
  0x17   : > { %1077 = vmatprep.subr.bf16.mxu0 %v1229_v6  ;;  %1186 = vmatprep.subr.bf16.mxu1 %v1229_v6  ;;  %v1262_v31 = vld [vmem:[%s1379_s7 + $0xb0] ss:$8 sps:$4 sm:$0xff]   ;;  %v1265_v33 = vld [vmem:[%s1379_s7 + $0xc4] ss:$8 sps:$4 sm:$0xff]   ;;  %v1268_v35 = vld [vmem:[%s1379_s7 + $0xc0] ss:$8 sps:$4 sm:$0xff]  }
  0x18   : > { %v1269_v36 = vld [vmem:[%s1379_s7 + $0x54] ss:$8 sps:$4 sm:$0xff]   ;;  %v1273_v38 = vld [vmem:[%s1379_s7 + $0x50] ss:$8 sps:$4 sm:$0xff]   ;;  %v1275_v40 = vld [vmem:[%s1379_s7 + $0x64] ss:$8 sps:$4 sm:$0xff]  }
  0x19   : > { %v1271_v37 = vld [vmem:[%s1379_s7 + $0xd4] ss:$8 sps:$4 sm:$0xff]   ;;  %v1274_v39 = vld [vmem:[%s1379_s7 + $0xd0] ss:$8 sps:$4 sm:$0xff]   ;;  %v1277_v41 = vld [vmem:[%s1379_s7 + $0xe4] ss:$8 sps:$4 sm:$0xff]  }
  0x1a   : > { %1078 = vmatpush3.bf16.msra.mxu0 %v1230_v7  ;;  %1194 = vmatpush3.bf16.msra.mxu1 %v1230_v7  ;;  %v1279_v42 = vld [vmem:[%s1379_s7 + $0x60] ss:$8 sps:$4 sm:$0xff]   ;;  %v1281_v44 = vld [vmem:[%s1379_s7 + $0x74] ss:$8 sps:$4 sm:$0xff]   ;;  %v1285_v46 = vld [vmem:[%s1379_s7 + $0x70] ss:$8 sps:$4 sm:$0xff]  }
  0x1b   : > { %1079 = vmatprep.subr.bf16.mxu0 %v1231_v8  ;;  %1187 = vmatprep.subr.bf16.mxu1 %v1231_v8  ;;  %v1280_v43 = vld [vmem:[%s1379_s7 + $0xe0] ss:$8 sps:$4 sm:$0xff]   ;;  %v1283_v45 = vld [vmem:[%s1379_s7 + $0xf4] ss:$8 sps:$4 sm:$0xff]   ;;  %v1286_v47 = vld [vmem:[%s1379_s7 + $0xf0] ss:$8 sps:$4 sm:$0xff]  }
  0x1e   : > { %1080 = vmatpush3.bf16.msra.mxu0 %v1232_v9  ;;  %1195 = vmatpush3.bf16.msra.mxu1 %v1232_v9 }
  0x1f   : > { %1081 = vmatprep.subr.bf16.mxu0 %v1233_v10  ;;  %1188 = vmatprep.subr.bf16.mxu1 %v1233_v10 }
  0x22   : > { %1082 = vmatpush3.bf16.msra.mxu0 %v1234_v13  ;;  %1196 = vmatpush3.bf16.msra.mxu1 %v1234_v13 }
  0x23   : > { %1083 = vmatprep.subr.bf16.mxu0 %v1235_v14  ;;  %1189 = vmatprep.subr.bf16.mxu1 %v1235_v14 }
  0x26   : > { %1084 = vmatpush3.bf16.msra.mxu0 %v1236_v15  ;;  %1197 = vmatpush3.bf16.msra.mxu1 %v1236_v15 }
  0x27   : > { %1085 = vmatprep.subr.bf16.mxu0 %v1237_v16  ;;  %1190 = vmatprep.subr.bf16.mxu1 %v1237_v16 }
  0x2a   : > { %1086 = vmatpush3.bf16.msra.mxu0 %v1238_v17  ;;  %1198 = vmatpush3.bf16.msra.mxu1 %v1238_v17 }
  0x2d   : > { %648 = vmatmul.mubr.bf16.vlgmr.msra.gmra.mxu0 %v1239_v18  ;;  %712 = vmatmul.mubr.bf16.vlgmr.msra.gmra.mxu1 %v1242_v19 }
  0x2e   : > { %655 = vmatprep.mubr.bf16.mxu0 %v1245_v20  ;;  %719 = vmatprep.mubr.bf16.mxu1 %v1247_v21 }
  0x35   : > { %656 = vmatmul.mubr.bf16.gmra.mxu0 %v1249_v22  ;;  %720 = vmatmul.mubr.bf16.gmra.mxu1 %v1250_v23 }
  0x36   : > { %663 = vmatprep.mubr.bf16.mxu0 %v1251_v24  ;;  %727 = vmatprep.mubr.bf16.mxu1 %v1253_v25 }
  0x3d   : > { %664 = vmatmul.mubr.bf16.gmra.mxu0 %v1255_v26  ;;  %728 = vmatmul.mubr.bf16.gmra.mxu1 %v1256_v27 }
  0x3e   : > { %671 = vmatprep.mubr.bf16.mxu0 %v1257_v28  ;;  %735 = vmatprep.mubr.bf16.mxu1 %v1259_v29 }
  0x45   : > { %672 = vmatmul.mubr.bf16.gmra.mxu0 %v1261_v30  ;;  %736 = vmatmul.mubr.bf16.gmra.mxu1 %v1262_v31 }
  0x46   : > { %679 = vmatprep.mubr.bf16.mxu0 %v1263_v32  ;;  %743 = vmatprep.mubr.bf16.mxu1 %v1265_v33 }
  0x4d   : > { %680 = vmatmul.mubr.bf16.gmra.mxu0 %v1267_v34  ;;  %744 = vmatmul.mubr.bf16.gmra.mxu1 %v1268_v35 }
  0x4e   : > { %687 = vmatprep.mubr.bf16.mxu0 %v1269_v36  ;;  %751 = vmatprep.mubr.bf16.mxu1 %v1271_v37 }
  0x55   : > { %688 = vmatmul.mubr.bf16.gmra.mxu0 %v1273_v38  ;;  %752 = vmatmul.mubr.bf16.gmra.mxu1 %v1274_v39 }
  0x56   : > { %695 = vmatprep.mubr.bf16.mxu0 %v1275_v40  ;;  %759 = vmatprep.mubr.bf16.mxu1 %v1277_v41 }
  0x5d   : > { %696 = vmatmul.mubr.bf16.gmra.mxu0 %v1279_v42  ;;  %760 = vmatmul.mubr.bf16.gmra.mxu1 %v1280_v43 }
  0x5e   : > { %703 = vmatprep.mubr.bf16.mxu0 %v1281_v44  ;;  %767 = vmatprep.mubr.bf16.mxu1 %v1283_v45 }
  0x65   : > { %704 = vmatmul.mubr.bf16.gmra.mxu0 %v1285_v46  ;;  %768 = vmatmul.mubr.bf16.gmra.mxu1 %v1286_v47 }
  0xed   : > { %v1087_v48 = vpop.f32.mrf.mxu0  ;;  %v1135_v49 = vpop.f32.mrf.mxu1 }
  0xef   : > { %v1088_v50 = vpop.f32.mrf.mxu0  ;;  %v1136_v51 = vpop.f32.mrf.mxu1 }
  0xf0   : > { %v1089_v52 = vadd.f32 %v1088_v50, %v1087_v48  ;;  %v1137_v53 = vadd.f32 %v1136_v51, %v1135_v49 }
  0xf1   : > { %v1090_v54 = vpop.f32.mrf.mxu0  ;;  %v1138_v55 = vpop.f32.mrf.mxu1 }
  0xf2   : > { %875 = vst [vmem:[%s1439_s28] sm:$0xff] %v1089_v52  ;;  %891 = vst [vmem:[%s1439_s28 + $0x80] sm:$0xff] %v1137_v53 }
  0xf3   : > { %v1091_v56 = vpop.f32.mrf.mxu0  ;;  %v1139_v57 = vpop.f32.mrf.mxu1 }
  0xf4   : > { %v1092_v58 = vadd.f32 %v1091_v56, %v1090_v54  ;;  %v1140_v59 = vadd.f32 %v1139_v57, %v1138_v55 }
  0xf5   : > { %v1093_v60 = vpop.f32.mrf.mxu0  ;;  %v1141_v61 = vpop.f32.mrf.mxu1 }
  0xf6   : > { %876 = vst [vmem:[%s1439_s28 + $0x8] sm:$0xff] %v1092_v58  ;;  %892 = vst [vmem:[%s1439_s28 + $0x88] sm:$0xff] %v1140_v59 }
  0xf7   : > { %v1094_v62 = vpop.f32.mrf.mxu0  ;;  %v1142_v63 = vpop.f32.mrf.mxu1 }
  0xf8   : > { %v1095_v0 = vadd.f32 %v1094_v62, %v1093_v60  ;;  %v1143_v1 = vadd.f32 %v1142_v63, %v1141_v61 }
  0xf9   : > { %v1096_v2 = vpop.f32.mrf.mxu0  ;;  %v1144_v3 = vpop.f32.mrf.mxu1 }
  0xfa   : > { %877 = vst [vmem:[%s1439_s28 + $0x10] sm:$0xff] %v1095_v0  ;;  %893 = vst [vmem:[%s1439_s28 + $0x90] sm:$0xff] %v1143_v1 }
  0xfb   : > { %v1097_v4 = vpop.f32.mrf.mxu0  ;;  %v1145_v5 = vpop.f32.mrf.mxu1 }
  0xfc   : > { %v1098_v6 = vadd.f32 %v1097_v4, %v1096_v2  ;;  %v1146_v7 = vadd.f32 %v1145_v5, %v1144_v3 }
  0xfd   : > { %v1099_v8 = vpop.f32.mrf.mxu0  ;;  %v1147_v9 = vpop.f32.mrf.mxu1 }
  0xfe   : > { %878 = vst [vmem:[%s1439_s28 + $0x18] sm:$0xff] %v1098_v6  ;;  %894 = vst [vmem:[%s1439_s28 + $0x98] sm:$0xff] %v1146_v7 }
  0xff   : > { %v1100_v10 = vpop.f32.mrf.mxu0  ;;  %v1148_v11 = vpop.f32.mrf.mxu1 }
 0x100   : > { %v1101_v12 = vadd.f32 %v1100_v10, %v1099_v8  ;;  %v1149_v13 = vadd.f32 %v1148_v11, %v1147_v9 }
 0x101   : > { %v1102_v14 = vpop.f32.mrf.mxu0  ;;  %v1150_v15 = vpop.f32.mrf.mxu1 }
 0x102   : > { %879 = vst [vmem:[%s1439_s28 + $0x20] sm:$0xff] %v1101_v12  ;;  %895 = vst [vmem:[%s1439_s28 + $0xa0] sm:$0xff] %v1149_v13 }
 0x103   : > { %v1103_v16 = vpop.f32.mrf.mxu0  ;;  %v1151_v17 = vpop.f32.mrf.mxu1 }
 0x104   : > { %v1104_v18 = vadd.f32 %v1103_v16, %v1102_v14  ;;  %v1152_v19 = vadd.f32 %v1151_v17, %v1150_v15 }
 0x105   : > { %v1105_v20 = vpop.f32.mrf.mxu0  ;;  %v1153_v21 = vpop.f32.mrf.mxu1 }
 0x106   : > { %880 = vst [vmem:[%s1439_s28 + $0x28] sm:$0xff] %v1104_v18  ;;  %896 = vst [vmem:[%s1439_s28 + $0xa8] sm:$0xff] %v1152_v19 }
 0x107   : > { %v1106_v22 = vpop.f32.mrf.mxu0  ;;  %v1154_v23 = vpop.f32.mrf.mxu1 }
 0x108   : > { %v1107_v24 = vadd.f32 %v1106_v22, %v1105_v20  ;;  %v1155_v25 = vadd.f32 %v1154_v23, %v1153_v21 }
 0x109   : > { %v1108_v26 = vpop.f32.mrf.mxu0  ;;  %v1156_v27 = vpop.f32.mrf.mxu1 }
 0x10a   : > { %881 = vst [vmem:[%s1439_s28 + $0x30] sm:$0xff] %v1107_v24  ;;  %897 = vst [vmem:[%s1439_s28 + $0xb0] sm:$0xff] %v1155_v25 }
 0x10b   : > { %v1109_v28 = vpop.f32.mrf.mxu0  ;;  %v1157_v29 = vpop.f32.mrf.mxu1 }
 0x10c   : > { %v1110_v30 = vadd.f32 %v1109_v28, %v1108_v26  ;;  %v1158_v31 = vadd.f32 %v1157_v29, %v1156_v27 }
 0x10d   : > { %v1111_v32 = vpop.f32.mrf.mxu0  ;;  %v1159_v33 = vpop.f32.mrf.mxu1 }
 0x10e   : > { %882 = vst [vmem:[%s1439_s28 + $0x38] sm:$0xff] %v1110_v30  ;;  %898 = vst [vmem:[%s1439_s28 + $0xb8] sm:$0xff] %v1158_v31 }
 0x10f   : > { %v1112_v34 = vpop.f32.mrf.mxu0  ;;  %v1160_v35 = vpop.f32.mrf.mxu1 }
 0x110   : > { %v1113_v36 = vadd.f32 %v1112_v34, %v1111_v32  ;;  %v1161_v37 = vadd.f32 %v1160_v35, %v1159_v33 }
 0x111   : > { %v1114_v38 = vpop.f32.mrf.mxu0  ;;  %v1162_v39 = vpop.f32.mrf.mxu1 }
 0x112   : > { %883 = vst [vmem:[%s1439_s28 + $0x40] sm:$0xff] %v1113_v36  ;;  %899 = vst [vmem:[%s1439_s28 + $0xc0] sm:$0xff] %v1161_v37 }
 0x113   : > { %v1115_v40 = vpop.f32.mrf.mxu0  ;;  %v1163_v41 = vpop.f32.mrf.mxu1 }
 0x114   : > { %v1116_v42 = vadd.f32 %v1115_v40, %v1114_v38  ;;  %v1164_v43 = vadd.f32 %v1163_v41, %v1162_v39 }
 0x115   : > { %v1117_v44 = vpop.f32.mrf.mxu0  ;;  %v1165_v45 = vpop.f32.mrf.mxu1 }
 0x116   : > { %884 = vst [vmem:[%s1439_s28 + $0x48] sm:$0xff] %v1116_v42  ;;  %900 = vst [vmem:[%s1439_s28 + $0xc8] sm:$0xff] %v1164_v43 }
 0x117   : > { %v1118_v46 = vpop.f32.mrf.mxu0  ;;  %v1166_v47 = vpop.f32.mrf.mxu1 }
 0x118   : > { %v1119_v48 = vadd.f32 %v1118_v46, %v1117_v44  ;;  %v1167_v49 = vadd.f32 %v1166_v47, %v1165_v45 }
 0x119   : > { %v1120_v50 = vpop.f32.mrf.mxu0  ;;  %v1168_v51 = vpop.f32.mrf.mxu1 }
 0x11a   : > { %885 = vst [vmem:[%s1439_s28 + $0x50] sm:$0xff] %v1119_v48  ;;  %901 = vst [vmem:[%s1439_s28 + $0xd0] sm:$0xff] %v1167_v49 }
 0x11b   : > { %v1121_v52 = vpop.f32.mrf.mxu0  ;;  %v1169_v53 = vpop.f32.mrf.mxu1 }
 0x11c   : > { %v1122_v54 = vadd.f32 %v1121_v52, %v1120_v50  ;;  %v1170_v55 = vadd.f32 %v1169_v53, %v1168_v51 }
 0x11d   : > { %v1123_v56 = vpop.f32.mrf.mxu0  ;;  %v1171_v57 = vpop.f32.mrf.mxu1 }
 0x11e   : > { %886 = vst [vmem:[%s1439_s28 + $0x58] sm:$0xff] %v1122_v54  ;;  %902 = vst [vmem:[%s1439_s28 + $0xd8] sm:$0xff] %v1170_v55 }
 0x11f   : > { %v1124_v58 = vpop.f32.mrf.mxu0  ;;  %v1172_v59 = vpop.f32.mrf.mxu1 }
 0x120   : > { %v1125_v60 = vadd.f32 %v1124_v58, %v1123_v56  ;;  %v1173_v61 = vadd.f32 %v1172_v59, %v1171_v57 }
 0x121   : > { %v1126_v62 = vpop.f32.mrf.mxu0  ;;  %v1174_v63 = vpop.f32.mrf.mxu1 }
 0x122   : > { %887 = vst [vmem:[%s1439_s28 + $0x60] sm:$0xff] %v1125_v60  ;;  %903 = vst [vmem:[%s1439_s28 + $0xe0] sm:$0xff] %v1173_v61 }
 0x123   : > { %v1127_v0 = vpop.f32.mrf.mxu0  ;;  %v1175_v1 = vpop.f32.mrf.mxu1 }
 0x124   : > { %v1128_v2 = vadd.f32 %v1127_v0, %v1126_v62  ;;  %v1176_v3 = vadd.f32 %v1175_v1, %v1174_v63 }
 0x125   : > { %v1129_v4 = vpop.f32.mrf.mxu0  ;;  %v1177_v5 = vpop.f32.mrf.mxu1 }
 0x126   : > { %888 = vst [vmem:[%s1439_s28 + $0x68] sm:$0xff] %v1128_v2  ;;  %904 = vst [vmem:[%s1439_s28 + $0xe8] sm:$0xff] %v1176_v3 }
 0x127   : > { %v1130_v6 = vpop.f32.mrf.mxu0  ;;  %v1178_v7 = vpop.f32.mrf.mxu1 }
 0x128   : > { %v1131_v8 = vadd.f32 %v1130_v6, %v1129_v4  ;;  %v1179_v9 = vadd.f32 %v1178_v7, %v1177_v5 }
 0x129   : > { %v1132_v10 = vpop.f32.mrf.mxu0  ;;  %v1180_v11 = vpop.f32.mrf.mxu1 }
 0x12a   : > { %889 = vst [vmem:[%s1439_s28 + $0x70] sm:$0xff] %v1131_v8  ;;  %905 = vst [vmem:[%s1439_s28 + $0xf0] sm:$0xff] %v1179_v9 }
 0x12b   : > { %v1133_v12 = vpop.f32.mrf.mxu0  ;;  %v1181_v13 = vpop.f32.mrf.mxu1 }
 0x12c   : > { %v1134_v14 = vadd.f32 %v1133_v12, %v1132_v10  ;;  %v1182_v15 = vadd.f32 %v1181_v13, %v1180_v11 }
 0x12e   : > { %890 = vst [vmem:[%s1439_s28 + $0x78] sm:$0xff] %v1134_v14  ;;  %906 = vst [vmem:[%s1439_s28 + $0xf8] sm:$0xff] %v1182_v15 }
 0x12f PF: > { %s12_s11 = sadd.s32 1, %s1309_s11   ;;  %s1485_s9 = smov %s1305_s10 }
 0x130   : > { %p9_p5 = scmp.ge.s32.totalorder %s12_s11, 4   ;;  %s1486_s10 = smov %s1488_s12 }
 0x132   :  { %11 = sbr.rel (!%p9_p5) target bundleno = 2 (0x2), region = 69 }

// kernel: _lambda_.58
= control target key start
LH: loop header
LB: loop body
LE: loop exit
PB: predicated region body
PF: predicated region fallthrough
CT: control target
= control target key end

     0   :  { %s713_s18 = smov 0   ;;  %s715_s19 = smov 0   ;;  %s1144_s0 = inlined_call_operand.vmem [shape: f32[2,256,32], index: 0, kind: input, shape index: {}]   ;;  %s1145_s1 = inlined_call_operand.vmem [shape: f32[2,1,32], index: 1, kind: input, shape index: {}]   ;;  %s1146_s2 = inlined_call_operand.vmem [shape: f32[2,1,32], index: 2, kind: input, shape index: {}]   ;;  %s1147_s3 = inlined_call_operand.vmem [shape: f32[1,1,32], index: 3, kind: input, shape index: {}]   ;;  %s1148_s4 = inlined_call_operand.vmem [shape: f32[1,1,32], index: 4, kind: input, shape index: {}]   ;;  %s1149_s5 = inlined_call_operand.vmem [shape: f32[2,256,32], index: 5, kind: output, shape index: {}]  }
   0x1   :  { %s717_s20 = smov 0  }
   0x2 LB: > { %s27_s21 = sadd.s32 1, %s677_s19  ;;  %p623_p0 = scmp.ge.s32.totalorder %s681_s20, 1  ;;  %s681_s20 = sphi %s717_s20, %s15_s20   ;;  %s677_s19 = sphi %s715_s19, %s1158_s19   ;;  %s673_s18 = sphi %s713_s18, %s1157_s18  }
   0x3   : > { %p29_p1 = scmp.ge.s32.totalorder %s27_s21, 2  ;;  %p224_p2 = scmp.lt.s32.totalorder %s681_s20, 3 }
   0x5   : > { %s1160_s21 = smov (%p29_p1, %s27_s21), 0  ;;  %p225_p3 = pnand %p623_p0, %p224_p2 }
   0x6   : > { %p267_p4 = scmp.lt.s32.totalorder (!%p225_p3), %s673_s18, 1 }
   0x7   : > { %228 = sbr.rel (%p225_p3) target bundleno = 73 (0x49), region = 40 }
   0xc   : > { %s1162_s18 = smov (!%p267_p4, %s673_s18), 1  ;;  %v333_v4 = vlaneseq  ;;  %v370_v26 = vld [vmem:[%s1147_s3] sm:$0x1]  ;;  %vm481_vm0 = vcmask 261120  }
   0xd   : > { %s278_s24 = scalar_lea.vmem %s1145_s1, %s1162_s18  ;;  %s281_s27 = scalar_lea.vmem %s1146_s2, %s1162_s18 }
   0xe   : > { %v324_v0 = vld [vmem:[%s278_s24] sm:$0x1]  ;;  %v741_v7 = vshrl.u32 %v333_v4, 7  ;;  %s631_s28 = sshll.u32 %s1162_s18, 8 }
   0xf   : > { %v325_v1 = vmul.f32 0.00390625, %v324_v0  ;;  %v326_v2 = vld [vmem:[%s281_s27] sm:$0x1]  ;;  %s749_s6 = scalar_lea.vmem %s1144_s0, %s631_s28  ;;  %s945_s13 = scalar_lea.vmem %s1149_s5, %s631_s28 }
  0x10   : > { %v327_v3 = vmul.f32 0.00390625, %v326_v2  ;;  %v335_v9 = vsub.s32 0, %v741_v7  ;;  %v753_v10 = vld [vmem:[%s749_s6] sm:$0xff]  ;;  %v756_v11 = vld [vmem:[%s749_s6 + $0x8] sm:$0xff]  ;;  %v763_v13 = vld [vmem:[%s749_s6 + $0x10] sm:$0xff] }
  0x11   : > { %v328_v5 = vmul.f32 %v325_v1, %v325_v1  ;;  %v766_v14 = vld [vmem:[%s749_s6 + $0x18] sm:$0xff]  ;;  %v769_v15 = vld [vmem:[%s749_s6 + $0x20] sm:$0xff]  ;;  %v772_v16 = vld [vmem:[%s749_s6 + $0x28] sm:$0xff] }
  0x12   : > { %v760_v12 = vrot.slane %v325_v1, %v335_v9  ;;  %v775_v17 = vld [vmem:[%s749_s6 + $0x30] sm:$0xff]  ;;  %v778_v18 = vld [vmem:[%s749_s6 + $0x38] sm:$0xff]  ;;  %v781_v19 = vld [vmem:[%s749_s6 + $0x40] sm:$0xff] }
  0x13   : > { %v329_v6 = vsub.f32 %v327_v3, %v328_v5  ;;  %v784_v20 = vld [vmem:[%s749_s6 + $0x48] sm:$0xff]  ;;  %v787_v21 = vld [vmem:[%s749_s6 + $0x50] sm:$0xff]  ;;  %v790_v22 = vld [vmem:[%s749_s6 + $0x58] sm:$0xff] }
  0x14   : > { %v793_v23 = vld [vmem:[%s749_s6 + $0x60] sm:$0xff]  ;;  %v796_v24 = vld [vmem:[%s749_s6 + $0x68] sm:$0xff]  ;;  %v338_v25 = vsub.f32 %v753_v10, %v760_v12  ;;  %v339_v27 = vsub.f32 %v756_v11, %v760_v12  ;;  %v806_v28 = vld [vmem:[%s749_s6 + $0x70] sm:$0xff]  ;;  %v340_v31 = vsub.f32 %v763_v13, %v760_v12  ;;  %v341_v32 = vsub.f32 %v766_v14, %v760_v12 }
  0x15   : > { %v330_v8 = vadd.f32 1e-05, %v329_v6  ;;  %v809_v29 = vld [vmem:[%s749_s6 + $0x78] sm:$0xff]  ;;  %v812_v30 = vld [vmem:[%s749_s6 + $0x80] sm:$0xff]  ;;  %v342_v33 = vsub.f32 %v769_v15, %v760_v12  ;;  %v343_v34 = vsub.f32 %v772_v16, %v760_v12  ;;  %v823_v35 = vld [vmem:[%s749_s6 + $0x88] sm:$0xff]  ;;  %v344_v38 = vsub.f32 %v775_v17, %v760_v12 }
  0x16   : > { %v826_v36 = vld [vmem:[%s749_s6 + $0x90] sm:$0xff]  ;;  %v829_v37 = vld [vmem:[%s749_s6 + $0x98] sm:$0xff]  ;;  %v345_v39 = vsub.f32 %v778_v18, %v760_v12  ;;  %v346_v40 = vsub.f32 %v781_v19, %v760_v12  ;;  %v347_v41 = vsub.f32 %v784_v20, %v760_v12  ;;  %v840_v42 = vld [vmem:[%s749_s6 + $0xa0] sm:$0xff]  ;;  %v348_v45 = vsub.f32 %v787_v21, %v760_v12 }
  0x17   : > { %657 = vrsqrt.f32 %v330_v8  ;;  %v843_v43 = vld [vmem:[%s749_s6 + $0xa8] sm:$0xff]  ;;  %v846_v44 = vld [vmem:[%s749_s6 + $0xb0] sm:$0xff]  ;;  %v349_v46 = vsub.f32 %v790_v22, %v760_v12  ;;  %v350_v47 = vsub.f32 %v793_v23, %v760_v12  ;;  %v351_v48 = vsub.f32 %v796_v24, %v760_v12  ;;  %v857_v49 = vld [vmem:[%s749_s6 + $0xb8] sm:$0xff] }
  0x18   : > { %v860_v50 = vld [vmem:[%s749_s6 + $0xc0] sm:$0xff]  ;;  %v863_v51 = vld [vmem:[%s749_s6 + $0xc8] sm:$0xff]  ;;  %v352_v53 = vsub.f32 %v806_v28, %v760_v12  ;;  %v353_v54 = vsub.f32 %v809_v29, %v760_v12  ;;  %v354_v55 = vsub.f32 %v812_v30, %v760_v12  ;;  %v355_v56 = vsub.f32 %v823_v35, %v760_v12  ;;  %v874_v57 = vld [vmem:[%s749_s6 + $0xd0] sm:$0xff] }
  0x19   : > { %v877_v58 = vld [vmem:[%s749_s6 + $0xd8] sm:$0xff]  ;;  %v880_v59 = vld [vmem:[%s749_s6 + $0xe0] sm:$0xff]  ;;  %v356_v61 = vsub.f32 %v826_v36, %v760_v12  ;;  %v357_v62 = vsub.f32 %v829_v37, %v760_v12  ;;  %v358_v63 = vsub.f32 %v840_v42, %v760_v12  ;;  %v889_v0 = vld [vmem:[%s749_s6 + $0xe8] sm:$0xff]  ;;  %v359_v3 = vsub.f32 %v843_v43, %v760_v12 }
  0x1a   : > { %v892_v1 = vld [vmem:[%s749_s6 + $0xf0] sm:$0xff]  ;;  %v895_v2 = vld [vmem:[%s749_s6 + $0xf8] sm:$0xff]  ;;  %v360_v4 = vsub.f32 %v846_v44, %v760_v12  ;;  %v361_v5 = vsub.f32 %v857_v49, %v760_v12  ;;  %v362_v6 = vsub.f32 %v860_v50, %v760_v12  ;;  %v918_v14 = vld [vmem:[%s1148_s4] ss:$0 sm:$0xff]  ;;  %v1153_v50 = vsub.f32 %v880_v59, %v760_v12 }
  0x24   : > { %v658_v52 = vpop.eup %657 }
  0x25   : > { %v371_v60 = vmul.f32 %v658_v52, %v370_v26 }
  0x27   : > { %v907_v8 = vrot.slane %v371_v60, %v335_v9 }
  0x29   : > { %v378_v17 = vmul.f32 %v907_v8, %v338_v25  ;;  %v379_v18 = vmul.f32 %v907_v8, %v339_v27  ;;  %v380_v26 = vmul.f32 %v907_v8, %v340_v31  ;;  %v381_v52 = vmul.f32 %v907_v8, %v341_v32 }
  0x2a   : > { %v382_v60 = vmul.f32 %v907_v8, %v342_v33  ;;  %v383_v15 = vmul.f32 %v907_v8, %v343_v34  ;;  %v384_v7 = vmul.f32 %v907_v8, %v344_v38  ;;  %v385_v13 = vmul.f32 %v907_v8, %v345_v39 }
  0x2b   : > { %v417_v9 = vadd.f32 %v918_v14, %v378_v17  ;;  %v418_v16 = vadd.f32 %v918_v14, %v379_v18  ;;  %v419_v25 = vadd.f32 %v918_v14, %v380_v26  ;;  %v420_v27 = vadd.f32 %v918_v14, %v381_v52 }
  0x2c   : > { %v421_v31 = vadd.f32 %v918_v14, %v382_v60  ;;  %v422_v32 = vadd.f32 %v918_v14, %v383_v15  ;;  %v423_v33 = vadd.f32 %v918_v14, %v384_v7  ;;  %v424_v34 = vadd.f32 %v918_v14, %v385_v13 }
  0x2d   : > { %v449_v38 = vmax.f32 %v417_v9, 0.0  ;;  %v450_v39 = vmax.f32 %v418_v16, 0.0  ;;  %v451_v17 = vmax.f32 %v419_v25, 0.0  ;;  %v452_v18 = vmax.f32 %v420_v27, 0.0 }
  0x2e   : > { %v453_v26 = vmax.f32 %v421_v31, 0.0  ;;  %v454_v52 = vmax.f32 %v422_v32, 0.0  ;;  %v455_v11 = vmax.f32 %v423_v33, 0.0  ;;  %v456_v10 = vmax.f32 %v424_v34, 0.0 }
  0x2f   : > { %482 = vst.msk [vmem:[%s945_s13] sm:$0xff] %vm481_vm0, %v449_v38  ;;  %483 = vst.msk [vmem:[%s945_s13 + $0x8] sm:$0xff] %vm481_vm0, %v450_v39  ;;  %v386_v13 = vmul.f32 %v907_v8, %v346_v40  ;;  %v387_v15 = vmul.f32 %v907_v8, %v347_v41  ;;  %v388_v7 = vmul.f32 %v907_v8, %v348_v45 }
  0x30   : > { %484 = vst.msk [vmem:[%s945_s13 + $0x10] sm:$0xff] %vm481_vm0, %v451_v17  ;;  %485 = vst.msk [vmem:[%s945_s13 + $0x18] sm:$0xff] %vm481_vm0, %v452_v18  ;;  %v389_v9 = vmul.f32 %v907_v8, %v349_v46  ;;  %v390_v19 = vmul.f32 %v907_v8, %v350_v47  ;;  %v391_v20 = vmul.f32 %v907_v8, %v351_v48 }
  0x31   : > { %486 = vst.msk [vmem:[%s945_s13 + $0x20] sm:$0xff] %vm481_vm0, %v453_v26  ;;  %487 = vst.msk [vmem:[%s945_s13 + $0x28] sm:$0xff] %vm481_vm0, %v454_v52  ;;  %v392_v21 = vmul.f32 %v907_v8, %v352_v53  ;;  %v393_v22 = vmul.f32 %v907_v8, %v353_v54  ;;  %v425_v40 = vadd.f32 %v918_v14, %v386_v13 }
  0x32   : > { %488 = vst.msk [vmem:[%s945_s13 + $0x30] sm:$0xff] %vm481_vm0, %v455_v11  ;;  %489 = vst.msk [vmem:[%s945_s13 + $0x38] sm:$0xff] %vm481_vm0, %v456_v10  ;;  %v426_v23 = vadd.f32 %v918_v14, %v387_v15  ;;  %v427_v24 = vadd.f32 %v918_v14, %v388_v7  ;;  %v428_v41 = vadd.f32 %v918_v14, %v389_v9 }
  0x33   : > { %v429_v28 = vadd.f32 %v918_v14, %v390_v19  ;;  %v430_v45 = vadd.f32 %v918_v14, %v391_v20  ;;  %v431_v29 = vadd.f32 %v918_v14, %v392_v21  ;;  %v432_v46 = vadd.f32 %v918_v14, %v393_v22 }
  0x34   : > { %v457_v47 = vmax.f32 %v425_v40, 0.0  ;;  %v458_v48 = vmax.f32 %v426_v23, 0.0  ;;  %v459_v53 = vmax.f32 %v427_v24, 0.0  ;;  %v460_v54 = vmax.f32 %v428_v41, 0.0 }
  0x35   : > { %v461_v10 = vmax.f32 %v429_v28, 0.0  ;;  %v462_v11 = vmax.f32 %v430_v45, 0.0  ;;  %v463_v16 = vmax.f32 %v431_v29, 0.0  ;;  %v464_v60 = vmax.f32 %v432_v46, 0.0 }
  0x36   : > { %490 = vst.msk [vmem:[%s945_s13 + $0x40] sm:$0xff] %vm481_vm0, %v457_v47  ;;  %491 = vst.msk [vmem:[%s945_s13 + $0x48] sm:$0xff] %vm481_vm0, %v458_v48  ;;  %v394_v25 = vmul.f32 %v907_v8, %v354_v55  ;;  %v395_v27 = vmul.f32 %v907_v8, %v355_v56  ;;  %v396_v31 = vmul.f32 %v907_v8, %v356_v61 }
  0x37   : > { %492 = vst.msk [vmem:[%s945_s13 + $0x50] sm:$0xff] %vm481_vm0, %v459_v53  ;;  %493 = vst.msk [vmem:[%s945_s13 + $0x58] sm:$0xff] %vm481_vm0, %v460_v54  ;;  %v397_v32 = vmul.f32 %v907_v8, %v357_v62  ;;  %v398_v30 = vmul.f32 %v907_v8, %v358_v63  ;;  %v399_v35 = vmul.f32 %v907_v8, %v359_v3 }
  0x38   : > { %494 = vst.msk [vmem:[%s945_s13 + $0x60] sm:$0xff] %vm481_vm0, %v461_v10  ;;  %495 = vst.msk [vmem:[%s945_s13 + $0x68] sm:$0xff] %vm481_vm0, %v462_v11  ;;  %v400_v36 = vmul.f32 %v907_v8, %v360_v4  ;;  %v401_v37 = vmul.f32 %v907_v8, %v361_v5  ;;  %v433_v55 = vadd.f32 %v918_v14, %v394_v25 }
  0x39   : > { %496 = vst.msk [vmem:[%s945_s13 + $0x70] sm:$0xff] %vm481_vm0, %v463_v16  ;;  %497 = vst.msk [vmem:[%s945_s13 + $0x78] sm:$0xff] %vm481_vm0, %v464_v60  ;;  %v434_v42 = vadd.f32 %v918_v14, %v395_v27  ;;  %v435_v43 = vadd.f32 %v918_v14, %v396_v31  ;;  %v436_v56 = vadd.f32 %v918_v14, %v397_v32 }
  0x3a   : > { %v437_v44 = vadd.f32 %v918_v14, %v398_v30  ;;  %v438_v61 = vadd.f32 %v918_v14, %v399_v35  ;;  %v439_v49 = vadd.f32 %v918_v14, %v400_v36  ;;  %v440_v62 = vadd.f32 %v918_v14, %v401_v37 }
  0x3b   : > { %v465_v63 = vmax.f32 %v433_v55, 0.0  ;;  %v466_v3 = vmax.f32 %v434_v42, 0.0  ;;  %v467_v4 = vmax.f32 %v435_v43, 0.0  ;;  %v468_v5 = vmax.f32 %v436_v56, 0.0 }
  0x3c   : > { %v469_v33 = vmax.f32 %v437_v44, 0.0  ;;  %v470_v34 = vmax.f32 %v438_v61, 0.0  ;;  %v471_v38 = vmax.f32 %v439_v49, 0.0  ;;  %v472_v39 = vmax.f32 %v440_v62, 0.0 }
  0x3d   : > { %498 = vst.msk [vmem:[%s945_s13 + $0x80] sm:$0xff] %vm481_vm0, %v465_v63  ;;  %499 = vst.msk [vmem:[%s945_s13 + $0x88] sm:$0xff] %vm481_vm0, %v466_v3  ;;  %v402_v17 = vmul.f32 %v907_v8, %v362_v6  ;;  %v1150_v18 = vsub.f32 %v863_v51, %v760_v12  ;;  %v1151_v52 = vsub.f32 %v874_v57, %v760_v12 }
  0x3e   : > { %500 = vst.msk [vmem:[%s945_s13 + $0x90] sm:$0xff] %vm481_vm0, %v467_v4  ;;  %501 = vst.msk [vmem:[%s945_s13 + $0x98] sm:$0xff] %vm481_vm0, %v468_v5  ;;  %v1152_v15 = vsub.f32 %v877_v58, %v760_v12  ;;  %v406_v51 = vmul.f32 %v907_v8, %v1153_v50  ;;  %v1154_v57 = vsub.f32 %v889_v0, %v760_v12 }
  0x3f   : > { %v403_v26 = vmul.f32 %v907_v8, %v1150_v18  ;;  %v404_v13 = vmul.f32 %v907_v8, %v1151_v52  ;;  %502 = vst.msk [vmem:[%s945_s13 + $0xa0] sm:$0xff] %vm481_vm0, %v469_v33  ;;  %503 = vst.msk [vmem:[%s945_s13 + $0xa8] sm:$0xff] %vm481_vm0, %v470_v34  ;;  %v1155_v6 = vsub.f32 %v892_v1, %v760_v12 }
  0x40   : > { %v405_v7 = vmul.f32 %v907_v8, %v1152_v15  ;;  %504 = vst.msk [vmem:[%s945_s13 + $0xb0] sm:$0xff] %vm481_vm0, %v471_v38  ;;  %505 = vst.msk [vmem:[%s945_s13 + $0xb8] sm:$0xff] %vm481_vm0, %v472_v39  ;;  %v407_v58 = vmul.f32 %v907_v8, %v1154_v57  ;;  %v1156_v19 = vsub.f32 %v895_v2, %v760_v12 }
  0x41   : > { %v408_v9 = vmul.f32 %v907_v8, %v1155_v6  ;;  %v441_v21 = vadd.f32 %v918_v14, %v402_v17  ;;  %v442_v59 = vadd.f32 %v918_v14, %v403_v26  ;;  %v443_v0 = vadd.f32 %v918_v14, %v404_v13 }
  0x42   : > { %v409_v20 = vmul.f32 %v907_v8, %v1156_v19  ;;  %v444_v22 = vadd.f32 %v918_v14, %v405_v7  ;;  %v445_v1 = vadd.f32 %v918_v14, %v406_v51  ;;  %v446_v40 = vadd.f32 %v918_v14, %v407_v58 }
  0x43   : > { %v447_v12 = vadd.f32 %v918_v14, %v408_v9  ;;  %v473_v8 = vmax.f32 %v441_v21, 0.0  ;;  %v474_v23 = vmax.f32 %v442_v59, 0.0  ;;  %v475_v24 = vmax.f32 %v443_v0, 0.0 }
  0x44   : > { %v448_v2 = vadd.f32 %v918_v14, %v409_v20  ;;  %v476_v41 = vmax.f32 %v444_v22, 0.0  ;;  %v477_v28 = vmax.f32 %v445_v1, 0.0  ;;  %v478_v45 = vmax.f32 %v446_v40, 0.0 }
  0x45   : > { %v479_v29 = vmax.f32 %v447_v12, 0.0  ;;  %506 = vst.msk [vmem:[%s945_s13 + $0xc0] sm:$0xff] %vm481_vm0, %v473_v8  ;;  %507 = vst.msk [vmem:[%s945_s13 + $0xc8] sm:$0xff] %vm481_vm0, %v474_v23 }
  0x46   : > { %v480_v46 = vmax.f32 %v448_v2, 0.0  ;;  %508 = vst.msk [vmem:[%s945_s13 + $0xd0] sm:$0xff] %vm481_vm0, %v475_v24  ;;  %509 = vst.msk [vmem:[%s945_s13 + $0xd8] sm:$0xff] %vm481_vm0, %v476_v41 }
  0x47   : > { %510 = vst.msk [vmem:[%s945_s13 + $0xe0] sm:$0xff] %vm481_vm0, %v477_v28  ;;  %511 = vst.msk [vmem:[%s945_s13 + $0xe8] sm:$0xff] %vm481_vm0, %v478_v45 }
  0x48   : > { %512 = vst.msk [vmem:[%s945_s13 + $0xf0] sm:$0xff] %vm481_vm0, %v479_v29  ;;  %513 = vst.msk [vmem:[%s945_s13 + $0xf8] sm:$0xff] %vm481_vm0, %v480_v46 }
  0x49 PF: > { %s15_s20 = sadd.s32 1, %s681_s20   ;;  %s1157_s18 = smov %s677_s19 }
  0x4a   : > { %p12_p5 = scmp.ge.s32.totalorder %s15_s20, 4   ;;  %s1158_s19 = smov %s1160_s21 }
  0x4c   :  { %14 = sbr.rel (!%p12_p5) target bundleno = 2 (0x2), region = 76 }

// kernel: _lambda_.59
= control target key start
LH: loop header
LB: loop body
LE: loop exit
PB: predicated region body
PF: predicated region fallthrough
CT: control target
= control target key end

     0   :  { %s1088_s1 = inlined_call_operand.vmem [shape: bf16[384,128], index: 1, kind: input, shape index: {}]   ;;  %s1089_s0 = inlined_call_operand.vmem [shape: bf16[128,384], index: 0, kind: input, shape index: {}]   ;;  %s1090_s2 = inlined_call_operand.vmem [shape: f32[128,128], index: 2, kind: output, shape index: {}]  }
   0x1   :  { %v825_v0 = vld [vmem:[%s1088_s1 + $0x78] sm:$0xff]   ;;  %v828_v3 = vld [vmem:[%s1088_s1 + $0x70] sm:$0xff]   ;;  %v831_v6 = vld [vmem:[%s1088_s1 + $0x68] sm:$0xff]  }
   0x2   :  { %v826_v1 = vld [vmem:[%s1088_s1 + $0x38] sm:$0xff]   ;;  %713 = vmatprep.subr.bf16.mxu0 %v825_v0  ;;  %v829_v4 = vld [vmem:[%s1088_s1 + $0x30] sm:$0xff]   ;;  %v832_v7 = vld [vmem:[%s1088_s1 + $0x28] sm:$0xff]  }
   0x3   :  { %v827_v2 = vld [vmem:[%s1088_s1 + $0xb8] sm:$0xff]   ;;  %714 = vmatpush3.bf16.msra.mxu0 %v826_v1  ;;  %v830_v5 = vld [vmem:[%s1088_s1 + $0xb0] sm:$0xff]   ;;  %v833_v8 = vld [vmem:[%s1088_s1 + $0xa8] sm:$0xff]  }
   0x4   :  { %793 = vmatprep.subr.bf16.mxu1 %v827_v2  ;;  %715 = vmatprep.subr.bf16.mxu0 %v828_v3  ;;  %v834_v9 = vld [vmem:[%s1088_s1 + $0x60] sm:$0xff]   ;;  %v837_v12 = vld [vmem:[%s1088_s1 + $0x58] sm:$0xff]   ;;  %v840_v15 = vld [vmem:[%s1088_s1 + $0x50] sm:$0xff]  }
   0x5   :  { %794 = vmatpush3.bf16.msra.mxu1 %v827_v2  ;;  %v835_v10 = vld [vmem:[%s1088_s1 + $0x20] sm:$0xff]   ;;  %v839_v13 = vld [vmem:[%s1088_s1 + $0x98] sm:$0xff]   ;;  %v842_v16 = vld [vmem:[%s1088_s1 + $0x90] sm:$0xff]  }
   0x6   :  { %795 = vmatprep.subr.bf16.mxu1 %v830_v5  ;;  %v836_v11 = vld [vmem:[%s1088_s1 + $0xa0] sm:$0xff]   ;;  %v838_v14 = vld [vmem:[%s1088_s1 + $0x18] sm:$0xff]   ;;  %v841_v17 = vld [vmem:[%s1088_s1 + $0x10] sm:$0xff]  }
   0x7   :  { %716 = vmatpush3.bf16.msra.mxu0 %v829_v4  ;;  %v843_v18 = vld [vmem:[%s1088_s1 + $0x48] sm:$0xff]   ;;  %v846_v21 = vld [vmem:[%s1088_s1 + $0x40] sm:$0xff]   ;;  %v861_v32 = vld [vmem:[%s1089_s0 + $0x50] ss:$12 sps:$4 sm:$0xff]  }
   0x8   :  { %717 = vmatprep.subr.bf16.mxu0 %v831_v6  ;;  %v844_v19 = vld [vmem:[%s1088_s1 + $0x8] sm:$0xff]   ;;  %v848_v22 = vld [vmem:[%s1088_s1 + $0x80] sm:$0xff]   ;;  %v859_v34 = vld [vmem:[%s1089_s0 + $0x30] ss:$12 sps:$4 sm:$0xff]  }
   0x9   :  { %796 = vmatpush3.bf16.msra.mxu1 %v830_v5  ;;  %v845_v20 = vld [vmem:[%s1088_s1 + $0x88] sm:$0xff]   ;;  %v851_v23 = vld [vmem:[%s1089_s0 + $0x4] ss:$12 sps:$4 sm:$0xff]   ;;  %v857_v31 = vld [vmem:[%s1089_s0 + $0x34] ss:$12 sps:$4 sm:$0xff]  }
   0xa   :  { %797 = vmatprep.subr.bf16.mxu1 %v833_v8  ;;  %v852_v24 = vld [vmem:[%s1089_s0 + $0x8] ss:$12 sps:$4 sm:$0xff]   ;;  %v847_v25 = vld [vmem:[%s1088_s1] sm:$0xff]   ;;  %432 = vmatprep.mubr.bf16.mxu0 %v851_v23  ;;  %v862_v35 = vld [vmem:[%s1089_s0 + $0x4c] ss:$12 sps:$4 sm:$0xff]  }
   0xb   :  { %718 = vmatpush3.bf16.msra.mxu0 %v832_v7  ;;  %809 = vmatprep.mubr.bf16.mxu1 %v852_v24  ;;  %v849_v26 = vld [vmem:[%s1089_s0] ss:$12 sps:$4 sm:$0xff]   ;;  %v854_v27 = vld [vmem:[%s1089_s0 + $0x1c] ss:$12 sps:$4 sm:$0xff]   ;;  %v860_v29 = vld [vmem:[%s1089_s0 + $0x38] ss:$12 sps:$4 sm:$0xff]  }
   0xc   :  { %719 = vmatprep.subr.bf16.mxu0 %v834_v9  ;;  %v853_v28 = vld [vmem:[%s1089_s0 + $0x20] ss:$12 sps:$4 sm:$0xff]   ;;  %v856_v30 = vld [vmem:[%s1089_s0 + $0x18] ss:$12 sps:$4 sm:$0xff]   ;;  %v868_v33 = vld [vmem:[%s1089_s0 + $0x68] ss:$12 sps:$4 sm:$0xff]  }
   0xd   :  { %798 = vmatpush3.bf16.msra.mxu1 %v833_v8  ;;  %v869_v36 = vld [vmem:[%s1089_s0 + $0x80] ss:$12 sps:$4 sm:$0xff]   ;;  %v876_v37 = vld [vmem:[%s1089_s0 + $0x98] ss:$12 sps:$4 sm:$0xff]   ;;  %v864_v38 = vld [vmem:[%s1089_s0 + $0x48] ss:$12 sps:$4 sm:$0xff]  }
   0xe   :  { %799 = vmatprep.subr.bf16.mxu1 %v836_v11  ;;  %v865_v39 = vld [vmem:[%s1089_s0 + $0x64] ss:$12 sps:$4 sm:$0xff]   ;;  %v867_v41 = vld [vmem:[%s1089_s0 + $0x60] ss:$12 sps:$4 sm:$0xff]   ;;  %v870_v42 = vld [vmem:[%s1089_s0 + $0x7c] ss:$12 sps:$4 sm:$0xff]  }
   0xf   :  { %720 = vmatpush3.bf16.msra.mxu0 %v835_v10  ;;  %v877_v40 = vld [vmem:[%s1089_s0 + $0xb0] ss:$12 sps:$4 sm:$0xff]   ;;  %v872_v43 = vld [vmem:[%s1089_s0 + $0x78] ss:$12 sps:$4 sm:$0xff]   ;;  %v873_v44 = vld [vmem:[%s1089_s0 + $0x94] ss:$12 sps:$4 sm:$0xff]  }
  0x10   :  { %721 = vmatprep.subr.bf16.mxu0 %v837_v12  ;;  %v875_v45 = vld [vmem:[%s1089_s0 + $0x90] ss:$12 sps:$4 sm:$0xff]   ;;  %v878_v46 = vld [vmem:[%s1089_s0 + $0xac] ss:$12 sps:$4 sm:$0xff]   ;;  %v880_v47 = vld [vmem:[%s1089_s0 + $0xa8] ss:$12 sps:$4 sm:$0xff]  }
  0x11   :  { %800 = vmatpush3.bf16.msra.mxu1 %v836_v11 }
  0x12   :  { %801 = vmatprep.subr.bf16.mxu1 %v839_v13 }
  0x13   :  { %722 = vmatpush3.bf16.msra.mxu0 %v838_v14 }
  0x14   :  { %723 = vmatprep.subr.bf16.mxu0 %v840_v15 }
  0x15   :  { %802 = vmatpush3.bf16.msra.mxu1 %v839_v13 }
  0x16   :  { %803 = vmatprep.subr.bf16.mxu1 %v842_v16 }
  0x17   :  { %724 = vmatpush3.bf16.msra.mxu0 %v841_v17 }
  0x18   :  { %725 = vmatprep.subr.bf16.mxu0 %v843_v18 }
  0x19   :  { %804 = vmatpush3.bf16.msra.mxu1 %v842_v16 }
  0x1a   :  { %805 = vmatprep.subr.bf16.mxu1 %v845_v20 }
  0x1b   :  { %726 = vmatpush3.bf16.msra.mxu0 %v844_v19 }
  0x1c   :  { %727 = vmatprep.subr.bf16.mxu0 %v846_v21 }
  0x1d   :  { %806 = vmatpush3.bf16.msra.mxu1 %v845_v20 }
  0x1e   :  { %807 = vmatprep.subr.bf16.mxu1 %v848_v22 }
  0x1f   :  { %728 = vmatpush3.bf16.msra.mxu0 %v847_v25 }
  0x21   :  { %808 = vmatpush3.bf16.msra.mxu1 %v848_v22 }
  0x22   :  { %433 = vmatmul.mubr.bf16.vlgmr.msra.gmra.mxu0 %v849_v26 }
  0x23   :  { %440 = vmatprep.mubr.bf16.mxu0 %v854_v27 }
  0x24   :  { %810 = vmatmul.mubr.bf16.vlgmr.msra.gmra.mxu1 %v853_v28 }
  0x25   :  { %813 = vmatprep.mubr.bf16.mxu1 %v860_v29 }
  0x2a   :  { %441 = vmatmul.mubr.bf16.gmra.mxu0 %v856_v30 }
  0x2b   :  { %448 = vmatprep.mubr.bf16.mxu0 %v857_v31 }
  0x2c   :  { %814 = vmatmul.mubr.bf16.gmra.mxu1 %v861_v32 }
  0x2d   :  { %817 = vmatprep.mubr.bf16.mxu1 %v868_v33 }
  0x32   :  { %449 = vmatmul.mubr.bf16.gmra.mxu0 %v859_v34 }
  0x33   :  { %456 = vmatprep.mubr.bf16.mxu0 %v862_v35 }
  0x34   :  { %818 = vmatmul.mubr.bf16.gmra.mxu1 %v869_v36 }
  0x35   :  { %821 = vmatprep.mubr.bf16.mxu1 %v876_v37 }
  0x3a   :  { %457 = vmatmul.mubr.bf16.gmra.mxu0 %v864_v38 }
  0x3b   :  { %464 = vmatprep.mubr.bf16.mxu0 %v865_v39 }
  0x3c   :  { %822 = vmatmul.mubr.bf16.gmra.mxu1 %v877_v40 }
  0x42   :  { %465 = vmatmul.mubr.bf16.gmra.mxu0 %v867_v41 }
  0x43   :  { %472 = vmatprep.mubr.bf16.mxu0 %v870_v42 }
  0x4a   :  { %473 = vmatmul.mubr.bf16.gmra.mxu0 %v872_v43 }
  0x4b   :  { %480 = vmatprep.mubr.bf16.mxu0 %v873_v44 }
  0x52   :  { %481 = vmatmul.mubr.bf16.gmra.mxu0 %v875_v45 }
  0x53   :  { %488 = vmatprep.mubr.bf16.mxu0 %v878_v46 }
  0x5a   :  { %489 = vmatmul.mubr.bf16.gmra.mxu0 %v880_v47 }
  0xe2   :  { %v729_v48 = vpop.f32.mrf.mxu0 }
  0xe4   :  { %v730_v49 = vpop.f32.mrf.mxu0  ;;  %v811_v50 = vpop.f32.mrf.mxu1 }
  0xe5   :  { %v731_v51 = vadd.f32 %v730_v49, %v729_v48 }
  0xe6   :  { %v732_v52 = vpop.f32.mrf.mxu0  ;;  %v531_v53 = vpop.f32.mrf.mxu1 }
  0xe7   :  { %v532_v54 = vadd.f32 %v731_v51, %v531_v53 }
  0xe8   :  { %v733_v55 = vpop.f32.mrf.mxu0  ;;  %v812_v56 = vpop.f32.mrf.mxu1 }
  0xe9   :  { %645 = vst [vmem:[%s1090_s2] sm:$0xff] %v532_v54  ;;  %v734_v57 = vadd.f32 %v733_v55, %v732_v52 }
  0xea   :  { %v735_v58 = vpop.f32.mrf.mxu0  ;;  %v534_v59 = vpop.f32.mrf.mxu1 }
  0xeb   :  { %v535_v60 = vadd.f32 %v734_v57, %v534_v59 }
  0xec   :  { %v736_v61 = vpop.f32.mrf.mxu0  ;;  %v815_v62 = vpop.f32.mrf.mxu1 }
  0xed   :  { %646 = vst [vmem:[%s1090_s2 + $0x8] sm:$0xff] %v535_v60  ;;  %v737_v63 = vadd.f32 %v736_v61, %v735_v58 }
  0xee   :  { %v738_v0 = vpop.f32.mrf.mxu0  ;;  %v547_v3 = vpop.f32.mrf.mxu1 }
  0xef   :  { %v540_v1 = vadd.f32 %v811_v50, %v737_v63 }
  0xf0   :  { %v739_v2 = vpop.f32.mrf.mxu0  ;;  %v816_v8 = vpop.f32.mrf.mxu1 }
  0xf1   :  { %647 = vst [vmem:[%s1090_s2 + $0x10] sm:$0xff] %v540_v1  ;;  %v740_v4 = vadd.f32 %v739_v2, %v738_v0 }
  0xf2   :  { %v741_v5 = vpop.f32.mrf.mxu0  ;;  %v550_v13 = vpop.f32.mrf.mxu1 }
  0xf3   :  { %v543_v6 = vadd.f32 %v812_v56, %v740_v4 }
  0xf4   :  { %v742_v7 = vpop.f32.mrf.mxu0  ;;  %v819_v18 = vpop.f32.mrf.mxu1 }
  0xf5   :  { %648 = vst [vmem:[%s1090_s2 + $0x18] sm:$0xff] %v543_v6  ;;  %v743_v9 = vadd.f32 %v742_v7, %v741_v5 }
  0xf6   :  { %v744_v10 = vpop.f32.mrf.mxu0  ;;  %v563_v23 = vpop.f32.mrf.mxu1 }
  0xf7   :  { %v548_v11 = vadd.f32 %v743_v9, %v547_v3 }
  0xf8   :  { %v745_v12 = vpop.f32.mrf.mxu0  ;;  %v820_v28 = vpop.f32.mrf.mxu1 }
  0xf9   :  { %649 = vst [vmem:[%s1090_s2 + $0x20] sm:$0xff] %v548_v11  ;;  %v746_v14 = vadd.f32 %v745_v12, %v744_v10 }
  0xfa   :  { %v747_v15 = vpop.f32.mrf.mxu0  ;;  %v566_v33 = vpop.f32.mrf.mxu1 }
  0xfb   :  { %v551_v16 = vadd.f32 %v746_v14, %v550_v13 }
  0xfc   :  { %v748_v17 = vpop.f32.mrf.mxu0  ;;  %v823_v38 = vpop.f32.mrf.mxu1 }
  0xfd   :  { %650 = vst [vmem:[%s1090_s2 + $0x28] sm:$0xff] %v551_v16  ;;  %v749_v19 = vadd.f32 %v748_v17, %v747_v15 }
  0xfe   :  { %v750_v20 = vpop.f32.mrf.mxu0  ;;  %v579_v43 = vpop.f32.mrf.mxu1 }
  0xff   :  { %v556_v21 = vadd.f32 %v815_v62, %v749_v19 }
 0x100   :  { %v751_v22 = vpop.f32.mrf.mxu0  ;;  %v824_v48 = vpop.f32.mrf.mxu1 }
 0x101   :  { %651 = vst [vmem:[%s1090_s2 + $0x30] sm:$0xff] %v556_v21  ;;  %v752_v24 = vadd.f32 %v751_v22, %v750_v20 }
 0x102   :  { %v753_v25 = vpop.f32.mrf.mxu0  ;;  %v582_v53 = vpop.f32.mrf.mxu1 }
 0x103   :  { %v559_v26 = vadd.f32 %v816_v8, %v752_v24 }
 0x104   :  { %v754_v27 = vpop.f32.mrf.mxu0 }
 0x105   :  { %652 = vst [vmem:[%s1090_s2 + $0x38] sm:$0xff] %v559_v26  ;;  %v755_v29 = vadd.f32 %v754_v27, %v753_v25 }
 0x106   :  { %v756_v30 = vpop.f32.mrf.mxu0 }
 0x107   :  { %v564_v31 = vadd.f32 %v755_v29, %v563_v23 }
 0x108   :  { %v757_v32 = vpop.f32.mrf.mxu0 }
 0x109   :  { %653 = vst [vmem:[%s1090_s2 + $0x40] sm:$0xff] %v564_v31  ;;  %v758_v34 = vadd.f32 %v757_v32, %v756_v30 }
 0x10a   :  { %v759_v35 = vpop.f32.mrf.mxu0 }
 0x10b   :  { %v567_v36 = vadd.f32 %v758_v34, %v566_v33 }
 0x10c   :  { %v760_v37 = vpop.f32.mrf.mxu0 }
 0x10d   :  { %654 = vst [vmem:[%s1090_s2 + $0x48] sm:$0xff] %v567_v36  ;;  %v761_v39 = vadd.f32 %v760_v37, %v759_v35 }
 0x10e   :  { %v762_v40 = vpop.f32.mrf.mxu0 }
 0x10f   :  { %v572_v41 = vadd.f32 %v819_v18, %v761_v39 }
 0x110   :  { %v763_v42 = vpop.f32.mrf.mxu0 }
 0x111   :  { %655 = vst [vmem:[%s1090_s2 + $0x50] sm:$0xff] %v572_v41  ;;  %v764_v44 = vadd.f32 %v763_v42, %v762_v40 }
 0x112   :  { %v765_v45 = vpop.f32.mrf.mxu0 }
 0x113   :  { %v575_v46 = vadd.f32 %v820_v28, %v764_v44 }
 0x114   :  { %v766_v47 = vpop.f32.mrf.mxu0 }
 0x115   :  { %656 = vst [vmem:[%s1090_s2 + $0x58] sm:$0xff] %v575_v46  ;;  %v767_v49 = vadd.f32 %v766_v47, %v765_v45 }
 0x116   :  { %v768_v50 = vpop.f32.mrf.mxu0 }
 0x117   :  { %v580_v51 = vadd.f32 %v767_v49, %v579_v43 }
 0x118   :  { %v769_v52 = vpop.f32.mrf.mxu0 }
 0x119   :  { %657 = vst [vmem:[%s1090_s2 + $0x60] sm:$0xff] %v580_v51  ;;  %v770_v54 = vadd.f32 %v769_v52, %v768_v50 }
 0x11a   :  { %v771_v55 = vpop.f32.mrf.mxu0 }
 0x11b   :  { %v583_v56 = vadd.f32 %v770_v54, %v582_v53 }
 0x11c   :  { %v772_v57 = vpop.f32.mrf.mxu0 }
 0x11d   :  { %658 = vst [vmem:[%s1090_s2 + $0x68] sm:$0xff] %v583_v56  ;;  %v773_v58 = vadd.f32 %v772_v57, %v771_v55 }
 0x11e   :  { %v774_v59 = vpop.f32.mrf.mxu0 }
 0x11f   :  { %v588_v60 = vadd.f32 %v823_v38, %v773_v58 }
 0x120   :  { %v775_v61 = vpop.f32.mrf.mxu0 }
 0x121   :  { %659 = vst [vmem:[%s1090_s2 + $0x70] sm:$0xff] %v588_v60  ;;  %v776_v62 = vadd.f32 %v775_v61, %v774_v59 }
 0x123   :  { %v591_v63 = vadd.f32 %v824_v48, %v776_v62 }
 0x125   :  { %660 = vst [vmem:[%s1090_s2 + $0x78] sm:$0xff] %v591_v63 }

// kernel: _lambda_.60
= control target key start
LH: loop header
LB: loop body
LE: loop exit
PB: predicated region body
PF: predicated region fallthrough
CT: control target
= control target key end

     0   :  { %s418_s9 = smov 0   ;;  %s420_s10 = smov 0   ;;  %s481_s0 = inlined_call_operand.vmem [shape: f32[2,64,64], index: 0, kind: input, shape index: {}]   ;;  %s482_s1 = inlined_call_operand.vmem [shape: f32[2,1,64], index: 1, kind: output, shape index: {0}]   ;;  %s483_s2 = inlined_call_operand.vmem [shape: f32[2,1,64], index: 2, kind: output, shape index: {1}]  }
   0x1   :  { %s422_s11 = smov 0  }
   0x2 LB: > { %s25_s12 = sadd.s32 1, %s396_s10  ;;  %p347_p0 = scmp.ge.s32.totalorder %s400_s11, 1  ;;  %s400_s11 = sphi %s422_s11, %s13_s11   ;;  %s396_s10 = sphi %s420_s10, %s485_s10   ;;  %s392_s9 = sphi %s418_s9, %s484_s9  }
   0x3   : > { %p27_p1 = scmp.ge.s32.totalorder %s25_s12, 2  ;;  %p134_p2 = scmp.lt.s32.totalorder %s400_s11, 3 }
   0x5   : > { %s487_s12 = smov (%p27_p1, %s25_s12), 0  ;;  %p135_p3 = pnand %p347_p0, %p134_p2 }
   0x6   : > { %p162_p4 = scmp.lt.s32.totalorder (!%p135_p3), %s392_s9, 1 }
   0x7   : > { %138 = sbr.rel (%p135_p3) target bundleno = 57 (0x39), region = 24 }
   0xc   : > { %vm181_vm0 = vcmask 516096   ;;  %v402_v0 = vmov 0.0   ;;  %s489_s9 = smov (!%p162_p4, %s392_s9), 1  ;;  %vm193_vm1 = vcmask 523264  }
   0xd   : > { %182 = vst.msk [vmem:[#allocation2] sm:$0x1] %vm181_vm0, %v402_v0  ;;  %183 = vst.msk [vmem:[#allocation3] sm:$0x1] %vm181_vm0, %v402_v0  ;;  %s352_s13 = sshll.u32 %s489_s9, 6  ;;  %s173_s19 = scalar_lea.vmem %s482_s1, %s489_s9 }
   0xe   : > { %s169_s16 = scalar_lea.vmem %s481_s0, %s352_s13  ;;  %s176_s22 = scalar_lea.vmem %s483_s2, %s489_s9 }
   0xf   : > { %v184_v1 = vld [vmem:[%s169_s16] sm:$0xff]  ;;  %v185_v2 = vld [vmem:[%s169_s16 + $0x8] sm:$0xff]  ;;  %v186_v3 = vld [vmem:[%s169_s16 + $0x10] sm:$0xff] }
  0x10   : > { %v187_v4 = vld [vmem:[%s169_s16 + $0x18] sm:$0xff]  ;;  %v194_v5 = vsel %vm193_vm1, %v184_v1, 0.0  ;;  %v195_v6 = vsel %vm193_vm1, %v185_v2, 0.0  ;;  %v197_v7 = vsel %vm193_vm1, %v186_v3, 0.0  ;;  %v219_v8 = vmul.f32 %v184_v1, %v184_v1  ;;  %v188_v9 = vld [vmem:[%s169_s16 + $0x20] sm:$0xff]  ;;  %v189_v14 = vld [vmem:[%s169_s16 + $0x28] sm:$0xff] }
  0x11   : > { %v196_v10 = vadd.f32 %v195_v6, %v194_v5  ;;  %v220_v11 = vmul.f32 %v185_v2, %v185_v2  ;;  %v199_v12 = vsel %vm193_vm1, %v187_v4, 0.0  ;;  %v221_v13 = vmul.f32 %v186_v3, %v186_v3  ;;  %v190_v21 = vld [vmem:[%s169_s16 + $0x30] sm:$0xff]  ;;  %v191_v28 = vld [vmem:[%s169_s16 + $0x38] sm:$0xff] }
  0x12   : > { %v222_v16 = vmul.f32 %v187_v4, %v187_v4  ;;  %v201_v17 = vsel %vm193_vm1, %v188_v9, 0.0  ;;  %v223_v18 = vmul.f32 %v188_v9, %v188_v9  ;;  %v227_v19 = vsel %vm193_vm1, %v219_v8, 0.0 }
  0x13   : > { %v198_v15 = vadd.f32 %v197_v7, %v196_v10  ;;  %v228_v20 = vsel %vm193_vm1, %v220_v11, 0.0  ;;  %v230_v24 = vsel %vm193_vm1, %v221_v13, 0.0  ;;  %v203_v25 = vsel %vm193_vm1, %v189_v14, 0.0 }
  0x14   : > { %v229_v23 = vadd.f32 %v228_v20, %v227_v19  ;;  %v224_v26 = vmul.f32 %v189_v14, %v189_v14  ;;  %v232_v27 = vsel %vm193_vm1, %v222_v16, 0.0  ;;  %v205_v31 = vsel %vm193_vm1, %v190_v21, 0.0  ;;  %v192_v55 = vld [vmem:[#allocation2] sm:$0x1]  ;;  %v218_v60 = vld [vmem:[#allocation3] sm:$0x1] }
  0x15   : > { %v200_v22 = vadd.f32 %v199_v12, %v198_v15  ;;  %v225_v32 = vmul.f32 %v190_v21, %v190_v21  ;;  %v234_v33 = vsel %vm193_vm1, %v223_v18, 0.0  ;;  %v207_v36 = vsel %vm193_vm1, %v191_v28, 0.0 }
  0x16   : > { %v231_v30 = vadd.f32 %v230_v24, %v229_v23  ;;  %v226_v37 = vmul.f32 %v191_v28, %v191_v28  ;;  %v236_v38 = vsel %vm193_vm1, %v224_v26, 0.0 }
  0x17   : > { %v202_v29 = vadd.f32 %v201_v17, %v200_v22  ;;  %v238_v41 = vsel %vm193_vm1, %v225_v32, 0.0 }
  0x18   : > { %v233_v35 = vadd.f32 %v232_v27, %v231_v30  ;;  %v240_v44 = vsel %vm193_vm1, %v226_v37, 0.0 }
  0x19   : > { %v204_v34 = vadd.f32 %v203_v25, %v202_v29 }
  0x1a   : > { %v235_v40 = vadd.f32 %v234_v33, %v233_v35 }
  0x1b   : > { %v206_v39 = vadd.f32 %v205_v31, %v204_v34 }
  0x1c   : > { %v237_v43 = vadd.f32 %v236_v38, %v235_v40 }
  0x1d   : > { %v208_v42 = vadd.f32 %v207_v36, %v206_v39 }
  0x1e   : > { %v239_v46 = vadd.f32 %v238_v41, %v237_v43 }
  0x1f   : > { %v209_v45 = vrot.slane %v208_v42, 4 }
  0x20   : > { %v241_v48 = vadd.f32 %v240_v44, %v239_v46 }
  0x21   : > { %v210_v47 = vadd.f32 %v209_v45, %v208_v42 }
  0x22   : > { %v242_v50 = vrot.slane %v241_v48, 4 }
  0x23   : > { %v211_v49 = vrot.slane %v210_v47, 2 }
  0x24   : > { %v243_v52 = vadd.f32 %v242_v50, %v241_v48 }
  0x25   : > { %v212_v51 = vadd.f32 %v211_v49, %v210_v47 }
  0x26   : > { %v244_v54 = vrot.slane %v243_v52, 2 }
  0x27   : > { %v213_v53 = vrot.slane %v212_v51, 1 }
  0x28   : > { %v245_v57 = vadd.f32 %v244_v54, %v243_v52 }
  0x29   : > { %v214_v56 = vadd.f32 %v213_v53, %v212_v51 }
  0x2a   : > { %v246_v59 = vrot.slane %v245_v57, 1 }
  0x2b   : > { %v215_v58 = vadd.f32 %v214_v56, %v192_v55 }
  0x2c   : > { %v247_v61 = vadd.f32 %v246_v59, %v245_v57 }
  0x2d   : > { %217 = vst.msk [vmem:[#allocation2] sm:$0x1] %vm181_vm0, %v215_v58 }
  0x2e   : > { %v248_v62 = vadd.f32 %v247_v61, %v218_v60 }
  0x30   : > { %249 = vst.msk [vmem:[#allocation3] sm:$0x1] %vm181_vm0, %v248_v62 }
  0x34   : > { %v253_v63 = vld [vmem:[#allocation2] sm:$0x1] }
  0x35   : > { %254 = vst.msk [vmem:[%s173_s19] sm:$0x1] %vm181_vm0, %v253_v63 }
  0x37   : > { %v255_v0 = vld [vmem:[#allocation3] sm:$0x1] }
  0x38   : > { %256 = vst.msk [vmem:[%s176_s22] sm:$0x1] %vm181_vm0, %v255_v0 }
  0x39 PF: > { %s13_s11 = sadd.s32 1, %s400_s11   ;;  %s484_s9 = smov %s396_s10 }
  0x3a   : > { %p10_p5 = scmp.ge.s32.totalorder %s13_s11, 4   ;;  %s485_s10 = smov %s487_s12 }
  0x3c   :  { %12 = sbr.rel (!%p10_p5) target bundleno = 2 (0x2), region = 74 }

// kernel: _lambda_.61
= control target key start
LH: loop header
LB: loop body
LE: loop exit
PB: predicated region body
PF: predicated region fallthrough
CT: control target
= control target key end

     0   :  { %s569_s18 = smov 0   ;;  %s571_s19 = smov 0   ;;  %s631_s0 = inlined_call_operand.vmem [shape: f32[2,64,64], index: 0, kind: input, shape index: {}]   ;;  %s632_s1 = inlined_call_operand.vmem [shape: f32[2,1,64], index: 1, kind: input, shape index: {}]   ;;  %s633_s2 = inlined_call_operand.vmem [shape: f32[2,1,64], index: 2, kind: input, shape index: {}]   ;;  %s634_s3 = inlined_call_operand.vmem [shape: f32[1,1,64], index: 3, kind: input, shape index: {}]   ;;  %s635_s4 = inlined_call_operand.vmem [shape: f32[1,1,64], index: 4, kind: input, shape index: {}]   ;;  %s636_s5 = inlined_call_operand.vmem [shape: f32[2,64,64], index: 5, kind: output, shape index: {}]  }
   0x1   :  { %s573_s20 = smov 0  }
   0x2 LB: > { %s27_s21 = sadd.s32 1, %s533_s19  ;;  %p479_p0 = scmp.ge.s32.totalorder %s537_s20, 1  ;;  %s537_s20 = sphi %s573_s20, %s15_s20   ;;  %s533_s19 = sphi %s571_s19, %s638_s19   ;;  %s529_s18 = sphi %s569_s18, %s637_s18  }
   0x3   : > { %p29_p1 = scmp.ge.s32.totalorder %s27_s21, 2  ;;  %p224_p2 = scmp.lt.s32.totalorder %s537_s20, 3 }
   0x5   : > { %s640_s21 = smov (%p29_p1, %s27_s21), 0  ;;  %p225_p3 = pnand %p479_p0, %p224_p2 }
   0x6   : > { %p267_p4 = scmp.lt.s32.totalorder (!%p225_p3), %s529_s18, 1 }
   0x7   : > { %228 = sbr.rel (%p225_p3) target bundleno = 51 (0x33), region = 40 }
   0xc   : > { %s642_s18 = smov (!%p267_p4, %s529_s18), 1  ;;  %v309_v6 = vlaneseq  ;;  %v322_v12 = vld [vmem:[%s634_s3] sm:$0x1]  ;;  %vm361_vm0 = vcmask 523264  }
   0xd   : > { %s278_s24 = scalar_lea.vmem %s632_s1, %s642_s18  ;;  %s281_s27 = scalar_lea.vmem %s633_s2, %s642_s18  ;;  %v484_v31 = vld [vmem:[%s635_s4] ss:$0 sm:$0xff] }
   0xe   : > { %v300_v0 = vld [vmem:[%s278_s24] sm:$0x1]  ;;  %v310_v8 = vshrl.u32 %v309_v6, 7  ;;  %s487_s28 = sshll.u32 %s642_s18, 6 }
   0xf   : > { %v301_v1 = vmul.f32 0.015625, %v300_v0  ;;  %v302_v2 = vld [vmem:[%s281_s27] sm:$0x1]  ;;  %s274_s6 = scalar_lea.vmem %s631_s0, %s487_s28  ;;  %s290_s13 = scalar_lea.vmem %s636_s5, %s487_s28 }
  0x10   : > { %v303_v3 = vmul.f32 0.015625, %v302_v2  ;;  %v311_v9 = vsub.s32 0, %v310_v8  ;;  %v292_v11 = vld [vmem:[%s274_s6] sm:$0xff]  ;;  %v293_v13 = vld [vmem:[%s274_s6 + $0x8] sm:$0xff]  ;;  %v294_v14 = vld [vmem:[%s274_s6 + $0x10] sm:$0xff] }
  0x11   : > { %v304_v4 = vmul.f32 %v301_v1, %v301_v1  ;;  %v295_v15 = vld [vmem:[%s274_s6 + $0x18] sm:$0xff]  ;;  %v296_v16 = vld [vmem:[%s274_s6 + $0x20] sm:$0xff]  ;;  %v297_v17 = vld [vmem:[%s274_s6 + $0x28] sm:$0xff] }
  0x12   : > { %v312_v10 = vrot.slane %v301_v1, %v311_v9  ;;  %v298_v18 = vld [vmem:[%s274_s6 + $0x30] sm:$0xff]  ;;  %v299_v19 = vld [vmem:[%s274_s6 + $0x38] sm:$0xff] }
  0x13   : > { %v305_v5 = vsub.f32 %v303_v3, %v304_v4 }
  0x14   : > { %v314_v21 = vsub.f32 %v292_v11, %v312_v10  ;;  %v315_v23 = vsub.f32 %v293_v13, %v312_v10  ;;  %v316_v24 = vsub.f32 %v294_v14, %v312_v10  ;;  %v317_v25 = vsub.f32 %v295_v15, %v312_v10 }
  0x15   : > { %v306_v7 = vadd.f32 1e-05, %v305_v5  ;;  %v318_v26 = vsub.f32 %v296_v16, %v312_v10  ;;  %v319_v27 = vsub.f32 %v297_v17, %v312_v10  ;;  %v320_v28 = vsub.f32 %v298_v18, %v312_v10 }
  0x16   : > { %v321_v29 = vsub.f32 %v299_v19, %v312_v10 }
  0x17   : > { %513 = vrsqrt.f32 %v306_v7 }
  0x24   : > { %v514_v20 = vpop.eup %513 }
  0x25   : > { %v323_v22 = vmul.f32 %v514_v20, %v322_v12 }
  0x27   : > { %v328_v30 = vrot.slane %v323_v22, %v311_v9 }
  0x29   : > { %v330_v32 = vmul.f32 %v328_v30, %v314_v21  ;;  %v331_v33 = vmul.f32 %v328_v30, %v315_v23  ;;  %v332_v34 = vmul.f32 %v328_v30, %v316_v24  ;;  %v333_v35 = vmul.f32 %v328_v30, %v317_v25 }
  0x2a   : > { %v334_v36 = vmul.f32 %v328_v30, %v318_v26  ;;  %v335_v37 = vmul.f32 %v328_v30, %v319_v27  ;;  %v336_v38 = vmul.f32 %v328_v30, %v320_v28  ;;  %v337_v39 = vmul.f32 %v328_v30, %v321_v29 }
  0x2b   : > { %v345_v40 = vadd.f32 %v484_v31, %v330_v32  ;;  %v346_v41 = vadd.f32 %v484_v31, %v331_v33  ;;  %v347_v42 = vadd.f32 %v484_v31, %v332_v34  ;;  %v348_v43 = vadd.f32 %v484_v31, %v333_v35 }
  0x2c   : > { %v349_v44 = vadd.f32 %v484_v31, %v334_v36  ;;  %v350_v45 = vadd.f32 %v484_v31, %v335_v37  ;;  %v351_v46 = vadd.f32 %v484_v31, %v336_v38  ;;  %v352_v47 = vadd.f32 %v484_v31, %v337_v39 }
  0x2d   : > { %v353_v48 = vmax.f32 %v345_v40, 0.0  ;;  %v354_v49 = vmax.f32 %v346_v41, 0.0  ;;  %v355_v50 = vmax.f32 %v347_v42, 0.0  ;;  %v356_v51 = vmax.f32 %v348_v43, 0.0 }
  0x2e   : > { %v357_v52 = vmax.f32 %v349_v44, 0.0  ;;  %v358_v53 = vmax.f32 %v350_v45, 0.0  ;;  %v359_v54 = vmax.f32 %v351_v46, 0.0  ;;  %v360_v55 = vmax.f32 %v352_v47, 0.0 }
  0x2f   : > { %362 = vst.msk [vmem:[%s290_s13] sm:$0xff] %vm361_vm0, %v353_v48  ;;  %363 = vst.msk [vmem:[%s290_s13 + $0x8] sm:$0xff] %vm361_vm0, %v354_v49 }
  0x30   : > { %364 = vst.msk [vmem:[%s290_s13 + $0x10] sm:$0xff] %vm361_vm0, %v355_v50  ;;  %365 = vst.msk [vmem:[%s290_s13 + $0x18] sm:$0xff] %vm361_vm0, %v356_v51 }
  0x31   : > { %366 = vst.msk [vmem:[%s290_s13 + $0x20] sm:$0xff] %vm361_vm0, %v357_v52  ;;  %367 = vst.msk [vmem:[%s290_s13 + $0x28] sm:$0xff] %vm361_vm0, %v358_v53 }
  0x32   : > { %368 = vst.msk [vmem:[%s290_s13 + $0x30] sm:$0xff] %vm361_vm0, %v359_v54  ;;  %369 = vst.msk [vmem:[%s290_s13 + $0x38] sm:$0xff] %vm361_vm0, %v360_v55 }
  0x33 PF: > { %s15_s20 = sadd.s32 1, %s537_s20   ;;  %s637_s18 = smov %s533_s19 }
  0x34   : > { %p12_p5 = scmp.ge.s32.totalorder %s15_s20, 4   ;;  %s638_s19 = smov %s640_s21 }
  0x36   :  { %14 = sbr.rel (!%p12_p5) target bundleno = 2 (0x2), region = 76 }

// kernel: _lambda_.64
= control target key start
LH: loop header
LB: loop body
LE: loop exit
PB: predicated region body
PF: predicated region fallthrough
CT: control target
= control target key end

     0   :  { %s532_s18 = smov 0   ;;  %s534_s19 = smov 0   ;;  %s582_s0 = inlined_call_operand.vmem [shape: f32[2,16,128], index: 0, kind: input, shape index: {}]   ;;  %s583_s1 = inlined_call_operand.vmem [shape: f32[2,1,128], index: 1, kind: input, shape index: {}]   ;;  %s584_s2 = inlined_call_operand.vmem [shape: f32[2,1,128], index: 2, kind: input, shape index: {}]   ;;  %s585_s3 = inlined_call_operand.vmem [shape: f32[1,1,128], index: 3, kind: input, shape index: {}]   ;;  %s586_s4 = inlined_call_operand.vmem [shape: f32[1,1,128], index: 4, kind: input, shape index: {}]   ;;  %s587_s5 = inlined_call_operand.vmem [shape: f32[2,16,128], index: 5, kind: output, shape index: {}]  }
   0x1   :  { %s536_s20 = smov 0  }
   0x2 LB: > { %s27_s21 = sadd.s32 1, %s496_s19  ;;  %p442_p0 = scmp.ge.s32.totalorder %s500_s20, 1  ;;  %s500_s20 = sphi %s536_s20, %s15_s20   ;;  %s496_s19 = sphi %s534_s19, %s589_s19   ;;  %s492_s18 = sphi %s532_s18, %s588_s18  }
   0x3   : > { %p29_p1 = scmp.ge.s32.totalorder %s27_s21, 2  ;;  %p224_p2 = scmp.lt.s32.totalorder %s500_s20, 3 }
   0x5   : > { %s591_s21 = smov (%p29_p1, %s27_s21), 0  ;;  %p225_p3 = pnand %p442_p0, %p224_p2 }
   0x6   : > { %p267_p4 = scmp.lt.s32.totalorder (!%p225_p3), %s492_s18, 1 }
   0x7   : > { %228 = sbr.rel (%p225_p3) target bundleno = 48 (0x30), region = 40 }
   0xc   : > { %s593_s18 = smov (!%p267_p4, %s492_s18), 1  ;;  %v303_v7 = vlaneseq  ;;  %v310_v13 = vld [vmem:[%s585_s3] sm:$0x1] }
   0xd   : > { %s278_s24 = scalar_lea.vmem %s583_s1, %s593_s18  ;;  %s281_s27 = scalar_lea.vmem %s584_s2, %s593_s18  ;;  %v447_v19 = vld [vmem:[%s586_s4] ss:$0 sm:$0xff] }
   0xe   : > { %v294_v0 = vld [vmem:[%s278_s24] sm:$0x1]  ;;  %v304_v8 = vshrl.u32 %v303_v7, 7  ;;  %s450_s28 = sshll.u32 %s593_s18, 4 }
   0xf   : > { %v295_v1 = vmul.f32 0.0625, %v294_v0  ;;  %v296_v2 = vld [vmem:[%s281_s27] sm:$0x1]  ;;  %s274_s6 = scalar_lea.vmem %s582_s0, %s450_s28  ;;  %s290_s13 = scalar_lea.vmem %s587_s5, %s450_s28 }
  0x10   : > { %v297_v3 = vmul.f32 0.0625, %v296_v2  ;;  %v305_v9 = vsub.s32 0, %v304_v8  ;;  %v292_v11 = vld [vmem:[%s274_s6] sm:$0xff]  ;;  %v293_v12 = vld [vmem:[%s274_s6 + $0x8] sm:$0xff] }
  0x11   : > { %v298_v4 = vmul.f32 %v295_v1, %v295_v1 }
  0x12   : > { %v306_v10 = vrot.slane %v295_v1, %v305_v9 }
  0x13   : > { %v299_v5 = vsub.f32 %v297_v3, %v298_v4 }
  0x14   : > { %v308_v15 = vsub.f32 %v292_v11, %v306_v10  ;;  %v309_v16 = vsub.f32 %v293_v12, %v306_v10 }
  0x15   : > { %v300_v6 = vadd.f32 1e-05, %v299_v5 }
  0x17   : > { %476 = vrsqrt.f32 %v300_v6 }
  0x24   : > { %v477_v14 = vpop.eup %476 }
  0x25   : > { %v311_v17 = vmul.f32 %v477_v14, %v310_v13 }
  0x27   : > { %v316_v18 = vrot.slane %v311_v17, %v305_v9 }
  0x29   : > { %v318_v20 = vmul.f32 %v316_v18, %v308_v15  ;;  %v319_v21 = vmul.f32 %v316_v18, %v309_v16 }
  0x2b   : > { %v327_v22 = vadd.f32 %v447_v19, %v318_v20  ;;  %v328_v23 = vadd.f32 %v447_v19, %v319_v21 }
  0x2d   : > { %v329_v24 = vmax.f32 %v327_v22, 0.0  ;;  %v330_v25 = vmax.f32 %v328_v23, 0.0 }
  0x2f   : > { %331 = vst [vmem:[%s290_s13] sm:$0xff] %v329_v24  ;;  %332 = vst [vmem:[%s290_s13 + $0x8] sm:$0xff] %v330_v25 }
  0x30 PF: > { %s15_s20 = sadd.s32 1, %s500_s20   ;;  %s588_s18 = smov %s496_s19 }
  0x31   : > { %p12_p5 = scmp.ge.s32.totalorder %s15_s20, 4   ;;  %s589_s19 = smov %s591_s21 }
  0x33   :  { %14 = sbr.rel (!%p12_p5) target bundleno = 2 (0x2), region = 76 }

// kernel: _lambda_.62
= control target key start
LH: loop header
LB: loop body
LE: loop exit
PB: predicated region body
PF: predicated region fallthrough
CT: control target
= control target key end

     0   :  { %s688_s9 = smov 0   ;;  %s690_s10 = smov 0   ;;  %s784_s0 = inlined_call_operand.vmem [shape: bf16[32,640], index: 0, kind: input, shape index: {}]   ;;  %s785_s1 = inlined_call_operand.vmem [shape: bf16[640,128], index: 1, kind: input, shape index: {}]   ;;  %s786_s2 = inlined_call_operand.vmem [shape: f32[32,128], index: 2, kind: output, shape index: {}]  }
   0x1   :  { %s692_s11 = smov 0   ;;  %s694_s12 = smov 0  }
   0x2   :  { %s696_s13 = smov 0  }
   0x3 LB: > { %s24_s14 = sadd.s32 1, %s666_s12  ;;  %p47_p1 = scmp.ne.s32.totalorder %s658_s10, %s654_s9  ;;  %s670_s13 = sphi %s696_s13, %s12_s13   ;;  %s666_s12 = sphi %s694_s12, %s790_s12   ;;  %s662_s11 = sphi %s692_s11, %s789_s11   ;;  %s658_s10 = sphi %s690_s10, %s788_s10   ;;  %s654_s9 = sphi %s688_s9, %s787_s9  }
   0x4   : > { %p25_p0 = scmp.ge.s32.totalorder %s24_s14, 5  ;;  %p48_p2 = scmp.eq.s32.totalorder %s670_s13, 0 }
   0x5   : > { %s40_s16 = sadd.s32 1, %s658_s10  ;;  %p528_p5 = scmp.ge.s32.totalorder %s670_s13, 5 }
   0x6   : > { %s792_s14 = smov (%p25_p0, %s24_s14), 0  ;;  %p49_p3 = por %p48_p2, %p47_p1 }
   0x7   : > { %s36_s15 = ssub.s32 %s666_s12, %s792_s14  ;;  %129 = sbr.rel (%p528_p5) target bundleno = 18 (0x12), region = 16 }
   0x8   : > { %p38_p4 = scmp.eq.s32.totalorder %s36_s15, 0 }
   0xa   : > { %s723_s17 = scalar_select %p38_p4, %s658_s10, %s40_s16  }
   0xc   : > { %132 = sbr.rel (!%p49_p3) target bundleno = 18 (0x12), region = 20  ;;  %s134_s18 = sand.u32 (%p49_p3), 1, %s658_s10  }
   0xd   : > { %s530_s19 = sshll.u32 (%p49_p3), %s666_s12, 2  ;;  %s529_s20 = sshll.u32 (%p49_p3), %s134_s18, 4 }
   0xe   : > { %s141_s23 = scalar_lea.vmem (%p49_p3), %s784_s0, %s530_s19  ;;  %s136_s24 = scalar_lea.vmem (%p49_p3), [#allocation3], %s529_s20 }
   0xf   : > { %v158_v0 = vld [vmem:[%s141_s23] sm:$0xf] (%p49_p3)  ;;  %v160_v1 = vld [vmem:[%s141_s23 + $0x14] sm:$0xf] (%p49_p3)  ;;  %v162_v2 = vld [vmem:[%s141_s23 + $0x28] sm:$0xf] (%p49_p3) }
  0x10   : > { %159 = vst [vmem:[%s136_s24] sm:$0xf] (%p49_p3), %v158_v0  ;;  %161 = vst [vmem:[%s136_s24 + $0x4] sm:$0xf] (%p49_p3), %v160_v1  ;;  %v164_v3 = vld [vmem:[%s141_s23 + $0x3c] sm:$0xf] (%p49_p3) }
  0x11   : > { %163 = vst [vmem:[%s136_s24 + $0x8] sm:$0xf] %v162_v2  ;;  %165 = vst [vmem:[%s136_s24 + $0xc] sm:$0xf] %v164_v3 }
  0x12 PF: > { %p531_p6 = scmp.ge.s32.totalorder %s670_s13, 1  ;;  %p208_p7 = scmp.lt.s32.totalorder %s670_s13, 6 }
  0x14   : > { %p209_p8 = pnand %p531_p6, %p208_p7 }
  0x15   : > { %s215_s25 = sand.u32 (!%p209_p8), 1, %s654_s9   ;;  %s533_s26 = sshll.u32 (!%p209_p8), %s662_s11, 4 }
  0x16   : > { %212 = sbr.rel (%p209_p8) target bundleno = 278 (0x116), region = 65  ;;  %s735_s27 = sshll.u32 (!%p209_p8), %s215_s25, 4 }
  0x17   : > { %p249_p9 = scmp.lt.s32.totalorder (!%p209_p8), %s533_s26, 79  ;;  %s217_s4 = scalar_lea.vmem (!%p209_p8), [#allocation3], %s735_s27 }
  0x18   : > { %p535_p10 = scmp.ne.s32.totalorder (!%p209_p8), %s662_s11, 0 }
  0x1b   : > { %s794_s26 = smov (!%p249_p9, %s533_s26), 79  ;;  %270 = sbr.rel (%p535_p10) target bundleno = 35 (0x23), region = 73 }
  0x1c   : > { %s534_s28 = sshll.u32 %s794_s26, 2 }
  0x1d   : > { %s740_s3 = scalar_lea.vmem %s785_s1, %s534_s28 }
  0x20   : > { %v672_v4 = vmov 0.0  }
  0x21   : > { %271 = vst [vmem:[#allocation2 + $0x10] sm:$0xff] %v672_v4  ;;  %272 = vst [vmem:[#allocation2] sm:$0xff] %v672_v4 }
  0x22   : > { %273 = vst [vmem:[#allocation2 + $0x18] sm:$0xff] %v672_v4  ;;  %274 = vst [vmem:[#allocation2 + $0x8] sm:$0xff] %v672_v4 }
  0x23 PF: > { %v622_v5 = vld [vmem:[%s740_s3 + $0x38] sm:$0xff]   ;;  %v623_v6 = vld [vmem:[%s740_s3 + $0x30] sm:$0xff]   ;;  %v624_v7 = vld [vmem:[%s740_s3 + $0x28] sm:$0xff]   ;;  %p546_p11 = scmp.ne.s32.totalorder %s662_s11, 4 }
  0x24   : > { %561 = vmatprep.subr.bf16.mxu0 %v622_v5  ;;  %v625_v8 = vld [vmem:[%s740_s3 + $0x20] sm:$0xff]   ;;  %v626_v10 = vld [vmem:[%s740_s3 + $0x18] sm:$0xff]   ;;  %v627_v11 = vld [vmem:[%s740_s3 + $0x10] sm:$0xff]  }
  0x25   : > { %562 = vmatpush3.bf16.msra.mxu0 %v622_v5  ;;  %v630_v9 = vld [vmem:[%s217_s4] sm:$0xff]   ;;  %v628_v12 = vld [vmem:[%s740_s3 + $0x8] sm:$0xff]  }
  0x26   : > { %563 = vmatprep.subr.bf16.mxu0 %v623_v6  ;;  %577 = vmatprep.mubr.bf16.mxu0 %v630_v9  ;;  %v629_v13 = vld [vmem:[%s740_s3] sm:$0xff]   ;;  %v631_v14 = vld [vmem:[%s217_s4 + $0x8] sm:$0xff]  }
  0x28   : > { %v275_v17 = vld [vmem:[#allocation2 + $0x10] sm:$0xff]  ;;  %v276_v23 = vld [vmem:[#allocation2] sm:$0xff] }
  0x29   : > { %564 = vmatpush3.bf16.msra.mxu0 %v623_v6  ;;  %v277_v15 = vld [vmem:[#allocation2 + $0x18] sm:$0xff]  ;;  %v278_v20 = vld [vmem:[#allocation2 + $0x8] sm:$0xff] }
  0x2a   : > { %565 = vmatprep.subr.bf16.mxu0 %v624_v7 }
  0x2d   : > { %566 = vmatpush3.bf16.msra.mxu0 %v624_v7 }
  0x2e   : > { %567 = vmatprep.subr.bf16.mxu0 %v625_v8 }
  0x31   : > { %568 = vmatpush3.bf16.msra.mxu0 %v625_v8 }
  0x32   : > { %569 = vmatprep.subr.bf16.mxu0 %v626_v10 }
  0x35   : > { %570 = vmatpush3.bf16.msra.mxu0 %v626_v10 }
  0x36   : > { %571 = vmatprep.subr.bf16.mxu0 %v627_v11 }
  0x39   : > { %572 = vmatpush3.bf16.msra.mxu0 %v627_v11 }
  0x3a   : > { %573 = vmatprep.subr.bf16.mxu0 %v628_v12 }
  0x3d   : > { %574 = vmatpush3.bf16.msra.mxu0 %v628_v12 }
  0x3e   : > { %575 = vmatprep.subr.bf16.mxu0 %v629_v13 }
  0x41   : > { %576 = vmatpush3.bf16.msra.mxu0 %v629_v13 }
  0x44   : > { %578 = vmatmul.mubr.bf16.vlgmr.msra.gmra.mxu0 %v631_v14 }
 0x104   : > { %v579_v16 = vpop.f32.mrf.mxu0 }
 0x105   : > { %v410_v18 = vadd.f32 %v579_v16, %v277_v15 }
 0x106   : > { %v393_v19 = vpop.f32.mrf.mxu0 }
 0x107   : > { %414 = vst [vmem:[#allocation2 + $0x18] sm:$0xff] %v410_v18  ;;  %v408_v21 = vadd.f32 %v393_v19, %v275_v17 }
 0x108   : > { %v580_v22 = vpop.f32.mrf.mxu0 }
 0x109   : > { %412 = vst [vmem:[#allocation2 + $0x10] sm:$0xff] %v408_v21  ;;  %v411_v24 = vadd.f32 %v580_v22, %v278_v20  ;;  %419 = sbr.rel (%p546_p11) target bundleno = 278 (0x116), region = 77 }
 0x10a   : > { %v396_v25 = vpop.f32.mrf.mxu0 }
 0x10b   : > { %415 = vst [vmem:[#allocation2 + $0x8] sm:$0xff] %v411_v24  ;;  %v409_v26 = vadd.f32 %v396_v25, %v276_v23 }
 0x10d   : > { %413 = vst [vmem:[#allocation2] sm:$0xff] %v409_v26 }
 0x10e   : > { %v422_v29 = vld [vmem:[#allocation2 + $0x18] sm:$0xff] }
 0x10f   : > { %426 = vst [vmem:[%s786_s2 + $0x10] sm:$0xff] %v422_v29 }
 0x110   : > { %v420_v27 = vld [vmem:[#allocation2 + $0x10] sm:$0xff] }
 0x111   : > { %424 = vst [vmem:[%s786_s2] sm:$0xff] %v420_v27 }
 0x112   : > { %v423_v30 = vld [vmem:[#allocation2 + $0x8] sm:$0xff] }
 0x113   : > { %427 = vst [vmem:[%s786_s2 + $0x18] sm:$0xff] %v423_v30 }
 0x114   : > { %v421_v28 = vld [vmem:[#allocation2] sm:$0xff] }
 0x115   : > { %425 = vst [vmem:[%s786_s2 + $0x8] sm:$0xff] %v421_v28 }
 0x116 PF: > { %s12_s13 = sadd.s32 1, %s670_s13   ;;  %s787_s9 = smov %s658_s10 }
 0x117   : > { %p9_p12 = scmp.ge.s32.totalorder %s12_s13, 7   ;;  %s788_s10 = smov %s723_s17 }
 0x118   : > { %s789_s11 = smov %s666_s12  ;;  %s790_s12 = smov %s792_s14 }
 0x119   :  { %11 = sbr.rel (!%p9_p12) target bundleno = 3 (0x3), region = 115 }

// kernel: _lambda_.63
= control target key start
LH: loop header
LB: loop body
LE: loop exit
PB: predicated region body
PF: predicated region fallthrough
CT: control target
= control target key end

     0   :  { %s375_s9 = smov 0   ;;  %s377_s10 = smov 0   ;;  %s416_s0 = inlined_call_operand.vmem [shape: f32[2,16,128], index: 0, kind: input, shape index: {}]   ;;  %s417_s1 = inlined_call_operand.vmem [shape: f32[2,1,128], index: 1, kind: output, shape index: {0}]   ;;  %s418_s2 = inlined_call_operand.vmem [shape: f32[2,1,128], index: 2, kind: output, shape index: {1}]  }
   0x1   :  { %s379_s11 = smov 0  }
   0x2 LB: > { %s25_s12 = sadd.s32 1, %s353_s10  ;;  %p304_p0 = scmp.ge.s32.totalorder %s357_s11, 1  ;;  %s357_s11 = sphi %s379_s11, %s13_s11   ;;  %s353_s10 = sphi %s377_s10, %s420_s10   ;;  %s349_s9 = sphi %s375_s9, %s419_s9  }
   0x3   : > { %p27_p1 = scmp.ge.s32.totalorder %s25_s12, 2  ;;  %p134_p2 = scmp.lt.s32.totalorder %s357_s11, 3 }
   0x5   : > { %s422_s12 = smov (%p27_p1, %s25_s12), 0  ;;  %p135_p3 = pnand %p304_p0, %p134_p2 }
   0x6   : > { %p162_p4 = scmp.lt.s32.totalorder (!%p135_p3), %s349_s9, 1 }
   0x7   : > { %138 = sbr.rel (%p135_p3) target bundleno = 43 (0x2b), region = 24 }
   0xc   : > { %v359_v0 = vmov 0.0   ;;  %s424_s9 = smov (!%p162_p4, %s349_s9), 1 }
   0xd   : > { %181 = vst [vmem:[#allocation2] sm:$0x1] %v359_v0  ;;  %182 = vst [vmem:[#allocation3] sm:$0x1] %v359_v0  ;;  %s309_s13 = sshll.u32 %s424_s9, 4  ;;  %s173_s19 = scalar_lea.vmem %s417_s1, %s424_s9 }
   0xe   : > { %s169_s16 = scalar_lea.vmem %s416_s0, %s309_s13  ;;  %s176_s22 = scalar_lea.vmem %s418_s2, %s424_s9 }
   0xf   : > { %v183_v1 = vld [vmem:[%s169_s16] sm:$0xff]  ;;  %v184_v2 = vld [vmem:[%s169_s16 + $0x8] sm:$0xff] }
  0x10   : > { %v186_v3 = vadd.f32 %v184_v2, %v183_v1  ;;  %v196_v4 = vmul.f32 %v183_v1, %v183_v1  ;;  %v197_v5 = vmul.f32 %v184_v2, %v184_v2 }
  0x12   : > { %v187_v6 = vrot.slane %v186_v3, 4  ;;  %v198_v7 = vadd.f32 %v197_v5, %v196_v4 }
  0x14   : > { %v188_v8 = vadd.f32 %v187_v6, %v186_v3  ;;  %v199_v9 = vrot.slane %v198_v7, 4  ;;  %v185_v16 = vld [vmem:[#allocation2] sm:$0x1]  ;;  %v195_v19 = vld [vmem:[#allocation3] sm:$0x1] }
  0x16   : > { %v189_v10 = vrot.slane %v188_v8, 2  ;;  %v200_v11 = vadd.f32 %v199_v9, %v198_v7 }
  0x18   : > { %v190_v12 = vadd.f32 %v189_v10, %v188_v8  ;;  %v201_v13 = vrot.slane %v200_v11, 2 }
  0x1a   : > { %v191_v14 = vrot.slane %v190_v12, 1  ;;  %v202_v15 = vadd.f32 %v201_v13, %v200_v11 }
  0x1c   : > { %v192_v17 = vadd.f32 %v191_v14, %v190_v12  ;;  %v203_v18 = vrot.slane %v202_v15, 1 }
  0x1e   : > { %v193_v20 = vadd.f32 %v192_v17, %v185_v16  ;;  %v204_v21 = vadd.f32 %v203_v18, %v202_v15 }
  0x20   : > { %194 = vst [vmem:[#allocation2] sm:$0x1] %v193_v20  ;;  %v205_v22 = vadd.f32 %v204_v21, %v195_v19 }
  0x22   : > { %206 = vst [vmem:[#allocation3] sm:$0x1] %v205_v22 }
  0x27   : > { %v210_v23 = vld [vmem:[#allocation2] sm:$0x1] }
  0x28   : > { %211 = vst [vmem:[%s173_s19] sm:$0x1] %v210_v23 }
  0x29   : > { %v212_v24 = vld [vmem:[#allocation3] sm:$0x1] }
  0x2a   : > { %213 = vst [vmem:[%s176_s22] sm:$0x1] %v212_v24 }
  0x2b PF: > { %s13_s11 = sadd.s32 1, %s357_s11   ;;  %s419_s9 = smov %s353_s10 }
  0x2c   : > { %p10_p5 = scmp.ge.s32.totalorder %s13_s11, 4   ;;  %s420_s10 = smov %s422_s12 }
  0x2e   :  { %12 = sbr.rel (!%p10_p5) target bundleno = 2 (0x2), region = 74 }

// kernel: _lambda_.70
= control target key start
LH: loop header
LB: loop body
LE: loop exit
PB: predicated region body
PF: predicated region fallthrough
CT: control target
= control target key end

     0   :  { %s625_s21 = smov 0   ;;  %s627_s22 = smov 0   ;;  %s673_s0 = inlined_call_operand.vmem [shape: f32[2,16,128], index: 0, kind: input, shape index: {}]   ;;  %s674_s1 = inlined_call_operand.vmem [shape: f32[2,1,128], index: 1, kind: input, shape index: {}]   ;;  %s675_s2 = inlined_call_operand.vmem [shape: f32[2,1,128], index: 2, kind: input, shape index: {}]   ;;  %s676_s3 = inlined_call_operand.vmem [shape: f32[1,1,128], index: 3, kind: input, shape index: {}]   ;;  %s677_s4 = inlined_call_operand.vmem [shape: f32[1,1,128], index: 4, kind: input, shape index: {}]   ;;  %s678_s5 = inlined_call_operand.vmem [shape: f32[2,16,128], index: 5, kind: input, shape index: {}]   ;;  %s679_s6 = inlined_call_operand.vmem [shape: f32[2,16,128], index: 6, kind: output, shape index: {}]  }
   0x1   :  { %s629_s23 = smov 0  }
   0x2 LB: > { %s28_s24 = sadd.s32 1, %s584_s22  ;;  %p527_p0 = scmp.ge.s32.totalorder %s588_s23, 1  ;;  %s588_s23 = sphi %s629_s23, %s16_s23   ;;  %s584_s22 = sphi %s627_s22, %s681_s22   ;;  %s580_s21 = sphi %s625_s21, %s680_s21  }
   0x3   : > { %p30_p1 = scmp.ge.s32.totalorder %s28_s24, 2  ;;  %p266_p2 = scmp.lt.s32.totalorder %s588_s23, 3 }
   0x5   : > { %s683_s24 = smov (%p30_p1, %s28_s24), 0  ;;  %p267_p3 = pnand %p527_p0, %p266_p2 }
   0x6   : > { %p320_p4 = scmp.lt.s32.totalorder (!%p267_p3), %s580_s21, 1 }
   0x7   : > { %270 = sbr.rel (%p267_p3) target bundleno = 50 (0x32), region = 44 }
   0xc   : > { %s685_s21 = smov (!%p320_p4, %s580_s21), 1  ;;  %v366_v7 = vlaneseq  ;;  %v373_v13 = vld [vmem:[%s676_s3] sm:$0x1] }
   0xd   : > { %s331_s27 = scalar_lea.vmem %s674_s1, %s685_s21  ;;  %s334_s30 = scalar_lea.vmem %s675_s2, %s685_s21  ;;  %v534_v19 = vld [vmem:[%s677_s4] ss:$0 sm:$0xff] }
   0xe   : > { %v357_v0 = vld [vmem:[%s331_s27] sm:$0x1]  ;;  %v367_v8 = vshrl.u32 %v366_v7, 7  ;;  %s537_s7 = sshll.u32 %s685_s21, 4 }
   0xf   : > { %v358_v1 = vmul.f32 0.0625, %v357_v0  ;;  %v359_v2 = vld [vmem:[%s334_s30] sm:$0x1]  ;;  %s327_s10 = scalar_lea.vmem %s673_s0, %s537_s7  ;;  %s343_s15 = scalar_lea.vmem %s678_s5, %s537_s7 }
  0x10   : > { %v360_v3 = vmul.f32 0.0625, %v359_v2  ;;  %v368_v9 = vsub.s32 0, %v367_v8  ;;  %v355_v11 = vld [vmem:[%s327_s10] sm:$0xff]  ;;  %v356_v12 = vld [vmem:[%s327_s10 + $0x8] sm:$0xff]  ;;  %s353_s20 = scalar_lea.vmem %s679_s6, %s537_s7 }
  0x11   : > { %v361_v4 = vmul.f32 %v358_v1, %v358_v1  ;;  %v392_v22 = vld [vmem:[%s343_s15] sm:$0xff]  ;;  %v393_v23 = vld [vmem:[%s343_s15 + $0x8] sm:$0xff] }
  0x12   : > { %v369_v10 = vrot.slane %v358_v1, %v368_v9 }
  0x13   : > { %v362_v5 = vsub.f32 %v360_v3, %v361_v4 }
  0x14   : > { %v371_v15 = vsub.f32 %v355_v11, %v369_v10  ;;  %v372_v16 = vsub.f32 %v356_v12, %v369_v10 }
  0x15   : > { %v363_v6 = vadd.f32 1e-05, %v362_v5 }
  0x17   : > { %564 = vrsqrt.f32 %v363_v6 }
  0x24   : > { %v565_v14 = vpop.eup %564 }
  0x25   : > { %v374_v17 = vmul.f32 %v565_v14, %v373_v13 }
  0x27   : > { %v379_v18 = vrot.slane %v374_v17, %v368_v9 }
  0x29   : > { %v381_v20 = vmul.f32 %v379_v18, %v371_v15  ;;  %v382_v21 = vmul.f32 %v379_v18, %v372_v16 }
  0x2b   : > { %v390_v24 = vadd.f32 %v534_v19, %v381_v20  ;;  %v391_v25 = vadd.f32 %v534_v19, %v382_v21 }
  0x2d   : > { %v394_v26 = vadd.f32 %v392_v22, %v390_v24  ;;  %v395_v27 = vadd.f32 %v393_v23, %v391_v25 }
  0x2f   : > { %v396_v28 = vmax.f32 %v394_v26, 0.0  ;;  %v397_v29 = vmax.f32 %v395_v27, 0.0 }
  0x31   : > { %398 = vst [vmem:[%s353_s20] sm:$0xff] %v396_v28  ;;  %399 = vst [vmem:[%s353_s20 + $0x8] sm:$0xff] %v397_v29 }
  0x32 PF: > { %s16_s23 = sadd.s32 1, %s588_s23   ;;  %s680_s21 = smov %s584_s22 }
  0x33   : > { %p13_p5 = scmp.ge.s32.totalorder %s16_s23, 4   ;;  %s681_s22 = smov %s683_s24 }
  0x35   :  { %15 = sbr.rel (!%p13_p5) target bundleno = 2 (0x2), region = 83 }

// kernel: _lambda_.65
= control target key start
LH: loop header
LB: loop body
LE: loop exit
PB: predicated region body
PF: predicated region fallthrough
CT: control target
= control target key end

     0   :  { %s962_s9 = smov 0   ;;  %s964_s10 = smov 0   ;;  %s1075_s0 = inlined_call_operand.vmem [shape: bf16[32,1152], index: 0, kind: input, shape index: {}]   ;;  %s1076_s1 = inlined_call_operand.vmem [shape: bf16[1152,128], index: 1, kind: input, shape index: {}]   ;;  %s1077_s2 = inlined_call_operand.vmem [shape: f32[32,128], index: 2, kind: output, shape index: {}]  }
   0x1   :  { %s966_s11 = smov 0   ;;  %s968_s12 = smov 0  }
   0x2   :  { %s970_s13 = smov 0  }
   0x3 LB: > { %s24_s14 = sadd.s32 1, %s940_s12  ;;  %p47_p1 = scmp.ne.s32.totalorder %s932_s10, %s928_s9  ;;  %s944_s13 = sphi %s970_s13, %s12_s13   ;;  %s940_s12 = sphi %s968_s12, %s1081_s12   ;;  %s936_s11 = sphi %s966_s11, %s1080_s11   ;;  %s932_s10 = sphi %s964_s10, %s1079_s10   ;;  %s928_s9 = sphi %s962_s9, %s1078_s9  }
   0x4   : > { %p25_p0 = scmp.ge.s32.totalorder %s24_s14, 3  ;;  %p48_p2 = scmp.eq.s32.totalorder %s944_s13, 0 }
   0x5   : > { %s40_s16 = sadd.s32 1, %s932_s10  ;;  %p724_p5 = scmp.ge.s32.totalorder %s944_s13, 3 }
   0x6   : > { %s1083_s14 = smov (%p25_p0, %s24_s14), 0  ;;  %p49_p3 = por %p48_p2, %p47_p1 }
   0x7   : > { %s36_s15 = ssub.s32 %s940_s12, %s1083_s14  ;;  %129 = sbr.rel (%p724_p5) target bundleno = 21 (0x15), region = 16 }
   0x8   : > { %p38_p4 = scmp.eq.s32.totalorder %s36_s15, 0 }
   0xa   : > { %s997_s17 = scalar_select %p38_p4, %s932_s10, %s40_s16  }
   0xc   : > { %132 = sbr.rel (!%p49_p3) target bundleno = 21 (0x15), region = 20  ;;  %s134_s18 = sand.u32 (%p49_p3), 1, %s932_s10  }
   0xd   : > { %s772_s19 = smul.u32 (%p49_p3), 12, %s940_s12 }
   0xe   : > { %s831_s20 = smul.u32 (%p49_p3), 48, %s134_s18 }
   0xf   : > { %s142_s23 = scalar_lea.vmem (%p49_p3), %s1075_s0, %s772_s19 }
  0x10   : > { %v157_v0 = vld [vmem:[%s142_s23] sm:$0xff] (%p49_p3)  ;;  %v161_v2 = vld [vmem:[%s142_s23 + $0x48] sm:$0xff] (%p49_p3)  ;;  %s136_s24 = scalar_lea.vmem (%p49_p3), [#allocation3], %s831_s20  ;;  %v730_v6 = vld [vmem:[%s142_s23 + $0x50] sm:$0xf] (%p49_p3) }
  0x11   : > { %v159_v1 = vld [vmem:[%s142_s23 + $0x24] sm:$0xff]  ;;  %158 = vst [vmem:[%s136_s24] sm:$0xff] %v157_v0  ;;  %162 = vst [vmem:[%s136_s24 + $0x18] sm:$0xff] %v161_v2  ;;  %v163_v3 = vld [vmem:[%s142_s23 + $0x6c] sm:$0xff] }
  0x12   : > { %160 = vst [vmem:[%s136_s24 + $0xc] sm:$0xff] %v159_v1  ;;  %v726_v4 = vld [vmem:[%s142_s23 + $0x8] sm:$0xf]  ;;  %v728_v5 = vld [vmem:[%s142_s23 + $0x2c] sm:$0xf]  ;;  %164 = vst [vmem:[%s136_s24 + $0x24] sm:$0xff] %v163_v3 }
  0x13   : > { %727 = vst [vmem:[%s136_s24 + $0x8] sm:$0xf] %v726_v4  ;;  %729 = vst [vmem:[%s136_s24 + $0x14] sm:$0xf] %v728_v5  ;;  %v732_v7 = vld [vmem:[%s142_s23 + $0x74] sm:$0xf] }
  0x14   : > { %731 = vst [vmem:[%s136_s24 + $0x20] sm:$0xf] %v730_v6  ;;  %733 = vst [vmem:[%s136_s24 + $0x2c] sm:$0xf] %v732_v7 }
  0x15 PF: > { %p734_p6 = scmp.ge.s32.totalorder %s944_s13, 1  ;;  %p197_p7 = scmp.lt.s32.totalorder %s944_s13, 4 }
  0x17   : > { %p198_p8 = pnand %p734_p6, %p197_p7 }
  0x18   : > { %s204_s25 = sand.u32 (!%p198_p8), 1, %s928_s9   ;;  %s238_s26 = smul.u32 (!%p198_p8), 48, %s936_s11 }
  0x19   : > { %201 = sbr.rel (%p198_p8) target bundleno = 293 (0x125), region = 50  ;;  %p736_p10 = scmp.ne.s32.totalorder (!%p198_p8), %s936_s11, 0 }
  0x1a   : > { %s832_s27 = smul.u32 (!%p198_p8), 48, %s204_s25  ;;  %p239_p9 = scmp.lt.s32.totalorder (!%p198_p8), %s238_s26, 143 }
  0x1c   : > { %s1014_s4 = scalar_lea.vmem (!%p198_p8), [#allocation3], %s832_s27 }
  0x1e   : > { %s1085_s26 = smov (!%p239_p9, %s238_s26), 143  ;;  %260 = sbr.rel (%p736_p10) target bundleno = 38 (0x26), region = 58 }
  0x1f   : > { %s735_s28 = sshll.u32 %s1085_s26, 2 }
  0x20   : > { %s1012_s3 = scalar_lea.vmem %s1076_s1, %s735_s28 }
  0x23   : > { %v946_v8 = vmov 0.0  }
  0x24   : > { %261 = vst [vmem:[#allocation2 + $0x10] sm:$0xff] %v946_v8  ;;  %262 = vst [vmem:[#allocation2] sm:$0xff] %v946_v8 }
  0x25   : > { %263 = vst [vmem:[#allocation2 + $0x18] sm:$0xff] %v946_v8  ;;  %264 = vst [vmem:[#allocation2 + $0x8] sm:$0xff] %v946_v8 }
  0x26 PF: > { %v874_v9 = vld [vmem:[%s1012_s3 + $0x78] sm:$0xff]   ;;  %v877_v12 = vld [vmem:[%s1012_s3 + $0x70] sm:$0xff]   ;;  %v880_v15 = vld [vmem:[%s1012_s3 + $0x68] sm:$0xff]   ;;  %p767_p11 = scmp.ne.s32.totalorder %s936_s11, 2 }
  0x27   : > { %v875_v10 = vld [vmem:[%s1012_s3 + $0x38] sm:$0xff]   ;;  %773 = vmatprep.subr.bf16.mxu0 %v874_v9  ;;  %v878_v13 = vld [vmem:[%s1012_s3 + $0x30] sm:$0xff]   ;;  %v881_v16 = vld [vmem:[%s1012_s3 + $0x28] sm:$0xff]  }
  0x28   : > { %v876_v11 = vld [vmem:[%s1012_s3 + $0xb8] sm:$0xff]   ;;  %774 = vmatpush3.bf16.msra.mxu0 %v875_v10  ;;  %v879_v14 = vld [vmem:[%s1012_s3 + $0xb0] sm:$0xff]   ;;  %v882_v17 = vld [vmem:[%s1012_s3 + $0xa8] sm:$0xff]  }
  0x29   : > { %811 = vmatprep.subr.bf16.mxu1 %v876_v11  ;;  %775 = vmatprep.subr.bf16.mxu0 %v877_v12  ;;  %v883_v18 = vld [vmem:[%s1012_s3 + $0x60] sm:$0xff]   ;;  %v886_v21 = vld [vmem:[%s1012_s3 + $0x58] sm:$0xff]   ;;  %v889_v24 = vld [vmem:[%s1012_s3 + $0x50] sm:$0xff]  }
  0x2a   : > { %812 = vmatpush3.bf16.msra.mxu1 %v876_v11  ;;  %v884_v19 = vld [vmem:[%s1012_s3 + $0x20] sm:$0xff]   ;;  %v888_v22 = vld [vmem:[%s1012_s3 + $0x98] sm:$0xff]   ;;  %v891_v25 = vld [vmem:[%s1012_s3 + $0x90] sm:$0xff]  }
  0x2b   : > { %813 = vmatprep.subr.bf16.mxu1 %v879_v14  ;;  %v885_v20 = vld [vmem:[%s1012_s3 + $0xa0] sm:$0xff]   ;;  %v887_v23 = vld [vmem:[%s1012_s3 + $0x18] sm:$0xff]   ;;  %v890_v26 = vld [vmem:[%s1012_s3 + $0x10] sm:$0xff]  }
  0x2c   : > { %776 = vmatpush3.bf16.msra.mxu0 %v878_v13  ;;  %v892_v27 = vld [vmem:[%s1012_s3 + $0x48] sm:$0xff]   ;;  %v895_v30 = vld [vmem:[%s1012_s3 + $0x40] sm:$0xff]   ;;  %v265_v44 = vld [vmem:[#allocation2 + $0x10] sm:$0xff] }
  0x2d   : > { %777 = vmatprep.subr.bf16.mxu0 %v880_v15  ;;  %v893_v28 = vld [vmem:[%s1012_s3 + $0x8] sm:$0xff]   ;;  %v897_v31 = vld [vmem:[%s1012_s3 + $0x80] sm:$0xff]   ;;  %v267_v58 = vld [vmem:[#allocation2 + $0x18] sm:$0xff] }
  0x2e   : > { %814 = vmatpush3.bf16.msra.mxu1 %v879_v14  ;;  %v894_v29 = vld [vmem:[%s1012_s3 + $0x88] sm:$0xff]   ;;  %v900_v32 = vld [vmem:[%s1014_s4 + $0x4] ss:$12 sps:$4 sm:$0xff]  }
  0x2f   : > { %815 = vmatprep.subr.bf16.mxu1 %v882_v17  ;;  %v901_v33 = vld [vmem:[%s1014_s4 + $0x8] ss:$12 sps:$4 sm:$0xff]   ;;  %533 = vmatprep.mubr.bf16.mxu0 %v900_v32  ;;  %v898_v35 = vld [vmem:[%s1014_s4] ss:$12 sps:$4 sm:$0xff]   ;;  %v905_v38 = vld [vmem:[%s1014_s4 + $0x18] ss:$12 sps:$4 sm:$0xff]  }
  0x30   : > { %778 = vmatpush3.bf16.msra.mxu0 %v881_v16  ;;  %v896_v34 = vld [vmem:[%s1012_s3] sm:$0xff]   ;;  %827 = vmatprep.mubr.bf16.mxu1 %v901_v33  ;;  %v903_v36 = vld [vmem:[%s1014_s4 + $0x1c] ss:$12 sps:$4 sm:$0xff]  }
  0x31   : > { %779 = vmatprep.subr.bf16.mxu0 %v883_v18  ;;  %v902_v37 = vld [vmem:[%s1014_s4 + $0x20] ss:$12 sps:$4 sm:$0xff]  }
  0x32   : > { %816 = vmatpush3.bf16.msra.mxu1 %v882_v17  ;;  %v266_v52 = vld [vmem:[#allocation2] sm:$0xff]  ;;  %v268_v0 = vld [vmem:[#allocation2 + $0x8] sm:$0xff] }
  0x33   : > { %817 = vmatprep.subr.bf16.mxu1 %v885_v20 }
  0x34   : > { %780 = vmatpush3.bf16.msra.mxu0 %v884_v19 }
  0x35   : > { %781 = vmatprep.subr.bf16.mxu0 %v886_v21 }
  0x36   : > { %818 = vmatpush3.bf16.msra.mxu1 %v885_v20 }
  0x37   : > { %819 = vmatprep.subr.bf16.mxu1 %v888_v22 }
  0x38   : > { %782 = vmatpush3.bf16.msra.mxu0 %v887_v23 }
  0x39   : > { %783 = vmatprep.subr.bf16.mxu0 %v889_v24 }
  0x3a   : > { %820 = vmatpush3.bf16.msra.mxu1 %v888_v22 }
  0x3b   : > { %821 = vmatprep.subr.bf16.mxu1 %v891_v25 }
  0x3c   : > { %784 = vmatpush3.bf16.msra.mxu0 %v890_v26 }
  0x3d   : > { %785 = vmatprep.subr.bf16.mxu0 %v892_v27 }
  0x3e   : > { %822 = vmatpush3.bf16.msra.mxu1 %v891_v25 }
  0x3f   : > { %823 = vmatprep.subr.bf16.mxu1 %v894_v29 }
  0x40   : > { %786 = vmatpush3.bf16.msra.mxu0 %v893_v28 }
  0x41   : > { %787 = vmatprep.subr.bf16.mxu0 %v895_v30 }
  0x42   : > { %824 = vmatpush3.bf16.msra.mxu1 %v894_v29 }
  0x43   : > { %825 = vmatprep.subr.bf16.mxu1 %v897_v31 }
  0x44   : > { %788 = vmatpush3.bf16.msra.mxu0 %v896_v34 }
  0x46   : > { %826 = vmatpush3.bf16.msra.mxu1 %v897_v31 }
  0x47   : > { %534 = vmatmul.mubr.bf16.vlgmr.msra.gmra.mxu0 %v898_v35 }
  0x48   : > { %541 = vmatprep.mubr.bf16.mxu0 %v903_v36 }
  0x49   : > { %828 = vmatmul.mubr.bf16.vlgmr.msra.gmra.mxu1 %v902_v37 }
  0x4f   : > { %542 = vmatmul.mubr.bf16.gmra.mxu0 %v905_v38 }
 0x107   : > { %v789_v39 = vpop.f32.mrf.mxu0 }
 0x109   : > { %v790_v40 = vpop.f32.mrf.mxu0  ;;  %v829_v41 = vpop.f32.mrf.mxu1 }
 0x10a   : > { %v791_v42 = vadd.f32 %v790_v40, %v789_v39 }
 0x10b   : > { %v792_v43 = vpop.f32.mrf.mxu0  ;;  %v584_v45 = vpop.f32.mrf.mxu1 }
 0x10c   : > { %v585_v46 = vadd.f32 %v791_v42, %v584_v45 }
 0x10d   : > { %v793_v47 = vpop.f32.mrf.mxu0  ;;  %v830_v48 = vpop.f32.mrf.mxu1 }
 0x10e   : > { %v599_v49 = vadd.f32 %v585_v46, %v265_v44  ;;  %v794_v50 = vadd.f32 %v793_v47, %v792_v43 }
 0x10f   : > { %v795_v51 = vpop.f32.mrf.mxu0  ;;  %v587_v53 = vpop.f32.mrf.mxu1 }
 0x110   : > { %603 = vst [vmem:[#allocation2 + $0x10] sm:$0xff] %v599_v49  ;;  %v588_v54 = vadd.f32 %v794_v50, %v587_v53 }
 0x111   : > { %v796_v55 = vpop.f32.mrf.mxu0 }
 0x112   : > { %v600_v56 = vadd.f32 %v588_v54, %v266_v52  ;;  %v797_v57 = vadd.f32 %v796_v55, %v795_v51 }
 0x113   : > { %v798_v59 = vpop.f32.mrf.mxu0 }
 0x114   : > { %604 = vst [vmem:[#allocation2] sm:$0xff] %v600_v56  ;;  %v593_v60 = vadd.f32 %v829_v41, %v797_v57 }
 0x115   : > { %v799_v61 = vpop.f32.mrf.mxu0 }
 0x116   : > { %v601_v62 = vadd.f32 %v593_v60, %v267_v58  ;;  %v800_v63 = vadd.f32 %v799_v61, %v798_v59 }
 0x118   : > { %605 = vst [vmem:[#allocation2 + $0x18] sm:$0xff] %v601_v62  ;;  %v596_v1 = vadd.f32 %v830_v48, %v800_v63  ;;  %610 = sbr.rel (%p767_p11) target bundleno = 293 (0x125), region = 62 }
 0x11a   : > { %v602_v2 = vadd.f32 %v596_v1, %v268_v0 }
 0x11c   : > { %606 = vst [vmem:[#allocation2 + $0x8] sm:$0xff] %v602_v2 }
 0x11d   : > { %v611_v3 = vld [vmem:[#allocation2 + $0x10] sm:$0xff]  ;;  %v612_v4 = vld [vmem:[#allocation2] sm:$0xff] }
 0x11e   : > { %615 = vst [vmem:[%s1077_s2] sm:$0xff] %v611_v3  ;;  %616 = vst [vmem:[%s1077_s2 + $0x8] sm:$0xff] %v612_v4 }
 0x11f   : > { %v613_v5 = vld [vmem:[#allocation2 + $0x18] sm:$0xff] }
 0x120   : > { %617 = vst [vmem:[%s1077_s2 + $0x10] sm:$0xff] %v613_v5 }
 0x123   : > { %v614_v6 = vld [vmem:[#allocation2 + $0x8] sm:$0xff] }
 0x124   : > { %618 = vst [vmem:[%s1077_s2 + $0x18] sm:$0xff] %v614_v6 }
 0x125 PF: > { %s12_s13 = sadd.s32 1, %s944_s13   ;;  %s1078_s9 = smov %s932_s10 }
 0x126   : > { %p9_p12 = scmp.ge.s32.totalorder %s12_s13, 5   ;;  %s1079_s10 = smov %s997_s17 }
 0x127   : > { %s1080_s11 = smov %s940_s12  ;;  %s1081_s12 = smov %s1083_s14 }
 0x128   :  { %11 = sbr.rel (!%p9_p12) target bundleno = 3 (0x3), region = 106 }

// kernel: _lambda_.95
= control target key start
LH: loop header
LB: loop body
LE: loop exit
PB: predicated region body
PF: predicated region fallthrough
CT: control target
= control target key end

     0   :  { %s1418_s9 = smov 0   ;;  %s1420_s10 = smov 0   ;;  %s1653_s0 = inlined_call_operand.vmem [shape: bf16[128,1152], index: 0, kind: input, shape index: {}]   ;;  %s1654_s1 = inlined_call_operand.vmem [shape: bf16[1152,128], index: 1, kind: input, shape index: {}]   ;;  %s1655_s2 = inlined_call_operand.vmem [shape: f32[128,128], index: 2, kind: output, shape index: {}]  }
   0x1   :  { %s1422_s11 = smov 0   ;;  %s1424_s12 = smov 0  }
   0x2   :  { %s1426_s13 = smov 0  }
   0x3 LB: > { %s24_s14 = sadd.s32 1, %s1396_s12  ;;  %p47_p1 = scmp.ne.s32.totalorder %s1388_s10, %s1384_s9  ;;  %s1400_s13 = sphi %s1426_s13, %s12_s13   ;;  %s1396_s12 = sphi %s1424_s12, %s1659_s12   ;;  %s1392_s11 = sphi %s1422_s11, %s1658_s11   ;;  %s1388_s10 = sphi %s1420_s10, %s1657_s10   ;;  %s1384_s9 = sphi %s1418_s9, %s1656_s9  }
   0x4   : > { %p25_p0 = scmp.ge.s32.totalorder %s24_s14, 3  ;;  %p48_p2 = scmp.eq.s32.totalorder %s1400_s13, 0 }
   0x5   : > { %s40_s16 = sadd.s32 1, %s1388_s10  ;;  %p1060_p5 = scmp.ge.s32.totalorder %s1400_s13, 3 }
   0x6   : > { %s1661_s14 = smov (%p25_p0, %s24_s14), 0  ;;  %p49_p3 = por %p48_p2, %p47_p1 }
   0x7   : > { %s36_s15 = ssub.s32 %s1396_s12, %s1661_s14  ;;  %129 = sbr.rel (%p1060_p5) target bundleno = 35 (0x23), region = 16 }
   0x8   : > { %p38_p4 = scmp.eq.s32.totalorder %s36_s15, 0 }
   0xa   : > { %s1453_s17 = scalar_select %p38_p4, %s1388_s10, %s40_s16  }
   0xc   : > { %132 = sbr.rel (!%p49_p3) target bundleno = 35 (0x23), region = 20  ;;  %s134_s18 = sand.u32 (%p49_p3), 1, %s1388_s10  }
   0xd   : > { %s1150_s19 = smul.u32 (%p49_p3), 12, %s1396_s12 }
   0xe   : > { %s1263_s20 = smul.u32 (%p49_p3), 192, %s134_s18 }
   0xf   : > { %s1461_s23 = scalar_lea.vmem (%p49_p3), %s1653_s0, %s1150_s19 }
  0x10   : > { %v157_v0 = vld [vmem:[%s1461_s23] sm:$0xff] (%p49_p3)  ;;  %v161_v2 = vld [vmem:[%s1461_s23 + $0x48] sm:$0xff] (%p49_p3)  ;;  %s1466_s24 = scalar_lea.vmem (%p49_p3), [#allocation3], %s1263_s20  ;;  %v165_v4 = vld [vmem:[%s1461_s23 + $0x90] sm:$0xff] (%p49_p3) }
  0x11   : > { %v159_v1 = vld [vmem:[%s1461_s23 + $0x24] sm:$0xff]  ;;  %158 = vst [vmem:[%s1466_s24] sm:$0xff] %v157_v0  ;;  %162 = vst [vmem:[%s1466_s24 + $0x18] sm:$0xff] %v161_v2  ;;  %v163_v3 = vld [vmem:[%s1461_s23 + $0x6c] sm:$0xff] }
  0x12   : > { %160 = vst [vmem:[%s1466_s24 + $0xc] sm:$0xff] %v159_v1  ;;  %v167_v5 = vld [vmem:[%s1461_s23 + $0xb4] sm:$0xff]  ;;  %164 = vst [vmem:[%s1466_s24 + $0x24] sm:$0xff] %v163_v3  ;;  %v171_v7 = vld [vmem:[%s1461_s23 + $0xfc] sm:$0xff] }
  0x13   : > { %166 = vst [vmem:[%s1466_s24 + $0x30] sm:$0xff] %v165_v4  ;;  %168 = vst [vmem:[%s1466_s24 + $0x3c] sm:$0xff] %v167_v5  ;;  %v169_v6 = vld [vmem:[%s1461_s23 + $0xd8] sm:$0xff]  ;;  %v173_v8 = vld [vmem:[%s1461_s23 + $0x120] sm:$0xff] }
  0x14   : > { %170 = vst [vmem:[%s1466_s24 + $0x48] sm:$0xff] %v169_v6  ;;  %172 = vst [vmem:[%s1466_s24 + $0x54] sm:$0xff] %v171_v7  ;;  %v175_v9 = vld [vmem:[%s1461_s23 + $0x144] sm:$0xff]  ;;  %v179_v11 = vld [vmem:[%s1461_s23 + $0x18c] sm:$0xff] }
  0x15   : > { %174 = vst [vmem:[%s1466_s24 + $0x60] sm:$0xff] %v173_v8  ;;  %v177_v10 = vld [vmem:[%s1461_s23 + $0x168] sm:$0xff]  ;;  %176 = vst [vmem:[%s1466_s24 + $0x6c] sm:$0xff] %v175_v9  ;;  %v181_v12 = vld [vmem:[%s1461_s23 + $0x1b0] sm:$0xff] }
  0x16   : > { %178 = vst [vmem:[%s1466_s24 + $0x78] sm:$0xff] %v177_v10  ;;  %180 = vst [vmem:[%s1466_s24 + $0x84] sm:$0xff] %v179_v11  ;;  %v183_v13 = vld [vmem:[%s1461_s23 + $0x1d4] sm:$0xff]  ;;  %v187_v15 = vld [vmem:[%s1461_s23 + $0x21c] sm:$0xff] }
  0x17   : > { %v185_v14 = vld [vmem:[%s1461_s23 + $0x1f8] sm:$0xff]  ;;  %182 = vst [vmem:[%s1466_s24 + $0x90] sm:$0xff] %v181_v12  ;;  %184 = vst [vmem:[%s1466_s24 + $0x9c] sm:$0xff] %v183_v13  ;;  %v1062_v16 = vld [vmem:[%s1461_s23 + $0x8] sm:$0xf] }
  0x18   : > { %186 = vst [vmem:[%s1466_s24 + $0xa8] sm:$0xff] %v185_v14  ;;  %v1064_v17 = vld [vmem:[%s1461_s23 + $0x2c] sm:$0xf]  ;;  %188 = vst [vmem:[%s1466_s24 + $0xb4] sm:$0xff] %v187_v15  ;;  %v1066_v18 = vld [vmem:[%s1461_s23 + $0x50] sm:$0xf] }
  0x19   : > { %1063 = vst [vmem:[%s1466_s24 + $0x8] sm:$0xf] %v1062_v16  ;;  %1065 = vst [vmem:[%s1466_s24 + $0x14] sm:$0xf] %v1064_v17  ;;  %v1068_v19 = vld [vmem:[%s1461_s23 + $0x74] sm:$0xf] }
  0x1a   : > { %v1070_v20 = vld [vmem:[%s1461_s23 + $0x98] sm:$0xf]  ;;  %1067 = vst [vmem:[%s1466_s24 + $0x20] sm:$0xf] %v1066_v18  ;;  %1069 = vst [vmem:[%s1466_s24 + $0x2c] sm:$0xf] %v1068_v19 }
  0x1b   : > { %1071 = vst [vmem:[%s1466_s24 + $0x38] sm:$0xf] %v1070_v20  ;;  %v1072_v21 = vld [vmem:[%s1461_s23 + $0xbc] sm:$0xf]  ;;  %v1074_v22 = vld [vmem:[%s1461_s23 + $0xe0] sm:$0xf] }
  0x1c   : > { %v1076_v23 = vld [vmem:[%s1461_s23 + $0x104] sm:$0xf]  ;;  %1073 = vst [vmem:[%s1466_s24 + $0x44] sm:$0xf] %v1072_v21  ;;  %1075 = vst [vmem:[%s1466_s24 + $0x50] sm:$0xf] %v1074_v22 }
  0x1d   : > { %1077 = vst [vmem:[%s1466_s24 + $0x5c] sm:$0xf] %v1076_v23  ;;  %v1078_v24 = vld [vmem:[%s1461_s23 + $0x128] sm:$0xf]  ;;  %v1080_v25 = vld [vmem:[%s1461_s23 + $0x14c] sm:$0xf] }
  0x1e   : > { %v1082_v26 = vld [vmem:[%s1461_s23 + $0x170] sm:$0xf]  ;;  %1079 = vst [vmem:[%s1466_s24 + $0x68] sm:$0xf] %v1078_v24  ;;  %1081 = vst [vmem:[%s1466_s24 + $0x74] sm:$0xf] %v1080_v25 }
  0x1f   : > { %1083 = vst [vmem:[%s1466_s24 + $0x80] sm:$0xf] %v1082_v26  ;;  %v1084_v27 = vld [vmem:[%s1461_s23 + $0x194] sm:$0xf]  ;;  %v1086_v28 = vld [vmem:[%s1461_s23 + $0x1b8] sm:$0xf] }
  0x20   : > { %v1088_v29 = vld [vmem:[%s1461_s23 + $0x1dc] sm:$0xf]  ;;  %1085 = vst [vmem:[%s1466_s24 + $0x8c] sm:$0xf] %v1084_v27  ;;  %1087 = vst [vmem:[%s1466_s24 + $0x98] sm:$0xf] %v1086_v28 }
  0x21   : > { %1089 = vst [vmem:[%s1466_s24 + $0xa4] sm:$0xf] %v1088_v29  ;;  %v1090_v30 = vld [vmem:[%s1461_s23 + $0x200] sm:$0xf]  ;;  %v1092_v31 = vld [vmem:[%s1461_s23 + $0x224] sm:$0xf] }
  0x22   : > { %1091 = vst [vmem:[%s1466_s24 + $0xb0] sm:$0xf] %v1090_v30  ;;  %1093 = vst [vmem:[%s1466_s24 + $0xbc] sm:$0xf] %v1092_v31 }
  0x23 PF: > { %p1094_p6 = scmp.ge.s32.totalorder %s1400_s13, 1  ;;  %p245_p7 = scmp.lt.s32.totalorder %s1400_s13, 4 }
  0x25   : > { %p246_p8 = pnand %p1094_p6, %p245_p7 }
  0x26   : > { %s252_s25 = sand.u32 (!%p246_p8), 1, %s1384_s9   ;;  %s286_s26 = smul.u32 (!%p246_p8), 48, %s1392_s11 }
  0x27   : > { %249 = sbr.rel (%p246_p8) target bundleno = 362 (0x16a), region = 50  ;;  %p1096_p10 = scmp.ne.s32.totalorder (!%p246_p8), %s1392_s11, 0 }
  0x28   : > { %s1264_s27 = smul.u32 (!%p246_p8), 192, %s252_s25  ;;  %p287_p9 = scmp.lt.s32.totalorder (!%p246_p8), %s286_s26, 143 }
  0x2a   : > { %s1538_s4 = scalar_lea.vmem (!%p246_p8), [#allocation3], %s1264_s27 }
  0x2c   : > { %s1663_s26 = smov (!%p287_p9, %s286_s26), 143  ;;  %308 = sbr.rel (%p1096_p10) target bundleno = 58 (0x3a), region = 58 }
  0x2d   : > { %s1095_s28 = sshll.u32 %s1663_s26, 2 }
  0x2e   : > { %s1536_s3 = scalar_lea.vmem %s1654_s1, %s1095_s28 }
  0x31   : > { %v1402_v32 = vmov 0.0  }
  0x32   : > { %309 = vst [vmem:[#allocation2 + $0x30] sm:$0xff] %v1402_v32  ;;  %310 = vst [vmem:[#allocation2] sm:$0xff] %v1402_v32 }
  0x33   : > { %311 = vst [vmem:[#allocation2 + $0x58] sm:$0xff] %v1402_v32  ;;  %312 = vst [vmem:[#allocation2 + $0x18] sm:$0xff] %v1402_v32 }
  0x34   : > { %313 = vst [vmem:[#allocation2 + $0x50] sm:$0xff] %v1402_v32  ;;  %314 = vst [vmem:[#allocation2 + $0x68] sm:$0xff] %v1402_v32 }
  0x35   : > { %315 = vst [vmem:[#allocation2 + $0x8] sm:$0xff] %v1402_v32  ;;  %316 = vst [vmem:[#allocation2 + $0x48] sm:$0xff] %v1402_v32 }
  0x36   : > { %317 = vst [vmem:[#allocation2 + $0x40] sm:$0xff] %v1402_v32  ;;  %318 = vst [vmem:[#allocation2 + $0x20] sm:$0xff] %v1402_v32 }
  0x37   : > { %319 = vst [vmem:[#allocation2 + $0x10] sm:$0xff] %v1402_v32  ;;  %320 = vst [vmem:[#allocation2 + $0x38] sm:$0xff] %v1402_v32 }
  0x38   : > { %321 = vst [vmem:[#allocation2 + $0x60] sm:$0xff] %v1402_v32  ;;  %322 = vst [vmem:[#allocation2 + $0x70] sm:$0xff] %v1402_v32 }
  0x39   : > { %323 = vst [vmem:[#allocation2 + $0x78] sm:$0xff] %v1402_v32  ;;  %324 = vst [vmem:[#allocation2 + $0x28] sm:$0xff] %v1402_v32 }
  0x3a PF: > { %v1306_v33 = vld [vmem:[%s1536_s3 + $0x78] sm:$0xff]   ;;  %v1309_v36 = vld [vmem:[%s1536_s3 + $0x70] sm:$0xff]   ;;  %v1312_v39 = vld [vmem:[%s1536_s3 + $0x68] sm:$0xff]   ;;  %p1145_p11 = scmp.ne.s32.totalorder %s1392_s11, 2 }
  0x3b   : > { %v1307_v34 = vld [vmem:[%s1536_s3 + $0x38] sm:$0xff]   ;;  %1151 = vmatprep.subr.bf16.mxu0 %v1306_v33  ;;  %v1310_v37 = vld [vmem:[%s1536_s3 + $0x30] sm:$0xff]   ;;  %v1313_v40 = vld [vmem:[%s1536_s3 + $0x28] sm:$0xff]  }
  0x3c   : > { %v1308_v35 = vld [vmem:[%s1536_s3 + $0xb8] sm:$0xff]   ;;  %1152 = vmatpush3.bf16.msra.mxu0 %v1307_v34  ;;  %v1311_v38 = vld [vmem:[%s1536_s3 + $0xb0] sm:$0xff]   ;;  %v1314_v41 = vld [vmem:[%s1536_s3 + $0xa8] sm:$0xff]  }
  0x3d   : > { %1231 = vmatprep.subr.bf16.mxu1 %v1308_v35  ;;  %1153 = vmatprep.subr.bf16.mxu0 %v1309_v36  ;;  %v1315_v42 = vld [vmem:[%s1536_s3 + $0x60] sm:$0xff]   ;;  %v1318_v45 = vld [vmem:[%s1536_s3 + $0x58] sm:$0xff]   ;;  %v1321_v48 = vld [vmem:[%s1536_s3 + $0x50] sm:$0xff]  }
  0x3e   : > { %1232 = vmatpush3.bf16.msra.mxu1 %v1308_v35  ;;  %v1316_v43 = vld [vmem:[%s1536_s3 + $0x20] sm:$0xff]   ;;  %v1320_v46 = vld [vmem:[%s1536_s3 + $0x98] sm:$0xff]   ;;  %v1323_v49 = vld [vmem:[%s1536_s3 + $0x90] sm:$0xff]  }
  0x3f   : > { %1233 = vmatprep.subr.bf16.mxu1 %v1311_v38  ;;  %v1317_v44 = vld [vmem:[%s1536_s3 + $0xa0] sm:$0xff]   ;;  %v1319_v47 = vld [vmem:[%s1536_s3 + $0x18] sm:$0xff]   ;;  %v1322_v50 = vld [vmem:[%s1536_s3 + $0x10] sm:$0xff]  }
  0x40   : > { %1154 = vmatpush3.bf16.msra.mxu0 %v1310_v37  ;;  %v1324_v51 = vld [vmem:[%s1536_s3 + $0x48] sm:$0xff]   ;;  %v1327_v54 = vld [vmem:[%s1536_s3 + $0x40] sm:$0xff]   ;;  %v1342_v1 = vld [vmem:[%s1538_s4 + $0x50] ss:$12 sps:$4 sm:$0xff]  }
  0x41   : > { %1155 = vmatprep.subr.bf16.mxu0 %v1312_v39  ;;  %v1325_v52 = vld [vmem:[%s1536_s3 + $0x8] sm:$0xff]   ;;  %v1329_v55 = vld [vmem:[%s1536_s3 + $0x80] sm:$0xff]   ;;  %v1340_v3 = vld [vmem:[%s1538_s4 + $0x30] ss:$12 sps:$4 sm:$0xff]  }
  0x42   : > { %1234 = vmatpush3.bf16.msra.mxu1 %v1311_v38  ;;  %v1326_v53 = vld [vmem:[%s1536_s3 + $0x88] sm:$0xff]   ;;  %v1332_v56 = vld [vmem:[%s1538_s4 + $0x4] ss:$12 sps:$4 sm:$0xff]   ;;  %v1338_v0 = vld [vmem:[%s1538_s4 + $0x34] ss:$12 sps:$4 sm:$0xff]  }
  0x43   : > { %1235 = vmatprep.subr.bf16.mxu1 %v1314_v41  ;;  %v1333_v57 = vld [vmem:[%s1538_s4 + $0x8] ss:$12 sps:$4 sm:$0xff]   ;;  %v1328_v58 = vld [vmem:[%s1536_s3] sm:$0xff]   ;;  %725 = vmatprep.mubr.bf16.mxu0 %v1332_v56  ;;  %v1343_v4 = vld [vmem:[%s1538_s4 + $0x4c] ss:$12 sps:$4 sm:$0xff]  }
  0x44   : > { %1156 = vmatpush3.bf16.msra.mxu0 %v1313_v40  ;;  %1247 = vmatprep.mubr.bf16.mxu1 %v1333_v57  ;;  %v1330_v59 = vld [vmem:[%s1538_s4] ss:$12 sps:$4 sm:$0xff]   ;;  %v1335_v60 = vld [vmem:[%s1538_s4 + $0x1c] ss:$12 sps:$4 sm:$0xff]   ;;  %v1341_v62 = vld [vmem:[%s1538_s4 + $0x38] ss:$12 sps:$4 sm:$0xff]  }
  0x45   : > { %1157 = vmatprep.subr.bf16.mxu0 %v1315_v42  ;;  %v1334_v61 = vld [vmem:[%s1538_s4 + $0x20] ss:$12 sps:$4 sm:$0xff]   ;;  %v1337_v63 = vld [vmem:[%s1538_s4 + $0x18] ss:$12 sps:$4 sm:$0xff]   ;;  %v1349_v2 = vld [vmem:[%s1538_s4 + $0x68] ss:$12 sps:$4 sm:$0xff]  }
  0x46   : > { %1236 = vmatpush3.bf16.msra.mxu1 %v1314_v41  ;;  %v1350_v5 = vld [vmem:[%s1538_s4 + $0x80] ss:$12 sps:$4 sm:$0xff]   ;;  %v1357_v6 = vld [vmem:[%s1538_s4 + $0x98] ss:$12 sps:$4 sm:$0xff]   ;;  %v1345_v7 = vld [vmem:[%s1538_s4 + $0x48] ss:$12 sps:$4 sm:$0xff]  }
  0x47   : > { %1237 = vmatprep.subr.bf16.mxu1 %v1317_v44  ;;  %v1346_v8 = vld [vmem:[%s1538_s4 + $0x64] ss:$12 sps:$4 sm:$0xff]   ;;  %v1348_v10 = vld [vmem:[%s1538_s4 + $0x60] ss:$12 sps:$4 sm:$0xff]   ;;  %v1351_v11 = vld [vmem:[%s1538_s4 + $0x7c] ss:$12 sps:$4 sm:$0xff]  }
  0x48   : > { %1158 = vmatpush3.bf16.msra.mxu0 %v1316_v43  ;;  %v1358_v9 = vld [vmem:[%s1538_s4 + $0xb0] ss:$12 sps:$4 sm:$0xff]   ;;  %v1353_v12 = vld [vmem:[%s1538_s4 + $0x78] ss:$12 sps:$4 sm:$0xff]   ;;  %v1354_v13 = vld [vmem:[%s1538_s4 + $0x94] ss:$12 sps:$4 sm:$0xff]  }
  0x49   : > { %1159 = vmatprep.subr.bf16.mxu0 %v1318_v45  ;;  %v1356_v14 = vld [vmem:[%s1538_s4 + $0x90] ss:$12 sps:$4 sm:$0xff]   ;;  %v1359_v15 = vld [vmem:[%s1538_s4 + $0xac] ss:$12 sps:$4 sm:$0xff]   ;;  %v1361_v16 = vld [vmem:[%s1538_s4 + $0xa8] ss:$12 sps:$4 sm:$0xff]  }
  0x4a   : > { %1238 = vmatpush3.bf16.msra.mxu1 %v1317_v44  ;;  %v325_v22 = vld [vmem:[#allocation2 + $0x30] sm:$0xff]  ;;  %v326_v30 = vld [vmem:[#allocation2] sm:$0xff]  ;;  %v327_v37 = vld [vmem:[#allocation2 + $0x58] sm:$0xff] }
  0x4b   : > { %1239 = vmatprep.subr.bf16.mxu1 %v1320_v46  ;;  %v328_v44 = vld [vmem:[#allocation2 + $0x18] sm:$0xff] }
  0x4c   : > { %1160 = vmatpush3.bf16.msra.mxu0 %v1319_v47 }
  0x4d   : > { %1161 = vmatprep.subr.bf16.mxu0 %v1321_v48 }
  0x4e   : > { %1240 = vmatpush3.bf16.msra.mxu1 %v1320_v46 }
  0x4f   : > { %1241 = vmatprep.subr.bf16.mxu1 %v1323_v49 }
  0x50   : > { %1162 = vmatpush3.bf16.msra.mxu0 %v1322_v50 }
  0x51   : > { %1163 = vmatprep.subr.bf16.mxu0 %v1324_v51 }
  0x52   : > { %1242 = vmatpush3.bf16.msra.mxu1 %v1323_v49 }
  0x53   : > { %1243 = vmatprep.subr.bf16.mxu1 %v1326_v53 }
  0x54   : > { %1164 = vmatpush3.bf16.msra.mxu0 %v1325_v52  ;;  %v329_v52 = vld [vmem:[#allocation2 + $0x50] sm:$0xff] }
  0x55   : > { %1165 = vmatprep.subr.bf16.mxu0 %v1327_v54 }
  0x56   : > { %1244 = vmatpush3.bf16.msra.mxu1 %v1326_v53 }
  0x57   : > { %1245 = vmatprep.subr.bf16.mxu1 %v1329_v55 }
  0x58   : > { %1166 = vmatpush3.bf16.msra.mxu0 %v1328_v58 }
  0x5a   : > { %1246 = vmatpush3.bf16.msra.mxu1 %v1329_v55 }
  0x5b   : > { %726 = vmatmul.mubr.bf16.vlgmr.msra.gmra.mxu0 %v1330_v59  ;;  %v330_v59 = vld [vmem:[#allocation2 + $0x68] sm:$0xff] }
  0x5c   : > { %733 = vmatprep.mubr.bf16.mxu0 %v1335_v60 }
  0x5d   : > { %1248 = vmatmul.mubr.bf16.vlgmr.msra.gmra.mxu1 %v1334_v61 }
  0x5e   : > { %1251 = vmatprep.mubr.bf16.mxu1 %v1341_v62 }
  0x63   : > { %734 = vmatmul.mubr.bf16.gmra.mxu0 %v1337_v63 }
  0x64   : > { %741 = vmatprep.mubr.bf16.mxu0 %v1338_v0 }
  0x65   : > { %1252 = vmatmul.mubr.bf16.gmra.mxu1 %v1342_v1  ;;  %v331_v1 = vld [vmem:[#allocation2 + $0x8] sm:$0xff] }
  0x66   : > { %1255 = vmatprep.mubr.bf16.mxu1 %v1349_v2 }
  0x6b   : > { %742 = vmatmul.mubr.bf16.gmra.mxu0 %v1340_v3 }
  0x6c   : > { %749 = vmatprep.mubr.bf16.mxu0 %v1343_v4 }
  0x6d   : > { %1256 = vmatmul.mubr.bf16.gmra.mxu1 %v1350_v5 }
  0x6e   : > { %1259 = vmatprep.mubr.bf16.mxu1 %v1357_v6 }
  0x73   : > { %750 = vmatmul.mubr.bf16.gmra.mxu0 %v1345_v7 }
  0x74   : > { %757 = vmatprep.mubr.bf16.mxu0 %v1346_v8  ;;  %v332_v8 = vld [vmem:[#allocation2 + $0x48] sm:$0xff] }
  0x75   : > { %1260 = vmatmul.mubr.bf16.gmra.mxu1 %v1358_v9 }
  0x7b   : > { %758 = vmatmul.mubr.bf16.gmra.mxu0 %v1348_v10 }
  0x7c   : > { %765 = vmatprep.mubr.bf16.mxu0 %v1351_v11 }
  0x83   : > { %766 = vmatmul.mubr.bf16.gmra.mxu0 %v1353_v12 }
  0x84   : > { %773 = vmatprep.mubr.bf16.mxu0 %v1354_v13 }
  0x8b   : > { %774 = vmatmul.mubr.bf16.gmra.mxu0 %v1356_v14 }
  0x8c   : > { %781 = vmatprep.mubr.bf16.mxu0 %v1359_v15 }
  0x93   : > { %782 = vmatmul.mubr.bf16.gmra.mxu0 %v1361_v16  ;;  %v333_v16 = vld [vmem:[#allocation2 + $0x40] sm:$0xff] }
 0x11b   : > { %v1167_v17 = vpop.f32.mrf.mxu0 }
 0x11d   : > { %v1168_v18 = vpop.f32.mrf.mxu0  ;;  %v1249_v19 = vpop.f32.mrf.mxu1 }
 0x11e   : > { %v1169_v20 = vadd.f32 %v1168_v18, %v1167_v17 }
 0x11f   : > { %v1170_v21 = vpop.f32.mrf.mxu0  ;;  %v824_v23 = vpop.f32.mrf.mxu1 }
 0x120   : > { %v825_v24 = vadd.f32 %v1169_v20, %v824_v23  ;;  %v334_v23 = vld [vmem:[#allocation2 + $0x20] sm:$0xff] }
 0x121   : > { %v1171_v25 = vpop.f32.mrf.mxu0  ;;  %v1250_v26 = vpop.f32.mrf.mxu1 }
 0x122   : > { %v887_v27 = vadd.f32 %v825_v24, %v325_v22  ;;  %v1172_v28 = vadd.f32 %v1171_v25, %v1170_v21 }
 0x123   : > { %v1173_v29 = vpop.f32.mrf.mxu0  ;;  %v827_v31 = vpop.f32.mrf.mxu1 }
 0x124   : > { %903 = vst [vmem:[#allocation2 + $0x30] sm:$0xff] %v887_v27  ;;  %v828_v32 = vadd.f32 %v1172_v28, %v827_v31 }
 0x125   : > { %v1174_v33 = vpop.f32.mrf.mxu0  ;;  %v1253_v34 = vpop.f32.mrf.mxu1 }
 0x126   : > { %v888_v35 = vadd.f32 %v828_v32, %v326_v30  ;;  %v1175_v36 = vadd.f32 %v1174_v33, %v1173_v29  ;;  %v335_v29 = vld [vmem:[#allocation2 + $0x10] sm:$0xff] }
 0x127   : > { %v1176_v38 = vpop.f32.mrf.mxu0  ;;  %v840_v41 = vpop.f32.mrf.mxu1 }
 0x128   : > { %904 = vst [vmem:[#allocation2] sm:$0xff] %v888_v35  ;;  %v833_v39 = vadd.f32 %v1249_v19, %v1175_v36  ;;  %v336_v36 = vld [vmem:[#allocation2 + $0x38] sm:$0xff] }
 0x129   : > { %v1177_v40 = vpop.f32.mrf.mxu0  ;;  %v1254_v48 = vpop.f32.mrf.mxu1 }
 0x12a   : > { %v889_v42 = vadd.f32 %v833_v39, %v327_v37  ;;  %v1178_v43 = vadd.f32 %v1177_v40, %v1176_v38 }
 0x12b   : > { %v1179_v45 = vpop.f32.mrf.mxu0  ;;  %v843_v55 = vpop.f32.mrf.mxu1 }
 0x12c   : > { %905 = vst [vmem:[#allocation2 + $0x58] sm:$0xff] %v889_v42  ;;  %v836_v46 = vadd.f32 %v1250_v26, %v1178_v43 }
 0x12d   : > { %v1180_v47 = vpop.f32.mrf.mxu0  ;;  %v1257_v62 = vpop.f32.mrf.mxu1 }
 0x12e   : > { %v890_v49 = vadd.f32 %v836_v46, %v328_v44  ;;  %v1181_v50 = vadd.f32 %v1180_v47, %v1179_v45  ;;  %v337_v44 = vld [vmem:[#allocation2 + $0x60] sm:$0xff] }
 0x12f   : > { %v1182_v51 = vpop.f32.mrf.mxu0  ;;  %v856_v5 = vpop.f32.mrf.mxu1 }
 0x130   : > { %906 = vst [vmem:[#allocation2 + $0x18] sm:$0xff] %v890_v49  ;;  %v841_v53 = vadd.f32 %v1181_v50, %v840_v41 }
 0x131   : > { %v1183_v54 = vpop.f32.mrf.mxu0  ;;  %v1258_v12 = vpop.f32.mrf.mxu1 }
 0x132   : > { %v891_v56 = vadd.f32 %v841_v53, %v329_v52  ;;  %v1184_v57 = vadd.f32 %v1183_v54, %v1182_v51  ;;  %v338_v51 = vld [vmem:[#allocation2 + $0x70] sm:$0xff] }
 0x133   : > { %v1185_v58 = vpop.f32.mrf.mxu0  ;;  %v859_v19 = vpop.f32.mrf.mxu1 }
 0x134   : > { %907 = vst [vmem:[#allocation2 + $0x50] sm:$0xff] %v891_v56  ;;  %v844_v60 = vadd.f32 %v1184_v57, %v843_v55  ;;  %v339_v56 = vld [vmem:[#allocation2 + $0x78] sm:$0xff] }
 0x135   : > { %v1186_v61 = vpop.f32.mrf.mxu0  ;;  %v1261_v26 = vpop.f32.mrf.mxu1 }
 0x136   : > { %v892_v63 = vadd.f32 %v844_v60, %v330_v59  ;;  %v1187_v0 = vadd.f32 %v1186_v61, %v1185_v58 }
 0x137   : > { %v1188_v2 = vpop.f32.mrf.mxu0  ;;  %v872_v33 = vpop.f32.mrf.mxu1 }
 0x138   : > { %908 = vst [vmem:[#allocation2 + $0x68] sm:$0xff] %v892_v63  ;;  %v849_v3 = vadd.f32 %v1253_v34, %v1187_v0 }
 0x139   : > { %v1189_v4 = vpop.f32.mrf.mxu0  ;;  %v1262_v40 = vpop.f32.mrf.mxu1 }
 0x13a   : > { %v893_v6 = vadd.f32 %v849_v3, %v331_v1  ;;  %v1190_v7 = vadd.f32 %v1189_v4, %v1188_v2 }
 0x13b   : > { %v1191_v9 = vpop.f32.mrf.mxu0  ;;  %v875_v47 = vpop.f32.mrf.mxu1 }
 0x13c   : > { %909 = vst [vmem:[#allocation2 + $0x8] sm:$0xff] %v893_v6  ;;  %v852_v10 = vadd.f32 %v1254_v48, %v1190_v7 }
 0x13d   : > { %v1192_v11 = vpop.f32.mrf.mxu0 }
 0x13e   : > { %v894_v13 = vadd.f32 %v852_v10, %v332_v8  ;;  %v1193_v14 = vadd.f32 %v1192_v11, %v1191_v9 }
 0x13f   : > { %v1194_v15 = vpop.f32.mrf.mxu0 }
 0x140   : > { %910 = vst [vmem:[#allocation2 + $0x48] sm:$0xff] %v894_v13  ;;  %v857_v17 = vadd.f32 %v1193_v14, %v856_v5 }
 0x141   : > { %v1195_v18 = vpop.f32.mrf.mxu0 }
 0x142   : > { %v895_v20 = vadd.f32 %v857_v17, %v333_v16  ;;  %v1196_v21 = vadd.f32 %v1195_v18, %v1194_v15 }
 0x143   : > { %v1197_v22 = vpop.f32.mrf.mxu0 }
 0x144   : > { %911 = vst [vmem:[#allocation2 + $0x40] sm:$0xff] %v895_v20  ;;  %v860_v24 = vadd.f32 %v1196_v21, %v859_v19 }
 0x145   : > { %v1198_v25 = vpop.f32.mrf.mxu0 }
 0x146   : > { %v896_v27 = vadd.f32 %v860_v24, %v334_v23  ;;  %v1199_v28 = vadd.f32 %v1198_v25, %v1197_v22 }
 0x147   : > { %v1200_v30 = vpop.f32.mrf.mxu0 }
 0x148   : > { %912 = vst [vmem:[#allocation2 + $0x20] sm:$0xff] %v896_v27  ;;  %v865_v31 = vadd.f32 %v1257_v62, %v1199_v28  ;;  %v340_v62 = vld [vmem:[#allocation2 + $0x28] sm:$0xff] }
 0x149   : > { %v1201_v32 = vpop.f32.mrf.mxu0 }
 0x14a   : > { %v897_v34 = vadd.f32 %v865_v31, %v335_v29  ;;  %v1202_v35 = vadd.f32 %v1201_v32, %v1200_v30 }
 0x14b   : > { %v1203_v37 = vpop.f32.mrf.mxu0 }
 0x14c   : > { %913 = vst [vmem:[#allocation2 + $0x10] sm:$0xff] %v897_v34  ;;  %v868_v38 = vadd.f32 %v1258_v12, %v1202_v35 }
 0x14d   : > { %v1204_v39 = vpop.f32.mrf.mxu0 }
 0x14e   : > { %v898_v41 = vadd.f32 %v868_v38, %v336_v36  ;;  %v1205_v42 = vadd.f32 %v1204_v39, %v1203_v37 }
 0x14f   : > { %v1206_v43 = vpop.f32.mrf.mxu0 }
 0x150   : > { %914 = vst [vmem:[#allocation2 + $0x38] sm:$0xff] %v898_v41  ;;  %v873_v45 = vadd.f32 %v1205_v42, %v872_v33 }
 0x151   : > { %v1207_v46 = vpop.f32.mrf.mxu0 }
 0x152   : > { %v899_v48 = vadd.f32 %v873_v45, %v337_v44  ;;  %v1208_v49 = vadd.f32 %v1207_v46, %v1206_v43 }
 0x153   : > { %v1209_v50 = vpop.f32.mrf.mxu0 }
 0x154   : > { %915 = vst [vmem:[#allocation2 + $0x60] sm:$0xff] %v899_v48  ;;  %v876_v52 = vadd.f32 %v1208_v49, %v875_v47 }
 0x155   : > { %v1210_v53 = vpop.f32.mrf.mxu0 }
 0x156   : > { %v900_v54 = vadd.f32 %v876_v52, %v338_v51  ;;  %v1211_v55 = vadd.f32 %v1210_v53, %v1209_v50 }
 0x157   : > { %v1212_v57 = vpop.f32.mrf.mxu0 }
 0x158   : > { %916 = vst [vmem:[#allocation2 + $0x70] sm:$0xff] %v900_v54  ;;  %v881_v58 = vadd.f32 %v1261_v26, %v1211_v55 }
 0x159   : > { %v1213_v59 = vpop.f32.mrf.mxu0 }
 0x15a   : > { %v901_v60 = vadd.f32 %v881_v58, %v339_v56  ;;  %v1214_v61 = vadd.f32 %v1213_v59, %v1212_v57 }
 0x15c   : > { %917 = vst [vmem:[#allocation2 + $0x78] sm:$0xff] %v901_v60  ;;  %v884_v63 = vadd.f32 %v1262_v40, %v1214_v61  ;;  %922 = sbr.rel (%p1145_p11) target bundleno = 362 (0x16a), region = 62 }
 0x15e   : > { %v902_v0 = vadd.f32 %v884_v63, %v340_v62 }
 0x160   : > { %918 = vst [vmem:[#allocation2 + $0x28] sm:$0xff] %v902_v0 }
 0x161   : > { %v923_v1 = vld [vmem:[#allocation2 + $0x30] sm:$0xff]  ;;  %v924_v2 = vld [vmem:[#allocation2] sm:$0xff]  ;;  %v925_v3 = vld [vmem:[#allocation2 + $0x58] sm:$0xff] }
 0x162   : > { %939 = vst [vmem:[%s1655_s2] sm:$0xff] %v923_v1  ;;  %940 = vst [vmem:[%s1655_s2 + $0x8] sm:$0xff] %v924_v2  ;;  %v926_v4 = vld [vmem:[#allocation2 + $0x18] sm:$0xff]  ;;  %v927_v5 = vld [vmem:[#allocation2 + $0x50] sm:$0xff] }
 0x163   : > { %941 = vst [vmem:[%s1655_s2 + $0x10] sm:$0xff] %v925_v3  ;;  %v928_v6 = vld [vmem:[#allocation2 + $0x68] sm:$0xff]  ;;  %942 = vst [vmem:[%s1655_s2 + $0x18] sm:$0xff] %v926_v4  ;;  %v931_v9 = vld [vmem:[#allocation2 + $0x40] sm:$0xff] }
 0x164   : > { %943 = vst [vmem:[%s1655_s2 + $0x20] sm:$0xff] %v927_v5  ;;  %944 = vst [vmem:[%s1655_s2 + $0x28] sm:$0xff] %v928_v6  ;;  %v929_v7 = vld [vmem:[#allocation2 + $0x8] sm:$0xff]  ;;  %v932_v10 = vld [vmem:[#allocation2 + $0x20] sm:$0xff] }
 0x165   : > { %v930_v8 = vld [vmem:[#allocation2 + $0x48] sm:$0xff]  ;;  %945 = vst [vmem:[%s1655_s2 + $0x30] sm:$0xff] %v929_v7  ;;  %947 = vst [vmem:[%s1655_s2 + $0x40] sm:$0xff] %v931_v9  ;;  %v933_v11 = vld [vmem:[#allocation2 + $0x10] sm:$0xff] }
 0x166   : > { %946 = vst [vmem:[%s1655_s2 + $0x38] sm:$0xff] %v930_v8  ;;  %v934_v12 = vld [vmem:[#allocation2 + $0x38] sm:$0xff]  ;;  %948 = vst [vmem:[%s1655_s2 + $0x48] sm:$0xff] %v932_v10  ;;  %v935_v13 = vld [vmem:[#allocation2 + $0x60] sm:$0xff] }
 0x167   : > { %949 = vst [vmem:[%s1655_s2 + $0x50] sm:$0xff] %v933_v11  ;;  %950 = vst [vmem:[%s1655_s2 + $0x58] sm:$0xff] %v934_v12  ;;  %v936_v14 = vld [vmem:[#allocation2 + $0x70] sm:$0xff]  ;;  %v937_v15 = vld [vmem:[#allocation2 + $0x78] sm:$0xff] }
 0x168   : > { %951 = vst [vmem:[%s1655_s2 + $0x60] sm:$0xff] %v935_v13  ;;  %952 = vst [vmem:[%s1655_s2 + $0x68] sm:$0xff] %v936_v14  ;;  %v938_v16 = vld [vmem:[#allocation2 + $0x28] sm:$0xff] }
 0x169   : > { %953 = vst [vmem:[%s1655_s2 + $0x70] sm:$0xff] %v937_v15  ;;  %954 = vst [vmem:[%s1655_s2 + $0x78] sm:$0xff] %v938_v16 }
 0x16a PF: > { %s12_s13 = sadd.s32 1, %s1400_s13   ;;  %s1656_s9 = smov %s1388_s10 }
 0x16b   : > { %p9_p12 = scmp.ge.s32.totalorder %s12_s13, 5   ;;  %s1657_s10 = smov %s1453_s17 }
 0x16c   : > { %s1658_s11 = smov %s1396_s12  ;;  %s1659_s12 = smov %s1661_s14 }
 0x16d   :  { %11 = sbr.rel (!%p9_p12) target bundleno = 3 (0x3), region = 106 }

// kernel: _lambda_.98
= control target key start
LH: loop header
LB: loop body
LE: loop exit
PB: predicated region body
PF: predicated region fallthrough
CT: control target
= control target key end

     0   :  { %s1320_s9 = smov 0   ;;  %s1322_s10 = smov 0   ;;  %s1544_s0 = inlined_call_operand.vmem [shape: bf16[512,640], index: 0, kind: input, shape index: {}]   ;;  %s1545_s1 = inlined_call_operand.vmem [shape: bf16[640,128], index: 1, kind: input, shape index: {}]   ;;  %s1546_s2 = inlined_call_operand.vmem [shape: f32[512,128], index: 2, kind: output, shape index: {}]  }
   0x1   :  { %s1324_s11 = smov 0   ;;  %s1326_s12 = smov 0  }
   0x2   :  { %s1328_s13 = smov 0   ;;  %s1330_s14 = smov 0  }
   0x3   :  { %s1332_s15 = smov 0  }
   0x4 LB: > { %s24_s16 = sadd.s32 1, %s1294_s13  ;;  %s31_s17 = sadd.s32 1, %s1298_s14  ;;  %s1302_s15 = sphi %s1332_s15, %s12_s15   ;;  %s1298_s14 = sphi %s1330_s14, %s1552_s14   ;;  %s1294_s13 = sphi %s1328_s13, %s1551_s13   ;;  %s1290_s12 = sphi %s1326_s12, %s1550_s12   ;;  %s1286_s11 = sphi %s1324_s11, %s1549_s11   ;;  %s1282_s10 = sphi %s1322_s10, %s1548_s10   ;;  %s1278_s9 = sphi %s1320_s9, %s1547_s9  }
   0x5   : > { %p25_p0 = scmp.ge.s32.totalorder %s24_s16, 5  ;;  %p47_p1 = scmp.ne.s32.totalorder %s1282_s10, %s1278_s9 }
   0x6   : > { %p48_p2 = scmp.eq.s32.totalorder %s1302_s15, 0  ;;  %s40_s21 = sadd.s32 1, %s1282_s10 }
   0x7   : > { %s1554_s16 = smov (%p25_p0, %s24_s16), 0  ;;  %s1556_s17 = smov (!%p25_p0, %s31_s17), %s1298_s14 }
   0x8   : > { %p49_p3 = por %p48_p2, %p47_p1  ;;  %p33_p4 = scmp.ge.s32.totalorder %s1556_s17, 2 }
   0x9   : > { %s36_s18 = ssub.s32 %s1294_s13, %s1554_s16  ;;  %p1039_p6 = scmp.ge.s32.totalorder %s1302_s15, 10 }
   0xa   : > { %s1558_s17 = smov (%p33_p4, %s1556_s17), 0 }
   0xb   : > { %s35_s19 = ssub.s32 %s1298_s14, %s1558_s17  ;;  %129 = sbr.rel (%p1039_p6) target bundleno = 44 (0x2c), region = 16 }
   0xc   : > { %s37_s20 = sor.u32 %s36_s18, %s35_s19 }
   0xd   : > { %p38_p5 = scmp.eq.s32.totalorder %s37_s20, 0 }
   0xf   : > { %s1371_s22 = scalar_select %p38_p5, %s1282_s10, %s40_s21  }
  0x10   : > { %132 = sbr.rel (!%p49_p3) target bundleno = 44 (0x2c), region = 20  ;;  %s134_s23 = sand.u32 (%p49_p3), 1, %s1282_s10  }
  0x11   : > { %s1166_s24 = smul.u32 (%p49_p3), 160, %s1298_s14  ;;  %s1040_s25 = sshll.u32 (%p49_p3), %s134_s23, 7 }
  0x12   : > { %s1385_s3 = scalar_lea.vmem (%p49_p3), [#allocation3], %s1040_s25 }
  0x13   : > { %s139_s26 = sadd.s32 (%p49_p3), %s1294_s13, %s1166_s24 }
  0x14   : > { %s1043_s27 = sshll.u32 (%p49_p3), %s139_s26, 2 }
  0x15   : > { %s1380_s30 = scalar_lea.vmem %s1544_s0, %s1043_s27 }
  0x16   : > { %v158_v0 = vld [vmem:[%s1380_s30] sm:$0xf]  ;;  %v160_v1 = vld [vmem:[%s1380_s30 + $0x14] sm:$0xf]  ;;  %v162_v2 = vld [vmem:[%s1380_s30 + $0x28] sm:$0xf] }
  0x17   : > { %159 = vst [vmem:[%s1385_s3] sm:$0xf] %v158_v0  ;;  %161 = vst [vmem:[%s1385_s3 + $0x4] sm:$0xf] %v160_v1  ;;  %v164_v3 = vld [vmem:[%s1380_s30 + $0x3c] sm:$0xf] }
  0x18   : > { %163 = vst [vmem:[%s1385_s3 + $0x8] sm:$0xf] %v162_v2  ;;  %v166_v4 = vld [vmem:[%s1380_s30 + $0x50] sm:$0xf]  ;;  %v168_v5 = vld [vmem:[%s1380_s30 + $0x64] sm:$0xf] }
  0x19   : > { %165 = vst [vmem:[%s1385_s3 + $0xc] sm:$0xf] %v164_v3  ;;  %167 = vst [vmem:[%s1385_s3 + $0x10] sm:$0xf] %v166_v4  ;;  %v170_v6 = vld [vmem:[%s1380_s30 + $0x78] sm:$0xf] }
  0x1a   : > { %169 = vst [vmem:[%s1385_s3 + $0x14] sm:$0xf] %v168_v5  ;;  %v172_v7 = vld [vmem:[%s1380_s30 + $0x8c] sm:$0xf]  ;;  %v174_v8 = vld [vmem:[%s1380_s30 + $0xa0] sm:$0xf] }
  0x1b   : > { %171 = vst [vmem:[%s1385_s3 + $0x18] sm:$0xf] %v170_v6  ;;  %173 = vst [vmem:[%s1385_s3 + $0x1c] sm:$0xf] %v172_v7  ;;  %v176_v9 = vld [vmem:[%s1380_s30 + $0xb4] sm:$0xf] }
  0x1c   : > { %175 = vst [vmem:[%s1385_s3 + $0x20] sm:$0xf] %v174_v8  ;;  %v178_v10 = vld [vmem:[%s1380_s30 + $0xc8] sm:$0xf]  ;;  %v180_v11 = vld [vmem:[%s1380_s30 + $0xdc] sm:$0xf] }
  0x1d   : > { %177 = vst [vmem:[%s1385_s3 + $0x24] sm:$0xf] %v176_v9  ;;  %179 = vst [vmem:[%s1385_s3 + $0x28] sm:$0xf] %v178_v10  ;;  %v182_v12 = vld [vmem:[%s1380_s30 + $0xf0] sm:$0xf] }
  0x1e   : > { %181 = vst [vmem:[%s1385_s3 + $0x2c] sm:$0xf] %v180_v11  ;;  %v184_v13 = vld [vmem:[%s1380_s30 + $0x104] sm:$0xf]  ;;  %v186_v14 = vld [vmem:[%s1380_s30 + $0x118] sm:$0xf] }
  0x1f   : > { %183 = vst [vmem:[%s1385_s3 + $0x30] sm:$0xf] %v182_v12  ;;  %185 = vst [vmem:[%s1385_s3 + $0x34] sm:$0xf] %v184_v13  ;;  %v188_v15 = vld [vmem:[%s1380_s30 + $0x12c] sm:$0xf] }
  0x20   : > { %187 = vst [vmem:[%s1385_s3 + $0x38] sm:$0xf] %v186_v14  ;;  %v190_v16 = vld [vmem:[%s1380_s30 + $0x140] sm:$0xf]  ;;  %v192_v17 = vld [vmem:[%s1380_s30 + $0x154] sm:$0xf] }
  0x21   : > { %189 = vst [vmem:[%s1385_s3 + $0x3c] sm:$0xf] %v188_v15  ;;  %191 = vst [vmem:[%s1385_s3 + $0x40] sm:$0xf] %v190_v16  ;;  %v194_v18 = vld [vmem:[%s1380_s30 + $0x168] sm:$0xf] }
  0x22   : > { %193 = vst [vmem:[%s1385_s3 + $0x44] sm:$0xf] %v192_v17  ;;  %v196_v19 = vld [vmem:[%s1380_s30 + $0x17c] sm:$0xf]  ;;  %v198_v20 = vld [vmem:[%s1380_s30 + $0x190] sm:$0xf] }
  0x23   : > { %195 = vst [vmem:[%s1385_s3 + $0x48] sm:$0xf] %v194_v18  ;;  %197 = vst [vmem:[%s1385_s3 + $0x4c] sm:$0xf] %v196_v19  ;;  %v200_v21 = vld [vmem:[%s1380_s30 + $0x1a4] sm:$0xf] }
  0x24   : > { %199 = vst [vmem:[%s1385_s3 + $0x50] sm:$0xf] %v198_v20  ;;  %v202_v22 = vld [vmem:[%s1380_s30 + $0x1b8] sm:$0xf]  ;;  %v204_v23 = vld [vmem:[%s1380_s30 + $0x1cc] sm:$0xf] }
  0x25   : > { %201 = vst [vmem:[%s1385_s3 + $0x54] sm:$0xf] %v200_v21  ;;  %203 = vst [vmem:[%s1385_s3 + $0x58] sm:$0xf] %v202_v22  ;;  %v206_v24 = vld [vmem:[%s1380_s30 + $0x1e0] sm:$0xf] }
  0x26   : > { %205 = vst [vmem:[%s1385_s3 + $0x5c] sm:$0xf] %v204_v23  ;;  %v208_v25 = vld [vmem:[%s1380_s30 + $0x1f4] sm:$0xf]  ;;  %v210_v26 = vld [vmem:[%s1380_s30 + $0x208] sm:$0xf] }
  0x27   : > { %207 = vst [vmem:[%s1385_s3 + $0x60] sm:$0xf] %v206_v24  ;;  %209 = vst [vmem:[%s1385_s3 + $0x64] sm:$0xf] %v208_v25  ;;  %v212_v27 = vld [vmem:[%s1380_s30 + $0x21c] sm:$0xf] }
  0x28   : > { %211 = vst [vmem:[%s1385_s3 + $0x68] sm:$0xf] %v210_v26  ;;  %v214_v28 = vld [vmem:[%s1380_s30 + $0x230] sm:$0xf]  ;;  %v216_v29 = vld [vmem:[%s1380_s30 + $0x244] sm:$0xf] }
  0x29   : > { %213 = vst [vmem:[%s1385_s3 + $0x6c] sm:$0xf] %v212_v27  ;;  %215 = vst [vmem:[%s1385_s3 + $0x70] sm:$0xf] %v214_v28  ;;  %v218_v30 = vld [vmem:[%s1380_s30 + $0x258] sm:$0xf] }
  0x2a   : > { %217 = vst [vmem:[%s1385_s3 + $0x74] sm:$0xf] %v216_v29  ;;  %v220_v31 = vld [vmem:[%s1380_s30 + $0x26c] sm:$0xf]  ;;  %219 = vst [vmem:[%s1385_s3 + $0x78] sm:$0xf] %v218_v30 }
  0x2b   : > { %221 = vst [vmem:[%s1385_s3 + $0x7c] sm:$0xf] %v220_v31 }
  0x2c PF: > { %p1044_p7 = scmp.ge.s32.totalorder %s1302_s15, 1  ;;  %p320_p8 = scmp.lt.s32.totalorder %s1302_s15, 11 }
  0x2e   : > { %p321_p9 = pnand %p1044_p7, %p320_p8 }
  0x2f   : > { %s327_s4 = sand.u32 (!%p321_p9), 1, %s1278_s9   ;;  %s1046_s5 = sshll.u32 (!%p321_p9), %s1286_s11, 4 }
  0x30   : > { %324 = sbr.rel (%p321_p9) target bundleno = 354 (0x162), region = 65  ;;  %s1045_s6 = sshll.u32 (!%p321_p9), %s327_s4, 7 }
  0x31   : > { %p361_p10 = scmp.lt.s32.totalorder (!%p321_p9), %s1046_s5, 79  ;;  %s1048_s7 = sshll.u32 (!%p321_p9), %s1290_s12, 5 }
  0x32   : > { %p370_p11 = scmp.lt.s32.totalorder (!%p321_p9), %s1048_s7, 63  ;;  %s1463_s9 = scalar_lea.vmem (!%p321_p9), [#allocation3], %s1045_s6 }
  0x33   : > { %p1050_p12 = scmp.ne.s32.totalorder (!%p321_p9), %s1286_s11, 0 }
  0x35   : > { %s1560_s5 = smov (!%p361_p10, %s1046_s5), 79  ;;  %s1562_s7 = smov (!%p370_p11, %s1048_s7), 63 }
  0x36   : > { %s1047_s8 = sshll.u32 %s1560_s5, 2  ;;  %s1049_s21 = sshll.u32 %s1562_s7, 3 }
  0x37   : > { %s1456_s20 = scalar_lea.vmem %s1545_s1, %s1047_s8  ;;  %s1461_s25 = scalar_lea.vmem %s1546_s2, %s1049_s21 }
  0x38   : > { %382 = sbr.rel (%p1050_p12) target bundleno = 78 (0x4e), region = 73 }
  0x3d   : > { %v1304_v32 = vmov 0.0  }
  0x3e   : > { %383 = vst [vmem:[#allocation2 + $0xb0] sm:$0xff] %v1304_v32  ;;  %384 = vst [vmem:[#allocation2] sm:$0xff] %v1304_v32 }
  0x3f   : > { %385 = vst [vmem:[#allocation2 + $0xd8] sm:$0xff] %v1304_v32  ;;  %386 = vst [vmem:[#allocation2 + $0x18] sm:$0xff] %v1304_v32 }
  0x40   : > { %387 = vst [vmem:[#allocation2 + $0x50] sm:$0xff] %v1304_v32  ;;  %388 = vst [vmem:[#allocation2 + $0x68] sm:$0xff] %v1304_v32 }
  0x41   : > { %389 = vst [vmem:[#allocation2 + $0x30] sm:$0xff] %v1304_v32  ;;  %390 = vst [vmem:[#allocation2 + $0x48] sm:$0xff] %v1304_v32 }
  0x42   : > { %391 = vst [vmem:[#allocation2 + $0x80] sm:$0xff] %v1304_v32  ;;  %392 = vst [vmem:[#allocation2 + $0x88] sm:$0xff] %v1304_v32 }
  0x43   : > { %393 = vst [vmem:[#allocation2 + $0xe8] sm:$0xff] %v1304_v32  ;;  %394 = vst [vmem:[#allocation2 + $0xb8] sm:$0xff] %v1304_v32 }
  0x44   : > { %395 = vst [vmem:[#allocation2 + $0x60] sm:$0xff] %v1304_v32  ;;  %396 = vst [vmem:[#allocation2 + $0xf0] sm:$0xff] %v1304_v32 }
  0x45   : > { %397 = vst [vmem:[#allocation2 + $0x8] sm:$0xff] %v1304_v32  ;;  %398 = vst [vmem:[#allocation2 + $0x78] sm:$0xff] %v1304_v32 }
  0x46   : > { %399 = vst [vmem:[#allocation2 + $0x38] sm:$0xff] %v1304_v32  ;;  %400 = vst [vmem:[#allocation2 + $0x58] sm:$0xff] %v1304_v32 }
  0x47   : > { %401 = vst [vmem:[#allocation2 + $0x40] sm:$0xff] %v1304_v32  ;;  %402 = vst [vmem:[#allocation2 + $0xc8] sm:$0xff] %v1304_v32 }
  0x48   : > { %403 = vst [vmem:[#allocation2 + $0xe0] sm:$0xff] %v1304_v32  ;;  %404 = vst [vmem:[#allocation2 + $0x90] sm:$0xff] %v1304_v32 }
  0x49   : > { %405 = vst [vmem:[#allocation2 + $0x70] sm:$0xff] %v1304_v32  ;;  %406 = vst [vmem:[#allocation2 + $0xc0] sm:$0xff] %v1304_v32 }
  0x4a   : > { %407 = vst [vmem:[#allocation2 + $0xa8] sm:$0xff] %v1304_v32  ;;  %408 = vst [vmem:[#allocation2 + $0xd0] sm:$0xff] %v1304_v32 }
  0x4b   : > { %409 = vst [vmem:[#allocation2 + $0x10] sm:$0xff] %v1304_v32  ;;  %410 = vst [vmem:[#allocation2 + $0x28] sm:$0xff] %v1304_v32 }
  0x4c   : > { %411 = vst [vmem:[#allocation2 + $0xa0] sm:$0xff] %v1304_v32  ;;  %412 = vst [vmem:[#allocation2 + $0xf8] sm:$0xff] %v1304_v32 }
  0x4d   : > { %413 = vst [vmem:[#allocation2 + $0x20] sm:$0xff] %v1304_v32  ;;  %414 = vst [vmem:[#allocation2 + $0x98] sm:$0xff] %v1304_v32 }
  0x4e PF: > { %v1224_v33 = vld [vmem:[%s1456_s20 + $0x38] sm:$0xff]   ;;  %v1225_v34 = vld [vmem:[%s1456_s20 + $0x30] sm:$0xff]   ;;  %v1226_v35 = vld [vmem:[%s1456_s20 + $0x28] sm:$0xff]   ;;  %p1075_p13 = scmp.ne.s32.totalorder %s1286_s11, 4 }
  0x4f   : > { %1102 = vmatprep.subr.bf16.mxu0 %v1224_v33  ;;  %1150 = vmatprep.subr.bf16.mxu1 %v1224_v33  ;;  %v1227_v36 = vld [vmem:[%s1456_s20 + $0x20] sm:$0xff]   ;;  %v1228_v39 = vld [vmem:[%s1456_s20 + $0x18] sm:$0xff]   ;;  %v1229_v40 = vld [vmem:[%s1456_s20 + $0x10] sm:$0xff]  }
  0x50   : > { %1103 = vmatpush3.bf16.msra.mxu0 %v1224_v33  ;;  %1158 = vmatpush3.bf16.msra.mxu1 %v1224_v33  ;;  %v1232_v37 = vld [vmem:[%s1463_s9] sm:$0xff]   ;;  %v1230_v41 = vld [vmem:[%s1456_s20 + $0x8] sm:$0xff]   ;;  %v1236_v45 = vld [vmem:[%s1463_s9 + $0x10] sm:$0xff]  }
  0x51   : > { %1104 = vmatprep.subr.bf16.mxu0 %v1225_v34  ;;  %1151 = vmatprep.subr.bf16.mxu1 %v1225_v34  ;;  %v1233_v38 = vld [vmem:[%s1463_s9 + $0x40] sm:$0xff]   ;;  %v1234_v43 = vld [vmem:[%s1463_s9 + $0x8] sm:$0xff]   ;;  %v1237_v46 = vld [vmem:[%s1463_s9 + $0x50] sm:$0xff]  }
  0x52   : > { %1118 = vmatprep.mubr.bf16.mxu0 %v1232_v37  ;;  %1134 = vmatprep.mubr.bf16.mxu1 %v1233_v38  ;;  %v1231_v42 = vld [vmem:[%s1456_s20] sm:$0xff]   ;;  %v1235_v44 = vld [vmem:[%s1463_s9 + $0x48] sm:$0xff]   ;;  %v1238_v47 = vld [vmem:[%s1463_s9 + $0x18] sm:$0xff]  }
  0x53   : > { %v1239_v48 = vld [vmem:[%s1463_s9 + $0x58] sm:$0xff]   ;;  %v1240_v49 = vld [vmem:[%s1463_s9 + $0x20] sm:$0xff]   ;;  %v1242_v51 = vld [vmem:[%s1463_s9 + $0x28] sm:$0xff]  }
  0x54   : > { %1105 = vmatpush3.bf16.msra.mxu0 %v1225_v34  ;;  %1159 = vmatpush3.bf16.msra.mxu1 %v1225_v34  ;;  %v1241_v50 = vld [vmem:[%s1463_s9 + $0x60] sm:$0xff]   ;;  %v1243_v52 = vld [vmem:[%s1463_s9 + $0x68] sm:$0xff]   ;;  %v1244_v53 = vld [vmem:[%s1463_s9 + $0x30] sm:$0xff]  }
  0x55   : > { %1106 = vmatprep.subr.bf16.mxu0 %v1226_v35  ;;  %1152 = vmatprep.subr.bf16.mxu1 %v1226_v35  ;;  %v1245_v54 = vld [vmem:[%s1463_s9 + $0x70] sm:$0xff]   ;;  %v1246_v55 = vld [vmem:[%s1463_s9 + $0x38] sm:$0xff]   ;;  %v433_v58 = vld [vmem:[#allocation2 + $0x40] sm:$0xff] }
  0x56   : > { %v1247_v56 = vld [vmem:[%s1463_s9 + $0x78] sm:$0xff]   ;;  %v415_v61 = vld [vmem:[#allocation2 + $0xb0] sm:$0xff]  ;;  %v434_v4 = vld [vmem:[#allocation2 + $0xc8] sm:$0xff] }
  0x57   : > { %v417_v57 = vld [vmem:[#allocation2 + $0xd8] sm:$0xff]  ;;  %v416_v9 = vld [vmem:[#allocation2] sm:$0xff]  ;;  %v421_v15 = vld [vmem:[#allocation2 + $0x30] sm:$0xff] }
  0x58   : > { %1107 = vmatpush3.bf16.msra.mxu0 %v1226_v35  ;;  %1160 = vmatpush3.bf16.msra.mxu1 %v1226_v35  ;;  %v431_v62 = vld [vmem:[#allocation2 + $0x38] sm:$0xff]  ;;  %v437_v16 = vld [vmem:[#allocation2 + $0x70] sm:$0xff]  ;;  %v435_v22 = vld [vmem:[#allocation2 + $0xe0] sm:$0xff] }
  0x59   : > { %1108 = vmatprep.subr.bf16.mxu0 %v1227_v36  ;;  %1153 = vmatprep.subr.bf16.mxu1 %v1227_v36  ;;  %v418_v3 = vld [vmem:[#allocation2 + $0x18] sm:$0xff]  ;;  %v419_v21 = vld [vmem:[#allocation2 + $0x50] sm:$0xff]  ;;  %v422_v27 = vld [vmem:[#allocation2 + $0x48] sm:$0xff] }
  0x5a   : > { %v432_v10 = vld [vmem:[#allocation2 + $0x58] sm:$0xff]  ;;  %v438_v28 = vld [vmem:[#allocation2 + $0xc0] sm:$0xff]  ;;  %v420_v33 = vld [vmem:[#allocation2 + $0x68] sm:$0xff] }
  0x5b   : > { %v436_v34 = vld [vmem:[#allocation2 + $0x90] sm:$0xff] }
  0x5c   : > { %1109 = vmatpush3.bf16.msra.mxu0 %v1227_v36  ;;  %1161 = vmatpush3.bf16.msra.mxu1 %v1227_v36 }
  0x5d   : > { %1110 = vmatprep.subr.bf16.mxu0 %v1228_v39  ;;  %1154 = vmatprep.subr.bf16.mxu1 %v1228_v39 }
  0x60   : > { %1111 = vmatpush3.bf16.msra.mxu0 %v1228_v39  ;;  %1162 = vmatpush3.bf16.msra.mxu1 %v1228_v39  ;;  %v425_v39 = vld [vmem:[#allocation2 + $0xe8] sm:$0xff] }
  0x61   : > { %1112 = vmatprep.subr.bf16.mxu0 %v1229_v40  ;;  %1155 = vmatprep.subr.bf16.mxu1 %v1229_v40 }
  0x64   : > { %1113 = vmatpush3.bf16.msra.mxu0 %v1229_v40  ;;  %1163 = vmatpush3.bf16.msra.mxu1 %v1229_v40  ;;  %v441_v40 = vld [vmem:[#allocation2 + $0x10] sm:$0xff] }
  0x65   : > { %1114 = vmatprep.subr.bf16.mxu0 %v1230_v41  ;;  %1156 = vmatprep.subr.bf16.mxu1 %v1230_v41 }
  0x68   : > { %1115 = vmatpush3.bf16.msra.mxu0 %v1230_v41  ;;  %1164 = vmatpush3.bf16.msra.mxu1 %v1230_v41 }
  0x69   : > { %1116 = vmatprep.subr.bf16.mxu0 %v1231_v42  ;;  %1157 = vmatprep.subr.bf16.mxu1 %v1231_v42 }
  0x6c   : > { %1117 = vmatpush3.bf16.msra.mxu0 %v1231_v42  ;;  %1165 = vmatpush3.bf16.msra.mxu1 %v1231_v42 }
  0x6f   : > { %1119 = vmatmul.mubr.bf16.vlgmr.msra.gmra.mxu0 %v1234_v43  ;;  %1135 = vmatmul.mubr.bf16.vlgmr.msra.gmra.mxu1 %v1235_v44 }
  0x70   : > { %1122 = vmatprep.mubr.bf16.mxu0 %v1236_v45  ;;  %1138 = vmatprep.mubr.bf16.mxu1 %v1237_v46  ;;  %v423_v45 = vld [vmem:[#allocation2 + $0x80] sm:$0xff]  ;;  %v439_v46 = vld [vmem:[#allocation2 + $0xa8] sm:$0xff] }
  0x77   : > { %1123 = vmatmul.mubr.bf16.gmra.mxu0 %v1238_v47  ;;  %1139 = vmatmul.mubr.bf16.gmra.mxu1 %v1239_v48 }
  0x78   : > { %1126 = vmatprep.mubr.bf16.mxu0 %v1240_v49  ;;  %1142 = vmatprep.mubr.bf16.mxu1 %v1241_v50 }
  0x7f   : > { %1127 = vmatmul.mubr.bf16.gmra.mxu0 %v1242_v51  ;;  %1143 = vmatmul.mubr.bf16.gmra.mxu1 %v1243_v52  ;;  %v426_v51 = vld [vmem:[#allocation2 + $0xb8] sm:$0xff]  ;;  %v442_v52 = vld [vmem:[#allocation2 + $0x28] sm:$0xff] }
  0x80   : > { %1130 = vmatprep.mubr.bf16.mxu0 %v1244_v53  ;;  %1146 = vmatprep.mubr.bf16.mxu1 %v1245_v54 }
  0x87   : > { %1131 = vmatmul.mubr.bf16.gmra.mxu0 %v1246_v55  ;;  %1147 = vmatmul.mubr.bf16.gmra.mxu1 %v1247_v56 }
 0x12f   : > { %v1120_v59 = vpop.f32.mrf.mxu0  ;;  %v1136_v60 = vpop.f32.mrf.mxu1 }
 0x130   : > { %v802_v63 = vadd.f32 %v1120_v59, %v417_v57  ;;  %v818_v0 = vadd.f32 %v1136_v60, %v433_v58  ;;  %v424_v57 = vld [vmem:[#allocation2 + $0x88] sm:$0xff]  ;;  %v440_v58 = vld [vmem:[#allocation2 + $0xd0] sm:$0xff] }
 0x131   : > { %v673_v1 = vpop.f32.mrf.mxu0  ;;  %v737_v2 = vpop.f32.mrf.mxu1 }
 0x132   : > { %834 = vst [vmem:[#allocation2 + $0xd8] sm:$0xff] %v802_v63  ;;  %850 = vst [vmem:[#allocation2 + $0x40] sm:$0xff] %v818_v0  ;;  %v800_v5 = vadd.f32 %v673_v1, %v415_v61  ;;  %v816_v6 = vadd.f32 %v737_v2, %v431_v62  ;;  %v429_v63 = vld [vmem:[#allocation2 + $0x8] sm:$0xff]  ;;  %v445_v0 = vld [vmem:[#allocation2 + $0x20] sm:$0xff] }
 0x133   : > { %v1121_v7 = vpop.f32.mrf.mxu0  ;;  %v1137_v8 = vpop.f32.mrf.mxu1 }
 0x134   : > { %832 = vst [vmem:[#allocation2 + $0xb0] sm:$0xff] %v800_v5  ;;  %848 = vst [vmem:[#allocation2 + $0x38] sm:$0xff] %v816_v6  ;;  %v803_v11 = vadd.f32 %v1121_v7, %v418_v3  ;;  %v819_v12 = vadd.f32 %v1137_v8, %v434_v4  ;;  %v427_v5 = vld [vmem:[#allocation2 + $0x60] sm:$0xff] }
 0x135   : > { %v676_v13 = vpop.f32.mrf.mxu0  ;;  %v740_v14 = vpop.f32.mrf.mxu1  ;;  %v443_v6 = vld [vmem:[#allocation2 + $0xa0] sm:$0xff] }
 0x136   : > { %835 = vst [vmem:[#allocation2 + $0x18] sm:$0xff] %v803_v11  ;;  %851 = vst [vmem:[#allocation2 + $0xc8] sm:$0xff] %v819_v12  ;;  %v801_v17 = vadd.f32 %v676_v13, %v416_v9  ;;  %v817_v18 = vadd.f32 %v740_v14, %v432_v10  ;;  %v430_v11 = vld [vmem:[#allocation2 + $0x78] sm:$0xff] }
 0x137   : > { %v1124_v19 = vpop.f32.mrf.mxu0  ;;  %v1140_v20 = vpop.f32.mrf.mxu1  ;;  %v446_v12 = vld [vmem:[#allocation2 + $0x98] sm:$0xff] }
 0x138   : > { %833 = vst [vmem:[#allocation2] sm:$0xff] %v801_v17  ;;  %849 = vst [vmem:[#allocation2 + $0x58] sm:$0xff] %v817_v18  ;;  %v806_v23 = vadd.f32 %v1124_v19, %v421_v15  ;;  %v822_v24 = vadd.f32 %v1140_v20, %v437_v16  ;;  %v428_v17 = vld [vmem:[#allocation2 + $0xf0] sm:$0xff]  ;;  %v444_v18 = vld [vmem:[#allocation2 + $0xf8] sm:$0xff] }
 0x139   : > { %v689_v25 = vpop.f32.mrf.mxu0  ;;  %v753_v26 = vpop.f32.mrf.mxu1 }
 0x13a   : > { %838 = vst [vmem:[#allocation2 + $0x30] sm:$0xff] %v806_v23  ;;  %854 = vst [vmem:[#allocation2 + $0x70] sm:$0xff] %v822_v24  ;;  %v804_v29 = vadd.f32 %v689_v25, %v419_v21  ;;  %v820_v30 = vadd.f32 %v753_v26, %v435_v22 }
 0x13b   : > { %v1125_v31 = vpop.f32.mrf.mxu0  ;;  %v1141_v32 = vpop.f32.mrf.mxu1 }
 0x13c   : > { %836 = vst [vmem:[#allocation2 + $0x50] sm:$0xff] %v804_v29  ;;  %852 = vst [vmem:[#allocation2 + $0xe0] sm:$0xff] %v820_v30  ;;  %v807_v35 = vadd.f32 %v1125_v31, %v422_v27  ;;  %v823_v36 = vadd.f32 %v1141_v32, %v438_v28 }
 0x13d   : > { %v692_v37 = vpop.f32.mrf.mxu0  ;;  %v756_v38 = vpop.f32.mrf.mxu1 }
 0x13e   : > { %839 = vst [vmem:[#allocation2 + $0x48] sm:$0xff] %v807_v35  ;;  %855 = vst [vmem:[#allocation2 + $0xc0] sm:$0xff] %v823_v36  ;;  %v805_v41 = vadd.f32 %v692_v37, %v420_v33  ;;  %v821_v42 = vadd.f32 %v756_v38, %v436_v34 }
 0x13f   : > { %v1128_v43 = vpop.f32.mrf.mxu0  ;;  %v1144_v44 = vpop.f32.mrf.mxu1 }
 0x140   : > { %837 = vst [vmem:[#allocation2 + $0x68] sm:$0xff] %v805_v41  ;;  %853 = vst [vmem:[#allocation2 + $0x90] sm:$0xff] %v821_v42  ;;  %v810_v47 = vadd.f32 %v1128_v43, %v425_v39  ;;  %v826_v48 = vadd.f32 %v1144_v44, %v441_v40 }
 0x141   : > { %v705_v49 = vpop.f32.mrf.mxu0  ;;  %v769_v50 = vpop.f32.mrf.mxu1 }
 0x142   : > { %842 = vst [vmem:[#allocation2 + $0xe8] sm:$0xff] %v810_v47  ;;  %858 = vst [vmem:[#allocation2 + $0x10] sm:$0xff] %v826_v48  ;;  %v808_v53 = vadd.f32 %v705_v49, %v423_v45  ;;  %v824_v54 = vadd.f32 %v769_v50, %v439_v46 }
 0x143   : > { %v1129_v55 = vpop.f32.mrf.mxu0  ;;  %v1145_v56 = vpop.f32.mrf.mxu1 }
 0x144   : > { %840 = vst [vmem:[#allocation2 + $0x80] sm:$0xff] %v808_v53  ;;  %856 = vst [vmem:[#allocation2 + $0xa8] sm:$0xff] %v824_v54  ;;  %v811_v59 = vadd.f32 %v1129_v55, %v426_v51  ;;  %v827_v60 = vadd.f32 %v1145_v56, %v442_v52 }
 0x145   : > { %v708_v61 = vpop.f32.mrf.mxu0  ;;  %v772_v62 = vpop.f32.mrf.mxu1 }
 0x146   : > { %843 = vst [vmem:[#allocation2 + $0xb8] sm:$0xff] %v811_v59  ;;  %859 = vst [vmem:[#allocation2 + $0x28] sm:$0xff] %v827_v60  ;;  %v809_v1 = vadd.f32 %v708_v61, %v424_v57  ;;  %v825_v2 = vadd.f32 %v772_v62, %v440_v58 }
 0x147   : > { %v1132_v3 = vpop.f32.mrf.mxu0  ;;  %v1148_v4 = vpop.f32.mrf.mxu1 }
 0x148   : > { %841 = vst [vmem:[#allocation2 + $0x88] sm:$0xff] %v809_v1  ;;  %857 = vst [vmem:[#allocation2 + $0xd0] sm:$0xff] %v825_v2  ;;  %v814_v7 = vadd.f32 %v1132_v3, %v429_v63  ;;  %v830_v8 = vadd.f32 %v1148_v4, %v445_v0 }
 0x149   : > { %v721_v9 = vpop.f32.mrf.mxu0  ;;  %v785_v10 = vpop.f32.mrf.mxu1 }
 0x14a   : > { %846 = vst [vmem:[#allocation2 + $0x8] sm:$0xff] %v814_v7  ;;  %862 = vst [vmem:[#allocation2 + $0x20] sm:$0xff] %v830_v8  ;;  %v812_v13 = vadd.f32 %v721_v9, %v427_v5  ;;  %v828_v14 = vadd.f32 %v785_v10, %v443_v6 }
 0x14b   : > { %v1133_v15 = vpop.f32.mrf.mxu0  ;;  %v1149_v16 = vpop.f32.mrf.mxu1 }
 0x14c   : > { %844 = vst [vmem:[#allocation2 + $0x60] sm:$0xff] %v812_v13  ;;  %860 = vst [vmem:[#allocation2 + $0xa0] sm:$0xff] %v828_v14  ;;  %v815_v19 = vadd.f32 %v1133_v15, %v430_v11  ;;  %v831_v20 = vadd.f32 %v1149_v16, %v446_v12  ;;  %867 = sbr.rel (%p1075_p13) target bundleno = 354 (0x162), region = 77 }
 0x14d   : > { %v724_v21 = vpop.f32.mrf.mxu0  ;;  %v788_v22 = vpop.f32.mrf.mxu1 }
 0x14e   : > { %847 = vst [vmem:[#allocation2 + $0x78] sm:$0xff] %v815_v19  ;;  %863 = vst [vmem:[#allocation2 + $0x98] sm:$0xff] %v831_v20  ;;  %v813_v23 = vadd.f32 %v724_v21, %v428_v17  ;;  %v829_v24 = vadd.f32 %v788_v22, %v444_v18 }
 0x150   : > { %845 = vst [vmem:[#allocation2 + $0xf0] sm:$0xff] %v813_v23  ;;  %861 = vst [vmem:[#allocation2 + $0xf8] sm:$0xff] %v829_v24 }
 0x151   : > { %v868_v25 = vld [vmem:[#allocation2 + $0xb0] sm:$0xff]  ;;  %v869_v26 = vld [vmem:[#allocation2] sm:$0xff]  ;;  %v870_v27 = vld [vmem:[#allocation2 + $0xd8] sm:$0xff] }
 0x152   : > { %900 = vst [vmem:[%s1461_s25] sm:$0xff] %v868_v25  ;;  %901 = vst [vmem:[%s1461_s25 + $0x8] sm:$0xff] %v869_v26  ;;  %v871_v28 = vld [vmem:[#allocation2 + $0x18] sm:$0xff]  ;;  %v872_v29 = vld [vmem:[#allocation2 + $0x50] sm:$0xff] }
 0x153   : > { %902 = vst [vmem:[%s1461_s25 + $0x10] sm:$0xff] %v870_v27  ;;  %v873_v30 = vld [vmem:[#allocation2 + $0x68] sm:$0xff]  ;;  %903 = vst [vmem:[%s1461_s25 + $0x18] sm:$0xff] %v871_v28  ;;  %v874_v31 = vld [vmem:[#allocation2 + $0x30] sm:$0xff] }
 0x154   : > { %904 = vst [vmem:[%s1461_s25 + $0x20] sm:$0xff] %v872_v29  ;;  %905 = vst [vmem:[%s1461_s25 + $0x28] sm:$0xff] %v873_v30  ;;  %v875_v32 = vld [vmem:[#allocation2 + $0x48] sm:$0xff]  ;;  %v876_v33 = vld [vmem:[#allocation2 + $0x80] sm:$0xff] }
 0x155   : > { %906 = vst [vmem:[%s1461_s25 + $0x30] sm:$0xff] %v874_v31  ;;  %907 = vst [vmem:[%s1461_s25 + $0x38] sm:$0xff] %v875_v32  ;;  %v877_v34 = vld [vmem:[#allocation2 + $0x88] sm:$0xff]  ;;  %v879_v36 = vld [vmem:[#allocation2 + $0xb8] sm:$0xff] }
 0x156   : > { %908 = vst [vmem:[%s1461_s25 + $0x40] sm:$0xff] %v876_v33  ;;  %v878_v35 = vld [vmem:[#allocation2 + $0xe8] sm:$0xff]  ;;  %909 = vst [vmem:[%s1461_s25 + $0x48] sm:$0xff] %v877_v34  ;;  %v880_v37 = vld [vmem:[#allocation2 + $0x60] sm:$0xff] }
 0x157   : > { %910 = vst [vmem:[%s1461_s25 + $0x50] sm:$0xff] %v878_v35  ;;  %911 = vst [vmem:[%s1461_s25 + $0x58] sm:$0xff] %v879_v36  ;;  %v881_v38 = vld [vmem:[#allocation2 + $0xf0] sm:$0xff]  ;;  %v882_v39 = vld [vmem:[#allocation2 + $0x8] sm:$0xff] }
 0x158   : > { %912 = vst [vmem:[%s1461_s25 + $0x60] sm:$0xff] %v880_v37  ;;  %913 = vst [vmem:[%s1461_s25 + $0x68] sm:$0xff] %v881_v38  ;;  %v883_v40 = vld [vmem:[#allocation2 + $0x78] sm:$0xff]  ;;  %v886_v43 = vld [vmem:[#allocation2 + $0x40] sm:$0xff] }
 0x159   : > { %914 = vst [vmem:[%s1461_s25 + $0x70] sm:$0xff] %v882_v39  ;;  %v884_v41 = vld [vmem:[#allocation2 + $0x38] sm:$0xff]  ;;  %915 = vst [vmem:[%s1461_s25 + $0x78] sm:$0xff] %v883_v40  ;;  %v887_v44 = vld [vmem:[#allocation2 + $0xc8] sm:$0xff] }
 0x15a   : > { %v885_v42 = vld [vmem:[#allocation2 + $0x58] sm:$0xff]  ;;  %916 = vst [vmem:[%s1461_s25 + $0x80] sm:$0xff] %v884_v41  ;;  %v888_v45 = vld [vmem:[#allocation2 + $0xe0] sm:$0xff]  ;;  %918 = vst [vmem:[%s1461_s25 + $0x90] sm:$0xff] %v886_v43 }
 0x15b   : > { %917 = vst [vmem:[%s1461_s25 + $0x88] sm:$0xff] %v885_v42  ;;  %919 = vst [vmem:[%s1461_s25 + $0x98] sm:$0xff] %v887_v44  ;;  %v889_v46 = vld [vmem:[#allocation2 + $0x90] sm:$0xff]  ;;  %v891_v48 = vld [vmem:[#allocation2 + $0xc0] sm:$0xff] }
 0x15c   : > { %920 = vst [vmem:[%s1461_s25 + $0xa0] sm:$0xff] %v888_v45  ;;  %v890_v47 = vld [vmem:[#allocation2 + $0x70] sm:$0xff]  ;;  %921 = vst [vmem:[%s1461_s25 + $0xa8] sm:$0xff] %v889_v46  ;;  %v892_v49 = vld [vmem:[#allocation2 + $0xa8] sm:$0xff] }
 0x15d   : > { %922 = vst [vmem:[%s1461_s25 + $0xb0] sm:$0xff] %v890_v47  ;;  %923 = vst [vmem:[%s1461_s25 + $0xb8] sm:$0xff] %v891_v48  ;;  %v893_v50 = vld [vmem:[#allocation2 + $0xd0] sm:$0xff]  ;;  %v895_v52 = vld [vmem:[#allocation2 + $0x28] sm:$0xff] }
 0x15e   : > { %v894_v51 = vld [vmem:[#allocation2 + $0x10] sm:$0xff]  ;;  %924 = vst [vmem:[%s1461_s25 + $0xc0] sm:$0xff] %v892_v49  ;;  %925 = vst [vmem:[%s1461_s25 + $0xc8] sm:$0xff] %v893_v50  ;;  %v896_v53 = vld [vmem:[#allocation2 + $0xa0] sm:$0xff] }
 0x15f   : > { %926 = vst [vmem:[%s1461_s25 + $0xd0] sm:$0xff] %v894_v51  ;;  %v897_v54 = vld [vmem:[#allocation2 + $0xf8] sm:$0xff]  ;;  %927 = vst [vmem:[%s1461_s25 + $0xd8] sm:$0xff] %v895_v52  ;;  %v898_v55 = vld [vmem:[#allocation2 + $0x20] sm:$0xff] }
 0x160   : > { %928 = vst [vmem:[%s1461_s25 + $0xe0] sm:$0xff] %v896_v53  ;;  %929 = vst [vmem:[%s1461_s25 + $0xe8] sm:$0xff] %v897_v54  ;;  %v899_v56 = vld [vmem:[#allocation2 + $0x98] sm:$0xff] }
 0x161   : > { %930 = vst [vmem:[%s1461_s25 + $0xf0] sm:$0xff] %v898_v55  ;;  %931 = vst [vmem:[%s1461_s25 + $0xf8] sm:$0xff] %v899_v56 }
 0x162 PF: > { %s12_s15 = sadd.s32 1, %s1302_s15   ;;  %s1547_s9 = smov %s1282_s10 }
 0x163   : > { %p9_p0 = scmp.ge.s32.totalorder %s12_s15, 12   ;;  %s1548_s10 = smov %s1371_s22 }
 0x164   : > { %s1549_s11 = smov %s1294_s13  ;;  %s1550_s12 = smov %s1298_s14 }
 0x165   : > { %s1551_s13 = smov %s1554_s16  ;;  %s1552_s14 = smov %s1558_s17 }
 0x166   :  { %11 = sbr.rel (!%p9_p0) target bundleno = 4 (0x4), region = 115 }

// kernel: _lambda_.102
= control target key start
LH: loop header
LB: loop body
LE: loop exit
PB: predicated region body
PF: predicated region fallthrough
CT: control target
= control target key end

     0   :  { %s523_s12 = smov 0   ;;  %s525_s13 = smov 0   ;;  %s730_s0 = inlined_call_operand.vmem [shape: f32[2,256,3], index: 0, kind: input, shape index: {}]   ;;  %s731_s1 = inlined_call_operand.vmem [shape: f32[1,1,3], index: 1, kind: input, shape index: {}]   ;;  %s732_s2 = inlined_call_operand.vmem [shape: f32[1,1,3], index: 2, kind: input, shape index: {}]   ;;  %s733_s3 = inlined_call_operand.vmem [shape: f32[2,256,3], index: 3, kind: output, shape index: {}]  }
   0x1   :  { %s527_s14 = smov 0  }
   0x2 LB: > { %s25_s15 = sadd.s32 1, %s497_s13  ;;  %p444_p0 = scmp.ge.s32.totalorder %s501_s14, 1  ;;  %s501_s14 = sphi %s527_s14, %s13_s14   ;;  %s497_s13 = sphi %s525_s13, %s735_s13   ;;  %s493_s12 = sphi %s523_s12, %s734_s12  }
   0x3   : > { %p27_p1 = scmp.ge.s32.totalorder %s25_s15, 2  ;;  %p158_p2 = scmp.lt.s32.totalorder %s501_s14, 3 }
   0x5   : > { %s737_s15 = smov (%p27_p1, %s25_s15), 0  ;;  %p159_p3 = pnand %p444_p0, %p158_p2 }
   0x6   : > { %p191_p4 = scmp.lt.s32.totalorder (!%p159_p3), %s493_s12, 1 }
   0x7   : > { %162 = sbr.rel (%p159_p3) target bundleno = 39 (0x27), region = 32 }
   0xc   : > { %s739_s12 = smov (!%p191_p4, %s493_s12), 1  ;;  %v544_v0 = vld [vmem:[%s731_s1] ss:$0 sm:$0xff]  ;;  %vm320_vm0 = vcmask 23552  }
   0xd   : > { %s453_s16 = sshll.u32 %s739_s12, 8  ;;  %v554_v1 = vld [vmem:[%s732_s2] ss:$0 sm:$0xff] }
   0xe   : > { %s549_s21 = scalar_lea.vmem %s730_s0, %s453_s16  ;;  %s568_s26 = scalar_lea.vmem %s733_s3, %s453_s16 }
   0xf   : > { %v210_v2 = vld [vmem:[%s549_s21] sm:$0xff]  ;;  %v211_v3 = vld [vmem:[%s549_s21 + $0x8] sm:$0xff]  ;;  %v212_v4 = vld [vmem:[%s549_s21 + $0x10] sm:$0xff] }
  0x10   : > { %v249_v5 = vmul.f32 %v544_v0, %v210_v2  ;;  %v250_v6 = vmul.f32 %v544_v0, %v211_v3  ;;  %v251_v7 = vmul.f32 %v544_v0, %v212_v4  ;;  %v213_v8 = vld [vmem:[%s549_s21 + $0x18] sm:$0xff]  ;;  %v214_v9 = vld [vmem:[%s549_s21 + $0x20] sm:$0xff]  ;;  %v215_v10 = vld [vmem:[%s549_s21 + $0x28] sm:$0xff] }
  0x11   : > { %v252_v11 = vmul.f32 %v544_v0, %v213_v8  ;;  %v253_v12 = vmul.f32 %v544_v0, %v214_v9  ;;  %v254_v13 = vmul.f32 %v544_v0, %v215_v10  ;;  %v216_v14 = vld [vmem:[%s549_s21 + $0x30] sm:$0xff]  ;;  %v217_v15 = vld [vmem:[%s549_s21 + $0x38] sm:$0xff]  ;;  %v218_v16 = vld [vmem:[%s549_s21 + $0x40] sm:$0xff] }
  0x12   : > { %v288_v17 = vadd.f32 %v554_v1, %v249_v5  ;;  %v289_v18 = vadd.f32 %v554_v1, %v250_v6  ;;  %v290_v19 = vadd.f32 %v554_v1, %v251_v7  ;;  %v255_v20 = vmul.f32 %v544_v0, %v216_v14  ;;  %v219_v21 = vld [vmem:[%s549_s21 + $0x48] sm:$0xff]  ;;  %v220_v22 = vld [vmem:[%s549_s21 + $0x50] sm:$0xff]  ;;  %v221_v23 = vld [vmem:[%s549_s21 + $0x58] sm:$0xff] }
  0x13   : > { %v291_v24 = vadd.f32 %v554_v1, %v252_v11  ;;  %v292_v25 = vadd.f32 %v554_v1, %v253_v12  ;;  %v293_v26 = vadd.f32 %v554_v1, %v254_v13  ;;  %v256_v27 = vmul.f32 %v544_v0, %v217_v15  ;;  %v222_v28 = vld [vmem:[%s549_s21 + $0x60] sm:$0xff]  ;;  %v223_v29 = vld [vmem:[%s549_s21 + $0x68] sm:$0xff]  ;;  %v224_v30 = vld [vmem:[%s549_s21 + $0x70] sm:$0xff] }
  0x14   : > { %321 = vst.msk [vmem:[%s568_s26] sm:$0xff] %vm320_vm0, %v288_v17  ;;  %322 = vst.msk [vmem:[%s568_s26 + $0x8] sm:$0xff] %vm320_vm0, %v289_v18  ;;  %v294_v31 = vadd.f32 %v554_v1, %v255_v20  ;;  %v257_v32 = vmul.f32 %v544_v0, %v218_v16  ;;  %v258_v33 = vmul.f32 %v544_v0, %v219_v21  ;;  %v225_v35 = vld [vmem:[%s549_s21 + $0x78] sm:$0xff]  ;;  %v226_v40 = vld [vmem:[%s549_s21 + $0x80] sm:$0xff] }
  0x15   : > { %323 = vst.msk [vmem:[%s568_s26 + $0x10] sm:$0xff] %vm320_vm0, %v290_v19  ;;  %v259_v34 = vmul.f32 %v544_v0, %v220_v22  ;;  %324 = vst.msk [vmem:[%s568_s26 + $0x18] sm:$0xff] %vm320_vm0, %v291_v24  ;;  %v295_v36 = vadd.f32 %v554_v1, %v256_v27  ;;  %v260_v37 = vmul.f32 %v544_v0, %v221_v23  ;;  %v227_v41 = vld [vmem:[%s549_s21 + $0x88] sm:$0xff]  ;;  %v228_v42 = vld [vmem:[%s549_s21 + $0x90] sm:$0xff] }
  0x16   : > { %325 = vst.msk [vmem:[%s568_s26 + $0x20] sm:$0xff] %vm320_vm0, %v292_v25  ;;  %326 = vst.msk [vmem:[%s568_s26 + $0x28] sm:$0xff] %vm320_vm0, %v293_v26  ;;  %v261_v38 = vmul.f32 %v544_v0, %v222_v28  ;;  %v262_v39 = vmul.f32 %v544_v0, %v223_v29  ;;  %v296_v43 = vadd.f32 %v554_v1, %v257_v32  ;;  %v229_v47 = vld [vmem:[%s549_s21 + $0x98] sm:$0xff]  ;;  %v230_v48 = vld [vmem:[%s549_s21 + $0xa0] sm:$0xff] }
  0x17   : > { %327 = vst.msk [vmem:[%s568_s26 + $0x30] sm:$0xff] %vm320_vm0, %v294_v31  ;;  %v297_v44 = vadd.f32 %v554_v1, %v258_v33  ;;  %v298_v45 = vadd.f32 %v554_v1, %v259_v34  ;;  %v263_v46 = vmul.f32 %v544_v0, %v224_v30  ;;  %v231_v49 = vld [vmem:[%s549_s21 + $0xa8] sm:$0xff]  ;;  %328 = vst.msk [vmem:[%s568_s26 + $0x38] sm:$0xff] %vm320_vm0, %v295_v36  ;;  %v232_v54 = vld [vmem:[%s549_s21 + $0xb0] sm:$0xff] }
  0x18   : > { %v299_v50 = vadd.f32 %v554_v1, %v260_v37  ;;  %v300_v51 = vadd.f32 %v554_v1, %v261_v38  ;;  %v301_v52 = vadd.f32 %v554_v1, %v262_v39  ;;  %v264_v53 = vmul.f32 %v544_v0, %v225_v35  ;;  %329 = vst.msk [vmem:[%s568_s26 + $0x40] sm:$0xff] %vm320_vm0, %v296_v43  ;;  %v233_v59 = vld [vmem:[%s549_s21 + $0xb8] sm:$0xff]  ;;  %v234_v2 = vld [vmem:[%s549_s21 + $0xc0] sm:$0xff]  ;;  %v235_v3 = vld [vmem:[%s549_s21 + $0xc8] sm:$0xff] }
  0x19   : > { %330 = vst.msk [vmem:[%s568_s26 + $0x48] sm:$0xff] %vm320_vm0, %v297_v44  ;;  %331 = vst.msk [vmem:[%s568_s26 + $0x50] sm:$0xff] %vm320_vm0, %v298_v45  ;;  %v302_v55 = vadd.f32 %v554_v1, %v263_v46  ;;  %v265_v56 = vmul.f32 %v544_v0, %v226_v40  ;;  %v266_v57 = vmul.f32 %v544_v0, %v227_v41  ;;  %v236_v4 = vld [vmem:[%s549_s21 + $0xd0] sm:$0xff]  ;;  %v237_v9 = vld [vmem:[%s549_s21 + $0xd8] sm:$0xff] }
  0x1a   : > { %v267_v58 = vmul.f32 %v544_v0, %v228_v42  ;;  %332 = vst.msk [vmem:[%s568_s26 + $0x58] sm:$0xff] %vm320_vm0, %v299_v50  ;;  %333 = vst.msk [vmem:[%s568_s26 + $0x60] sm:$0xff] %vm320_vm0, %v300_v51  ;;  %v303_v60 = vadd.f32 %v554_v1, %v264_v53  ;;  %v268_v61 = vmul.f32 %v544_v0, %v229_v47  ;;  %v238_v10 = vld [vmem:[%s549_s21 + $0xe0] sm:$0xff]  ;;  %v239_v11 = vld [vmem:[%s549_s21 + $0xe8] sm:$0xff] }
  0x1b   : > { %334 = vst.msk [vmem:[%s568_s26 + $0x68] sm:$0xff] %vm320_vm0, %v301_v52  ;;  %v269_v62 = vmul.f32 %v544_v0, %v230_v48  ;;  %v270_v63 = vmul.f32 %v544_v0, %v231_v49  ;;  %335 = vst.msk [vmem:[%s568_s26 + $0x70] sm:$0xff] %vm320_vm0, %v302_v55  ;;  %v304_v5 = vadd.f32 %v554_v1, %v265_v56  ;;  %v240_v16 = vld [vmem:[%s549_s21 + $0xf0] sm:$0xff]  ;;  %v241_v21 = vld [vmem:[%s549_s21 + $0xf8] sm:$0xff] }
  0x1c   : > { %v305_v6 = vadd.f32 %v554_v1, %v266_v57  ;;  %v306_v7 = vadd.f32 %v554_v1, %v267_v58  ;;  %v271_v8 = vmul.f32 %v544_v0, %v232_v54  ;;  %336 = vst.msk [vmem:[%s568_s26 + $0x78] sm:$0xff] %vm320_vm0, %v303_v60  ;;  %v307_v12 = vadd.f32 %v554_v1, %v268_v61 }
  0x1d   : > { %v308_v13 = vadd.f32 %v554_v1, %v269_v62  ;;  %v309_v14 = vadd.f32 %v554_v1, %v270_v63  ;;  %v272_v15 = vmul.f32 %v544_v0, %v233_v59  ;;  %337 = vst.msk [vmem:[%s568_s26 + $0x80] sm:$0xff] %vm320_vm0, %v304_v5  ;;  %v273_v18 = vmul.f32 %v544_v0, %v234_v2 }
  0x1e   : > { %338 = vst.msk [vmem:[%s568_s26 + $0x88] sm:$0xff] %vm320_vm0, %v305_v6  ;;  %339 = vst.msk [vmem:[%s568_s26 + $0x90] sm:$0xff] %vm320_vm0, %v306_v7  ;;  %v310_v17 = vadd.f32 %v554_v1, %v271_v8  ;;  %v274_v19 = vmul.f32 %v544_v0, %v235_v3  ;;  %v275_v20 = vmul.f32 %v544_v0, %v236_v4 }
  0x1f   : > { %340 = vst.msk [vmem:[%s568_s26 + $0x98] sm:$0xff] %vm320_vm0, %v307_v12  ;;  %341 = vst.msk [vmem:[%s568_s26 + $0xa0] sm:$0xff] %vm320_vm0, %v308_v13  ;;  %v311_v22 = vadd.f32 %v554_v1, %v272_v15  ;;  %v276_v23 = vmul.f32 %v544_v0, %v237_v9  ;;  %v277_v24 = vmul.f32 %v544_v0, %v238_v10 }
  0x20   : > { %342 = vst.msk [vmem:[%s568_s26 + $0xa8] sm:$0xff] %vm320_vm0, %v309_v14  ;;  %v278_v25 = vmul.f32 %v544_v0, %v239_v11  ;;  %343 = vst.msk [vmem:[%s568_s26 + $0xb0] sm:$0xff] %vm320_vm0, %v310_v17  ;;  %v312_v26 = vadd.f32 %v554_v1, %v273_v18  ;;  %v313_v27 = vadd.f32 %v554_v1, %v274_v19 }
  0x21   : > { %v314_v28 = vadd.f32 %v554_v1, %v275_v20  ;;  %v279_v29 = vmul.f32 %v544_v0, %v240_v16  ;;  %344 = vst.msk [vmem:[%s568_s26 + $0xb8] sm:$0xff] %vm320_vm0, %v311_v22  ;;  %v315_v30 = vadd.f32 %v554_v1, %v276_v23  ;;  %v316_v31 = vadd.f32 %v554_v1, %v277_v24 }
  0x22   : > { %v317_v32 = vadd.f32 %v554_v1, %v278_v25  ;;  %v280_v33 = vmul.f32 %v544_v0, %v241_v21  ;;  %345 = vst.msk [vmem:[%s568_s26 + $0xc0] sm:$0xff] %vm320_vm0, %v312_v26  ;;  %346 = vst.msk [vmem:[%s568_s26 + $0xc8] sm:$0xff] %vm320_vm0, %v313_v27 }
  0x23   : > { %347 = vst.msk [vmem:[%s568_s26 + $0xd0] sm:$0xff] %vm320_vm0, %v314_v28  ;;  %v318_v34 = vadd.f32 %v554_v1, %v279_v29  ;;  %348 = vst.msk [vmem:[%s568_s26 + $0xd8] sm:$0xff] %vm320_vm0, %v315_v30 }
  0x24   : > { %349 = vst.msk [vmem:[%s568_s26 + $0xe0] sm:$0xff] %vm320_vm0, %v316_v31  ;;  %350 = vst.msk [vmem:[%s568_s26 + $0xe8] sm:$0xff] %vm320_vm0, %v317_v32  ;;  %v319_v35 = vadd.f32 %v554_v1, %v280_v33 }
  0x25   : > { %351 = vst.msk [vmem:[%s568_s26 + $0xf0] sm:$0xff] %vm320_vm0, %v318_v34 }
  0x26   : > { %352 = vst.msk [vmem:[%s568_s26 + $0xf8] sm:$0xff] %vm320_vm0, %v319_v35 }
  0x27 PF: > { %s13_s14 = sadd.s32 1, %s501_s14   ;;  %s734_s12 = smov %s497_s13 }
  0x28   : > { %p10_p5 = scmp.ge.s32.totalorder %s13_s14, 4   ;;  %s735_s13 = smov %s737_s15 }
  0x2a   :  { %12 = sbr.rel (!%p10_p5) target bundleno = 2 (0x2), region = 62 }

// kernel: _lambda_.101
= control target key start
LH: loop header
LB: loop body
LE: loop exit
PB: predicated region body
PF: predicated region fallthrough
CT: control target
= control target key end

     0   :  { %s2182_s12 = smov 0   ;;  %s2184_s13 = smov 0   ;;  %s2591_s0 = inlined_call_operand.vmem [shape: bf16[512,2688], index: 0, kind: input, shape index: {}]   ;;  %s2592_s1 = inlined_call_operand.vmem [shape: bf16[2688,128], index: 1, kind: input, shape index: {}]   ;;  %s2593_s2 = inlined_call_operand.vmem [shape: f32[1,128], index: 2, kind: input, shape index: {}]   ;;  %s2594_s3 = inlined_call_operand.vmem [shape: f32[512,128], index: 3, kind: output, shape index: {}]  }
   0x1   :  { %s2186_s14 = smov 0   ;;  %s2188_s15 = smov 0  }
   0x2   :  { %s2190_s16 = smov 0   ;;  %s2192_s17 = smov 0  }
   0x3   :  { %s2194_s18 = smov 0  }
   0x4 LB: > { %s25_s19 = sadd.s32 1, %s2151_s16  ;;  %s32_s20 = sadd.s32 1, %s2155_s17  ;;  %s2159_s18 = sphi %s2194_s18, %s13_s18   ;;  %s2155_s17 = sphi %s2192_s17, %s2600_s17   ;;  %s2151_s16 = sphi %s2190_s16, %s2599_s16   ;;  %s2147_s15 = sphi %s2188_s15, %s2598_s15   ;;  %s2143_s14 = sphi %s2186_s14, %s2597_s14   ;;  %s2139_s13 = sphi %s2184_s13, %s2596_s13   ;;  %s2135_s12 = sphi %s2182_s12, %s2595_s12  }
   0x5   : > { %p26_p0 = scmp.ge.s32.totalorder %s25_s19, 7  ;;  %p48_p1 = scmp.ne.s32.totalorder %s2139_s13, %s2135_s12 }
   0x6   : > { %p49_p2 = scmp.eq.s32.totalorder %s2159_s18, 0  ;;  %s41_s24 = sadd.s32 1, %s2139_s13 }
   0x7   : > { %s2602_s19 = smov (%p26_p0, %s25_s19), 0  ;;  %s2604_s20 = smov (!%p26_p0, %s32_s20), %s2155_s17 }
   0x8   : > { %p50_p3 = por %p49_p2, %p48_p1  ;;  %p34_p4 = scmp.ge.s32.totalorder %s2604_s20, 2 }
   0x9   : > { %s37_s21 = ssub.s32 %s2151_s16, %s2602_s19  ;;  %p1608_p6 = scmp.ge.s32.totalorder %s2159_s18, 14 }
   0xa   : > { %s2606_s20 = smov (%p34_p4, %s2604_s20), 0 }
   0xb   : > { %s36_s22 = ssub.s32 %s2155_s17, %s2606_s20  ;;  %162 = sbr.rel (%p1608_p6) target bundleno = 62 (0x3e), region = 20 }
   0xc   : > { %s38_s23 = sor.u32 %s37_s21, %s36_s22 }
   0xd   : > { %p39_p5 = scmp.eq.s32.totalorder %s38_s23, 0 }
   0xf   : > { %s2233_s25 = scalar_select %p39_p5, %s2139_s13, %s41_s24  }
  0x10   : > { %165 = sbr.rel (!%p50_p3) target bundleno = 62 (0x3e), region = 24  ;;  %s167_s26 = sand.u32 (%p50_p3), 1, %s2139_s13  }
  0x11   : > { %s171_s27 = smul.u32 (%p50_p3), 3, %s2151_s16 }
  0x12   : > { %s1957_s28 = smul.u32 (%p50_p3), 384, %s167_s26 }
  0x13   : > { %s1958_s29 = smul.u32 (%p50_p3), 672, %s2155_s17 }
  0x14   : > { %s2247_s8 = scalar_lea.vmem (%p50_p3), [#allocation3], %s1957_s28 }
  0x15   : > { %s173_s30 = sadd.s32 %s1958_s29, %s171_s27 }
  0x16   : > { %s1611_s4 = sshll.u32 %s173_s30, 2 }
  0x17   : > { %s2242_s7 = scalar_lea.vmem %s2591_s0, %s1611_s4 }
  0x18   : > { %v190_v0 = vld [vmem:[%s2242_s7] sm:$0xff]  ;;  %v192_v1 = vld [vmem:[%s2242_s7 + $0x54] sm:$0xff]  ;;  %v194_v2 = vld [vmem:[%s2242_s7 + $0xa8] sm:$0xff] }
  0x19   : > { %191 = vst [vmem:[%s2247_s8] sm:$0xff] %v190_v0  ;;  %193 = vst [vmem:[%s2247_s8 + $0xc] sm:$0xff] %v192_v1  ;;  %v196_v3 = vld [vmem:[%s2242_s7 + $0xfc] sm:$0xff]  ;;  %v198_v4 = vld [vmem:[%s2242_s7 + $0x150] sm:$0xff] }
  0x1a   : > { %195 = vst [vmem:[%s2247_s8 + $0x18] sm:$0xff] %v194_v2  ;;  %v200_v5 = vld [vmem:[%s2242_s7 + $0x1a4] sm:$0xff]  ;;  %197 = vst [vmem:[%s2247_s8 + $0x24] sm:$0xff] %v196_v3  ;;  %v202_v6 = vld [vmem:[%s2242_s7 + $0x1f8] sm:$0xff] }
  0x1b   : > { %199 = vst [vmem:[%s2247_s8 + $0x30] sm:$0xff] %v198_v4  ;;  %201 = vst [vmem:[%s2247_s8 + $0x3c] sm:$0xff] %v200_v5  ;;  %v204_v7 = vld [vmem:[%s2242_s7 + $0x24c] sm:$0xff]  ;;  %v206_v8 = vld [vmem:[%s2242_s7 + $0x2a0] sm:$0xff] }
  0x1c   : > { %203 = vst [vmem:[%s2247_s8 + $0x48] sm:$0xff] %v202_v6  ;;  %205 = vst [vmem:[%s2247_s8 + $0x54] sm:$0xff] %v204_v7  ;;  %v208_v9 = vld [vmem:[%s2242_s7 + $0x2f4] sm:$0xff]  ;;  %v210_v10 = vld [vmem:[%s2242_s7 + $0x348] sm:$0xff] }
  0x1d   : > { %207 = vst [vmem:[%s2247_s8 + $0x60] sm:$0xff] %v206_v8  ;;  %v212_v11 = vld [vmem:[%s2242_s7 + $0x39c] sm:$0xff]  ;;  %209 = vst [vmem:[%s2247_s8 + $0x6c] sm:$0xff] %v208_v9  ;;  %v214_v12 = vld [vmem:[%s2242_s7 + $0x3f0] sm:$0xff] }
  0x1e   : > { %211 = vst [vmem:[%s2247_s8 + $0x78] sm:$0xff] %v210_v10  ;;  %213 = vst [vmem:[%s2247_s8 + $0x84] sm:$0xff] %v212_v11  ;;  %v216_v13 = vld [vmem:[%s2242_s7 + $0x444] sm:$0xff]  ;;  %v218_v14 = vld [vmem:[%s2242_s7 + $0x498] sm:$0xff] }
  0x1f   : > { %215 = vst [vmem:[%s2247_s8 + $0x90] sm:$0xff] %v214_v12  ;;  %217 = vst [vmem:[%s2247_s8 + $0x9c] sm:$0xff] %v216_v13  ;;  %v220_v15 = vld [vmem:[%s2242_s7 + $0x4ec] sm:$0xff]  ;;  %v222_v16 = vld [vmem:[%s2242_s7 + $0x540] sm:$0xff] }
  0x20   : > { %219 = vst [vmem:[%s2247_s8 + $0xa8] sm:$0xff] %v218_v14  ;;  %v224_v17 = vld [vmem:[%s2242_s7 + $0x594] sm:$0xff]  ;;  %221 = vst [vmem:[%s2247_s8 + $0xb4] sm:$0xff] %v220_v15  ;;  %v226_v18 = vld [vmem:[%s2242_s7 + $0x5e8] sm:$0xff] }
  0x21   : > { %223 = vst [vmem:[%s2247_s8 + $0xc0] sm:$0xff] %v222_v16  ;;  %225 = vst [vmem:[%s2247_s8 + $0xcc] sm:$0xff] %v224_v17  ;;  %v228_v19 = vld [vmem:[%s2242_s7 + $0x63c] sm:$0xff]  ;;  %v230_v20 = vld [vmem:[%s2242_s7 + $0x690] sm:$0xff] }
  0x22   : > { %227 = vst [vmem:[%s2247_s8 + $0xd8] sm:$0xff] %v226_v18  ;;  %229 = vst [vmem:[%s2247_s8 + $0xe4] sm:$0xff] %v228_v19  ;;  %v232_v21 = vld [vmem:[%s2242_s7 + $0x6e4] sm:$0xff]  ;;  %v234_v22 = vld [vmem:[%s2242_s7 + $0x738] sm:$0xff] }
  0x23   : > { %231 = vst [vmem:[%s2247_s8 + $0xf0] sm:$0xff] %v230_v20  ;;  %v236_v23 = vld [vmem:[%s2242_s7 + $0x78c] sm:$0xff]  ;;  %233 = vst [vmem:[%s2247_s8 + $0xfc] sm:$0xff] %v232_v21  ;;  %v238_v24 = vld [vmem:[%s2242_s7 + $0x7e0] sm:$0xff] }
  0x24   : > { %235 = vst [vmem:[%s2247_s8 + $0x108] sm:$0xff] %v234_v22  ;;  %237 = vst [vmem:[%s2247_s8 + $0x114] sm:$0xff] %v236_v23  ;;  %v240_v25 = vld [vmem:[%s2242_s7 + $0x834] sm:$0xff]  ;;  %v242_v26 = vld [vmem:[%s2242_s7 + $0x888] sm:$0xff] }
  0x25   : > { %239 = vst [vmem:[%s2247_s8 + $0x120] sm:$0xff] %v238_v24  ;;  %241 = vst [vmem:[%s2247_s8 + $0x12c] sm:$0xff] %v240_v25  ;;  %v244_v27 = vld [vmem:[%s2242_s7 + $0x8dc] sm:$0xff]  ;;  %v246_v28 = vld [vmem:[%s2242_s7 + $0x930] sm:$0xff] }
  0x26   : > { %243 = vst [vmem:[%s2247_s8 + $0x138] sm:$0xff] %v242_v26  ;;  %v248_v29 = vld [vmem:[%s2242_s7 + $0x984] sm:$0xff]  ;;  %245 = vst [vmem:[%s2247_s8 + $0x144] sm:$0xff] %v244_v27  ;;  %v250_v30 = vld [vmem:[%s2242_s7 + $0x9d8] sm:$0xff] }
  0x27   : > { %247 = vst [vmem:[%s2247_s8 + $0x150] sm:$0xff] %v246_v28  ;;  %249 = vst [vmem:[%s2247_s8 + $0x15c] sm:$0xff] %v248_v29  ;;  %v252_v31 = vld [vmem:[%s2242_s7 + $0xa2c] sm:$0xff]  ;;  %v1612_v32 = vld [vmem:[%s2242_s7 + $0x8] sm:$0xf] }
  0x28   : > { %251 = vst [vmem:[%s2247_s8 + $0x168] sm:$0xff] %v250_v30  ;;  %253 = vst [vmem:[%s2247_s8 + $0x174] sm:$0xff] %v252_v31  ;;  %v1614_v33 = vld [vmem:[%s2242_s7 + $0x5c] sm:$0xf]  ;;  %v1616_v34 = vld [vmem:[%s2242_s7 + $0xb0] sm:$0xf] }
  0x29   : > { %1613 = vst [vmem:[%s2247_s8 + $0x8] sm:$0xf] %v1612_v32  ;;  %v1618_v35 = vld [vmem:[%s2242_s7 + $0x104] sm:$0xf]  ;;  %1615 = vst [vmem:[%s2247_s8 + $0x14] sm:$0xf] %v1614_v33 }
  0x2a   : > { %1617 = vst [vmem:[%s2247_s8 + $0x20] sm:$0xf] %v1616_v34  ;;  %1619 = vst [vmem:[%s2247_s8 + $0x2c] sm:$0xf] %v1618_v35  ;;  %v1620_v36 = vld [vmem:[%s2242_s7 + $0x158] sm:$0xf] }
  0x2b   : > { %v1622_v37 = vld [vmem:[%s2242_s7 + $0x1ac] sm:$0xf]  ;;  %v1624_v38 = vld [vmem:[%s2242_s7 + $0x200] sm:$0xf]  ;;  %1621 = vst [vmem:[%s2247_s8 + $0x38] sm:$0xf] %v1620_v36 }
  0x2c   : > { %1623 = vst [vmem:[%s2247_s8 + $0x44] sm:$0xf] %v1622_v37  ;;  %1625 = vst [vmem:[%s2247_s8 + $0x50] sm:$0xf] %v1624_v38  ;;  %v1626_v39 = vld [vmem:[%s2242_s7 + $0x254] sm:$0xf] }
  0x2d   : > { %v1628_v40 = vld [vmem:[%s2242_s7 + $0x2a8] sm:$0xf]  ;;  %v1630_v41 = vld [vmem:[%s2242_s7 + $0x2fc] sm:$0xf]  ;;  %1627 = vst [vmem:[%s2247_s8 + $0x5c] sm:$0xf] %v1626_v39 }
  0x2e   : > { %1629 = vst [vmem:[%s2247_s8 + $0x68] sm:$0xf] %v1628_v40  ;;  %1631 = vst [vmem:[%s2247_s8 + $0x74] sm:$0xf] %v1630_v41  ;;  %v1632_v42 = vld [vmem:[%s2242_s7 + $0x350] sm:$0xf] }
  0x2f   : > { %v1634_v43 = vld [vmem:[%s2242_s7 + $0x3a4] sm:$0xf]  ;;  %v1636_v44 = vld [vmem:[%s2242_s7 + $0x3f8] sm:$0xf]  ;;  %1633 = vst [vmem:[%s2247_s8 + $0x80] sm:$0xf] %v1632_v42 }
  0x30   : > { %1635 = vst [vmem:[%s2247_s8 + $0x8c] sm:$0xf] %v1634_v43  ;;  %1637 = vst [vmem:[%s2247_s8 + $0x98] sm:$0xf] %v1636_v44  ;;  %v1638_v45 = vld [vmem:[%s2242_s7 + $0x44c] sm:$0xf] }
  0x31   : > { %v1640_v46 = vld [vmem:[%s2242_s7 + $0x4a0] sm:$0xf]  ;;  %v1642_v47 = vld [vmem:[%s2242_s7 + $0x4f4] sm:$0xf]  ;;  %1639 = vst [vmem:[%s2247_s8 + $0xa4] sm:$0xf] %v1638_v45 }
  0x32   : > { %1641 = vst [vmem:[%s2247_s8 + $0xb0] sm:$0xf] %v1640_v46  ;;  %1643 = vst [vmem:[%s2247_s8 + $0xbc] sm:$0xf] %v1642_v47  ;;  %v1644_v48 = vld [vmem:[%s2242_s7 + $0x548] sm:$0xf] }
  0x33   : > { %v1646_v49 = vld [vmem:[%s2242_s7 + $0x59c] sm:$0xf]  ;;  %v1648_v50 = vld [vmem:[%s2242_s7 + $0x5f0] sm:$0xf]  ;;  %1645 = vst [vmem:[%s2247_s8 + $0xc8] sm:$0xf] %v1644_v48 }
  0x34   : > { %1647 = vst [vmem:[%s2247_s8 + $0xd4] sm:$0xf] %v1646_v49  ;;  %1649 = vst [vmem:[%s2247_s8 + $0xe0] sm:$0xf] %v1648_v50  ;;  %v1650_v51 = vld [vmem:[%s2242_s7 + $0x644] sm:$0xf] }
  0x35   : > { %v1652_v52 = vld [vmem:[%s2242_s7 + $0x698] sm:$0xf]  ;;  %v1654_v53 = vld [vmem:[%s2242_s7 + $0x6ec] sm:$0xf]  ;;  %1651 = vst [vmem:[%s2247_s8 + $0xec] sm:$0xf] %v1650_v51 }
  0x36   : > { %1653 = vst [vmem:[%s2247_s8 + $0xf8] sm:$0xf] %v1652_v52  ;;  %1655 = vst [vmem:[%s2247_s8 + $0x104] sm:$0xf] %v1654_v53  ;;  %v1656_v54 = vld [vmem:[%s2242_s7 + $0x740] sm:$0xf] }
  0x37   : > { %v1658_v55 = vld [vmem:[%s2242_s7 + $0x794] sm:$0xf]  ;;  %v1660_v56 = vld [vmem:[%s2242_s7 + $0x7e8] sm:$0xf]  ;;  %1657 = vst [vmem:[%s2247_s8 + $0x110] sm:$0xf] %v1656_v54 }
  0x38   : > { %1659 = vst [vmem:[%s2247_s8 + $0x11c] sm:$0xf] %v1658_v55  ;;  %1661 = vst [vmem:[%s2247_s8 + $0x128] sm:$0xf] %v1660_v56  ;;  %v1662_v57 = vld [vmem:[%s2242_s7 + $0x83c] sm:$0xf] }
  0x39   : > { %v1664_v58 = vld [vmem:[%s2242_s7 + $0x890] sm:$0xf]  ;;  %v1666_v59 = vld [vmem:[%s2242_s7 + $0x8e4] sm:$0xf]  ;;  %1663 = vst [vmem:[%s2247_s8 + $0x134] sm:$0xf] %v1662_v57 }
  0x3a   : > { %1665 = vst [vmem:[%s2247_s8 + $0x140] sm:$0xf] %v1664_v58  ;;  %1667 = vst [vmem:[%s2247_s8 + $0x14c] sm:$0xf] %v1666_v59  ;;  %v1668_v60 = vld [vmem:[%s2242_s7 + $0x938] sm:$0xf] }
  0x3b   : > { %v1670_v61 = vld [vmem:[%s2242_s7 + $0x98c] sm:$0xf]  ;;  %v1672_v62 = vld [vmem:[%s2242_s7 + $0x9e0] sm:$0xf]  ;;  %1669 = vst [vmem:[%s2247_s8 + $0x158] sm:$0xf] %v1668_v60 }
  0x3c   : > { %1671 = vst [vmem:[%s2247_s8 + $0x164] sm:$0xf] %v1670_v61  ;;  %1673 = vst [vmem:[%s2247_s8 + $0x170] sm:$0xf] %v1672_v62  ;;  %v1674_v63 = vld [vmem:[%s2242_s7 + $0xa34] sm:$0xf] }
  0x3d   : > { %1675 = vst [vmem:[%s2247_s8 + $0x17c] sm:$0xf] %v1674_v63 }
  0x3e PF: > { %p1676_p7 = scmp.ge.s32.totalorder %s2159_s18, 1  ;;  %p342_p8 = scmp.lt.s32.totalorder %s2159_s18, 15 }
  0x40   : > { %p343_p9 = pnand %p1676_p7, %p342_p8 }
  0x41   : > { %s349_s9 = sand.u32 (!%p343_p9), 1, %s2135_s12   ;;  %s388_s10 = smul.u32 (!%p343_p9), 48, %s2143_s14 }
  0x42   : > { %346 = sbr.rel (%p343_p9) target bundleno = 442 (0x1ba), region = 54  ;;  %s1678_s21 = sshll.u32 (!%p343_p9), %s2147_s15, 5 }
  0x43   : > { %s1959_s11 = smul.u32 (!%p343_p9), 384, %s349_s9  ;;  %p389_p10 = scmp.lt.s32.totalorder (!%p343_p9), %s388_s10, 335 }
  0x44   : > { %p401_p11 = scmp.lt.s32.totalorder (!%p343_p9), %s1678_s21, 63  ;;  %p1680_p12 = scmp.ne.s32.totalorder (!%p343_p9), %s2143_s14, 0 }
  0x45   : > { %s2389_s12 = scalar_lea.vmem (!%p343_p9), [#allocation3], %s1959_s11 }
  0x47   : > { %s2608_s10 = smov (!%p389_p10, %s388_s10), 335  ;;  %s2610_s21 = smov (!%p401_p11, %s1678_s21), 63 }
  0x48   : > { %s1677_s22 = sshll.u32 %s2608_s10, 2  ;;  %s1679_s27 = sshll.u32 %s2610_s21, 3 }
  0x49   : > { %s2382_s26 = scalar_lea.vmem %s2592_s1, %s1677_s22  ;;  %s2387_s30 = scalar_lea.vmem %s2594_s3, %s1679_s27 }
  0x4a   : > { %413 = sbr.rel (%p1680_p12) target bundleno = 96 (0x60), region = 62 }
  0x4f   : > { %v2161_v0 = vmov 0.0  }
  0x50   : > { %414 = vst [vmem:[#allocation2 + $0xb0] sm:$0xff] %v2161_v0  ;;  %415 = vst [vmem:[#allocation2] sm:$0xff] %v2161_v0 }
  0x51   : > { %416 = vst [vmem:[#allocation2 + $0xd8] sm:$0xff] %v2161_v0  ;;  %417 = vst [vmem:[#allocation2 + $0x18] sm:$0xff] %v2161_v0 }
  0x52   : > { %418 = vst [vmem:[#allocation2 + $0x50] sm:$0xff] %v2161_v0  ;;  %419 = vst [vmem:[#allocation2 + $0x68] sm:$0xff] %v2161_v0 }
  0x53   : > { %420 = vst [vmem:[#allocation2 + $0x30] sm:$0xff] %v2161_v0  ;;  %421 = vst [vmem:[#allocation2 + $0x48] sm:$0xff] %v2161_v0 }
  0x54   : > { %422 = vst [vmem:[#allocation2 + $0x80] sm:$0xff] %v2161_v0  ;;  %423 = vst [vmem:[#allocation2 + $0x88] sm:$0xff] %v2161_v0 }
  0x55   : > { %424 = vst [vmem:[#allocation2 + $0xe8] sm:$0xff] %v2161_v0  ;;  %425 = vst [vmem:[#allocation2 + $0xb8] sm:$0xff] %v2161_v0 }
  0x56   : > { %426 = vst [vmem:[#allocation2 + $0x60] sm:$0xff] %v2161_v0  ;;  %427 = vst [vmem:[#allocation2 + $0xf0] sm:$0xff] %v2161_v0 }
  0x57   : > { %428 = vst [vmem:[#allocation2 + $0x8] sm:$0xff] %v2161_v0  ;;  %429 = vst [vmem:[#allocation2 + $0x78] sm:$0xff] %v2161_v0 }
  0x58   : > { %430 = vst [vmem:[#allocation2 + $0x38] sm:$0xff] %v2161_v0  ;;  %431 = vst [vmem:[#allocation2 + $0x58] sm:$0xff] %v2161_v0 }
  0x59   : > { %432 = vst [vmem:[#allocation2 + $0x40] sm:$0xff] %v2161_v0  ;;  %433 = vst [vmem:[#allocation2 + $0xc8] sm:$0xff] %v2161_v0 }
  0x5a   : > { %434 = vst [vmem:[#allocation2 + $0xe0] sm:$0xff] %v2161_v0  ;;  %435 = vst [vmem:[#allocation2 + $0x90] sm:$0xff] %v2161_v0 }
  0x5b   : > { %436 = vst [vmem:[#allocation2 + $0x70] sm:$0xff] %v2161_v0  ;;  %437 = vst [vmem:[#allocation2 + $0xc0] sm:$0xff] %v2161_v0 }
  0x5c   : > { %438 = vst [vmem:[#allocation2 + $0xa8] sm:$0xff] %v2161_v0  ;;  %439 = vst [vmem:[#allocation2 + $0xd0] sm:$0xff] %v2161_v0 }
  0x5d   : > { %440 = vst [vmem:[#allocation2 + $0x10] sm:$0xff] %v2161_v0  ;;  %441 = vst [vmem:[#allocation2 + $0x28] sm:$0xff] %v2161_v0 }
  0x5e   : > { %442 = vst [vmem:[#allocation2 + $0xa0] sm:$0xff] %v2161_v0  ;;  %443 = vst [vmem:[#allocation2 + $0xf8] sm:$0xff] %v2161_v0 }
  0x5f   : > { %444 = vst [vmem:[#allocation2 + $0x20] sm:$0xff] %v2161_v0  ;;  %445 = vst [vmem:[#allocation2 + $0x98] sm:$0xff] %v2161_v0 }
  0x60 PF: > { %v2017_v1 = vld [vmem:[%s2382_s26 + $0x78] sm:$0xff]   ;;  %v2019_v3 = vld [vmem:[%s2382_s26 + $0x70] sm:$0xff]   ;;  %v2021_v5 = vld [vmem:[%s2382_s26 + $0x68] sm:$0xff]   ;;  %p1753_p13 = scmp.ne.s32.totalorder %s2143_s14, 6 }
  0x61   : > { %v2018_v2 = vld [vmem:[%s2382_s26 + $0x38] sm:$0xff]   ;;  %1757 = vmatprep.subr.bf16.mxu0 %v2017_v1  ;;  %1941 = vmatprep.subr.bf16.mxu1 %v2017_v1  ;;  %v2020_v4 = vld [vmem:[%s2382_s26 + $0x30] sm:$0xff]   ;;  %v2022_v6 = vld [vmem:[%s2382_s26 + $0x28] sm:$0xff]  }
  0x62   : > { %1758 = vmatpush3.bf16.msra.mxu0 %v2018_v2  ;;  %1949 = vmatpush3.bf16.msra.mxu1 %v2018_v2  ;;  %v2023_v7 = vld [vmem:[%s2382_s26 + $0x60] sm:$0xff]   ;;  %v2025_v9 = vld [vmem:[%s2382_s26 + $0x58] sm:$0xff]   ;;  %v2027_v11 = vld [vmem:[%s2382_s26 + $0x50] sm:$0xff]  }
  0x63   : > { %1759 = vmatprep.subr.bf16.mxu0 %v2019_v3  ;;  %1942 = vmatprep.subr.bf16.mxu1 %v2019_v3  ;;  %v2024_v8 = vld [vmem:[%s2382_s26 + $0x20] sm:$0xff]   ;;  %v2026_v10 = vld [vmem:[%s2382_s26 + $0x18] sm:$0xff]   ;;  %v2028_v14 = vld [vmem:[%s2382_s26 + $0x10] sm:$0xff]  }
  0x64   : > { %v2035_v12 = vld [vmem:[%s2389_s12 + $0x4] ss:$12 sps:$4 sm:$0xff]   ;;  %v2029_v15 = vld [vmem:[%s2382_s26 + $0x48] sm:$0xff]   ;;  %v2039_v19 = vld [vmem:[%s2382_s26 + $0xb8] sm:$0xff]  }
  0x65   : > { %v2038_v13 = vld [vmem:[%s2389_s12 + $0x124] ss:$12 sps:$4 sm:$0xff]   ;;  %1022 = vmatprep.mubr.bf16.mxu0 %v2035_v12  ;;  %v2030_v16 = vld [vmem:[%s2382_s26 + $0x8] sm:$0xff]   ;;  %v2049_v29 = vld [vmem:[%s2389_s12 + $0x34] ss:$12 sps:$4 sm:$0xff]  }
  0x66   : > { %1760 = vmatpush3.bf16.msra.mxu0 %v2020_v4  ;;  %1950 = vmatpush3.bf16.msra.mxu1 %v2020_v4  ;;  %v2031_v17 = vld [vmem:[%s2382_s26 + $0x40] sm:$0xff]   ;;  %v2041_v22 = vld [vmem:[%s2389_s12 + $0x1c] ss:$12 sps:$4 sm:$0xff]   ;;  %v2040_v23 = vld [vmem:[%s2382_s26 + $0xb0] sm:$0xff]  }
  0x67   : > { %1761 = vmatprep.subr.bf16.mxu0 %v2021_v5  ;;  %1943 = vmatprep.subr.bf16.mxu1 %v2021_v5  ;;  %v2032_v18 = vld [vmem:[%s2382_s26] sm:$0xff]   ;;  %v2043_v24 = vld [vmem:[%s2389_s12 + $0x13c] ss:$12 sps:$4 sm:$0xff]   ;;  %v2056_v34 = vld [vmem:[%s2382_s26 + $0x90] sm:$0xff]  }
  0x68   : > { %1118 = vmatprep.mubr.bf16.mxu1 %v2038_v13  ;;  %v2033_v20 = vld [vmem:[%s2389_s12] ss:$12 sps:$4 sm:$0xff]   ;;  %v2045_v25 = vld [vmem:[%s2389_s12 + $0x18] ss:$12 sps:$4 sm:$0xff]   ;;  %v2053_v32 = vld [vmem:[%s2389_s12 + $0x30] ss:$12 sps:$4 sm:$0xff]  }
  0x69   : > { %v2036_v21 = vld [vmem:[%s2389_s12 + $0x120] ss:$12 sps:$4 sm:$0xff]   ;;  %v2046_v27 = vld [vmem:[%s2389_s12 + $0x138] ss:$12 sps:$4 sm:$0xff]   ;;  %v2054_v33 = vld [vmem:[%s2389_s12 + $0x150] ss:$12 sps:$4 sm:$0xff]  }
  0x6a   : > { %1762 = vmatpush3.bf16.msra.mxu0 %v2022_v6  ;;  %1951 = vmatpush3.bf16.msra.mxu1 %v2022_v6  ;;  %v2047_v26 = vld [vmem:[%s2382_s26 + $0xa8] sm:$0xff]   ;;  %v2048_v28 = vld [vmem:[%s2382_s26 + $0xa0] sm:$0xff]   ;;  %v2055_v31 = vld [vmem:[%s2382_s26 + $0x98] sm:$0xff]  }
  0x6b   : > { %1763 = vmatprep.subr.bf16.mxu0 %v2023_v7  ;;  %1944 = vmatprep.subr.bf16.mxu1 %v2023_v7  ;;  %v2051_v30 = vld [vmem:[%s2389_s12 + $0x154] ss:$12 sps:$4 sm:$0xff]   ;;  %v2057_v35 = vld [vmem:[%s2389_s12 + $0x4c] ss:$12 sps:$4 sm:$0xff]   ;;  %v2065_v40 = vld [vmem:[%s2389_s12 + $0x64] ss:$12 sps:$4 sm:$0xff]  }
  0x6c   : > { %v2059_v36 = vld [vmem:[%s2389_s12 + $0x16c] ss:$12 sps:$4 sm:$0xff]   ;;  %v2061_v38 = vld [vmem:[%s2389_s12 + $0x48] ss:$12 sps:$4 sm:$0xff]   ;;  %v2064_v41 = vld [vmem:[%s2382_s26 + $0x80] sm:$0xff]  }
  0x6d   : > { %v2063_v37 = vld [vmem:[%s2382_s26 + $0x88] sm:$0xff]   ;;  %v2072_v46 = vld [vmem:[%s2389_s12 + $0x38] ss:$12 sps:$4 sm:$0xff]   ;;  %v2074_v48 = vld [vmem:[%s2389_s12 + $0x50] ss:$12 sps:$4 sm:$0xff]  }
  0x6e   : > { %1764 = vmatpush3.bf16.msra.mxu0 %v2024_v8  ;;  %1952 = vmatpush3.bf16.msra.mxu1 %v2024_v8  ;;  %v2062_v39 = vld [vmem:[%s2389_s12 + $0x168] ss:$12 sps:$4 sm:$0xff]   ;;  %v2068_v43 = vld [vmem:[%s2389_s12 + $0x60] ss:$12 sps:$4 sm:$0xff]   ;;  %v2073_v47 = vld [vmem:[%s2389_s12 + $0x78] ss:$12 sps:$4 sm:$0xff]  }
  0x6f   : > { %1765 = vmatprep.subr.bf16.mxu0 %v2025_v9  ;;  %1945 = vmatprep.subr.bf16.mxu1 %v2025_v9  ;;  %v2067_v42 = vld [vmem:[%s2389_s12 + $0x8] ss:$12 sps:$4 sm:$0xff]   ;;  %v2069_v44 = vld [vmem:[%s2389_s12 + $0x20] ss:$12 sps:$4 sm:$0xff]   ;;  %v2078_v51 = vld [vmem:[%s2389_s12 + $0x90] ss:$12 sps:$4 sm:$0xff]  }
  0x70   : > { %v2070_v45 = vld [vmem:[%s2389_s12 + $0x7c] ss:$12 sps:$4 sm:$0xff]   ;;  %v2075_v49 = vld [vmem:[%s2389_s12 + $0x94] ss:$12 sps:$4 sm:$0xff]   ;;  %v2080_v53 = vld [vmem:[%s2389_s12 + $0xac] ss:$12 sps:$4 sm:$0xff]  }
  0x71   : > { %v2077_v50 = vld [vmem:[%s2389_s12 + $0x68] ss:$12 sps:$4 sm:$0xff]   ;;  %v2079_v52 = vld [vmem:[%s2389_s12 + $0x80] ss:$12 sps:$4 sm:$0xff]   ;;  %v2082_v54 = vld [vmem:[%s2389_s12 + $0x98] ss:$12 sps:$4 sm:$0xff]  }
  0x72   : > { %1766 = vmatpush3.bf16.msra.mxu0 %v2026_v10  ;;  %1953 = vmatpush3.bf16.msra.mxu1 %v2026_v10  ;;  %v2083_v55 = vld [vmem:[%s2389_s12 + $0xa8] ss:$12 sps:$4 sm:$0xff]   ;;  %v2084_v56 = vld [vmem:[%s2389_s12 + $0xb0] ss:$12 sps:$4 sm:$0xff]   ;;  %v2088_v59 = vld [vmem:[%s2389_s12 + $0xc0] ss:$12 sps:$4 sm:$0xff]  }
  0x73   : > { %1767 = vmatprep.subr.bf16.mxu0 %v2027_v11  ;;  %1946 = vmatprep.subr.bf16.mxu1 %v2027_v11  ;;  %v2085_v57 = vld [vmem:[%s2389_s12 + $0xc4] ss:$12 sps:$4 sm:$0xff]   ;;  %v2087_v58 = vld [vmem:[%s2389_s12 + $0xc8] ss:$12 sps:$4 sm:$0xff]   ;;  %v2089_v60 = vld [vmem:[%s2389_s12 + $0xe0] ss:$12 sps:$4 sm:$0xff]  }
  0x74   : > { %v2090_v61 = vld [vmem:[%s2389_s12 + $0xdc] ss:$12 sps:$4 sm:$0xff]   ;;  %v2092_v62 = vld [vmem:[%s2389_s12 + $0xf8] ss:$12 sps:$4 sm:$0xff]   ;;  %v2095_v1 = vld [vmem:[%s2389_s12 + $0xf4] ss:$12 sps:$4 sm:$0xff]  }
  0x75   : > { %v2093_v63 = vld [vmem:[%s2389_s12 + $0xd8] ss:$12 sps:$4 sm:$0xff]   ;;  %v2094_v0 = vld [vmem:[%s2389_s12 + $0x110] ss:$12 sps:$4 sm:$0xff]   ;;  %v2097_v2 = vld [vmem:[%s2389_s12 + $0x128] ss:$12 sps:$4 sm:$0xff]  }
  0x76   : > { %1768 = vmatpush3.bf16.msra.mxu0 %v2028_v14  ;;  %1954 = vmatpush3.bf16.msra.mxu1 %v2028_v14  ;;  %v2098_v3 = vld [vmem:[%s2389_s12 + $0xf0] ss:$12 sps:$4 sm:$0xff]   ;;  %v2099_v4 = vld [vmem:[%s2389_s12 + $0x140] ss:$12 sps:$4 sm:$0xff]   ;;  %v2102_v6 = vld [vmem:[%s2389_s12 + $0x158] ss:$12 sps:$4 sm:$0xff]  }
  0x77   : > { %1769 = vmatprep.subr.bf16.mxu0 %v2029_v15  ;;  %1947 = vmatprep.subr.bf16.mxu1 %v2029_v15  ;;  %v2100_v5 = vld [vmem:[%s2389_s12 + $0x10c] ss:$12 sps:$4 sm:$0xff]   ;;  %v2103_v7 = vld [vmem:[%s2389_s12 + $0x108] ss:$12 sps:$4 sm:$0xff]   ;;  %v2104_v8 = vld [vmem:[%s2389_s12 + $0x170] ss:$12 sps:$4 sm:$0xff]  }
  0x7a   : > { %1770 = vmatpush3.bf16.msra.mxu0 %v2030_v16  ;;  %1955 = vmatpush3.bf16.msra.mxu1 %v2030_v16 }
  0x7b   : > { %1771 = vmatprep.subr.bf16.mxu0 %v2031_v17  ;;  %1948 = vmatprep.subr.bf16.mxu1 %v2031_v17 }
  0x7e   : > { %1772 = vmatpush3.bf16.msra.mxu0 %v2032_v18  ;;  %1956 = vmatpush3.bf16.msra.mxu1 %v2032_v18 }
  0x7f   : > { %1893 = vmatprep.subr.bf16.mxu1 %v2039_v19 }
  0x81   : > { %1023 = vmatmul.mubr.bf16.vlgmr.msra.gmra.mxu0 %v2033_v20  ;;  %1119 = vmatmul.mubr.bf16.vlgmr.msra.gmra.mxu1 %v2036_v21 }
  0x82   : > { %1894 = vmatpush3.bf16.msra.mxu1 %v2039_v19  ;;  %1030 = vmatprep.mubr.bf16.mxu0 %v2041_v22 }
  0x83   : > { %1895 = vmatprep.subr.bf16.mxu1 %v2040_v23  ;;  %1126 = vmatprep.mubr.bf16.mxu1 %v2043_v24 }
  0x86   : > { %1896 = vmatpush3.bf16.msra.mxu1 %v2040_v23 }
  0x87   : > { %1897 = vmatprep.subr.bf16.mxu1 %v2047_v26 }
  0x89   : > { %1031 = vmatmul.mubr.bf16.gmra.mxu0 %v2045_v25  ;;  %1127 = vmatmul.mubr.bf16.gmra.mxu1 %v2046_v27 }
  0x8a   : > { %1898 = vmatpush3.bf16.msra.mxu1 %v2047_v26  ;;  %1038 = vmatprep.mubr.bf16.mxu0 %v2049_v29 }
  0x8b   : > { %1899 = vmatprep.subr.bf16.mxu1 %v2048_v28  ;;  %1134 = vmatprep.mubr.bf16.mxu1 %v2051_v30 }
  0x8e   : > { %1900 = vmatpush3.bf16.msra.mxu1 %v2048_v28 }
  0x8f   : > { %1901 = vmatprep.subr.bf16.mxu1 %v2055_v31 }
  0x91   : > { %1039 = vmatmul.mubr.bf16.gmra.mxu0 %v2053_v32  ;;  %1135 = vmatmul.mubr.bf16.gmra.mxu1 %v2054_v33 }
  0x92   : > { %1902 = vmatpush3.bf16.msra.mxu1 %v2055_v31  ;;  %1046 = vmatprep.mubr.bf16.mxu0 %v2057_v35 }
  0x93   : > { %1903 = vmatprep.subr.bf16.mxu1 %v2056_v34  ;;  %1142 = vmatprep.mubr.bf16.mxu1 %v2059_v36 }
  0x96   : > { %1904 = vmatpush3.bf16.msra.mxu1 %v2056_v34 }
  0x97   : > { %1905 = vmatprep.subr.bf16.mxu1 %v2063_v37 }
  0x99   : > { %1047 = vmatmul.mubr.bf16.gmra.mxu0 %v2061_v38  ;;  %1143 = vmatmul.mubr.bf16.gmra.mxu1 %v2062_v39 }
  0x9a   : > { %1906 = vmatpush3.bf16.msra.mxu1 %v2063_v37  ;;  %1054 = vmatprep.mubr.bf16.mxu0 %v2065_v40 }
  0x9b   : > { %1907 = vmatprep.subr.bf16.mxu1 %v2064_v41  ;;  %1909 = vmatprep.mubr.bf16.mxu1 %v2067_v42 }
  0x9e   : > { %1908 = vmatpush3.bf16.msra.mxu1 %v2064_v41 }
  0xa1   : > { %1055 = vmatmul.mubr.bf16.gmra.mxu0 %v2068_v43  ;;  %1910 = vmatmul.mubr.bf16.vlgmr.msra.gmra.mxu1 %v2069_v44 }
  0xa2   : > { %1062 = vmatprep.mubr.bf16.mxu0 %v2070_v45  ;;  %1913 = vmatprep.mubr.bf16.mxu1 %v2072_v46 }
  0xa9   : > { %1063 = vmatmul.mubr.bf16.gmra.mxu0 %v2073_v47  ;;  %1914 = vmatmul.mubr.bf16.gmra.mxu1 %v2074_v48 }
  0xaa   : > { %1070 = vmatprep.mubr.bf16.mxu0 %v2075_v49  ;;  %1917 = vmatprep.mubr.bf16.mxu1 %v2077_v50  ;;  %v448_v49 = vld [vmem:[#allocation2 + $0xd8] sm:$0xff] }
  0xb1   : > { %1071 = vmatmul.mubr.bf16.gmra.mxu0 %v2078_v51  ;;  %1918 = vmatmul.mubr.bf16.gmra.mxu1 %v2079_v52 }
  0xb2   : > { %1078 = vmatprep.mubr.bf16.mxu0 %v2080_v53  ;;  %1921 = vmatprep.mubr.bf16.mxu1 %v2082_v54  ;;  %v446_v54 = vld [vmem:[#allocation2 + $0xb0] sm:$0xff] }
  0xb9   : > { %1079 = vmatmul.mubr.bf16.gmra.mxu0 %v2083_v55  ;;  %1922 = vmatmul.mubr.bf16.gmra.mxu1 %v2084_v56 }
  0xba   : > { %1086 = vmatprep.mubr.bf16.mxu0 %v2085_v57  ;;  %1925 = vmatprep.mubr.bf16.mxu1 %v2087_v58 }
  0xc1   : > { %1087 = vmatmul.mubr.bf16.gmra.mxu0 %v2088_v59  ;;  %1926 = vmatmul.mubr.bf16.gmra.mxu1 %v2089_v60  ;;  %v449_v60 = vld [vmem:[#allocation2 + $0x18] sm:$0xff] }
  0xc2   : > { %1094 = vmatprep.mubr.bf16.mxu0 %v2090_v61  ;;  %1929 = vmatprep.mubr.bf16.mxu1 %v2092_v62 }
  0xc9   : > { %1095 = vmatmul.mubr.bf16.gmra.mxu0 %v2093_v63  ;;  %1930 = vmatmul.mubr.bf16.gmra.mxu1 %v2094_v0 }
  0xca   : > { %1102 = vmatprep.mubr.bf16.mxu0 %v2095_v1  ;;  %1933 = vmatprep.mubr.bf16.mxu1 %v2097_v2  ;;  %v447_v2 = vld [vmem:[#allocation2] sm:$0xff] }
  0xd1   : > { %1103 = vmatmul.mubr.bf16.gmra.mxu0 %v2098_v3  ;;  %1934 = vmatmul.mubr.bf16.gmra.mxu1 %v2099_v4 }
  0xd2   : > { %1110 = vmatprep.mubr.bf16.mxu0 %v2100_v5  ;;  %1937 = vmatprep.mubr.bf16.mxu1 %v2102_v6 }
  0xd9   : > { %1111 = vmatmul.mubr.bf16.gmra.mxu0 %v2103_v7  ;;  %1938 = vmatmul.mubr.bf16.gmra.mxu1 %v2104_v8  ;;  %v452_v8 = vld [vmem:[#allocation2 + $0x30] sm:$0xff] }
 0x141   : > { %v1773_v9 = vpop.f32.mrf.mxu0  ;;  %v1845_v10 = vpop.f32.mrf.mxu1 }
 0x143   : > { %v1774_v11 = vpop.f32.mrf.mxu0  ;;  %v1846_v12 = vpop.f32.mrf.mxu1 }
 0x144   : > { %v2464_v13 = vadd.f32 %v1846_v12, %v1845_v10  ;;  %v1775_v51 = vadd.f32 %v1774_v11, %v1773_v9 }
 0x145   : > { %v1776_v14 = vpop.f32.mrf.mxu0  ;;  %v1848_v15 = vpop.f32.mrf.mxu1 }
 0x147   : > { %v1777_v16 = vpop.f32.mrf.mxu0  ;;  %v1849_v17 = vpop.f32.mrf.mxu1 }
 0x148   : > { %v2466_v18 = vadd.f32 %v1849_v17, %v1848_v15  ;;  %v1778_v62 = vadd.f32 %v1777_v16, %v1776_v14  ;;  %v450_v17 = vld [vmem:[#allocation2 + $0x50] sm:$0xff] }
 0x149   : > { %v1779_v19 = vpop.f32.mrf.mxu0  ;;  %v1851_v20 = vpop.f32.mrf.mxu1 }
 0x14b   : > { %v1780_v21 = vpop.f32.mrf.mxu0  ;;  %v1852_v22 = vpop.f32.mrf.mxu1 }
 0x14c   : > { %v2468_v23 = vadd.f32 %v1852_v22, %v1851_v20  ;;  %v1781_v47 = vadd.f32 %v1780_v21, %v1779_v19  ;;  %v453_v22 = vld [vmem:[#allocation2 + $0x48] sm:$0xff] }
 0x14d   : > { %v1782_v24 = vpop.f32.mrf.mxu0  ;;  %v1854_v25 = vpop.f32.mrf.mxu1 }
 0x14f   : > { %v1783_v26 = vpop.f32.mrf.mxu0  ;;  %v1855_v27 = vpop.f32.mrf.mxu1 }
 0x150   : > { %v2470_v28 = vadd.f32 %v1855_v27, %v1854_v25  ;;  %v1784_v56 = vadd.f32 %v1783_v26, %v1782_v24 }
 0x151   : > { %v1785_v29 = vpop.f32.mrf.mxu0  ;;  %v1857_v30 = vpop.f32.mrf.mxu1 }
 0x153   : > { %v1786_v31 = vpop.f32.mrf.mxu0  ;;  %v1858_v32 = vpop.f32.mrf.mxu1 }
 0x154   : > { %v2472_v33 = vadd.f32 %v1858_v32, %v1857_v30  ;;  %v1787_v10 = vadd.f32 %v1786_v31, %v1785_v29  ;;  %v451_v32 = vld [vmem:[#allocation2 + $0x68] sm:$0xff] }
 0x155   : > { %v1788_v34 = vpop.f32.mrf.mxu0  ;;  %v1860_v35 = vpop.f32.mrf.mxu1 }
 0x157   : > { %v1789_v36 = vpop.f32.mrf.mxu0  ;;  %v1861_v37 = vpop.f32.mrf.mxu1 }
 0x158   : > { %v2474_v38 = vadd.f32 %v1861_v37, %v1860_v35  ;;  %v1790_v25 = vadd.f32 %v1789_v36, %v1788_v34 }
 0x159   : > { %v1791_v39 = vpop.f32.mrf.mxu0  ;;  %v2476_v40 = vpop.f32.mrf.mxu1 }
 0x15b   : > { %v1792_v41 = vpop.f32.mrf.mxu0  ;;  %v2478_v42 = vpop.f32.mrf.mxu1 }
 0x15c   : > { %v1793_v4 = vadd.f32 %v1792_v41, %v1791_v39  ;;  %v456_v41 = vld [vmem:[#allocation2 + $0xe8] sm:$0xff] }
 0x15d   : > { %v1794_v43 = vpop.f32.mrf.mxu0  ;;  %v2480_v44 = vpop.f32.mrf.mxu1 }
 0x15f   : > { %v1795_v45 = vpop.f32.mrf.mxu0  ;;  %v2482_v46 = vpop.f32.mrf.mxu1 }
 0x160   : > { %v1796_v16 = vadd.f32 %v1795_v45, %v1794_v43 }
 0x161   : > { %v1797_v48 = vpop.f32.mrf.mxu0  ;;  %v1911_v50 = vpop.f32.mrf.mxu1 }
 0x162   : > { %v1194_v52 = vadd.f32 %v1911_v50, %v1781_v47 }
 0x163   : > { %v1798_v53 = vpop.f32.mrf.mxu0  ;;  %v1185_v55 = vpop.f32.mrf.mxu1 }
 0x164   : > { %v1314_v57 = vadd.f32 %v1194_v52, %v448_v49  ;;  %v1186_v58 = vadd.f32 %v1775_v51, %v1185_v55  ;;  %v1799_v45 = vadd.f32 %v1798_v53, %v1797_v48  ;;  %v454_v51 = vld [vmem:[#allocation2 + $0x80] sm:$0xff] }
 0x165   : > { %v1800_v59 = vpop.f32.mrf.mxu0  ;;  %v1912_v61 = vpop.f32.mrf.mxu1 }
 0x166   : > { %1346 = vst [vmem:[#allocation2 + $0xd8] sm:$0xff] %v1314_v57  ;;  %v1312_v63 = vadd.f32 %v1186_v58, %v446_v54  ;;  %v1197_v0 = vadd.f32 %v1912_v61, %v1784_v56  ;;  %v457_v56 = vld [vmem:[#allocation2 + $0xb8] sm:$0xff] }
 0x167   : > { %v1801_v1 = vpop.f32.mrf.mxu0  ;;  %v1188_v3 = vpop.f32.mrf.mxu1 }
 0x168   : > { %1344 = vst [vmem:[#allocation2 + $0xb0] sm:$0xff] %v1312_v63  ;;  %v1315_v5 = vadd.f32 %v1197_v0, %v449_v60  ;;  %v1189_v6 = vadd.f32 %v1778_v62, %v1188_v3  ;;  %v1802_v58 = vadd.f32 %v1801_v1, %v1800_v59  ;;  %v455_v63 = vld [vmem:[#allocation2 + $0x88] sm:$0xff] }
 0x169   : > { %v1803_v7 = vpop.f32.mrf.mxu0  ;;  %v1915_v9 = vpop.f32.mrf.mxu1  ;;  %v460_v1 = vld [vmem:[#allocation2 + $0x8] sm:$0xff] }
 0x16a   : > { %1347 = vst [vmem:[#allocation2 + $0x18] sm:$0xff] %v1315_v5  ;;  %v1313_v11 = vadd.f32 %v1189_v6, %v447_v2  ;;  %v1210_v12 = vadd.f32 %v1915_v9, %v1793_v4 }
 0x16b   : > { %v1804_v15 = vpop.f32.mrf.mxu0  ;;  %v1201_v14 = vpop.f32.mrf.mxu1 }
 0x16c   : > { %1345 = vst [vmem:[#allocation2] sm:$0xff] %v1313_v11  ;;  %v1318_v19 = vadd.f32 %v1210_v12, %v452_v8  ;;  %v1202_v20 = vadd.f32 %v1787_v10, %v1201_v14  ;;  %v1805_v31 = vadd.f32 %v1804_v15, %v1803_v7  ;;  %v458_v7 = vld [vmem:[#allocation2 + $0x60] sm:$0xff] }
 0x16d   : > { %v1806_v21 = vpop.f32.mrf.mxu0  ;;  %v1916_v24 = vpop.f32.mrf.mxu1 }
 0x16e   : > { %1350 = vst [vmem:[#allocation2 + $0x30] sm:$0xff] %v1318_v19  ;;  %v1316_v26 = vadd.f32 %v1202_v20, %v450_v17  ;;  %v1213_v27 = vadd.f32 %v1916_v24, %v1796_v16  ;;  %v459_v16 = vld [vmem:[#allocation2 + $0xf0] sm:$0xff]  ;;  %v461_v24 = vld [vmem:[#allocation2 + $0x78] sm:$0xff] }
 0x16f   : > { %v1807_v30 = vpop.f32.mrf.mxu0  ;;  %v1204_v29 = vpop.f32.mrf.mxu1 }
 0x170   : > { %1348 = vst [vmem:[#allocation2 + $0x50] sm:$0xff] %v1316_v26  ;;  %v1319_v35 = vadd.f32 %v1213_v27, %v453_v22  ;;  %v1205_v37 = vadd.f32 %v1790_v25, %v1204_v29  ;;  %v1808_v36 = vadd.f32 %v1807_v30, %v1806_v21 }
 0x171   : > { %v1809_v39 = vpop.f32.mrf.mxu0  ;;  %v1919_v43 = vpop.f32.mrf.mxu1 }
 0x172   : > { %1351 = vst [vmem:[#allocation2 + $0x48] sm:$0xff] %v1319_v35  ;;  %v1317_v47 = vadd.f32 %v1205_v37, %v451_v32  ;;  %v1226_v49 = vadd.f32 %v1919_v43, %v1805_v31  ;;  %v462_v37 = vld [vmem:[#allocation2 + $0x38] sm:$0xff] }
 0x173   : > { %v1810_v50 = vpop.f32.mrf.mxu0  ;;  %v1217_v34 = vpop.f32.mrf.mxu1 }
 0x174   : > { %1349 = vst [vmem:[#allocation2 + $0x68] sm:$0xff] %v1317_v47  ;;  %v1322_v52 = vadd.f32 %v1226_v49, %v456_v41  ;;  %v1218_v54 = vadd.f32 %v1799_v45, %v1217_v34  ;;  %v1811_v4 = vadd.f32 %v1810_v50, %v1809_v39 }
 0x175   : > { %v1812_v55 = vpop.f32.mrf.mxu0  ;;  %v1920_v57 = vpop.f32.mrf.mxu1 }
 0x176   : > { %1354 = vst [vmem:[#allocation2 + $0xe8] sm:$0xff] %v1322_v52  ;;  %v1320_v60 = vadd.f32 %v1218_v54, %v454_v51  ;;  %v1229_v61 = vadd.f32 %v1920_v57, %v1808_v36  ;;  %v463_v51 = vld [vmem:[#allocation2 + $0x58] sm:$0xff] }
 0x177   : > { %v1813_v62 = vpop.f32.mrf.mxu0  ;;  %v1220_v48 = vpop.f32.mrf.mxu1 }
 0x178   : > { %1352 = vst [vmem:[#allocation2 + $0x80] sm:$0xff] %v1320_v60  ;;  %v1323_v53 = vadd.f32 %v1229_v61, %v457_v56  ;;  %v1221_v0 = vadd.f32 %v1802_v58, %v1220_v48  ;;  %v1814_v12 = vadd.f32 %v1813_v62, %v1812_v55  ;;  %v464_v58 = vld [vmem:[#allocation2 + $0x40] sm:$0xff] }
 0x179   : > { %v1815_v2 = vpop.f32.mrf.mxu0  ;;  %v1923_v3 = vpop.f32.mrf.mxu1 }
 0x17a   : > { %1355 = vst [vmem:[#allocation2 + $0xb8] sm:$0xff] %v1323_v53  ;;  %v1321_v5 = vadd.f32 %v1221_v0, %v455_v63 }
 0x17b   : > { %v1816_v6 = vpop.f32.mrf.mxu0  ;;  %v1233_v8 = vpop.f32.mrf.mxu1 }
 0x17c   : > { %1353 = vst [vmem:[#allocation2 + $0x88] sm:$0xff] %v1321_v5  ;;  %v1817_v9 = vadd.f32 %v1816_v6, %v1815_v2  ;;  %v1234_v59 = vadd.f32 %v1811_v4, %v1233_v8  ;;  %v465_v2 = vld [vmem:[#allocation2 + $0xc8] sm:$0xff]  ;;  %v472_v4 = vld [vmem:[#allocation2 + $0x10] sm:$0xff] }
 0x17d   : > { %v1818_v10 = vpop.f32.mrf.mxu0  ;;  %v1924_v11 = vpop.f32.mrf.mxu1 }
 0x17e   : > { %v1242_v15 = vadd.f32 %v1923_v3, %v1817_v9  ;;  %v1324_v17 = vadd.f32 %v1234_v59, %v458_v7  ;;  %v470_v9 = vld [vmem:[#allocation2 + $0xa8] sm:$0xff] }
 0x17f   : > { %v1819_v14 = vpop.f32.mrf.mxu0  ;;  %v1236_v19 = vpop.f32.mrf.mxu1 }
 0x180   : > { %v1326_v20 = vadd.f32 %v1242_v15, %v460_v1  ;;  %1356 = vst [vmem:[#allocation2 + $0x60] sm:$0xff] %v1324_v17  ;;  %v1820_v21 = vadd.f32 %v1819_v14, %v1818_v10  ;;  %v1237_v22 = vadd.f32 %v1814_v12, %v1236_v19  ;;  %v466_v15 = vld [vmem:[#allocation2 + $0xe0] sm:$0xff]  ;;  %v473_v14 = vld [vmem:[#allocation2 + $0x28] sm:$0xff] }
 0x181   : > { %v1821_v25 = vpop.f32.mrf.mxu0  ;;  %v1927_v26 = vpop.f32.mrf.mxu1 }
 0x182   : > { %1358 = vst [vmem:[#allocation2 + $0x8] sm:$0xff] %v1326_v20  ;;  %v1245_v27 = vadd.f32 %v1924_v11, %v1820_v21  ;;  %v1325_v30 = vadd.f32 %v1237_v22, %v459_v16 }
 0x183   : > { %v1822_v32 = vpop.f32.mrf.mxu0  ;;  %v1249_v29 = vpop.f32.mrf.mxu1 }
 0x184   : > { %v1327_v31 = vadd.f32 %v1245_v27, %v461_v24  ;;  %1357 = vst [vmem:[#allocation2 + $0xf0] sm:$0xff] %v1325_v30  ;;  %v1823_v35 = vadd.f32 %v1822_v32, %v1821_v25  ;;  %v471_v24 = vld [vmem:[#allocation2 + $0xd0] sm:$0xff] }
 0x185   : > { %v1824_v39 = vpop.f32.mrf.mxu0  ;;  %v1928_v41 = vpop.f32.mrf.mxu1  ;;  %v467_v32 = vld [vmem:[#allocation2 + $0x90] sm:$0xff] }
 0x186   : > { %1359 = vst [vmem:[#allocation2 + $0x78] sm:$0xff] %v1327_v31  ;;  %v1250_v43 = vadd.f32 %v1823_v35, %v1249_v29  ;;  %v476_v31 = vld [vmem:[#allocation2 + $0x20] sm:$0xff] }
 0x187   : > { %v1825_v45 = vpop.f32.mrf.mxu0  ;;  %v1252_v47 = vpop.f32.mrf.mxu1 }
 0x188   : > { %v1328_v49 = vadd.f32 %v1250_v43, %v462_v37  ;;  %v1826_v50 = vadd.f32 %v1825_v45, %v1824_v39 }
 0x189   : > { %v1827_v34 = vpop.f32.mrf.mxu0  ;;  %v2484_v36 = vpop.f32.mrf.mxu1 }
 0x18a   : > { %1360 = vst [vmem:[#allocation2 + $0x38] sm:$0xff] %v1328_v49  ;;  %v1253_v52 = vadd.f32 %v1826_v50, %v1252_v47  ;;  %v468_v50 = vld [vmem:[#allocation2 + $0x70] sm:$0xff] }
 0x18b   : > { %v1828_v54 = vpop.f32.mrf.mxu0  ;;  %v1265_v55 = vpop.f32.mrf.mxu1 }
 0x18c   : > { %v1329_v56 = vadd.f32 %v1253_v52, %v463_v51  ;;  %v1829_v57 = vadd.f32 %v1828_v54, %v1827_v34  ;;  %v477_v34 = vld [vmem:[#allocation2 + $0x98] sm:$0xff] }
 0x18d   : > { %v1830_v60 = vpop.f32.mrf.mxu0  ;;  %v2486_v61 = vpop.f32.mrf.mxu1 }
 0x18e   : > { %1361 = vst [vmem:[#allocation2 + $0x58] sm:$0xff] %v1329_v56  ;;  %v1258_v62 = vadd.f32 %v1927_v26, %v1829_v57 }
 0x18f   : > { %v1831_v63 = vpop.f32.mrf.mxu0  ;;  %v1268_v48 = vpop.f32.mrf.mxu1 }
 0x190   : > { %v1330_v53 = vadd.f32 %v1258_v62, %v464_v58  ;;  %v1832_v0 = vadd.f32 %v1831_v63, %v1830_v60 }
 0x191   : > { %v1833_v3 = vpop.f32.mrf.mxu0  ;;  %v1935_v5 = vpop.f32.mrf.mxu1 }
 0x192   : > { %1362 = vst [vmem:[#allocation2 + $0x40] sm:$0xff] %v1330_v53  ;;  %v1261_v6 = vadd.f32 %v1928_v41, %v1832_v0  ;;  %v1290_v7 = vadd.f32 %v1935_v5, %v2468_v23  ;;  %v1865_v23 = vadd.f32 %v2478_v42, %v2476_v40  ;;  %v1868_v40 = vadd.f32 %v2482_v46, %v2480_v44  ;;  %v474_v41 = vld [vmem:[#allocation2 + $0xa0] sm:$0xff]  ;;  %v475_v46 = vld [vmem:[#allocation2 + $0xf8] sm:$0xff] }
 0x193   : > { %v1834_v8 = vpop.f32.mrf.mxu0  ;;  %v1281_v59 = vpop.f32.mrf.mxu1 }
 0x194   : > { %v1331_v1 = vadd.f32 %v1261_v6, %v465_v2  ;;  %v1338_v10 = vadd.f32 %v1290_v7, %v472_v4  ;;  %v1835_v11 = vadd.f32 %v1834_v8, %v1833_v3  ;;  %v1282_v12 = vadd.f32 %v2464_v13, %v1281_v59 }
 0x195   : > { %v1836_v17 = vpop.f32.mrf.mxu0  ;;  %v1936_v16 = vpop.f32.mrf.mxu1 }
 0x196   : > { %1363 = vst [vmem:[#allocation2 + $0xc8] sm:$0xff] %v1331_v1  ;;  %1370 = vst [vmem:[#allocation2 + $0x10] sm:$0xff] %v1338_v10  ;;  %v1266_v19 = vadd.f32 %v1835_v11, %v1265_v55  ;;  %v1336_v20 = vadd.f32 %v1282_v12, %v470_v9  ;;  %v1293_v21 = vadd.f32 %v1936_v16, %v2470_v28 }
 0x197   : > { %v1837_v22 = vpop.f32.mrf.mxu0  ;;  %v1284_v25 = vpop.f32.mrf.mxu1 }
 0x198   : > { %v1332_v26 = vadd.f32 %v1266_v19, %v466_v15  ;;  %1368 = vst [vmem:[#allocation2 + $0xa8] sm:$0xff] %v1336_v20  ;;  %v1339_v27 = vadd.f32 %v1293_v21, %v473_v14  ;;  %v1838_v13 = vadd.f32 %v1837_v22, %v1836_v17  ;;  %v1285_v30 = vadd.f32 %v2466_v18, %v1284_v25 }
 0x199   : > { %v1839_v29 = vpop.f32.mrf.mxu0  ;;  %v1939_v35 = vpop.f32.mrf.mxu1 }
 0x19a   : > { %1364 = vst [vmem:[#allocation2 + $0xe0] sm:$0xff] %v1332_v26  ;;  %1371 = vst [vmem:[#allocation2 + $0x28] sm:$0xff] %v1339_v27  ;;  %v1269_v37 = vadd.f32 %v1838_v13, %v1268_v48  ;;  %v1337_v28 = vadd.f32 %v1285_v30, %v471_v24  ;;  %v1306_v39 = vadd.f32 %v1939_v35, %v1865_v23 }
 0x19b   : > { %v1840_v42 = vpop.f32.mrf.mxu0  ;;  %v1297_v43 = vpop.f32.mrf.mxu1 }
 0x19c   : > { %v1333_v45 = vadd.f32 %v1269_v37, %v467_v32  ;;  %1369 = vst [vmem:[#allocation2 + $0xd0] sm:$0xff] %v1337_v28  ;;  %v1342_v47 = vadd.f32 %v1306_v39, %v476_v31  ;;  %v1841_v49 = vadd.f32 %v1840_v42, %v1839_v29  ;;  %v1298_v18 = vadd.f32 %v2472_v33, %v1297_v43  ;;  %v469_v33 = vld [vmem:[#allocation2 + $0xc0] sm:$0xff] }
 0x19d   : > { %v1842_v51 = vpop.f32.mrf.mxu0  ;;  %v1940_v52 = vpop.f32.mrf.mxu1 }
 0x19e   : > { %1365 = vst [vmem:[#allocation2 + $0x90] sm:$0xff] %v1333_v45  ;;  %1374 = vst [vmem:[#allocation2 + $0x20] sm:$0xff] %v1342_v47  ;;  %v1274_v54 = vadd.f32 %v2484_v36, %v1841_v49  ;;  %v1340_v55 = vadd.f32 %v1298_v18, %v474_v41  ;;  %v1309_v56 = vadd.f32 %v1940_v52, %v1868_v40 }
 0x19f   : > { %v1843_v44 = vpop.f32.mrf.mxu0  ;;  %v1300_v57 = vpop.f32.mrf.mxu1 }
 0x1a0   : > { %v1334_v58 = vadd.f32 %v1274_v54, %v468_v50  ;;  %1372 = vst [vmem:[#allocation2 + $0xa0] sm:$0xff] %v1340_v55  ;;  %v1343_v60 = vadd.f32 %v1309_v56, %v477_v34  ;;  %v1844_v62 = vadd.f32 %v1843_v44, %v1842_v51  ;;  %v1301_v63 = vadd.f32 %v2474_v38, %v1300_v57 }
 0x1a2   : > { %1366 = vst [vmem:[#allocation2 + $0x70] sm:$0xff] %v1334_v58  ;;  %1375 = vst [vmem:[#allocation2 + $0x98] sm:$0xff] %v1343_v60  ;;  %v1277_v48 = vadd.f32 %v2486_v61, %v1844_v62  ;;  %v1341_v53 = vadd.f32 %v1301_v63, %v475_v46  ;;  %1379 = sbr.rel (%p1753_p13) target bundleno = 442 (0x1ba), region = 66 }
 0x1a4   : > { %v1335_v0 = vadd.f32 %v1277_v48, %v469_v33  ;;  %1373 = vst [vmem:[#allocation2 + $0xf8] sm:$0xff] %v1341_v53 }
 0x1a6   : > { %1367 = vst [vmem:[#allocation2 + $0xc0] sm:$0xff] %v1335_v0 }
 0x1a7   : > { %v1380_v36 = vld [vmem:[#allocation2 + $0xb0] sm:$0xff]  ;;  %v2504_v2 = vld [vmem:[%s2593_s2] ss:$0 sm:$0xff]  ;;  %v1382_v4 = vld [vmem:[#allocation2 + $0xd8] sm:$0xff] }
 0x1a8   : > { %v1381_v38 = vld [vmem:[#allocation2] sm:$0xff]  ;;  %v1419_v3 = vadd.f32 %v2504_v2, %v1380_v36  ;;  %v1383_v5 = vld [vmem:[#allocation2 + $0x18] sm:$0xff]  ;;  %v1384_v6 = vld [vmem:[#allocation2 + $0x50] sm:$0xff]  ;;  %v1421_v7 = vadd.f32 %v2504_v2, %v1382_v4 }
 0x1a9   : > { %v1420_v61 = vadd.f32 %v2504_v2, %v1381_v38  ;;  %v1422_v8 = vadd.f32 %v2504_v2, %v1383_v5  ;;  %v1423_v9 = vadd.f32 %v2504_v2, %v1384_v6  ;;  %v1385_v59 = vld [vmem:[#allocation2 + $0x68] sm:$0xff]  ;;  %v1386_v1 = vld [vmem:[#allocation2 + $0x30] sm:$0xff]  ;;  %v1388_v17 = vld [vmem:[#allocation2 + $0x80] sm:$0xff] }
 0x1aa   : > { %v1387_v10 = vld [vmem:[#allocation2 + $0x48] sm:$0xff]  ;;  %1451 = vst [vmem:[%s2387_s30] sm:$0xff] %v1419_v3  ;;  %v1424_v11 = vadd.f32 %v2504_v2, %v1385_v59  ;;  %v1425_v12 = vadd.f32 %v2504_v2, %v1386_v1  ;;  %1453 = vst [vmem:[%s2387_s30 + $0x10] sm:$0xff] %v1421_v7  ;;  %v1427_v19 = vadd.f32 %v2504_v2, %v1388_v17  ;;  %v1391_v23 = vld [vmem:[#allocation2 + $0xb8] sm:$0xff] }
 0x1ab   : > { %1452 = vst [vmem:[%s2387_s30 + $0x8] sm:$0xff] %v1420_v61  ;;  %v1426_v15 = vadd.f32 %v2504_v2, %v1387_v10  ;;  %v1389_v14 = vld [vmem:[#allocation2 + $0x88] sm:$0xff]  ;;  %1454 = vst [vmem:[%s2387_s30 + $0x18] sm:$0xff] %v1422_v8  ;;  %v1392_v22 = vld [vmem:[#allocation2 + $0x60] sm:$0xff]  ;;  %v1430_v25 = vadd.f32 %v2504_v2, %v1391_v23 }
 0x1ac   : > { %v1390_v16 = vld [vmem:[#allocation2 + $0xe8] sm:$0xff]  ;;  %1455 = vst [vmem:[%s2387_s30 + $0x20] sm:$0xff] %v1423_v9  ;;  %v1428_v20 = vadd.f32 %v2504_v2, %v1389_v14  ;;  %v1393_v24 = vld [vmem:[#allocation2 + $0xf0] sm:$0xff]  ;;  %1456 = vst [vmem:[%s2387_s30 + $0x28] sm:$0xff] %v1424_v11  ;;  %v1431_v26 = vadd.f32 %v2504_v2, %v1392_v22 }
 0x1ad   : > { %v1429_v21 = vadd.f32 %v2504_v2, %v1390_v16  ;;  %1457 = vst [vmem:[%s2387_s30 + $0x30] sm:$0xff] %v1425_v12  ;;  %1458 = vst [vmem:[%s2387_s30 + $0x38] sm:$0xff] %v1426_v15  ;;  %v1432_v27 = vadd.f32 %v2504_v2, %v1393_v24  ;;  %v1394_v13 = vld [vmem:[#allocation2 + $0x8] sm:$0xff]  ;;  %v1395_v30 = vld [vmem:[#allocation2 + $0x78] sm:$0xff] }
 0x1ae   : > { %v1396_v32 = vld [vmem:[#allocation2 + $0x38] sm:$0xff]  ;;  %1459 = vst [vmem:[%s2387_s30 + $0x40] sm:$0xff] %v1427_v19  ;;  %1460 = vst [vmem:[%s2387_s30 + $0x48] sm:$0xff] %v1428_v20  ;;  %v1433_v29 = vadd.f32 %v2504_v2, %v1394_v13  ;;  %v1434_v31 = vadd.f32 %v2504_v2, %v1395_v30  ;;  %v1398_v28 = vld [vmem:[#allocation2 + $0x40] sm:$0xff] }
 0x1af   : > { %1461 = vst [vmem:[%s2387_s30 + $0x50] sm:$0xff] %v1429_v21  ;;  %v1435_v35 = vadd.f32 %v2504_v2, %v1396_v32  ;;  %v1397_v37 = vld [vmem:[#allocation2 + $0x58] sm:$0xff]  ;;  %v1399_v39 = vld [vmem:[#allocation2 + $0xc8] sm:$0xff]  ;;  %1462 = vst [vmem:[%s2387_s30 + $0x58] sm:$0xff] %v1430_v25  ;;  %v1437_v42 = vadd.f32 %v2504_v2, %v1398_v28 }
 0x1b0   : > { %1463 = vst [vmem:[%s2387_s30 + $0x60] sm:$0xff] %v1431_v26  ;;  %1464 = vst [vmem:[%s2387_s30 + $0x68] sm:$0xff] %v1432_v27  ;;  %v1436_v40 = vadd.f32 %v2504_v2, %v1397_v37  ;;  %v1438_v41 = vadd.f32 %v2504_v2, %v1399_v39  ;;  %v1400_v43 = vld [vmem:[#allocation2 + $0xe0] sm:$0xff]  ;;  %v1401_v45 = vld [vmem:[#allocation2 + $0x90] sm:$0xff] }
 0x1b1   : > { %v1402_v47 = vld [vmem:[#allocation2 + $0x70] sm:$0xff]  ;;  %1465 = vst [vmem:[%s2387_s30 + $0x70] sm:$0xff] %v1433_v29  ;;  %1466 = vst [vmem:[%s2387_s30 + $0x78] sm:$0xff] %v1434_v31  ;;  %v1439_v49 = vadd.f32 %v2504_v2, %v1400_v43  ;;  %v1440_v18 = vadd.f32 %v2504_v2, %v1401_v45  ;;  %v1403_v51 = vld [vmem:[#allocation2 + $0xc0] sm:$0xff] }
 0x1b2   : > { %1467 = vst [vmem:[%s2387_s30 + $0x80] sm:$0xff] %v1435_v35  ;;  %v1441_v50 = vadd.f32 %v2504_v2, %v1402_v47  ;;  %v1404_v34 = vld [vmem:[#allocation2 + $0xa8] sm:$0xff]  ;;  %v1405_v52 = vld [vmem:[#allocation2 + $0xd0] sm:$0xff]  ;;  %1468 = vst [vmem:[%s2387_s30 + $0x88] sm:$0xff] %v1436_v40  ;;  %v1442_v54 = vadd.f32 %v2504_v2, %v1403_v51 }
 0x1b3   : > { %1469 = vst [vmem:[%s2387_s30 + $0x90] sm:$0xff] %v1437_v42  ;;  %1470 = vst [vmem:[%s2387_s30 + $0x98] sm:$0xff] %v1438_v41  ;;  %v1443_v55 = vadd.f32 %v2504_v2, %v1404_v34  ;;  %v1444_v56 = vadd.f32 %v2504_v2, %v1405_v52  ;;  %v1406_v44 = vld [vmem:[#allocation2 + $0x10] sm:$0xff]  ;;  %v1407_v46 = vld [vmem:[#allocation2 + $0x28] sm:$0xff] }
 0x1b4   : > { %v1408_v57 = vld [vmem:[#allocation2 + $0xa0] sm:$0xff]  ;;  %1471 = vst [vmem:[%s2387_s30 + $0xa0] sm:$0xff] %v1439_v49  ;;  %1472 = vst [vmem:[%s2387_s30 + $0xa8] sm:$0xff] %v1440_v18  ;;  %v1445_v58 = vadd.f32 %v2504_v2, %v1406_v44  ;;  %v1446_v60 = vadd.f32 %v2504_v2, %v1407_v46  ;;  %v1409_v63 = vld [vmem:[#allocation2 + $0xf8] sm:$0xff] }
 0x1b5   : > { %1473 = vst [vmem:[%s2387_s30 + $0xb0] sm:$0xff] %v1441_v50  ;;  %v1447_v62 = vadd.f32 %v2504_v2, %v1408_v57  ;;  %v1410_v33 = vld [vmem:[#allocation2 + $0x20] sm:$0xff]  ;;  %v1411_v48 = vld [vmem:[#allocation2 + $0x98] sm:$0xff]  ;;  %1474 = vst [vmem:[%s2387_s30 + $0xb8] sm:$0xff] %v1442_v54  ;;  %v1448_v53 = vadd.f32 %v2504_v2, %v1409_v63 }
 0x1b6   : > { %1475 = vst [vmem:[%s2387_s30 + $0xc0] sm:$0xff] %v1443_v55  ;;  %1476 = vst [vmem:[%s2387_s30 + $0xc8] sm:$0xff] %v1444_v56  ;;  %v1449_v0 = vadd.f32 %v2504_v2, %v1410_v33  ;;  %v1450_v36 = vadd.f32 %v2504_v2, %v1411_v48 }
 0x1b7   : > { %1477 = vst [vmem:[%s2387_s30 + $0xd0] sm:$0xff] %v1445_v58  ;;  %1478 = vst [vmem:[%s2387_s30 + $0xd8] sm:$0xff] %v1446_v60 }
 0x1b8   : > { %1479 = vst [vmem:[%s2387_s30 + $0xe0] sm:$0xff] %v1447_v62  ;;  %1480 = vst [vmem:[%s2387_s30 + $0xe8] sm:$0xff] %v1448_v53 }
 0x1b9   : > { %1481 = vst [vmem:[%s2387_s30 + $0xf0] sm:$0xff] %v1449_v0  ;;  %1482 = vst [vmem:[%s2387_s30 + $0xf8] sm:$0xff] %v1450_v36 }
 0x1ba PF: > { %s13_s18 = sadd.s32 1, %s2159_s18   ;;  %s2595_s12 = smov %s2139_s13 }
 0x1bb   : > { %p10_p0 = scmp.ge.s32.totalorder %s13_s18, 16   ;;  %s2596_s13 = smov %s2233_s25 }
 0x1bc   : > { %s2597_s14 = smov %s2151_s16  ;;  %s2598_s15 = smov %s2155_s17 }
 0x1bd   : > { %s2599_s16 = smov %s2602_s19  ;;  %s2600_s17 = smov %s2606_s20 }
 0x1be   :  { %12 = sbr.rel (!%p10_p0) target bundleno = 4 (0x4), region = 113 }

// kernel: _lambda_.103
= control target key start
LH: loop header
LB: loop body
LE: loop exit
PB: predicated region body
PF: predicated region fallthrough
CT: control target
= control target key end

     0   :  { %s1212_s12 = smov 0   ;;  %s1214_s13 = smov 0   ;;  %s1362_s0 = inlined_call_operand.vmem [shape: bf16[512,128], index: 0, kind: input, shape index: {}]   ;;  %s1363_s1 = inlined_call_operand.vmem [shape: bf16[128,128], index: 1, kind: input, shape index: {}]   ;;  %s1364_s2 = inlined_call_operand.vmem [shape: f32[1,128], index: 2, kind: input, shape index: {}]   ;;  %s1365_s3 = inlined_call_operand.vmem [shape: f32[512,128], index: 3, kind: output, shape index: {}]  }
   0x1   :  { %s1216_s14 = smov 0  }
   0x2 LB: > { %s32_s15 = sadd.s32 1, %s1186_s13  ;;  %p1000_p0 = scmp.ge.s32.totalorder %s1190_s14, 1  ;;  %s1190_s14 = sphi %s1216_s14, %s13_s14   ;;  %s1186_s13 = sphi %s1214_s13, %s1367_s13   ;;  %s1182_s12 = sphi %s1212_s12, %s1366_s12  }
   0x3   : > { %p34_p1 = scmp.ge.s32.totalorder %s32_s15, 2  ;;  %p188_p2 = scmp.lt.s32.totalorder %s1190_s14, 3 }
   0x5   : > { %s1369_s15 = smov (%p34_p1, %s32_s15), 0  ;;  %p189_p3 = pnand %p1000_p0, %p188_p2 }
   0x6   : > { %s1001_s18 = sshll.u32 (!%p189_p3), %s1182_s12, 5 }
   0x7   : > { %192 = sbr.rel (%p189_p3) target bundleno = 273 (0x111), region = 32  ;;  %p230_p4 = scmp.lt.s32.totalorder (!%p189_p3), %s1001_s18, 63 }
   0xc   : > { %v1144_v0 = vld [vmem:[%s1363_s1 + $0x38] sm:$0xff]   ;;  %v1145_v1 = vld [vmem:[%s1363_s1 + $0x30] sm:$0xff]   ;;  %s1371_s18 = smov (!%p230_p4, %s1001_s18), 63  ;;  %v1146_v2 = vld [vmem:[%s1363_s1 + $0x28] sm:$0xff]  }
   0xd   : > { %1056 = vmatprep.subr.bf16.mxu0 %v1144_v0  ;;  %1104 = vmatprep.subr.bf16.mxu1 %v1144_v0  ;;  %s1002_s23 = sshll.u32 %s1371_s18, 2  ;;  %v1147_v3 = vld [vmem:[%s1363_s1 + $0x20] sm:$0xff]   ;;  %v1148_v6 = vld [vmem:[%s1363_s1 + $0x18] sm:$0xff]   ;;  %v1149_v7 = vld [vmem:[%s1363_s1 + $0x10] sm:$0xff]   ;;  %s1004_s12 = sshll.u32 %s1371_s18, 3 }
   0xe   : > { %1057 = vmatpush3.bf16.msra.mxu0 %v1144_v0  ;;  %1112 = vmatpush3.bf16.msra.mxu1 %v1144_v0  ;;  %s1245_s26 = scalar_lea.vmem %s1362_s0, %s1002_s23  ;;  %v1150_v8 = vld [vmem:[%s1363_s1 + $0x8] sm:$0xff]   ;;  %v1151_v9 = vld [vmem:[%s1363_s1] sm:$0xff]   ;;  %s1289_s19 = scalar_lea.vmem %s1365_s3, %s1004_s12 }
   0xf   : > { %1058 = vmatprep.subr.bf16.mxu0 %v1145_v1  ;;  %1105 = vmatprep.subr.bf16.mxu1 %v1145_v1  ;;  %v1152_v4 = vld [vmem:[%s1245_s26] sm:$0xff]   ;;  %v1154_v10 = vld [vmem:[%s1245_s26 + $0x8] sm:$0xff]   ;;  %v1156_v12 = vld [vmem:[%s1245_s26 + $0x10] sm:$0xff]  }
  0x10   : > { %v1153_v5 = vld [vmem:[%s1245_s26 + $0x40] sm:$0xff]   ;;  %1072 = vmatprep.mubr.bf16.mxu0 %v1152_v4  ;;  %v1155_v11 = vld [vmem:[%s1245_s26 + $0x48] sm:$0xff]   ;;  %v1157_v13 = vld [vmem:[%s1245_s26 + $0x50] sm:$0xff]  }
  0x11   : > { %1088 = vmatprep.mubr.bf16.mxu1 %v1153_v5  ;;  %v1158_v14 = vld [vmem:[%s1245_s26 + $0x18] sm:$0xff]   ;;  %v1160_v16 = vld [vmem:[%s1245_s26 + $0x20] sm:$0xff]   ;;  %v1162_v18 = vld [vmem:[%s1245_s26 + $0x28] sm:$0xff]  }
  0x12   : > { %1059 = vmatpush3.bf16.msra.mxu0 %v1145_v1  ;;  %1113 = vmatpush3.bf16.msra.mxu1 %v1145_v1  ;;  %v1159_v15 = vld [vmem:[%s1245_s26 + $0x58] sm:$0xff]   ;;  %v1161_v17 = vld [vmem:[%s1245_s26 + $0x60] sm:$0xff]   ;;  %v1163_v19 = vld [vmem:[%s1245_s26 + $0x68] sm:$0xff]  }
  0x13   : > { %1060 = vmatprep.subr.bf16.mxu0 %v1146_v2  ;;  %1106 = vmatprep.subr.bf16.mxu1 %v1146_v2  ;;  %v1164_v20 = vld [vmem:[%s1245_s26 + $0x30] sm:$0xff]   ;;  %v1166_v22 = vld [vmem:[%s1245_s26 + $0x38] sm:$0xff]   ;;  %v1281_v24 = vld [vmem:[%s1364_s2] ss:$0 sm:$0xff] }
  0x14   : > { %v1165_v21 = vld [vmem:[%s1245_s26 + $0x70] sm:$0xff]   ;;  %v1167_v23 = vld [vmem:[%s1245_s26 + $0x78] sm:$0xff]  }
  0x16   : > { %1061 = vmatpush3.bf16.msra.mxu0 %v1146_v2  ;;  %1114 = vmatpush3.bf16.msra.mxu1 %v1146_v2 }
  0x17   : > { %1062 = vmatprep.subr.bf16.mxu0 %v1147_v3  ;;  %1107 = vmatprep.subr.bf16.mxu1 %v1147_v3 }
  0x1a   : > { %1063 = vmatpush3.bf16.msra.mxu0 %v1147_v3  ;;  %1115 = vmatpush3.bf16.msra.mxu1 %v1147_v3 }
  0x1b   : > { %1064 = vmatprep.subr.bf16.mxu0 %v1148_v6  ;;  %1108 = vmatprep.subr.bf16.mxu1 %v1148_v6 }
  0x1e   : > { %1065 = vmatpush3.bf16.msra.mxu0 %v1148_v6  ;;  %1116 = vmatpush3.bf16.msra.mxu1 %v1148_v6 }
  0x1f   : > { %1066 = vmatprep.subr.bf16.mxu0 %v1149_v7  ;;  %1109 = vmatprep.subr.bf16.mxu1 %v1149_v7 }
  0x22   : > { %1067 = vmatpush3.bf16.msra.mxu0 %v1149_v7  ;;  %1117 = vmatpush3.bf16.msra.mxu1 %v1149_v7 }
  0x23   : > { %1068 = vmatprep.subr.bf16.mxu0 %v1150_v8  ;;  %1110 = vmatprep.subr.bf16.mxu1 %v1150_v8 }
  0x26   : > { %1069 = vmatpush3.bf16.msra.mxu0 %v1150_v8  ;;  %1118 = vmatpush3.bf16.msra.mxu1 %v1150_v8 }
  0x27   : > { %1070 = vmatprep.subr.bf16.mxu0 %v1151_v9  ;;  %1111 = vmatprep.subr.bf16.mxu1 %v1151_v9 }
  0x2a   : > { %1071 = vmatpush3.bf16.msra.mxu0 %v1151_v9  ;;  %1119 = vmatpush3.bf16.msra.mxu1 %v1151_v9 }
  0x2d   : > { %1073 = vmatmul.mubr.bf16.vlgmr.msra.gmra.mxu0 %v1154_v10  ;;  %1089 = vmatmul.mubr.bf16.vlgmr.msra.gmra.mxu1 %v1155_v11 }
  0x2e   : > { %1076 = vmatprep.mubr.bf16.mxu0 %v1156_v12  ;;  %1092 = vmatprep.mubr.bf16.mxu1 %v1157_v13 }
  0x35   : > { %1077 = vmatmul.mubr.bf16.gmra.mxu0 %v1158_v14  ;;  %1093 = vmatmul.mubr.bf16.gmra.mxu1 %v1159_v15 }
  0x36   : > { %1080 = vmatprep.mubr.bf16.mxu0 %v1160_v16  ;;  %1096 = vmatprep.mubr.bf16.mxu1 %v1161_v17 }
  0x3d   : > { %1081 = vmatmul.mubr.bf16.gmra.mxu0 %v1162_v18  ;;  %1097 = vmatmul.mubr.bf16.gmra.mxu1 %v1163_v19 }
  0x3e   : > { %1084 = vmatprep.mubr.bf16.mxu0 %v1164_v20  ;;  %1100 = vmatprep.mubr.bf16.mxu1 %v1165_v21 }
  0x45   : > { %1085 = vmatmul.mubr.bf16.gmra.mxu0 %v1166_v22  ;;  %1101 = vmatmul.mubr.bf16.gmra.mxu1 %v1167_v23 }
  0xed   : > { %v1074_v25 = vpop.f32.mrf.mxu0  ;;  %v1090_v26 = vpop.f32.mrf.mxu1 }
  0xee   : > { %v789_v27 = vadd.f32 %v1074_v25, %v1281_v24  ;;  %v805_v28 = vadd.f32 %v1090_v26, %v1281_v24 }
  0xef   : > { %v554_v29 = vpop.f32.mrf.mxu0  ;;  %v618_v30 = vpop.f32.mrf.mxu1 }
  0xf0   : > { %v821_v31 = vmax.f32 %v789_v27, 0.0  ;;  %v837_v32 = vmax.f32 %v805_v28, 0.0  ;;  %v787_v33 = vadd.f32 %v1281_v24, %v554_v29  ;;  %v803_v34 = vadd.f32 %v1281_v24, %v618_v30 }
  0xf1   : > { %v1075_v35 = vpop.f32.mrf.mxu0  ;;  %v1091_v36 = vpop.f32.mrf.mxu1 }
  0xf2   : > { %853 = vst [vmem:[%s1289_s19 + $0x10] sm:$0xff] %v821_v31  ;;  %869 = vst [vmem:[%s1289_s19 + $0x90] sm:$0xff] %v837_v32  ;;  %v819_v37 = vmax.f32 %v787_v33, 0.0  ;;  %v835_v38 = vmax.f32 %v803_v34, 0.0  ;;  %v790_v39 = vadd.f32 %v1075_v35, %v1281_v24  ;;  %v806_v40 = vadd.f32 %v1091_v36, %v1281_v24 }
  0xf3   : > { %v557_v41 = vpop.f32.mrf.mxu0  ;;  %v621_v42 = vpop.f32.mrf.mxu1 }
  0xf4   : > { %851 = vst [vmem:[%s1289_s19] sm:$0xff] %v819_v37  ;;  %867 = vst [vmem:[%s1289_s19 + $0x80] sm:$0xff] %v835_v38  ;;  %v822_v43 = vmax.f32 %v790_v39, 0.0  ;;  %v838_v44 = vmax.f32 %v806_v40, 0.0  ;;  %v788_v45 = vadd.f32 %v1281_v24, %v557_v41  ;;  %v804_v46 = vadd.f32 %v1281_v24, %v621_v42 }
  0xf5   : > { %v1078_v47 = vpop.f32.mrf.mxu0  ;;  %v1094_v48 = vpop.f32.mrf.mxu1 }
  0xf6   : > { %854 = vst [vmem:[%s1289_s19 + $0x18] sm:$0xff] %v822_v43  ;;  %870 = vst [vmem:[%s1289_s19 + $0x98] sm:$0xff] %v838_v44  ;;  %v820_v49 = vmax.f32 %v788_v45, 0.0  ;;  %v836_v50 = vmax.f32 %v804_v46, 0.0  ;;  %v793_v51 = vadd.f32 %v1078_v47, %v1281_v24  ;;  %v809_v52 = vadd.f32 %v1094_v48, %v1281_v24 }
  0xf7   : > { %v570_v53 = vpop.f32.mrf.mxu0  ;;  %v634_v54 = vpop.f32.mrf.mxu1 }
  0xf8   : > { %852 = vst [vmem:[%s1289_s19 + $0x8] sm:$0xff] %v820_v49  ;;  %868 = vst [vmem:[%s1289_s19 + $0x88] sm:$0xff] %v836_v50  ;;  %v825_v55 = vmax.f32 %v793_v51, 0.0  ;;  %v841_v56 = vmax.f32 %v809_v52, 0.0  ;;  %v791_v57 = vadd.f32 %v1281_v24, %v570_v53  ;;  %v807_v58 = vadd.f32 %v1281_v24, %v634_v54 }
  0xf9   : > { %v1079_v59 = vpop.f32.mrf.mxu0  ;;  %v1095_v60 = vpop.f32.mrf.mxu1 }
  0xfa   : > { %857 = vst [vmem:[%s1289_s19 + $0x30] sm:$0xff] %v825_v55  ;;  %873 = vst [vmem:[%s1289_s19 + $0xb0] sm:$0xff] %v841_v56  ;;  %v823_v61 = vmax.f32 %v791_v57, 0.0  ;;  %v839_v62 = vmax.f32 %v807_v58, 0.0  ;;  %v794_v63 = vadd.f32 %v1079_v59, %v1281_v24  ;;  %v810_v0 = vadd.f32 %v1095_v60, %v1281_v24 }
  0xfb   : > { %v573_v1 = vpop.f32.mrf.mxu0  ;;  %v637_v2 = vpop.f32.mrf.mxu1 }
  0xfc   : > { %855 = vst [vmem:[%s1289_s19 + $0x20] sm:$0xff] %v823_v61  ;;  %871 = vst [vmem:[%s1289_s19 + $0xa0] sm:$0xff] %v839_v62  ;;  %v826_v3 = vmax.f32 %v794_v63, 0.0  ;;  %v842_v4 = vmax.f32 %v810_v0, 0.0  ;;  %v792_v5 = vadd.f32 %v1281_v24, %v573_v1  ;;  %v808_v6 = vadd.f32 %v1281_v24, %v637_v2 }
  0xfd   : > { %v1082_v7 = vpop.f32.mrf.mxu0  ;;  %v1098_v8 = vpop.f32.mrf.mxu1 }
  0xfe   : > { %858 = vst [vmem:[%s1289_s19 + $0x38] sm:$0xff] %v826_v3  ;;  %874 = vst [vmem:[%s1289_s19 + $0xb8] sm:$0xff] %v842_v4  ;;  %v824_v9 = vmax.f32 %v792_v5, 0.0  ;;  %v840_v10 = vmax.f32 %v808_v6, 0.0  ;;  %v797_v11 = vadd.f32 %v1082_v7, %v1281_v24  ;;  %v813_v12 = vadd.f32 %v1098_v8, %v1281_v24 }
  0xff   : > { %v586_v13 = vpop.f32.mrf.mxu0  ;;  %v650_v14 = vpop.f32.mrf.mxu1 }
 0x100   : > { %856 = vst [vmem:[%s1289_s19 + $0x28] sm:$0xff] %v824_v9  ;;  %872 = vst [vmem:[%s1289_s19 + $0xa8] sm:$0xff] %v840_v10  ;;  %v829_v15 = vmax.f32 %v797_v11, 0.0  ;;  %v845_v16 = vmax.f32 %v813_v12, 0.0  ;;  %v795_v17 = vadd.f32 %v1281_v24, %v586_v13  ;;  %v811_v18 = vadd.f32 %v1281_v24, %v650_v14 }
 0x101   : > { %v1083_v19 = vpop.f32.mrf.mxu0  ;;  %v1099_v20 = vpop.f32.mrf.mxu1 }
 0x102   : > { %861 = vst [vmem:[%s1289_s19 + $0x50] sm:$0xff] %v829_v15  ;;  %877 = vst [vmem:[%s1289_s19 + $0xd0] sm:$0xff] %v845_v16  ;;  %v827_v21 = vmax.f32 %v795_v17, 0.0  ;;  %v843_v22 = vmax.f32 %v811_v18, 0.0  ;;  %v798_v23 = vadd.f32 %v1083_v19, %v1281_v24  ;;  %v814_v25 = vadd.f32 %v1099_v20, %v1281_v24 }
 0x103   : > { %v589_v26 = vpop.f32.mrf.mxu0  ;;  %v653_v27 = vpop.f32.mrf.mxu1 }
 0x104   : > { %859 = vst [vmem:[%s1289_s19 + $0x40] sm:$0xff] %v827_v21  ;;  %875 = vst [vmem:[%s1289_s19 + $0xc0] sm:$0xff] %v843_v22  ;;  %v830_v28 = vmax.f32 %v798_v23, 0.0  ;;  %v846_v29 = vmax.f32 %v814_v25, 0.0  ;;  %v796_v30 = vadd.f32 %v1281_v24, %v589_v26  ;;  %v812_v31 = vadd.f32 %v1281_v24, %v653_v27 }
 0x105   : > { %v1086_v32 = vpop.f32.mrf.mxu0  ;;  %v1102_v33 = vpop.f32.mrf.mxu1 }
 0x106   : > { %862 = vst [vmem:[%s1289_s19 + $0x58] sm:$0xff] %v830_v28  ;;  %878 = vst [vmem:[%s1289_s19 + $0xd8] sm:$0xff] %v846_v29  ;;  %v828_v34 = vmax.f32 %v796_v30, 0.0  ;;  %v844_v35 = vmax.f32 %v812_v31, 0.0  ;;  %v801_v36 = vadd.f32 %v1086_v32, %v1281_v24  ;;  %v817_v37 = vadd.f32 %v1102_v33, %v1281_v24 }
 0x107   : > { %v602_v38 = vpop.f32.mrf.mxu0  ;;  %v666_v39 = vpop.f32.mrf.mxu1 }
 0x108   : > { %860 = vst [vmem:[%s1289_s19 + $0x48] sm:$0xff] %v828_v34  ;;  %876 = vst [vmem:[%s1289_s19 + $0xc8] sm:$0xff] %v844_v35  ;;  %v833_v40 = vmax.f32 %v801_v36, 0.0  ;;  %v849_v41 = vmax.f32 %v817_v37, 0.0  ;;  %v799_v42 = vadd.f32 %v1281_v24, %v602_v38  ;;  %v815_v43 = vadd.f32 %v1281_v24, %v666_v39 }
 0x109   : > { %v1087_v44 = vpop.f32.mrf.mxu0  ;;  %v1103_v45 = vpop.f32.mrf.mxu1 }
 0x10a   : > { %865 = vst [vmem:[%s1289_s19 + $0x70] sm:$0xff] %v833_v40  ;;  %881 = vst [vmem:[%s1289_s19 + $0xf0] sm:$0xff] %v849_v41  ;;  %v831_v46 = vmax.f32 %v799_v42, 0.0  ;;  %v847_v47 = vmax.f32 %v815_v43, 0.0  ;;  %v802_v48 = vadd.f32 %v1087_v44, %v1281_v24  ;;  %v818_v49 = vadd.f32 %v1103_v45, %v1281_v24 }
 0x10b   : > { %v605_v50 = vpop.f32.mrf.mxu0  ;;  %v669_v51 = vpop.f32.mrf.mxu1 }
 0x10c   : > { %863 = vst [vmem:[%s1289_s19 + $0x60] sm:$0xff] %v831_v46  ;;  %879 = vst [vmem:[%s1289_s19 + $0xe0] sm:$0xff] %v847_v47  ;;  %v834_v52 = vmax.f32 %v802_v48, 0.0  ;;  %v850_v53 = vmax.f32 %v818_v49, 0.0  ;;  %v800_v54 = vadd.f32 %v1281_v24, %v605_v50  ;;  %v816_v55 = vadd.f32 %v1281_v24, %v669_v51 }
 0x10e   : > { %866 = vst [vmem:[%s1289_s19 + $0x78] sm:$0xff] %v834_v52  ;;  %882 = vst [vmem:[%s1289_s19 + $0xf8] sm:$0xff] %v850_v53  ;;  %v832_v56 = vmax.f32 %v800_v54, 0.0  ;;  %v848_v57 = vmax.f32 %v816_v55, 0.0 }
 0x110   : > { %864 = vst [vmem:[%s1289_s19 + $0x68] sm:$0xff] %v832_v56  ;;  %880 = vst [vmem:[%s1289_s19 + $0xe8] sm:$0xff] %v848_v57 }
 0x111 PF: > { %s13_s14 = sadd.s32 1, %s1190_s14   ;;  %s1366_s12 = smov %s1186_s13 }
 0x112   : > { %p10_p5 = scmp.ge.s32.totalorder %s13_s14, 4   ;;  %s1367_s13 = smov %s1369_s15 }
 0x114   :  { %12 = sbr.rel (!%p10_p5) target bundleno = 2 (0x2), region = 76 }

// kernel: _lambda_.105
= control target key start
LH: loop header
LB: loop body
LE: loop exit
PB: predicated region body
PF: predicated region fallthrough
CT: control target
= control target key end

     0   :  { %s356_s9 = smov 0   ;;  %s430_s0 = inlined_call_operand.vmem [shape: f32[16,2,8,64], index: 0, kind: input, shape index: {}]   ;;  %s431_s1 = inlined_call_operand.vmem [shape: f32[16,2,8,64], index: 1, kind: input, shape index: {}]   ;;  %s432_s2 = inlined_call_operand.vmem [shape: f32[16,8,64], index: 2, kind: output, shape index: {}]  }
   0x1 LB: > { %s308_s10 = sadd.s32 4294967295, %s339_s9   ;;  %p312_p0 = scmp.ge.s32.totalorder %s339_s9, 1  ;;  %s339_s9 = sphi %s356_s9, %s12_s9  }
   0x2   : > { %p126_p1 = scmp.lt.s32.totalorder %s339_s9, 3 }
   0x4   : > { %p127_p2 = pnand %p312_p0, %p126_p1 }
   0x5   : > { %s313_s11 = sshll.u32 (!%p127_p2), %s308_s10, 3 }
   0x6   : > { %130 = sbr.rel (%p127_p2) target bundleno = 30 (0x1e), region = 28  ;;  %p156_p3 = scmp.lt.s32.totalorder (!%p127_p2), %s313_s11, 15 }
   0xb   : > { %s434_s11 = smov (!%p156_p3, %s313_s11), 15  ;;  %vm231_vm0 = vcmask 523264  }
   0xc   : > { %s323_s12 = sshll.u32 %s434_s11, 4  ;;  %s320_s19 = sshll.u32 %s434_s11, 3 }
   0xd   : > { %s367_s15 = scalar_lea.vmem %s430_s0, %s323_s12  ;;  %s372_s18 = scalar_lea.vmem %s431_s1, %s323_s12 }
   0xe   : > { %v175_v0 = vld [vmem:[%s367_s15] sm:$0xff]  ;;  %v176_v1 = vld [vmem:[%s367_s15 + $0x8] sm:$0xff]  ;;  %v177_v5 = vld [vmem:[%s367_s15 + $0x10] sm:$0xff]  ;;  %s386_s22 = scalar_lea.vmem %s432_s2, %s320_s19 }
   0xf   : > { %v191_v2 = vld [vmem:[%s372_s18] sm:$0xff]  ;;  %v192_v3 = vld [vmem:[%s372_s18 + $0x8] sm:$0xff]  ;;  %v178_v6 = vld [vmem:[%s367_s15 + $0x18] sm:$0xff] }
  0x10   : > { %v207_v4 = vmax.f32 %v175_v0, %v191_v2  ;;  %v208_v7 = vmax.f32 %v176_v1, %v192_v3  ;;  %v193_v8 = vld [vmem:[%s372_s18 + $0x10] sm:$0xff]  ;;  %v194_v9 = vld [vmem:[%s372_s18 + $0x18] sm:$0xff]  ;;  %v179_v10 = vld [vmem:[%s367_s15 + $0x20] sm:$0xff] }
  0x11   : > { %v209_v11 = vmax.f32 %v177_v5, %v193_v8  ;;  %v210_v12 = vmax.f32 %v178_v6, %v194_v9  ;;  %v180_v13 = vld [vmem:[%s367_s15 + $0x28] sm:$0xff]  ;;  %v195_v14 = vld [vmem:[%s372_s18 + $0x20] sm:$0xff]  ;;  %v181_v19 = vld [vmem:[%s367_s15 + $0x30] sm:$0xff] }
  0x12   : > { %v196_v15 = vld [vmem:[%s372_s18 + $0x28] sm:$0xff]  ;;  %v223_v16 = vmax.f32 %v207_v4, %v208_v7  ;;  %v211_v17 = vmax.f32 %v179_v10, %v195_v14  ;;  %v182_v20 = vld [vmem:[%s367_s15 + $0x38] sm:$0xff]  ;;  %v197_v21 = vld [vmem:[%s372_s18 + $0x30] sm:$0xff] }
  0x13   : > { %v212_v18 = vmax.f32 %v180_v13, %v196_v15  ;;  %v224_v22 = vmax.f32 %v209_v11, %v210_v12  ;;  %v198_v23 = vld [vmem:[%s372_s18 + $0x38] sm:$0xff]  ;;  %v213_v24 = vmax.f32 %v181_v19, %v197_v21  ;;  %v183_v25 = vld [vmem:[%s367_s15 + $0x40] sm:$0xff]  ;;  %v184_v26 = vld [vmem:[%s367_s15 + $0x48] sm:$0xff] }
  0x14   : > { %232 = vst.msk [vmem:[%s386_s22] sm:$0xff] %vm231_vm0, %v223_v16  ;;  %v214_v28 = vmax.f32 %v182_v20, %v198_v23  ;;  %v199_v29 = vld [vmem:[%s372_s18 + $0x40] sm:$0xff]  ;;  %v200_v30 = vld [vmem:[%s372_s18 + $0x48] sm:$0xff]  ;;  %v185_v31 = vld [vmem:[%s367_s15 + $0x50] sm:$0xff] }
  0x15   : > { %v225_v27 = vmax.f32 %v211_v17, %v212_v18  ;;  %233 = vst.msk [vmem:[%s386_s22 + $0x8] sm:$0xff] %vm231_vm0, %v224_v22  ;;  %v215_v32 = vmax.f32 %v183_v25, %v199_v29  ;;  %v216_v33 = vmax.f32 %v184_v26, %v200_v30  ;;  %v186_v34 = vld [vmem:[%s367_s15 + $0x58] sm:$0xff]  ;;  %v201_v35 = vld [vmem:[%s372_s18 + $0x50] sm:$0xff]  ;;  %v187_v40 = vld [vmem:[%s367_s15 + $0x60] sm:$0xff] }
  0x16   : > { %v202_v36 = vld [vmem:[%s372_s18 + $0x58] sm:$0xff]  ;;  %v226_v37 = vmax.f32 %v213_v24, %v214_v28  ;;  %v217_v38 = vmax.f32 %v185_v31, %v201_v35  ;;  %v188_v41 = vld [vmem:[%s367_s15 + $0x68] sm:$0xff]  ;;  %v203_v42 = vld [vmem:[%s372_s18 + $0x60] sm:$0xff] }
  0x17   : > { %234 = vst.msk [vmem:[%s386_s22 + $0x10] sm:$0xff] %vm231_vm0, %v225_v27  ;;  %v218_v39 = vmax.f32 %v186_v34, %v202_v36  ;;  %v227_v43 = vmax.f32 %v215_v32, %v216_v33  ;;  %v204_v44 = vld [vmem:[%s372_s18 + $0x68] sm:$0xff]  ;;  %v219_v45 = vmax.f32 %v187_v40, %v203_v42  ;;  %v189_v46 = vld [vmem:[%s367_s15 + $0x70] sm:$0xff]  ;;  %v190_v47 = vld [vmem:[%s367_s15 + $0x78] sm:$0xff] }
  0x18   : > { %235 = vst.msk [vmem:[%s386_s22 + $0x18] sm:$0xff] %vm231_vm0, %v226_v37  ;;  %v220_v49 = vmax.f32 %v188_v41, %v204_v44  ;;  %v205_v50 = vld [vmem:[%s372_s18 + $0x70] sm:$0xff]  ;;  %v206_v51 = vld [vmem:[%s372_s18 + $0x78] sm:$0xff] }
  0x19   : > { %v228_v48 = vmax.f32 %v217_v38, %v218_v39  ;;  %236 = vst.msk [vmem:[%s386_s22 + $0x20] sm:$0xff] %vm231_vm0, %v227_v43  ;;  %v221_v52 = vmax.f32 %v189_v46, %v205_v50  ;;  %v222_v53 = vmax.f32 %v190_v47, %v206_v51 }
  0x1a   : > { %v229_v54 = vmax.f32 %v219_v45, %v220_v49 }
  0x1b   : > { %237 = vst.msk [vmem:[%s386_s22 + $0x28] sm:$0xff] %vm231_vm0, %v228_v48  ;;  %v230_v55 = vmax.f32 %v221_v52, %v222_v53 }
  0x1c   : > { %238 = vst.msk [vmem:[%s386_s22 + $0x30] sm:$0xff] %vm231_vm0, %v229_v54 }
  0x1d   : > { %239 = vst.msk [vmem:[%s386_s22 + $0x38] sm:$0xff] %vm231_vm0, %v230_v55 }
  0x1e PF: > { %s12_s9 = sadd.s32 1, %s339_s9  }
  0x1f   : > { %p9_p4 = scmp.ge.s32.totalorder %s12_s9, 4  }
  0x21   :  { %11 = sbr.rel (!%p9_p4) target bundleno = 1 (0x1), region = 61 }

// kernel: _lambda_.104
= control target key start
LH: loop header
LB: loop body
LE: loop exit
PB: predicated region body
PF: predicated region fallthrough
CT: control target
= control target key end

     0   :  { %s1451_s12 = smov 0   ;;  %s1453_s13 = smov 0   ;;  %s1712_s0 = inlined_call_operand.vmem [shape: bf16[512,640], index: 0, kind: input, shape index: {}]   ;;  %s1713_s1 = inlined_call_operand.vmem [shape: bf16[640,128], index: 1, kind: input, shape index: {}]   ;;  %s1714_s2 = inlined_call_operand.vmem [shape: f32[1,128], index: 2, kind: input, shape index: {}]   ;;  %s1715_s3 = inlined_call_operand.vmem [shape: f32[512,128], index: 3, kind: output, shape index: {}]  }
   0x1   :  { %s1455_s14 = smov 0   ;;  %s1457_s15 = smov 0  }
   0x2   :  { %s1459_s16 = smov 0   ;;  %s1461_s17 = smov 0  }
   0x3   :  { %s1463_s18 = smov 0  }
   0x4 LB: > { %s25_s19 = sadd.s32 1, %s1420_s16  ;;  %s32_s20 = sadd.s32 1, %s1424_s17  ;;  %s1428_s18 = sphi %s1463_s18, %s13_s18   ;;  %s1424_s17 = sphi %s1461_s17, %s1721_s17   ;;  %s1420_s16 = sphi %s1459_s16, %s1720_s16   ;;  %s1416_s15 = sphi %s1457_s15, %s1719_s15   ;;  %s1412_s14 = sphi %s1455_s14, %s1718_s14   ;;  %s1408_s13 = sphi %s1453_s13, %s1717_s13   ;;  %s1404_s12 = sphi %s1451_s12, %s1716_s12  }
   0x5   : > { %p26_p0 = scmp.ge.s32.totalorder %s25_s19, 5  ;;  %p48_p1 = scmp.ne.s32.totalorder %s1408_s13, %s1404_s12 }
   0x6   : > { %p49_p2 = scmp.eq.s32.totalorder %s1428_s18, 0  ;;  %s41_s24 = sadd.s32 1, %s1408_s13 }
   0x7   : > { %s1723_s19 = smov (%p26_p0, %s25_s19), 0  ;;  %s1725_s20 = smov (!%p26_p0, %s32_s20), %s1424_s17 }
   0x8   : > { %p50_p3 = por %p49_p2, %p48_p1  ;;  %p34_p4 = scmp.ge.s32.totalorder %s1725_s20, 2 }
   0x9   : > { %s37_s21 = ssub.s32 %s1420_s16, %s1723_s19  ;;  %p1164_p6 = scmp.ge.s32.totalorder %s1428_s18, 10 }
   0xa   : > { %s1727_s20 = smov (%p34_p4, %s1725_s20), 0 }
   0xb   : > { %s36_s22 = ssub.s32 %s1424_s17, %s1727_s20  ;;  %162 = sbr.rel (%p1164_p6) target bundleno = 44 (0x2c), region = 20 }
   0xc   : > { %s38_s23 = sor.u32 %s37_s21, %s36_s22 }
   0xd   : > { %p39_p5 = scmp.eq.s32.totalorder %s38_s23, 0 }
   0xf   : > { %s1502_s25 = scalar_select %p39_p5, %s1408_s13, %s41_s24  }
  0x10   : > { %165 = sbr.rel (!%p50_p3) target bundleno = 44 (0x2c), region = 24  ;;  %s167_s26 = sand.u32 (%p50_p3), 1, %s1408_s13  }
  0x11   : > { %s1292_s27 = smul.u32 (%p50_p3), 160, %s1424_s17  ;;  %s1165_s28 = sshll.u32 (%p50_p3), %s167_s26, 7 }
  0x12   : > { %s1516_s7 = scalar_lea.vmem (%p50_p3), [#allocation3], %s1165_s28 }
  0x13   : > { %s172_s29 = sadd.s32 (%p50_p3), %s1420_s16, %s1292_s27 }
  0x14   : > { %s1168_s30 = sshll.u32 (%p50_p3), %s172_s29, 2 }
  0x15   : > { %s1511_s6 = scalar_lea.vmem %s1712_s0, %s1168_s30 }
  0x16   : > { %v191_v0 = vld [vmem:[%s1511_s6] sm:$0xf]  ;;  %v193_v1 = vld [vmem:[%s1511_s6 + $0x14] sm:$0xf]  ;;  %v195_v2 = vld [vmem:[%s1511_s6 + $0x28] sm:$0xf] }
  0x17   : > { %192 = vst [vmem:[%s1516_s7] sm:$0xf] %v191_v0  ;;  %194 = vst [vmem:[%s1516_s7 + $0x4] sm:$0xf] %v193_v1  ;;  %v197_v3 = vld [vmem:[%s1511_s6 + $0x3c] sm:$0xf] }
  0x18   : > { %196 = vst [vmem:[%s1516_s7 + $0x8] sm:$0xf] %v195_v2  ;;  %v199_v4 = vld [vmem:[%s1511_s6 + $0x50] sm:$0xf]  ;;  %v201_v5 = vld [vmem:[%s1511_s6 + $0x64] sm:$0xf] }
  0x19   : > { %198 = vst [vmem:[%s1516_s7 + $0xc] sm:$0xf] %v197_v3  ;;  %200 = vst [vmem:[%s1516_s7 + $0x10] sm:$0xf] %v199_v4  ;;  %v203_v6 = vld [vmem:[%s1511_s6 + $0x78] sm:$0xf] }
  0x1a   : > { %202 = vst [vmem:[%s1516_s7 + $0x14] sm:$0xf] %v201_v5  ;;  %v205_v7 = vld [vmem:[%s1511_s6 + $0x8c] sm:$0xf]  ;;  %v207_v8 = vld [vmem:[%s1511_s6 + $0xa0] sm:$0xf] }
  0x1b   : > { %204 = vst [vmem:[%s1516_s7 + $0x18] sm:$0xf] %v203_v6  ;;  %206 = vst [vmem:[%s1516_s7 + $0x1c] sm:$0xf] %v205_v7  ;;  %v209_v9 = vld [vmem:[%s1511_s6 + $0xb4] sm:$0xf] }
  0x1c   : > { %208 = vst [vmem:[%s1516_s7 + $0x20] sm:$0xf] %v207_v8  ;;  %v211_v10 = vld [vmem:[%s1511_s6 + $0xc8] sm:$0xf]  ;;  %v213_v11 = vld [vmem:[%s1511_s6 + $0xdc] sm:$0xf] }
  0x1d   : > { %210 = vst [vmem:[%s1516_s7 + $0x24] sm:$0xf] %v209_v9  ;;  %212 = vst [vmem:[%s1516_s7 + $0x28] sm:$0xf] %v211_v10  ;;  %v215_v12 = vld [vmem:[%s1511_s6 + $0xf0] sm:$0xf] }
  0x1e   : > { %214 = vst [vmem:[%s1516_s7 + $0x2c] sm:$0xf] %v213_v11  ;;  %v217_v13 = vld [vmem:[%s1511_s6 + $0x104] sm:$0xf]  ;;  %v219_v14 = vld [vmem:[%s1511_s6 + $0x118] sm:$0xf] }
  0x1f   : > { %216 = vst [vmem:[%s1516_s7 + $0x30] sm:$0xf] %v215_v12  ;;  %218 = vst [vmem:[%s1516_s7 + $0x34] sm:$0xf] %v217_v13  ;;  %v221_v15 = vld [vmem:[%s1511_s6 + $0x12c] sm:$0xf] }
  0x20   : > { %220 = vst [vmem:[%s1516_s7 + $0x38] sm:$0xf] %v219_v14  ;;  %v223_v16 = vld [vmem:[%s1511_s6 + $0x140] sm:$0xf]  ;;  %v225_v17 = vld [vmem:[%s1511_s6 + $0x154] sm:$0xf] }
  0x21   : > { %222 = vst [vmem:[%s1516_s7 + $0x3c] sm:$0xf] %v221_v15  ;;  %224 = vst [vmem:[%s1516_s7 + $0x40] sm:$0xf] %v223_v16  ;;  %v227_v18 = vld [vmem:[%s1511_s6 + $0x168] sm:$0xf] }
  0x22   : > { %226 = vst [vmem:[%s1516_s7 + $0x44] sm:$0xf] %v225_v17  ;;  %v229_v19 = vld [vmem:[%s1511_s6 + $0x17c] sm:$0xf]  ;;  %v231_v20 = vld [vmem:[%s1511_s6 + $0x190] sm:$0xf] }
  0x23   : > { %228 = vst [vmem:[%s1516_s7 + $0x48] sm:$0xf] %v227_v18  ;;  %230 = vst [vmem:[%s1516_s7 + $0x4c] sm:$0xf] %v229_v19  ;;  %v233_v21 = vld [vmem:[%s1511_s6 + $0x1a4] sm:$0xf] }
  0x24   : > { %232 = vst [vmem:[%s1516_s7 + $0x50] sm:$0xf] %v231_v20  ;;  %v235_v22 = vld [vmem:[%s1511_s6 + $0x1b8] sm:$0xf]  ;;  %v237_v23 = vld [vmem:[%s1511_s6 + $0x1cc] sm:$0xf] }
  0x25   : > { %234 = vst [vmem:[%s1516_s7 + $0x54] sm:$0xf] %v233_v21  ;;  %236 = vst [vmem:[%s1516_s7 + $0x58] sm:$0xf] %v235_v22  ;;  %v239_v24 = vld [vmem:[%s1511_s6 + $0x1e0] sm:$0xf] }
  0x26   : > { %238 = vst [vmem:[%s1516_s7 + $0x5c] sm:$0xf] %v237_v23  ;;  %v241_v25 = vld [vmem:[%s1511_s6 + $0x1f4] sm:$0xf]  ;;  %v243_v26 = vld [vmem:[%s1511_s6 + $0x208] sm:$0xf] }
  0x27   : > { %240 = vst [vmem:[%s1516_s7 + $0x60] sm:$0xf] %v239_v24  ;;  %242 = vst [vmem:[%s1516_s7 + $0x64] sm:$0xf] %v241_v25  ;;  %v245_v27 = vld [vmem:[%s1511_s6 + $0x21c] sm:$0xf] }
  0x28   : > { %244 = vst [vmem:[%s1516_s7 + $0x68] sm:$0xf] %v243_v26  ;;  %v247_v28 = vld [vmem:[%s1511_s6 + $0x230] sm:$0xf]  ;;  %v249_v29 = vld [vmem:[%s1511_s6 + $0x244] sm:$0xf] }
  0x29   : > { %246 = vst [vmem:[%s1516_s7 + $0x6c] sm:$0xf] %v245_v27  ;;  %248 = vst [vmem:[%s1516_s7 + $0x70] sm:$0xf] %v247_v28  ;;  %v251_v30 = vld [vmem:[%s1511_s6 + $0x258] sm:$0xf] }
  0x2a   : > { %250 = vst [vmem:[%s1516_s7 + $0x74] sm:$0xf] %v249_v29  ;;  %v253_v31 = vld [vmem:[%s1511_s6 + $0x26c] sm:$0xf]  ;;  %252 = vst [vmem:[%s1516_s7 + $0x78] sm:$0xf] %v251_v30 }
  0x2b   : > { %254 = vst [vmem:[%s1516_s7 + $0x7c] sm:$0xf] %v253_v31 }
  0x2c PF: > { %p1169_p7 = scmp.ge.s32.totalorder %s1428_s18, 1  ;;  %p353_p8 = scmp.lt.s32.totalorder %s1428_s18, 11 }
  0x2e   : > { %p354_p9 = pnand %p1169_p7, %p353_p8 }
  0x2f   : > { %s360_s8 = sand.u32 (!%p354_p9), 1, %s1404_s12   ;;  %s1171_s9 = sshll.u32 (!%p354_p9), %s1412_s14, 4 }
  0x30   : > { %357 = sbr.rel (%p354_p9) target bundleno = 358 (0x166), region = 69  ;;  %s1170_s10 = sshll.u32 (!%p354_p9), %s360_s8, 7 }
  0x31   : > { %p399_p10 = scmp.lt.s32.totalorder (!%p354_p9), %s1171_s9, 79  ;;  %s1173_s11 = sshll.u32 (!%p354_p9), %s1416_s15, 5 }
  0x32   : > { %p411_p11 = scmp.lt.s32.totalorder (!%p354_p9), %s1173_s11, 63  ;;  %s1594_s12 = scalar_lea.vmem (!%p354_p9), [#allocation3], %s1170_s10 }
  0x33   : > { %p1175_p12 = scmp.ne.s32.totalorder (!%p354_p9), %s1412_s14, 0 }
  0x35   : > { %s1729_s9 = smov (!%p399_p10, %s1171_s9), 79  ;;  %s1731_s11 = smov (!%p411_p11, %s1173_s11), 63 }
  0x36   : > { %s1172_s21 = sshll.u32 %s1729_s9, 2  ;;  %s1174_s26 = sshll.u32 %s1731_s11, 3 }
  0x37   : > { %s1587_s24 = scalar_lea.vmem %s1713_s1, %s1172_s21  ;;  %s1592_s29 = scalar_lea.vmem %s1715_s3, %s1174_s26 }
  0x38   : > { %423 = sbr.rel (%p1175_p12) target bundleno = 78 (0x4e), region = 77 }
  0x3d   : > { %v1430_v32 = vmov 0.0  }
  0x3e   : > { %424 = vst [vmem:[#allocation2 + $0xb0] sm:$0xff] %v1430_v32  ;;  %425 = vst [vmem:[#allocation2] sm:$0xff] %v1430_v32 }
  0x3f   : > { %426 = vst [vmem:[#allocation2 + $0xd8] sm:$0xff] %v1430_v32  ;;  %427 = vst [vmem:[#allocation2 + $0x18] sm:$0xff] %v1430_v32 }
  0x40   : > { %428 = vst [vmem:[#allocation2 + $0x50] sm:$0xff] %v1430_v32  ;;  %429 = vst [vmem:[#allocation2 + $0x68] sm:$0xff] %v1430_v32 }
  0x41   : > { %430 = vst [vmem:[#allocation2 + $0x30] sm:$0xff] %v1430_v32  ;;  %431 = vst [vmem:[#allocation2 + $0x48] sm:$0xff] %v1430_v32 }
  0x42   : > { %432 = vst [vmem:[#allocation2 + $0x80] sm:$0xff] %v1430_v32  ;;  %433 = vst [vmem:[#allocation2 + $0x88] sm:$0xff] %v1430_v32 }
  0x43   : > { %434 = vst [vmem:[#allocation2 + $0xe8] sm:$0xff] %v1430_v32  ;;  %435 = vst [vmem:[#allocation2 + $0xb8] sm:$0xff] %v1430_v32 }
  0x44   : > { %436 = vst [vmem:[#allocation2 + $0x60] sm:$0xff] %v1430_v32  ;;  %437 = vst [vmem:[#allocation2 + $0xf0] sm:$0xff] %v1430_v32 }
  0x45   : > { %438 = vst [vmem:[#allocation2 + $0x8] sm:$0xff] %v1430_v32  ;;  %439 = vst [vmem:[#allocation2 + $0x78] sm:$0xff] %v1430_v32 }
  0x46   : > { %440 = vst [vmem:[#allocation2 + $0x38] sm:$0xff] %v1430_v32  ;;  %441 = vst [vmem:[#allocation2 + $0x58] sm:$0xff] %v1430_v32 }
  0x47   : > { %442 = vst [vmem:[#allocation2 + $0x40] sm:$0xff] %v1430_v32  ;;  %443 = vst [vmem:[#allocation2 + $0xc8] sm:$0xff] %v1430_v32 }
  0x48   : > { %444 = vst [vmem:[#allocation2 + $0xe0] sm:$0xff] %v1430_v32  ;;  %445 = vst [vmem:[#allocation2 + $0x90] sm:$0xff] %v1430_v32 }
  0x49   : > { %446 = vst [vmem:[#allocation2 + $0x70] sm:$0xff] %v1430_v32  ;;  %447 = vst [vmem:[#allocation2 + $0xc0] sm:$0xff] %v1430_v32 }
  0x4a   : > { %448 = vst [vmem:[#allocation2 + $0xa8] sm:$0xff] %v1430_v32  ;;  %449 = vst [vmem:[#allocation2 + $0xd0] sm:$0xff] %v1430_v32 }
  0x4b   : > { %450 = vst [vmem:[#allocation2 + $0x10] sm:$0xff] %v1430_v32  ;;  %451 = vst [vmem:[#allocation2 + $0x28] sm:$0xff] %v1430_v32 }
  0x4c   : > { %452 = vst [vmem:[#allocation2 + $0xa0] sm:$0xff] %v1430_v32  ;;  %453 = vst [vmem:[#allocation2 + $0xf8] sm:$0xff] %v1430_v32 }
  0x4d   : > { %454 = vst [vmem:[#allocation2 + $0x20] sm:$0xff] %v1430_v32  ;;  %455 = vst [vmem:[#allocation2 + $0x98] sm:$0xff] %v1430_v32 }
  0x4e PF: > { %v1350_v33 = vld [vmem:[%s1587_s24 + $0x38] sm:$0xff]   ;;  %v1351_v34 = vld [vmem:[%s1587_s24 + $0x30] sm:$0xff]   ;;  %v1352_v35 = vld [vmem:[%s1587_s24 + $0x28] sm:$0xff]   ;;  %p1200_p13 = scmp.ne.s32.totalorder %s1412_s14, 4 }
  0x4f   : > { %1228 = vmatprep.subr.bf16.mxu0 %v1350_v33  ;;  %1276 = vmatprep.subr.bf16.mxu1 %v1350_v33  ;;  %v1353_v36 = vld [vmem:[%s1587_s24 + $0x20] sm:$0xff]   ;;  %v1354_v39 = vld [vmem:[%s1587_s24 + $0x18] sm:$0xff]   ;;  %v1355_v40 = vld [vmem:[%s1587_s24 + $0x10] sm:$0xff]  }
  0x50   : > { %1229 = vmatpush3.bf16.msra.mxu0 %v1350_v33  ;;  %1284 = vmatpush3.bf16.msra.mxu1 %v1350_v33  ;;  %v1358_v37 = vld [vmem:[%s1594_s12] sm:$0xff]   ;;  %v1356_v41 = vld [vmem:[%s1587_s24 + $0x8] sm:$0xff]   ;;  %v1362_v45 = vld [vmem:[%s1594_s12 + $0x10] sm:$0xff]  }
  0x51   : > { %1230 = vmatprep.subr.bf16.mxu0 %v1351_v34  ;;  %1277 = vmatprep.subr.bf16.mxu1 %v1351_v34  ;;  %v1359_v38 = vld [vmem:[%s1594_s12 + $0x40] sm:$0xff]   ;;  %v1360_v43 = vld [vmem:[%s1594_s12 + $0x8] sm:$0xff]   ;;  %v1363_v46 = vld [vmem:[%s1594_s12 + $0x50] sm:$0xff]  }
  0x52   : > { %1244 = vmatprep.mubr.bf16.mxu0 %v1358_v37  ;;  %1260 = vmatprep.mubr.bf16.mxu1 %v1359_v38  ;;  %v1357_v42 = vld [vmem:[%s1587_s24] sm:$0xff]   ;;  %v1361_v44 = vld [vmem:[%s1594_s12 + $0x48] sm:$0xff]   ;;  %v1364_v47 = vld [vmem:[%s1594_s12 + $0x18] sm:$0xff]  }
  0x53   : > { %v1365_v48 = vld [vmem:[%s1594_s12 + $0x58] sm:$0xff]   ;;  %v1366_v49 = vld [vmem:[%s1594_s12 + $0x20] sm:$0xff]   ;;  %v1368_v51 = vld [vmem:[%s1594_s12 + $0x28] sm:$0xff]  }
  0x54   : > { %1231 = vmatpush3.bf16.msra.mxu0 %v1351_v34  ;;  %1285 = vmatpush3.bf16.msra.mxu1 %v1351_v34  ;;  %v1367_v50 = vld [vmem:[%s1594_s12 + $0x60] sm:$0xff]   ;;  %v1369_v52 = vld [vmem:[%s1594_s12 + $0x68] sm:$0xff]   ;;  %v1370_v53 = vld [vmem:[%s1594_s12 + $0x30] sm:$0xff]  }
  0x55   : > { %1232 = vmatprep.subr.bf16.mxu0 %v1352_v35  ;;  %1278 = vmatprep.subr.bf16.mxu1 %v1352_v35  ;;  %v1371_v54 = vld [vmem:[%s1594_s12 + $0x70] sm:$0xff]   ;;  %v1372_v55 = vld [vmem:[%s1594_s12 + $0x38] sm:$0xff]   ;;  %v474_v58 = vld [vmem:[#allocation2 + $0x40] sm:$0xff] }
  0x56   : > { %v1373_v56 = vld [vmem:[%s1594_s12 + $0x78] sm:$0xff]   ;;  %v456_v61 = vld [vmem:[#allocation2 + $0xb0] sm:$0xff]  ;;  %v475_v4 = vld [vmem:[#allocation2 + $0xc8] sm:$0xff] }
  0x57   : > { %v458_v57 = vld [vmem:[#allocation2 + $0xd8] sm:$0xff]  ;;  %v457_v9 = vld [vmem:[#allocation2] sm:$0xff]  ;;  %v462_v15 = vld [vmem:[#allocation2 + $0x30] sm:$0xff] }
  0x58   : > { %1233 = vmatpush3.bf16.msra.mxu0 %v1352_v35  ;;  %1286 = vmatpush3.bf16.msra.mxu1 %v1352_v35  ;;  %v472_v62 = vld [vmem:[#allocation2 + $0x38] sm:$0xff]  ;;  %v478_v16 = vld [vmem:[#allocation2 + $0x70] sm:$0xff]  ;;  %v476_v22 = vld [vmem:[#allocation2 + $0xe0] sm:$0xff] }
  0x59   : > { %1234 = vmatprep.subr.bf16.mxu0 %v1353_v36  ;;  %1279 = vmatprep.subr.bf16.mxu1 %v1353_v36  ;;  %v459_v3 = vld [vmem:[#allocation2 + $0x18] sm:$0xff]  ;;  %v460_v21 = vld [vmem:[#allocation2 + $0x50] sm:$0xff]  ;;  %v463_v27 = vld [vmem:[#allocation2 + $0x48] sm:$0xff] }
  0x5a   : > { %v473_v10 = vld [vmem:[#allocation2 + $0x58] sm:$0xff]  ;;  %v479_v28 = vld [vmem:[#allocation2 + $0xc0] sm:$0xff]  ;;  %v461_v33 = vld [vmem:[#allocation2 + $0x68] sm:$0xff] }
  0x5b   : > { %v477_v34 = vld [vmem:[#allocation2 + $0x90] sm:$0xff] }
  0x5c   : > { %1235 = vmatpush3.bf16.msra.mxu0 %v1353_v36  ;;  %1287 = vmatpush3.bf16.msra.mxu1 %v1353_v36 }
  0x5d   : > { %1236 = vmatprep.subr.bf16.mxu0 %v1354_v39  ;;  %1280 = vmatprep.subr.bf16.mxu1 %v1354_v39 }
  0x60   : > { %1237 = vmatpush3.bf16.msra.mxu0 %v1354_v39  ;;  %1288 = vmatpush3.bf16.msra.mxu1 %v1354_v39  ;;  %v466_v39 = vld [vmem:[#allocation2 + $0xe8] sm:$0xff] }
  0x61   : > { %1238 = vmatprep.subr.bf16.mxu0 %v1355_v40  ;;  %1281 = vmatprep.subr.bf16.mxu1 %v1355_v40 }
  0x64   : > { %1239 = vmatpush3.bf16.msra.mxu0 %v1355_v40  ;;  %1289 = vmatpush3.bf16.msra.mxu1 %v1355_v40  ;;  %v482_v40 = vld [vmem:[#allocation2 + $0x10] sm:$0xff] }
  0x65   : > { %1240 = vmatprep.subr.bf16.mxu0 %v1356_v41  ;;  %1282 = vmatprep.subr.bf16.mxu1 %v1356_v41 }
  0x68   : > { %1241 = vmatpush3.bf16.msra.mxu0 %v1356_v41  ;;  %1290 = vmatpush3.bf16.msra.mxu1 %v1356_v41 }
  0x69   : > { %1242 = vmatprep.subr.bf16.mxu0 %v1357_v42  ;;  %1283 = vmatprep.subr.bf16.mxu1 %v1357_v42 }
  0x6c   : > { %1243 = vmatpush3.bf16.msra.mxu0 %v1357_v42  ;;  %1291 = vmatpush3.bf16.msra.mxu1 %v1357_v42 }
  0x6f   : > { %1245 = vmatmul.mubr.bf16.vlgmr.msra.gmra.mxu0 %v1360_v43  ;;  %1261 = vmatmul.mubr.bf16.vlgmr.msra.gmra.mxu1 %v1361_v44 }
  0x70   : > { %1248 = vmatprep.mubr.bf16.mxu0 %v1362_v45  ;;  %1264 = vmatprep.mubr.bf16.mxu1 %v1363_v46  ;;  %v464_v45 = vld [vmem:[#allocation2 + $0x80] sm:$0xff]  ;;  %v480_v46 = vld [vmem:[#allocation2 + $0xa8] sm:$0xff] }
  0x77   : > { %1249 = vmatmul.mubr.bf16.gmra.mxu0 %v1364_v47  ;;  %1265 = vmatmul.mubr.bf16.gmra.mxu1 %v1365_v48 }
  0x78   : > { %1252 = vmatprep.mubr.bf16.mxu0 %v1366_v49  ;;  %1268 = vmatprep.mubr.bf16.mxu1 %v1367_v50 }
  0x7f   : > { %1253 = vmatmul.mubr.bf16.gmra.mxu0 %v1368_v51  ;;  %1269 = vmatmul.mubr.bf16.gmra.mxu1 %v1369_v52  ;;  %v467_v51 = vld [vmem:[#allocation2 + $0xb8] sm:$0xff]  ;;  %v483_v52 = vld [vmem:[#allocation2 + $0x28] sm:$0xff] }
  0x80   : > { %1256 = vmatprep.mubr.bf16.mxu0 %v1370_v53  ;;  %1272 = vmatprep.mubr.bf16.mxu1 %v1371_v54 }
  0x87   : > { %1257 = vmatmul.mubr.bf16.gmra.mxu0 %v1372_v55  ;;  %1273 = vmatmul.mubr.bf16.gmra.mxu1 %v1373_v56 }
 0x12f   : > { %v1246_v59 = vpop.f32.mrf.mxu0  ;;  %v1262_v60 = vpop.f32.mrf.mxu1 }
 0x130   : > { %v843_v63 = vadd.f32 %v1246_v59, %v458_v57  ;;  %v859_v0 = vadd.f32 %v1262_v60, %v474_v58  ;;  %v465_v57 = vld [vmem:[#allocation2 + $0x88] sm:$0xff]  ;;  %v481_v58 = vld [vmem:[#allocation2 + $0xd0] sm:$0xff] }
 0x131   : > { %v714_v1 = vpop.f32.mrf.mxu0  ;;  %v778_v2 = vpop.f32.mrf.mxu1 }
 0x132   : > { %875 = vst [vmem:[#allocation2 + $0xd8] sm:$0xff] %v843_v63  ;;  %891 = vst [vmem:[#allocation2 + $0x40] sm:$0xff] %v859_v0  ;;  %v841_v5 = vadd.f32 %v714_v1, %v456_v61  ;;  %v857_v6 = vadd.f32 %v778_v2, %v472_v62  ;;  %v470_v63 = vld [vmem:[#allocation2 + $0x8] sm:$0xff]  ;;  %v486_v0 = vld [vmem:[#allocation2 + $0x20] sm:$0xff] }
 0x133   : > { %v1247_v7 = vpop.f32.mrf.mxu0  ;;  %v1263_v8 = vpop.f32.mrf.mxu1 }
 0x134   : > { %873 = vst [vmem:[#allocation2 + $0xb0] sm:$0xff] %v841_v5  ;;  %889 = vst [vmem:[#allocation2 + $0x38] sm:$0xff] %v857_v6  ;;  %v844_v11 = vadd.f32 %v1247_v7, %v459_v3  ;;  %v860_v12 = vadd.f32 %v1263_v8, %v475_v4  ;;  %v468_v5 = vld [vmem:[#allocation2 + $0x60] sm:$0xff] }
 0x135   : > { %v717_v13 = vpop.f32.mrf.mxu0  ;;  %v781_v14 = vpop.f32.mrf.mxu1  ;;  %v484_v6 = vld [vmem:[#allocation2 + $0xa0] sm:$0xff] }
 0x136   : > { %876 = vst [vmem:[#allocation2 + $0x18] sm:$0xff] %v844_v11  ;;  %892 = vst [vmem:[#allocation2 + $0xc8] sm:$0xff] %v860_v12  ;;  %v842_v17 = vadd.f32 %v717_v13, %v457_v9  ;;  %v858_v18 = vadd.f32 %v781_v14, %v473_v10  ;;  %v471_v11 = vld [vmem:[#allocation2 + $0x78] sm:$0xff] }
 0x137   : > { %v1250_v19 = vpop.f32.mrf.mxu0  ;;  %v1266_v20 = vpop.f32.mrf.mxu1  ;;  %v487_v12 = vld [vmem:[#allocation2 + $0x98] sm:$0xff] }
 0x138   : > { %874 = vst [vmem:[#allocation2] sm:$0xff] %v842_v17  ;;  %890 = vst [vmem:[#allocation2 + $0x58] sm:$0xff] %v858_v18  ;;  %v847_v23 = vadd.f32 %v1250_v19, %v462_v15  ;;  %v863_v24 = vadd.f32 %v1266_v20, %v478_v16  ;;  %v469_v17 = vld [vmem:[#allocation2 + $0xf0] sm:$0xff]  ;;  %v485_v18 = vld [vmem:[#allocation2 + $0xf8] sm:$0xff] }
 0x139   : > { %v730_v25 = vpop.f32.mrf.mxu0  ;;  %v794_v26 = vpop.f32.mrf.mxu1 }
 0x13a   : > { %879 = vst [vmem:[#allocation2 + $0x30] sm:$0xff] %v847_v23  ;;  %895 = vst [vmem:[#allocation2 + $0x70] sm:$0xff] %v863_v24  ;;  %v845_v29 = vadd.f32 %v730_v25, %v460_v21  ;;  %v861_v30 = vadd.f32 %v794_v26, %v476_v22 }
 0x13b   : > { %v1251_v31 = vpop.f32.mrf.mxu0  ;;  %v1267_v32 = vpop.f32.mrf.mxu1 }
 0x13c   : > { %877 = vst [vmem:[#allocation2 + $0x50] sm:$0xff] %v845_v29  ;;  %893 = vst [vmem:[#allocation2 + $0xe0] sm:$0xff] %v861_v30  ;;  %v848_v35 = vadd.f32 %v1251_v31, %v463_v27  ;;  %v864_v36 = vadd.f32 %v1267_v32, %v479_v28 }
 0x13d   : > { %v733_v37 = vpop.f32.mrf.mxu0  ;;  %v797_v38 = vpop.f32.mrf.mxu1 }
 0x13e   : > { %880 = vst [vmem:[#allocation2 + $0x48] sm:$0xff] %v848_v35  ;;  %896 = vst [vmem:[#allocation2 + $0xc0] sm:$0xff] %v864_v36  ;;  %v846_v41 = vadd.f32 %v733_v37, %v461_v33  ;;  %v862_v42 = vadd.f32 %v797_v38, %v477_v34 }
 0x13f   : > { %v1254_v43 = vpop.f32.mrf.mxu0  ;;  %v1270_v44 = vpop.f32.mrf.mxu1 }
 0x140   : > { %878 = vst [vmem:[#allocation2 + $0x68] sm:$0xff] %v846_v41  ;;  %894 = vst [vmem:[#allocation2 + $0x90] sm:$0xff] %v862_v42  ;;  %v851_v47 = vadd.f32 %v1254_v43, %v466_v39  ;;  %v867_v48 = vadd.f32 %v1270_v44, %v482_v40 }
 0x141   : > { %v746_v49 = vpop.f32.mrf.mxu0  ;;  %v810_v50 = vpop.f32.mrf.mxu1 }
 0x142   : > { %883 = vst [vmem:[#allocation2 + $0xe8] sm:$0xff] %v851_v47  ;;  %899 = vst [vmem:[#allocation2 + $0x10] sm:$0xff] %v867_v48  ;;  %v849_v53 = vadd.f32 %v746_v49, %v464_v45  ;;  %v865_v54 = vadd.f32 %v810_v50, %v480_v46 }
 0x143   : > { %v1255_v55 = vpop.f32.mrf.mxu0  ;;  %v1271_v56 = vpop.f32.mrf.mxu1 }
 0x144   : > { %881 = vst [vmem:[#allocation2 + $0x80] sm:$0xff] %v849_v53  ;;  %897 = vst [vmem:[#allocation2 + $0xa8] sm:$0xff] %v865_v54  ;;  %v852_v59 = vadd.f32 %v1255_v55, %v467_v51  ;;  %v868_v60 = vadd.f32 %v1271_v56, %v483_v52 }
 0x145   : > { %v749_v61 = vpop.f32.mrf.mxu0  ;;  %v813_v62 = vpop.f32.mrf.mxu1 }
 0x146   : > { %884 = vst [vmem:[#allocation2 + $0xb8] sm:$0xff] %v852_v59  ;;  %900 = vst [vmem:[#allocation2 + $0x28] sm:$0xff] %v868_v60  ;;  %v850_v1 = vadd.f32 %v749_v61, %v465_v57  ;;  %v866_v2 = vadd.f32 %v813_v62, %v481_v58 }
 0x147   : > { %v1258_v3 = vpop.f32.mrf.mxu0  ;;  %v1274_v4 = vpop.f32.mrf.mxu1 }
 0x148   : > { %882 = vst [vmem:[#allocation2 + $0x88] sm:$0xff] %v850_v1  ;;  %898 = vst [vmem:[#allocation2 + $0xd0] sm:$0xff] %v866_v2  ;;  %v855_v7 = vadd.f32 %v1258_v3, %v470_v63  ;;  %v871_v8 = vadd.f32 %v1274_v4, %v486_v0 }
 0x149   : > { %v762_v9 = vpop.f32.mrf.mxu0  ;;  %v826_v10 = vpop.f32.mrf.mxu1 }
 0x14a   : > { %887 = vst [vmem:[#allocation2 + $0x8] sm:$0xff] %v855_v7  ;;  %903 = vst [vmem:[#allocation2 + $0x20] sm:$0xff] %v871_v8  ;;  %v853_v13 = vadd.f32 %v762_v9, %v468_v5  ;;  %v869_v14 = vadd.f32 %v826_v10, %v484_v6 }
 0x14b   : > { %v1259_v15 = vpop.f32.mrf.mxu0  ;;  %v1275_v16 = vpop.f32.mrf.mxu1 }
 0x14c   : > { %885 = vst [vmem:[#allocation2 + $0x60] sm:$0xff] %v853_v13  ;;  %901 = vst [vmem:[#allocation2 + $0xa0] sm:$0xff] %v869_v14  ;;  %v856_v19 = vadd.f32 %v1259_v15, %v471_v11  ;;  %v872_v20 = vadd.f32 %v1275_v16, %v487_v12  ;;  %908 = sbr.rel (%p1200_p13) target bundleno = 358 (0x166), region = 81 }
 0x14d   : > { %v765_v21 = vpop.f32.mrf.mxu0  ;;  %v829_v22 = vpop.f32.mrf.mxu1 }
 0x14e   : > { %888 = vst [vmem:[#allocation2 + $0x78] sm:$0xff] %v856_v19  ;;  %904 = vst [vmem:[#allocation2 + $0x98] sm:$0xff] %v872_v20  ;;  %v854_v23 = vadd.f32 %v765_v21, %v469_v17  ;;  %v870_v24 = vadd.f32 %v829_v22, %v485_v18 }
 0x150   : > { %886 = vst [vmem:[#allocation2 + $0xf0] sm:$0xff] %v854_v23  ;;  %902 = vst [vmem:[#allocation2 + $0xf8] sm:$0xff] %v870_v24 }
 0x151   : > { %v909_v25 = vld [vmem:[#allocation2 + $0xb0] sm:$0xff]  ;;  %v1625_v26 = vld [vmem:[%s1714_s2] ss:$0 sm:$0xff]  ;;  %v911_v30 = vld [vmem:[#allocation2 + $0xd8] sm:$0xff] }
 0x152   : > { %v910_v27 = vld [vmem:[#allocation2] sm:$0xff]  ;;  %v948_v28 = vadd.f32 %v1625_v26, %v909_v25  ;;  %v912_v31 = vld [vmem:[#allocation2 + $0x18] sm:$0xff]  ;;  %v913_v32 = vld [vmem:[#allocation2 + $0x50] sm:$0xff]  ;;  %v950_v33 = vadd.f32 %v1625_v26, %v911_v30 }
 0x153   : > { %v949_v29 = vadd.f32 %v1625_v26, %v910_v27  ;;  %v951_v34 = vadd.f32 %v1625_v26, %v912_v31  ;;  %v952_v35 = vadd.f32 %v1625_v26, %v913_v32  ;;  %v914_v36 = vld [vmem:[#allocation2 + $0x68] sm:$0xff]  ;;  %v915_v37 = vld [vmem:[#allocation2 + $0x30] sm:$0xff]  ;;  %v917_v43 = vld [vmem:[#allocation2 + $0x80] sm:$0xff] }
 0x154   : > { %v916_v38 = vld [vmem:[#allocation2 + $0x48] sm:$0xff]  ;;  %v980_v39 = vmax.f32 %v948_v28, 0.0  ;;  %v953_v41 = vadd.f32 %v1625_v26, %v914_v36  ;;  %v954_v42 = vadd.f32 %v1625_v26, %v915_v37  ;;  %v982_v46 = vmax.f32 %v950_v33, 0.0  ;;  %v920_v50 = vld [vmem:[#allocation2 + $0xb8] sm:$0xff]  ;;  %v921_v51 = vld [vmem:[#allocation2 + $0x60] sm:$0xff] }
 0x155   : > { %v981_v40 = vmax.f32 %v949_v29, 0.0  ;;  %v918_v44 = vld [vmem:[#allocation2 + $0x88] sm:$0xff]  ;;  %v983_v47 = vmax.f32 %v951_v34, 0.0  ;;  %v984_v48 = vmax.f32 %v952_v35, 0.0  ;;  %v955_v49 = vadd.f32 %v1625_v26, %v916_v38  ;;  %v924_v58 = vld [vmem:[#allocation2 + $0x78] sm:$0xff]  ;;  %v927_v5 = vld [vmem:[#allocation2 + $0x40] sm:$0xff] }
 0x156   : > { %v919_v45 = vld [vmem:[#allocation2 + $0xe8] sm:$0xff]  ;;  %1012 = vst [vmem:[%s1592_s29] sm:$0xff] %v980_v39  ;;  %v985_v53 = vmax.f32 %v953_v41, 0.0  ;;  %v986_v54 = vmax.f32 %v954_v42, 0.0  ;;  %v956_v55 = vadd.f32 %v1625_v26, %v917_v43  ;;  %v957_v56 = vadd.f32 %v1625_v26, %v918_v44  ;;  %1014 = vst [vmem:[%s1592_s29 + $0x10] sm:$0xff] %v982_v46  ;;  %v925_v63 = vld [vmem:[#allocation2 + $0x38] sm:$0xff] }
 0x157   : > { %v922_v52 = vld [vmem:[#allocation2 + $0xf0] sm:$0xff]  ;;  %1013 = vst [vmem:[%s1592_s29 + $0x8] sm:$0xff] %v981_v40  ;;  %v923_v57 = vld [vmem:[#allocation2 + $0x8] sm:$0xff]  ;;  %1015 = vst [vmem:[%s1592_s29 + $0x18] sm:$0xff] %v983_v47  ;;  %v987_v59 = vmax.f32 %v955_v49, 0.0  ;;  %v958_v60 = vadd.f32 %v1625_v26, %v919_v45  ;;  %v959_v61 = vadd.f32 %v1625_v26, %v920_v50  ;;  %v960_v62 = vadd.f32 %v1625_v26, %v921_v51 }
 0x158   : > { %1016 = vst [vmem:[%s1592_s29 + $0x20] sm:$0xff] %v984_v48  ;;  %v926_v0 = vld [vmem:[#allocation2 + $0x58] sm:$0xff]  ;;  %1017 = vst [vmem:[%s1592_s29 + $0x28] sm:$0xff] %v985_v53  ;;  %v988_v1 = vmax.f32 %v956_v55, 0.0  ;;  %v989_v2 = vmax.f32 %v957_v56, 0.0  ;;  %v961_v3 = vadd.f32 %v1625_v26, %v922_v52  ;;  %v962_v4 = vadd.f32 %v1625_v26, %v923_v57  ;;  %v928_v6 = vld [vmem:[#allocation2 + $0xc8] sm:$0xff] }
 0x159   : > { %1018 = vst [vmem:[%s1592_s29 + $0x30] sm:$0xff] %v986_v54  ;;  %v929_v7 = vld [vmem:[#allocation2 + $0xe0] sm:$0xff]  ;;  %1019 = vst [vmem:[%s1592_s29 + $0x38] sm:$0xff] %v987_v59  ;;  %v990_v8 = vmax.f32 %v958_v60, 0.0  ;;  %v991_v9 = vmax.f32 %v959_v61, 0.0  ;;  %v992_v10 = vmax.f32 %v960_v62, 0.0  ;;  %v963_v11 = vadd.f32 %v1625_v26, %v924_v58 }
 0x15a   : > { %v930_v12 = vld [vmem:[#allocation2 + $0x90] sm:$0xff]  ;;  %1020 = vst [vmem:[%s1592_s29 + $0x40] sm:$0xff] %v988_v1  ;;  %1021 = vst [vmem:[%s1592_s29 + $0x48] sm:$0xff] %v989_v2  ;;  %v993_v14 = vmax.f32 %v961_v3, 0.0  ;;  %v994_v15 = vmax.f32 %v962_v4, 0.0  ;;  %v964_v16 = vadd.f32 %v1625_v26, %v925_v63  ;;  %v965_v17 = vadd.f32 %v1625_v26, %v926_v0  ;;  %v932_v18 = vld [vmem:[#allocation2 + $0xc0] sm:$0xff] }
 0x15b   : > { %v931_v13 = vld [vmem:[#allocation2 + $0x70] sm:$0xff]  ;;  %1022 = vst [vmem:[%s1592_s29 + $0x50] sm:$0xff] %v990_v8  ;;  %1023 = vst [vmem:[%s1592_s29 + $0x58] sm:$0xff] %v991_v9  ;;  %v995_v19 = vmax.f32 %v963_v11, 0.0  ;;  %v966_v20 = vadd.f32 %v1625_v26, %v927_v5  ;;  %v967_v21 = vadd.f32 %v1625_v26, %v928_v6  ;;  %v968_v22 = vadd.f32 %v1625_v26, %v929_v7  ;;  %v933_v23 = vld [vmem:[#allocation2 + $0xa8] sm:$0xff] }
 0x15c   : > { %1024 = vst [vmem:[%s1592_s29 + $0x60] sm:$0xff] %v992_v10  ;;  %v934_v24 = vld [vmem:[#allocation2 + $0xd0] sm:$0xff]  ;;  %1025 = vst [vmem:[%s1592_s29 + $0x68] sm:$0xff] %v993_v14  ;;  %v996_v25 = vmax.f32 %v964_v16, 0.0  ;;  %v997_v27 = vmax.f32 %v965_v17, 0.0  ;;  %v969_v28 = vadd.f32 %v1625_v26, %v930_v12  ;;  %v970_v29 = vadd.f32 %v1625_v26, %v931_v13  ;;  %v936_v31 = vld [vmem:[#allocation2 + $0x28] sm:$0xff] }
 0x15d   : > { %1026 = vst [vmem:[%s1592_s29 + $0x70] sm:$0xff] %v994_v15  ;;  %v935_v30 = vld [vmem:[#allocation2 + $0x10] sm:$0xff]  ;;  %v937_v32 = vld [vmem:[#allocation2 + $0xa0] sm:$0xff]  ;;  %1027 = vst [vmem:[%s1592_s29 + $0x78] sm:$0xff] %v995_v19  ;;  %v998_v33 = vmax.f32 %v966_v20, 0.0  ;;  %v999_v34 = vmax.f32 %v967_v21, 0.0  ;;  %v971_v36 = vadd.f32 %v1625_v26, %v932_v18  ;;  %v972_v41 = vadd.f32 %v1625_v26, %v933_v23 }
 0x15e   : > { %v1000_v35 = vmax.f32 %v968_v22, 0.0  ;;  %v938_v37 = vld [vmem:[#allocation2 + $0xf8] sm:$0xff]  ;;  %v939_v38 = vld [vmem:[#allocation2 + $0x20] sm:$0xff]  ;;  %1028 = vst [vmem:[%s1592_s29 + $0x80] sm:$0xff] %v996_v25  ;;  %1029 = vst [vmem:[%s1592_s29 + $0x88] sm:$0xff] %v997_v27  ;;  %v1001_v39 = vmax.f32 %v969_v28, 0.0  ;;  %v973_v42 = vadd.f32 %v1625_v26, %v934_v24  ;;  %v974_v45 = vadd.f32 %v1625_v26, %v935_v30 }
 0x15f   : > { %v1002_v40 = vmax.f32 %v970_v29, 0.0  ;;  %v940_v43 = vld [vmem:[#allocation2 + $0x98] sm:$0xff]  ;;  %1030 = vst [vmem:[%s1592_s29 + $0x90] sm:$0xff] %v998_v33  ;;  %1031 = vst [vmem:[%s1592_s29 + $0x98] sm:$0xff] %v999_v34  ;;  %v1003_v44 = vmax.f32 %v971_v36, 0.0  ;;  %v975_v46 = vadd.f32 %v1625_v26, %v936_v31  ;;  %v976_v47 = vadd.f32 %v1625_v26, %v937_v32 }
 0x160   : > { %1032 = vst [vmem:[%s1592_s29 + $0xa0] sm:$0xff] %v1000_v35  ;;  %1033 = vst [vmem:[%s1592_s29 + $0xa8] sm:$0xff] %v1001_v39  ;;  %v1004_v48 = vmax.f32 %v972_v41, 0.0  ;;  %v1005_v49 = vmax.f32 %v973_v42, 0.0  ;;  %v977_v50 = vadd.f32 %v1625_v26, %v938_v37  ;;  %v978_v51 = vadd.f32 %v1625_v26, %v939_v38 }
 0x161   : > { %1034 = vst [vmem:[%s1592_s29 + $0xb0] sm:$0xff] %v1002_v40  ;;  %1035 = vst [vmem:[%s1592_s29 + $0xb8] sm:$0xff] %v1003_v44  ;;  %v1006_v52 = vmax.f32 %v974_v45, 0.0  ;;  %v1007_v53 = vmax.f32 %v975_v46, 0.0  ;;  %v1008_v54 = vmax.f32 %v976_v47, 0.0  ;;  %v979_v55 = vadd.f32 %v1625_v26, %v940_v43 }
 0x162   : > { %1036 = vst [vmem:[%s1592_s29 + $0xc0] sm:$0xff] %v1004_v48  ;;  %1037 = vst [vmem:[%s1592_s29 + $0xc8] sm:$0xff] %v1005_v49  ;;  %v1009_v56 = vmax.f32 %v977_v50, 0.0  ;;  %v1010_v57 = vmax.f32 %v978_v51, 0.0 }
 0x163   : > { %1038 = vst [vmem:[%s1592_s29 + $0xd0] sm:$0xff] %v1006_v52  ;;  %1039 = vst [vmem:[%s1592_s29 + $0xd8] sm:$0xff] %v1007_v53  ;;  %v1011_v58 = vmax.f32 %v979_v55, 0.0 }
 0x164   : > { %1040 = vst [vmem:[%s1592_s29 + $0xe0] sm:$0xff] %v1008_v54  ;;  %1041 = vst [vmem:[%s1592_s29 + $0xe8] sm:$0xff] %v1009_v56 }
 0x165   : > { %1042 = vst [vmem:[%s1592_s29 + $0xf0] sm:$0xff] %v1010_v57  ;;  %1043 = vst [vmem:[%s1592_s29 + $0xf8] sm:$0xff] %v1011_v58 }
 0x166 PF: > { %s13_s18 = sadd.s32 1, %s1428_s18   ;;  %s1716_s12 = smov %s1408_s13 }
 0x167   : > { %p10_p0 = scmp.ge.s32.totalorder %s13_s18, 12   ;;  %s1717_s13 = smov %s1502_s25 }
 0x168   : > { %s1718_s14 = smov %s1420_s16  ;;  %s1719_s15 = smov %s1424_s17 }
 0x169   : > { %s1720_s16 = smov %s1723_s19  ;;  %s1721_s17 = smov %s1727_s20 }
 0x16a   :  { %12 = sbr.rel (!%p10_p0) target bundleno = 4 (0x4), region = 122 }

// kernel: _lambda_.106
= control target key start
LH: loop header
LB: loop body
LE: loop exit
PB: predicated region body
PF: predicated region fallthrough
CT: control target
= control target key end

     0   :  { %8 = vsyncpa [#allocation5], 0  ;;  %s1067_s12 = smov 0   ;;  %s1069_s13 = smov 0   ;;  %s1193_s0 = inlined_call_operand.vmem [shape: bf16[128,640], index: 0, kind: input, shape index: {}]   ;;  %s1194_s1 = inlined_call_operand.vmem [shape: bf16[640,128], index: 1, kind: input, shape index: {}]   ;;  %s1195_s2 = inlined_call_operand.vmem [shape: f32[1,128], index: 2, kind: input, shape index: {}]   ;;  %s1196_s3 = inlined_call_operand.hbm [shape: f32[128,128], index: 3, kind: output, shape index: {}]  }
   0x1   :  { %s1071_s14 = smov 0   ;;  %s1073_s15 = smov 0  }
   0x2   :  { %s1075_s16 = smov 0  }
   0x3 LB: > { %s812_s17 = sadd.s32 4294967295, %s1041_s16   ;;  %s26_s18 = sadd.s32 1, %s1037_s15  ;;  %s1041_s16 = sphi %s1075_s16, %s14_s16   ;;  %s1037_s15 = sphi %s1073_s15, %s1201_s15   ;;  %s1033_s14 = sphi %s1071_s14, %s1200_s14   ;;  %s1029_s13 = sphi %s1069_s13, %s1199_s13   ;;  %s1025_s12 = sphi %s1067_s12, %s1198_s12  }
   0x4   : > { %p27_p0 = scmp.ge.s32.totalorder %s26_s18, 5  ;;  %p49_p1 = scmp.ne.s32.totalorder %s1029_s13, %s1025_s12 }
   0x5   : > { %p50_p2 = scmp.eq.s32.totalorder %s1041_s16, 0  ;;  %s42_s20 = sadd.s32 1, %s1029_s13 }
   0x6   : > { %s1203_s18 = smov (%p27_p0, %s26_s18), 0  ;;  %p815_p5 = scmp.ge.s32.totalorder %s1041_s16, 5 }
   0x7   : > { %p51_p3 = por %p50_p2, %p49_p1  ;;  %s38_s19 = ssub.s32 %s1037_s15, %s1203_s18 }
   0x8   : > { %p40_p4 = scmp.eq.s32.totalorder %s38_s19, 0  ;;  %163 = sbr.rel (%p815_p5) target bundleno = 27 (0x1b), region = 20 }
   0xa   : > { %s1103_s21 = scalar_select %p40_p4, %s1029_s13, %s42_s20  }
   0xd   : > { %166 = sbr.rel (!%p51_p3) target bundleno = 27 (0x1b), region = 24  ;;  %s168_s22 = sand.u32 (%p51_p3), 1, %s1029_s13  }
   0xe   : > { %s817_s23 = sshll.u32 (%p51_p3), %s1037_s15, 2  ;;  %s816_s24 = sshll.u32 (%p51_p3), %s168_s22, 6 }
   0xf   : > { %s1111_s27 = scalar_lea.vmem (%p51_p3), %s1193_s0, %s817_s23  ;;  %s170_s28 = scalar_lea.vmem (%p51_p3), [#allocation3], %s816_s24 }
  0x10   : > { %v192_v0 = vld [vmem:[%s1111_s27] sm:$0xf] (%p51_p3)  ;;  %v194_v1 = vld [vmem:[%s1111_s27 + $0x14] sm:$0xf] (%p51_p3)  ;;  %v196_v2 = vld [vmem:[%s1111_s27 + $0x28] sm:$0xf] (%p51_p3) }
  0x11   : > { %193 = vst [vmem:[%s170_s28] sm:$0xf] (%p51_p3), %v192_v0  ;;  %195 = vst [vmem:[%s170_s28 + $0x4] sm:$0xf] (%p51_p3), %v194_v1  ;;  %v198_v3 = vld [vmem:[%s1111_s27 + $0x3c] sm:$0xf] (%p51_p3) }
  0x12   : > { %v200_v4 = vld [vmem:[%s1111_s27 + $0x50] sm:$0xf]  ;;  %197 = vst [vmem:[%s170_s28 + $0x8] sm:$0xf] %v196_v2  ;;  %199 = vst [vmem:[%s170_s28 + $0xc] sm:$0xf] %v198_v3 }
  0x13   : > { %201 = vst [vmem:[%s170_s28 + $0x10] sm:$0xf] %v200_v4  ;;  %v202_v5 = vld [vmem:[%s1111_s27 + $0x64] sm:$0xf]  ;;  %v204_v6 = vld [vmem:[%s1111_s27 + $0x78] sm:$0xf] }
  0x14   : > { %v206_v7 = vld [vmem:[%s1111_s27 + $0x8c] sm:$0xf]  ;;  %203 = vst [vmem:[%s170_s28 + $0x14] sm:$0xf] %v202_v5  ;;  %205 = vst [vmem:[%s170_s28 + $0x18] sm:$0xf] %v204_v6 }
  0x15   : > { %207 = vst [vmem:[%s170_s28 + $0x1c] sm:$0xf] %v206_v7  ;;  %v208_v8 = vld [vmem:[%s1111_s27 + $0xa0] sm:$0xf]  ;;  %v210_v9 = vld [vmem:[%s1111_s27 + $0xb4] sm:$0xf] }
  0x16   : > { %v212_v10 = vld [vmem:[%s1111_s27 + $0xc8] sm:$0xf]  ;;  %209 = vst [vmem:[%s170_s28 + $0x20] sm:$0xf] %v208_v8  ;;  %211 = vst [vmem:[%s170_s28 + $0x24] sm:$0xf] %v210_v9 }
  0x17   : > { %213 = vst [vmem:[%s170_s28 + $0x28] sm:$0xf] %v212_v10  ;;  %v214_v11 = vld [vmem:[%s1111_s27 + $0xdc] sm:$0xf]  ;;  %v216_v12 = vld [vmem:[%s1111_s27 + $0xf0] sm:$0xf] }
  0x18   : > { %v218_v13 = vld [vmem:[%s1111_s27 + $0x104] sm:$0xf]  ;;  %215 = vst [vmem:[%s170_s28 + $0x2c] sm:$0xf] %v214_v11  ;;  %217 = vst [vmem:[%s170_s28 + $0x30] sm:$0xf] %v216_v12 }
  0x19   : > { %219 = vst [vmem:[%s170_s28 + $0x34] sm:$0xf] %v218_v13  ;;  %v220_v14 = vld [vmem:[%s1111_s27 + $0x118] sm:$0xf]  ;;  %v222_v15 = vld [vmem:[%s1111_s27 + $0x12c] sm:$0xf] }
  0x1a   : > { %221 = vst [vmem:[%s170_s28 + $0x38] sm:$0xf] %v220_v14  ;;  %223 = vst [vmem:[%s170_s28 + $0x3c] sm:$0xf] %v222_v15 }
  0x1b PF: > { %p818_p6 = scmp.ge.s32.totalorder %s1041_s16, 1  ;;  %p290_p7 = scmp.lt.s32.totalorder %s1041_s16, 6 }
  0x1d   : > { %p291_p8 = pnand %p818_p6, %p290_p7 }
  0x1e   : > { %s297_s29 = sand.u32 (!%p291_p8), 1, %s1025_s12   ;;  %s820_s30 = sshll.u32 (!%p291_p8), %s1033_s14, 4 }
  0x1f   : > { %294 = sbr.rel (%p291_p8) target bundleno = 322 (0x142), region = 69  ;;  %s819_s4 = sshll.u32 (!%p291_p8), %s297_s29, 6 }
  0x20   : > { %p328_p9 = scmp.lt.s32.totalorder (!%p291_p8), %s820_s30, 79  ;;  %s1138_s9 = scalar_lea.vmem (!%p291_p8), [#allocation3], %s819_s4 }
  0x21   : > { %p822_p10 = scmp.ne.s32.totalorder (!%p291_p8), %s1033_s14, 0 }
  0x24   : > { %s1205_s30 = smov (!%p328_p9, %s820_s30), 79  ;;  %344 = sbr.rel (%p822_p10) target bundleno = 50 (0x32), region = 77 }
  0x25   : > { %s821_s5 = sshll.u32 %s1205_s30, 2 }
  0x26   : > { %s1136_s8 = scalar_lea.vmem %s1194_s1, %s821_s5 }
  0x29   : > { %v1043_v16 = vmov 0.0  }
  0x2a   : > { %345 = vst [vmem:[#allocation2 + $0x30] sm:$0xff] %v1043_v16  ;;  %346 = vst [vmem:[#allocation2] sm:$0xff] %v1043_v16 }
  0x2b   : > { %347 = vst [vmem:[#allocation2 + $0x58] sm:$0xff] %v1043_v16  ;;  %348 = vst [vmem:[#allocation2 + $0x18] sm:$0xff] %v1043_v16 }
  0x2c   : > { %349 = vst [vmem:[#allocation2 + $0x50] sm:$0xff] %v1043_v16  ;;  %350 = vst [vmem:[#allocation2 + $0x68] sm:$0xff] %v1043_v16 }
  0x2d   : > { %351 = vst [vmem:[#allocation2 + $0x8] sm:$0xff] %v1043_v16  ;;  %352 = vst [vmem:[#allocation2 + $0x48] sm:$0xff] %v1043_v16 }
  0x2e   : > { %353 = vst [vmem:[#allocation2 + $0x40] sm:$0xff] %v1043_v16  ;;  %354 = vst [vmem:[#allocation2 + $0x20] sm:$0xff] %v1043_v16 }
  0x2f   : > { %355 = vst [vmem:[#allocation2 + $0x10] sm:$0xff] %v1043_v16  ;;  %356 = vst [vmem:[#allocation2 + $0x38] sm:$0xff] %v1043_v16 }
  0x30   : > { %357 = vst [vmem:[#allocation2 + $0x60] sm:$0xff] %v1043_v16  ;;  %358 = vst [vmem:[#allocation2 + $0x70] sm:$0xff] %v1043_v16 }
  0x31   : > { %359 = vst [vmem:[#allocation2 + $0x78] sm:$0xff] %v1043_v16  ;;  %360 = vst [vmem:[#allocation2 + $0x28] sm:$0xff] %v1043_v16 }
  0x32 PF: > { %v959_v17 = vld [vmem:[%s1136_s8 + $0x38] sm:$0xff]   ;;  %v960_v18 = vld [vmem:[%s1136_s8 + $0x30] sm:$0xff]   ;;  %v961_v19 = vld [vmem:[%s1136_s8 + $0x28] sm:$0xff]   ;;  %p839_p11 = scmp.ne.s32.totalorder %s1033_s14, 4 }
  0x33   : > { %861 = vmatprep.subr.bf16.mxu0 %v959_v17  ;;  %893 = vmatprep.subr.bf16.mxu1 %v959_v17  ;;  %v962_v20 = vld [vmem:[%s1136_s8 + $0x20] sm:$0xff]   ;;  %v963_v23 = vld [vmem:[%s1136_s8 + $0x18] sm:$0xff]   ;;  %v964_v24 = vld [vmem:[%s1136_s8 + $0x10] sm:$0xff]  }
  0x34   : > { %862 = vmatpush3.bf16.msra.mxu0 %v959_v17  ;;  %901 = vmatpush3.bf16.msra.mxu1 %v959_v17  ;;  %v967_v21 = vld [vmem:[%s1138_s9] sm:$0xff]   ;;  %v965_v25 = vld [vmem:[%s1136_s8 + $0x8] sm:$0xff]   ;;  %v971_v29 = vld [vmem:[%s1138_s9 + $0x10] sm:$0xff]  }
  0x35   : > { %863 = vmatprep.subr.bf16.mxu0 %v960_v18  ;;  %894 = vmatprep.subr.bf16.mxu1 %v960_v18  ;;  %v968_v22 = vld [vmem:[%s1138_s9 + $0x20] sm:$0xff]   ;;  %v969_v27 = vld [vmem:[%s1138_s9 + $0x8] sm:$0xff]   ;;  %v972_v30 = vld [vmem:[%s1138_s9 + $0x30] sm:$0xff]  }
  0x36   : > { %877 = vmatprep.mubr.bf16.mxu0 %v967_v21  ;;  %885 = vmatprep.mubr.bf16.mxu1 %v968_v22  ;;  %v966_v26 = vld [vmem:[%s1136_s8] sm:$0xff]   ;;  %v970_v28 = vld [vmem:[%s1138_s9 + $0x28] sm:$0xff]   ;;  %v973_v31 = vld [vmem:[%s1138_s9 + $0x18] sm:$0xff]  }
  0x37   : > { %v974_v32 = vld [vmem:[%s1138_s9 + $0x38] sm:$0xff]   ;;  %v371_v34 = vld [vmem:[#allocation2 + $0x10] sm:$0xff]  ;;  %v369_v38 = vld [vmem:[#allocation2 + $0x40] sm:$0xff] }
  0x38   : > { %864 = vmatpush3.bf16.msra.mxu0 %v960_v18  ;;  %902 = vmatpush3.bf16.msra.mxu1 %v960_v18  ;;  %v363_v33 = vld [vmem:[#allocation2 + $0x58] sm:$0xff]  ;;  %v361_v37 = vld [vmem:[#allocation2 + $0x30] sm:$0xff]  ;;  %v362_v49 = vld [vmem:[#allocation2] sm:$0xff] }
  0x39   : > { %865 = vmatprep.subr.bf16.mxu0 %v961_v19  ;;  %895 = vmatprep.subr.bf16.mxu1 %v961_v19  ;;  %v364_v43 = vld [vmem:[#allocation2 + $0x18] sm:$0xff]  ;;  %v370_v50 = vld [vmem:[#allocation2 + $0x20] sm:$0xff]  ;;  %v367_v55 = vld [vmem:[#allocation2 + $0x8] sm:$0xff] }
  0x3a   : > { %v372_v44 = vld [vmem:[#allocation2 + $0x38] sm:$0xff]  ;;  %v365_v61 = vld [vmem:[#allocation2 + $0x50] sm:$0xff]  ;;  %v373_v62 = vld [vmem:[#allocation2 + $0x60] sm:$0xff] }
  0x3b   : > { %v375_v56 = vld [vmem:[#allocation2 + $0x78] sm:$0xff]  ;;  %v368_v3 = vld [vmem:[#allocation2 + $0x48] sm:$0xff]  ;;  %v374_v10 = vld [vmem:[#allocation2 + $0x70] sm:$0xff] }
  0x3c   : > { %866 = vmatpush3.bf16.msra.mxu0 %v961_v19  ;;  %903 = vmatpush3.bf16.msra.mxu1 %v961_v19  ;;  %v376_v4 = vld [vmem:[#allocation2 + $0x28] sm:$0xff] }
  0x3d   : > { %867 = vmatprep.subr.bf16.mxu0 %v962_v20  ;;  %896 = vmatprep.subr.bf16.mxu1 %v962_v20  ;;  %v366_v9 = vld [vmem:[#allocation2 + $0x68] sm:$0xff] }
  0x40   : > { %868 = vmatpush3.bf16.msra.mxu0 %v962_v20  ;;  %904 = vmatpush3.bf16.msra.mxu1 %v962_v20 }
  0x41   : > { %869 = vmatprep.subr.bf16.mxu0 %v963_v23  ;;  %897 = vmatprep.subr.bf16.mxu1 %v963_v23 }
  0x44   : > { %870 = vmatpush3.bf16.msra.mxu0 %v963_v23  ;;  %905 = vmatpush3.bf16.msra.mxu1 %v963_v23 }
  0x45   : > { %871 = vmatprep.subr.bf16.mxu0 %v964_v24  ;;  %898 = vmatprep.subr.bf16.mxu1 %v964_v24 }
  0x48   : > { %872 = vmatpush3.bf16.msra.mxu0 %v964_v24  ;;  %906 = vmatpush3.bf16.msra.mxu1 %v964_v24 }
  0x49   : > { %873 = vmatprep.subr.bf16.mxu0 %v965_v25  ;;  %899 = vmatprep.subr.bf16.mxu1 %v965_v25 }
  0x4c   : > { %874 = vmatpush3.bf16.msra.mxu0 %v965_v25  ;;  %907 = vmatpush3.bf16.msra.mxu1 %v965_v25 }
  0x4d   : > { %875 = vmatprep.subr.bf16.mxu0 %v966_v26  ;;  %900 = vmatprep.subr.bf16.mxu1 %v966_v26 }
  0x50   : > { %876 = vmatpush3.bf16.msra.mxu0 %v966_v26  ;;  %908 = vmatpush3.bf16.msra.mxu1 %v966_v26 }
  0x53   : > { %878 = vmatmul.mubr.bf16.vlgmr.msra.gmra.mxu0 %v969_v27  ;;  %886 = vmatmul.mubr.bf16.vlgmr.msra.gmra.mxu1 %v970_v28 }
  0x54   : > { %881 = vmatprep.mubr.bf16.mxu0 %v971_v29  ;;  %889 = vmatprep.mubr.bf16.mxu1 %v972_v30 }
  0x5b   : > { %882 = vmatmul.mubr.bf16.gmra.mxu0 %v973_v31  ;;  %890 = vmatmul.mubr.bf16.gmra.mxu1 %v974_v32 }
 0x113   : > { %v879_v35 = vpop.f32.mrf.mxu0  ;;  %v887_v36 = vpop.f32.mrf.mxu1 }
 0x114   : > { %v604_v39 = vadd.f32 %v879_v35, %v363_v33  ;;  %v612_v40 = vadd.f32 %v887_v36, %v371_v34 }
 0x115   : > { %v539_v41 = vpop.f32.mrf.mxu0  ;;  %v571_v42 = vpop.f32.mrf.mxu1 }
 0x116   : > { %620 = vst [vmem:[#allocation2 + $0x58] sm:$0xff] %v604_v39  ;;  %628 = vst [vmem:[#allocation2 + $0x10] sm:$0xff] %v612_v40  ;;  %v602_v45 = vadd.f32 %v539_v41, %v361_v37  ;;  %v610_v46 = vadd.f32 %v571_v42, %v369_v38 }
 0x117   : > { %v880_v47 = vpop.f32.mrf.mxu0  ;;  %v888_v48 = vpop.f32.mrf.mxu1 }
 0x118   : > { %618 = vst [vmem:[#allocation2 + $0x30] sm:$0xff] %v602_v45  ;;  %626 = vst [vmem:[#allocation2 + $0x40] sm:$0xff] %v610_v46  ;;  %v605_v51 = vadd.f32 %v880_v47, %v364_v43  ;;  %v613_v52 = vadd.f32 %v888_v48, %v372_v44 }
 0x119   : > { %v542_v53 = vpop.f32.mrf.mxu0  ;;  %v574_v54 = vpop.f32.mrf.mxu1 }
 0x11a   : > { %621 = vst [vmem:[#allocation2 + $0x18] sm:$0xff] %v605_v51  ;;  %629 = vst [vmem:[#allocation2 + $0x38] sm:$0xff] %v613_v52  ;;  %v603_v57 = vadd.f32 %v542_v53, %v362_v49  ;;  %v611_v58 = vadd.f32 %v574_v54, %v370_v50 }
 0x11b   : > { %v883_v59 = vpop.f32.mrf.mxu0  ;;  %v891_v60 = vpop.f32.mrf.mxu1 }
 0x11c   : > { %619 = vst [vmem:[#allocation2] sm:$0xff] %v603_v57  ;;  %627 = vst [vmem:[#allocation2 + $0x20] sm:$0xff] %v611_v58  ;;  %v608_v63 = vadd.f32 %v883_v59, %v367_v55  ;;  %v616_v0 = vadd.f32 %v891_v60, %v375_v56 }
 0x11d   : > { %v555_v1 = vpop.f32.mrf.mxu0  ;;  %v587_v2 = vpop.f32.mrf.mxu1 }
 0x11e   : > { %624 = vst [vmem:[#allocation2 + $0x8] sm:$0xff] %v608_v63  ;;  %632 = vst [vmem:[#allocation2 + $0x78] sm:$0xff] %v616_v0  ;;  %v606_v5 = vadd.f32 %v555_v1, %v365_v61  ;;  %v614_v6 = vadd.f32 %v587_v2, %v373_v62 }
 0x11f   : > { %v884_v7 = vpop.f32.mrf.mxu0  ;;  %v892_v8 = vpop.f32.mrf.mxu1 }
 0x120   : > { %622 = vst [vmem:[#allocation2 + $0x50] sm:$0xff] %v606_v5  ;;  %630 = vst [vmem:[#allocation2 + $0x60] sm:$0xff] %v614_v6  ;;  %v609_v11 = vadd.f32 %v884_v7, %v368_v3  ;;  %v617_v12 = vadd.f32 %v892_v8, %v376_v4  ;;  %637 = sbr.rel (%p839_p11) target bundleno = 306 (0x132), region = 81 }
 0x121   : > { %v558_v13 = vpop.f32.mrf.mxu0  ;;  %v590_v14 = vpop.f32.mrf.mxu1 }
 0x122   : > { %625 = vst [vmem:[#allocation2 + $0x48] sm:$0xff] %v609_v11  ;;  %633 = vst [vmem:[#allocation2 + $0x28] sm:$0xff] %v617_v12  ;;  %v607_v15 = vadd.f32 %v558_v13, %v366_v9  ;;  %v615_v16 = vadd.f32 %v590_v14, %v374_v10 }
 0x124   : > { %623 = vst [vmem:[#allocation2 + $0x68] sm:$0xff] %v607_v15  ;;  %631 = vst [vmem:[#allocation2 + $0x70] sm:$0xff] %v615_v16 }
 0x125   : > { %v638_v17 = vld [vmem:[#allocation2 + $0x30] sm:$0xff]  ;;  %v840_v18 = vld [vmem:[%s1195_s2] ss:$0 sm:$0xff]  ;;  %v640_v22 = vld [vmem:[#allocation2 + $0x58] sm:$0xff] }
 0x126   : > { %v639_v19 = vld [vmem:[#allocation2] sm:$0xff]  ;;  %v661_v20 = vadd.f32 %v840_v18, %v638_v17  ;;  %v641_v23 = vld [vmem:[#allocation2 + $0x18] sm:$0xff]  ;;  %v663_v25 = vadd.f32 %v840_v18, %v640_v22  ;;  %v644_v29 = vld [vmem:[#allocation2 + $0x8] sm:$0xff] }
 0x127   : > { %v662_v21 = vadd.f32 %v840_v18, %v639_v19  ;;  %v642_v24 = vld [vmem:[#allocation2 + $0x50] sm:$0xff]  ;;  %v664_v26 = vadd.f32 %v840_v18, %v641_v23  ;;  %v667_v34 = vadd.f32 %v840_v18, %v644_v29  ;;  %v646_v35 = vld [vmem:[#allocation2 + $0x40] sm:$0xff]  ;;  %v649_v42 = vld [vmem:[#allocation2 + $0x38] sm:$0xff] }
 0x128   : > { %v665_v27 = vadd.f32 %v840_v18, %v642_v24  ;;  %v677_v31 = vmax.f32 %v661_v20, 0.0  ;;  %v647_v36 = vld [vmem:[#allocation2 + $0x20] sm:$0xff]  ;;  %v648_v37 = vld [vmem:[#allocation2 + $0x10] sm:$0xff]  ;;  %v679_v38 = vmax.f32 %v663_v25, 0.0  ;;  %v669_v47 = vadd.f32 %v840_v18, %v646_v35  ;;  %v652_v49 = vld [vmem:[#allocation2 + $0x78] sm:$0xff] }
 0x129   : > { %v645_v30 = vld [vmem:[#allocation2 + $0x48] sm:$0xff]  ;;  %v678_v32 = vmax.f32 %v662_v21, 0.0  ;;  %v680_v39 = vmax.f32 %v664_v26, 0.0  ;;  %v650_v43 = vld [vmem:[#allocation2 + $0x60] sm:$0xff]  ;;  %v683_v46 = vmax.f32 %v667_v34, 0.0  ;;  %v670_v48 = vadd.f32 %v840_v18, %v647_v36 }
 0x12a   : > { %v681_v40 = vmax.f32 %v665_v27, 0.0  ;;  %v668_v41 = vadd.f32 %v840_v18, %v645_v30  ;;  %693 = vst [vmem:[#allocation4] sm:$0xff] %v677_v31  ;;  %v653_v50 = vld [vmem:[#allocation2 + $0x28] sm:$0xff]  ;;  %695 = vst [vmem:[#allocation4 + $0x10] sm:$0xff] %v679_v38  ;;  %v671_v52 = vadd.f32 %v840_v18, %v648_v37  ;;  %v672_v53 = vadd.f32 %v840_v18, %v649_v42 }
 0x12b   : > { %v643_v28 = vld [vmem:[#allocation2 + $0x68] sm:$0xff]  ;;  %v651_v44 = vld [vmem:[#allocation2 + $0x70] sm:$0xff]  ;;  %694 = vst [vmem:[#allocation4 + $0x8] sm:$0xff] %v678_v32  ;;  %696 = vst [vmem:[#allocation4 + $0x18] sm:$0xff] %v680_v39  ;;  %v673_v54 = vadd.f32 %v840_v18, %v650_v43  ;;  %v685_v55 = vmax.f32 %v669_v47, 0.0  ;;  %v686_v56 = vmax.f32 %v670_v48, 0.0  ;;  %v675_v58 = vadd.f32 %v840_v18, %v652_v49 }
 0x12c   : > { %v666_v33 = vadd.f32 %v840_v18, %v643_v28  ;;  %697 = vst [vmem:[#allocation4 + $0x20] sm:$0xff] %v681_v40  ;;  %v684_v51 = vmax.f32 %v668_v41, 0.0  ;;  %699 = vst [vmem:[#allocation4 + $0x30] sm:$0xff] %v683_v46  ;;  %v674_v57 = vadd.f32 %v840_v18, %v651_v44  ;;  %v687_v59 = vmax.f32 %v671_v52, 0.0 }
 0x12d   : > { %v688_v60 = vmax.f32 %v672_v53, 0.0  ;;  %v689_v61 = vmax.f32 %v673_v54, 0.0  ;;  %v676_v62 = vadd.f32 %v840_v18, %v653_v50  ;;  %701 = vst [vmem:[#allocation4 + $0x40] sm:$0xff] %v685_v55  ;;  %702 = vst [vmem:[#allocation4 + $0x48] sm:$0xff] %v686_v56  ;;  %v691_v0 = vmax.f32 %v675_v58, 0.0 }
 0x12e   : > { %v682_v45 = vmax.f32 %v666_v33, 0.0  ;;  %700 = vst [vmem:[#allocation4 + $0x38] sm:$0xff] %v684_v51  ;;  %v690_v63 = vmax.f32 %v674_v57, 0.0  ;;  %703 = vst [vmem:[#allocation4 + $0x50] sm:$0xff] %v687_v59 }
 0x12f   : > { %704 = vst [vmem:[#allocation4 + $0x58] sm:$0xff] %v688_v60  ;;  %705 = vst [vmem:[#allocation4 + $0x60] sm:$0xff] %v689_v61  ;;  %v692_v1 = vmax.f32 %v676_v62, 0.0 }
 0x130   : > { %698 = vst [vmem:[#allocation4 + $0x28] sm:$0xff] %v682_v45  ;;  %706 = vst [vmem:[#allocation4 + $0x68] sm:$0xff] %v690_v63 }
 0x131   : > { %707 = vst [vmem:[#allocation4 + $0x70] sm:$0xff] %v691_v0  ;;  %708 = vst [vmem:[#allocation4 + $0x78] sm:$0xff] %v692_v1 }
 0x132 PF: > { %p1163_p12 = scmp.eq.s32.totalorder %s812_s17, 4  ;;  %s1044_s14 = smov [#allocation4]  }
 0x133   : > { %s719_s19 = sshll.u32 %s1044_s14, 4  ;;  %s720_s19 = int_to_ptr.vmem [resolvable:$true] %s719_s19 }
 0x134   : > { %s975_s20 = scalar_lea.vmem %s720_s19, 2048  ;;  %p982_p2 = scmp.lt.s32.totalorder %s720_s19, %s720_s19 }
 0x135   : > { %p976_p13 = scmp.ne.s32.totalorder %s720_s19, %s975_s20  ;;  %p983_p3 = scmp.lt.s32.totalorder %s975_s20, %s975_s20 }
 0x137   : > { %p977_p0 = pnand %p976_p13, %p1163_p12  ;;  %p984_p4 = por %p983_p3, %p982_p2 }
 0x139   : > { %p978_p1 = pneg %p977_p0 }
 0x13b   : > { %p985_p5 = pnand %p984_p4, %p978_p1 }
 0x13d   : > { %988 = shalt.err (!%p985_p5)
}
 0x13e   : > { %s1045_s22 = smov 128   ;;  %s1046_s17 = smov 8  }
 0x13f   : > { %910 = dma.vmem_to_hbm [thread:$0]  (%p1163_p12), %s720_s19, 2048, %s1196_s3, [#allocation5], %s1045_s22, %s1045_s22, %s1046_s17  }
 0x140   : > { %1020 = dma.done.wait (%p1163_p12), [#allocation5], 2048  }
 0x141   : > { %1022 = vsyncadd (%p1163_p12), [#allocation5], 4294965248 }
 0x142 PF: > { %s14_s16 = sadd.s32 1, %s1041_s16   ;;  %s1198_s12 = smov %s1029_s13 }
 0x143   : > { %p11_p6 = scmp.ge.s32.totalorder %s14_s16, 7   ;;  %s1199_s13 = smov %s1103_s21 }
 0x144   : > { %s1200_s14 = smov %s1037_s15  ;;  %s1201_s15 = smov %s1203_s18 }
 0x145   :  { %13 = sbr.rel (!%p11_p6) target bundleno = 3 (0x3), region = 120 }
 0x14a   :  { %735 = vsyncpa [#allocation5], 1 }
 0x14b   :  { %737 = vsyncpa [#allocation5 + $0x1], 1 }

</bundles_post_ra>
